<compile_context>
chip_gen: v6e
topology: v6e:2x2x1
jax: 0.10.0
libtpu: 0.0.40
codegen_flags: <defaults>
</compile_context>

<pallas_src>
import functools

import jax
import jax.numpy as jnp
from jax import lax
from jax.experimental import pallas as pl
from jax.experimental.pallas import tpu as pltpu


# ----------------------------- fused Pallas kernel ---------------------------

def _llama_kernel(
    # inputs (one batch's block + resident constants/weights)
    emb_ref,      # (S, H)             this batch's embeddings
    cos_ref,      # (S, dh)            RoPE cos
    sin_ref,      # (S, dh)            RoPE sin
    mask_ref,     # (S, S)             additive causal mask (0 / -1e30)
    ln1_ref,      # (L, 1, H)          input_layernorm weights
    ln2_ref,      # (L, 1, H)          post_attention_layernorm weights
    wqkv_ref,     # (L*5, nh, H, dh)   per layer: [Wq, Wq@P, Wk, Wk@P, Wv] head-major
    wo_ref,       # (L, nh, dh, H)     output projection, head-major
    wgu_ref,      # (L, H, 2I)         fused gate|up projection
    wdown_ref,    # (L, I, H)          down projection
    wfinal_ref,   # (1, H)             final RMSNorm weight
    # output
    out_ref,      # (S, H)
    *, num_layers, num_heads, head_dim, inter, eps, scale,
):
    S, H = emb_ref.shape
    nh, dh = num_heads, head_dim

    def rmsnorm(v, w):                       # v: (S, H), w: (1, H); f32 compute
        var = jnp.mean(v * v, axis=-1, keepdims=True)
        return v * lax.rsqrt(var + eps) * w

    # Hoisted once per grid step (shared by every layer).
    cos = jnp.broadcast_to(cos_ref[...][None], (nh, S, dh))
    sin = jnp.broadcast_to(sin_ref[...][None], (nh, S, dh))
    mask = jnp.broadcast_to(mask_ref[...][None], (nh, S, S))

    x = emb_ref[...].astype(jnp.float32)

    # All layers run inside one grid step; weights are resident in VMEM and
    # indexed with static layer offsets (zero-cost ref views).
    for l in range(num_layers):
        # ---------------- self-attention block ----------------
        h = rmsnorm(x, ln1_ref[l])
        hb = jnp.broadcast_to(h[None], (nh, S, H))
        base = l * 5

        def hproj(w):                        # w: (nh, H, dh) -> (nh, S, dh)
            return lax.dot_general(hb, w, (((2,), (1,)), ((0,), (0,))),
                                   preferred_element_type=jnp.float32)

        # rotate_half + sign are folded into the *_rot weights host-side, so
        # RoPE is pure full-tile VPU math (no lane slicing / concatenation).
        q = hproj(wqkv_ref[base + 0]) * cos + hproj(wqkv_ref[base + 1]) * sin
        k = hproj(wqkv_ref[base + 2]) * cos + hproj(wqkv_ref[base + 3]) * sin
        v = hproj(wqkv_ref[base + 4])

        s = lax.dot_general(q, k, (((2,), (2,)), ((0,), (0,))),
                            preferred_element_type=jnp.float32) * scale + mask
        m = jnp.max(s, axis=-1, keepdims=True)
        p = jnp.exp(s - m)
        p = p / jnp.sum(p, axis=-1, keepdims=True)        # exact division (parity)
        ctx = lax.dot_general(p, v, (((2,), (1,)), ((0,), (0,))),
                              preferred_element_type=jnp.float32)   # (nh, S, dh)
        attn = jnp.sum(
            lax.dot_general(ctx, wo_ref[l], (((2,), (1,)), ((0,), (0,))),
                            preferred_element_type=jnp.float32),
            axis=0)                                                   # (S, H)
        x = x + attn

        # ---------------- MLP block (SwiGLU) ----------------
        h2 = rmsnorm(x, ln2_ref[l])
        gu = jnp.dot(h2, wgu_ref[l], preferred_element_type=jnp.float32)  # (S, 2I)
        g = gu[:, :inter]                    # 128-lane aligned slices
        u = gu[:, inter:]
        act = g * (1.0 / (1.0 + jnp.exp(-g))) * u          # exact silu(g) * u
        x = x + jnp.dot(act, wdown_ref[l], preferred_element_type=jnp.float32)

    # Final model-level RMSNorm; single store per batch block.
    out_ref[...] = rmsnorm(x, wfinal_ref[...]).astype(out_ref.dtype)


# ------------------------------ wrapper --------------------------------------

def llama_forward(embeddings, params, cfg):
    """Returns last_hidden_state, like LlamaModel(inputs_embeds=...).last_hidden_state."""
    # TODO(synk): output_attentions / output_hidden_states are not returned
    # (the reference module only consumes last_hidden_state).
    B, S, H = embeddings.shape
    L = cfg["num_layers"]
    nh, dh, I = cfg["num_heads"], cfg["head_dim"], cfg["intermediate"]

    emb2d = embeddings.reshape(B * S, H)

    kernel = functools.partial(
        _llama_kernel,
        num_layers=L, num_heads=nh, head_dim=dh, inter=I,
        eps=cfg["eps"], scale=1.0 / (dh ** 0.5),
    )

    out = pl.pallas_call(
        kernel,
        out_shape=jax.ShapeDtypeStruct((B * S, H), embeddings.dtype),
        grid=(B,),
        in_specs=[
            pl.BlockSpec((S, H), lambda b: (b, 0)),                    # emb
            pl.BlockSpec((S, dh), lambda b: (0, 0)),                   # cos
            pl.BlockSpec((S, dh), lambda b: (0, 0)),                   # sin
            pl.BlockSpec((S, S), lambda b: (0, 0)),                    # causal mask
            pl.BlockSpec((L, 1, H), lambda b: (0, 0, 0)),              # ln1
            pl.BlockSpec((L, 1, H), lambda b: (0, 0, 0)),              # ln2
            pl.BlockSpec((L * 5, nh, H, dh), lambda b: (0, 0, 0, 0)),  # q|q_rot|k|k_rot|v
            pl.BlockSpec((L, nh, dh, H), lambda b: (0, 0, 0, 0)),      # wo (head-major)
            pl.BlockSpec((L, H, 2 * I), lambda b: (0, 0, 0)),          # gate|up
            pl.BlockSpec((L, I, H), lambda b: (0, 0, 0)),              # down
            pl.BlockSpec((1, H), lambda b: (0, 0)),                    # final norm
        ],
        out_specs=pl.BlockSpec((S, H), lambda b: (b, 0)),
        compiler_params=pltpu.CompilerParams(
            dimension_semantics=("parallel",),        # batch blocks across v7x TCs
            vmem_limit_bytes=32 * 1024 * 1024),
    )(
        emb2d, cfg["cos"], cfg["sin"], cfg["mask"],
        params["ln1"], params["ln2"], params["wqkv"], params["wo"],
        params["wgu"], params["wdown"], params["final_norm"],
    )
    return out.reshape(B, S, H)


# ------------------------------ host-side glue --------------------------------

def rope_cos_sin(seq_len, head_dim, theta=10000.0):
    inv_freq = 1.0 / (
        theta ** (jnp.arange(0, head_dim, 2, dtype=jnp.float32) / head_dim)
    )
    t = jnp.arange(seq_len, dtype=jnp.float32)
    freqs = jnp.outer(t, inv_freq)                       # (S, dh/2)
    emb = jnp.concatenate([freqs, freqs], axis=-1)       # (S, dh)
    return jnp.cos(emb), jnp.sin(emb)


def rotate_half_matrix(dh):
    """P such that (v @ P) == rotate_half(v) for a single head vector v of size dh."""
    half = dh // 2
    P = jnp.zeros((dh, dh), jnp.float32)
    P = P.at[jnp.arange(half) + half, jnp.arange(half)].set(-1.0)
    P = P.at[jnp.arange(half), jnp.arange(half) + half].set(1.0)
    return P


def init_base_params(key, cfg):
    """Synthetic per-layer weights in a 'reference-friendly' layout."""
    H, I, L = cfg["hidden"], cfg["intermediate"], cfg["num_layers"]

    def norm(k, shape):
        return jax.random.normal(k, shape, dtype=jnp.float32) * 0.02

    layers = []
    for _ in range(L):
        key, *ks = jax.random.split(key, 10)
        layers.append(dict(
            wq=norm(ks[0], (H, H)), wk=norm(ks[1], (H, H)), wv=norm(ks[2], (H, H)),
            wo=norm(ks[3], (H, H)),
            wg=norm(ks[4], (H, I)), wu=norm(ks[5], (H, I)), wd=norm(ks[6], (I, H)),
            ln1=1.0 + 0.05 * jax.random.normal(ks[7], (H,), jnp.float32),
            ln2=1.0 + 0.05 * jax.random.normal(ks[8], (H,), jnp.float32),
        ))
    key, kf = jax.random.split(key)
    final_norm = 1.0 + 0.05 * jax.random.normal(kf, (H,), jnp.float32)
    return dict(layers=layers, final_norm=final_norm)


def pack_kernel_params(base, cfg):
    """Repack weights into the head-major / RoPE-folded layouts the kernel expects."""
    H, I, nh, dh = cfg["hidden"], cfg["intermediate"], cfg["num_heads"], cfg["head_dim"]
    P = rotate_half_matrix(dh)

    def to_heads(w):                          # (H, H) -> (nh, H, dh)
        return w.reshape(H, nh, dh).transpose(1, 0, 2)

    wqkv, wo, wgu, wdown, ln1, ln2 = [], [], [], [], [], []
    for lyr in base["layers"]:
        qh, kh, vh = to_heads(lyr["wq"]), to_heads(lyr["wk"]), to_heads(lyr["wv"])
        # order per layer: q, q_rot, k, k_rot, v   (rotate_half folded into *_rot)
        wqkv.extend([qh, qh @ P, kh, kh @ P, vh])
        wo.append(lyr["wo"].reshape(nh, dh, H))
        wgu.append(jnp.concatenate([lyr["wg"], lyr["wu"]], axis=1))     # (H, 2I)
        wdown.append(lyr["wd"])
        ln1.append(lyr["ln1"].reshape(1, H))
        ln2.append(lyr["ln2"].reshape(1, H))

    return dict(
        ln1=jnp.stack(ln1),                 # (L, 1, H)
        ln2=jnp.stack(ln2),                 # (L, 1, H)
        wqkv=jnp.stack(wqkv),               # (L*5, nh, H, dh)
        wo=jnp.stack(wo),                   # (L, nh, dh, H)
        wgu=jnp.stack(wgu),                 # (L, H, 2I)
        wdown=jnp.stack(wdown),             # (L, I, H)
        final_norm=base["final_norm"].reshape(1, H),
    )


def llama_reference(emb, base, cos, sin, cfg):
    """Pure-JAX (f32, highest precision) reference of the HF Llama forward math."""
    nh, dh, eps = cfg["num_heads"], cfg["head_dim"], cfg["eps"]
    B, S, H = emb.shape
    scale = 1.0 / (dh ** 0.5)
    hp = lax.Precision.HIGHEST

    def rms(v, w):
        return v * lax.rsqrt(jnp.mean(v * v, axis=-1, keepdims=True) + eps) * w

    def rotate_half(v):
        half = v.shape[-1] // 2
        return jnp.concatenate([-v[..., half:], v[..., :half]], axis=-1)

    row = jnp.arange(S)[:, None]
    col = jnp.arange(S)[None, :]
    mask = jnp.where(col <= row, 0.0, -1e30).astype(jnp.float32)

    def heads(t):
        return t.reshape(B, S, nh, dh).transpose(0, 2, 1, 3)

    x = emb
    for lyr in base["layers"]:
        h = rms(x, lyr["ln1"])
        q = heads(jnp.einsum('bsd,de->bse', h, lyr["wq"], precision=hp))
        k = heads(jnp.einsum('bsd,de->bse', h, lyr["wk"], precision=hp))
        v = heads(jnp.einsum('bsd,de->bse', h, lyr["wv"], precision=hp))
        q = q * cos + rotate_half(q) * sin
        k = k * cos + rotate_half(k) * sin
        s = jnp.einsum('bhqd,bhkd->bhqk', q, k, precision=hp) * scale + mask
        p = jax.nn.softmax(s, axis=-1)
        ctx = jnp.einsum('bhqk,bhkd->bhqd', p, v, precision=hp)
        ctx = ctx.transpose(0, 2, 1, 3).reshape(B, S, H)
        x = x + jnp.einsum('bsd,de->bse', ctx, lyr["wo"], precision=hp)
        h2 = rms(x, lyr["ln2"])
        g = jnp.einsum('bsd,di->bsi', h2, lyr["wg"], precision=hp)
        u = jnp.einsum('bsd,di->bsi', h2, lyr["wu"], precision=hp)
        act = g * jax.nn.sigmoid(g) * u
        x = x + jnp.einsum('bsi,id->bsd', act, lyr["wd"], precision=hp)
    return rms(x, base["final_norm"])


# ----------------------------------- main -------------------------------------

if __name__ == "__main__":
    # Scaled-down llama config (llama-7b is 4096 / 32 heads / 11008; 6 layers kept).
    B, S = 2, 8
    cfg = dict(
        hidden=64,
        num_heads=4,
        head_dim=16,
        intermediate=128,
        num_layers=6,
        eps=1e-6,
    )
    cos, sin = rope_cos_sin(S, cfg["head_dim"])
    row = jnp.arange(S)[:, None]
    col = jnp.arange(S)[None, :]
    mask = jnp.where(col <= row, 0.0, -1e30).astype(jnp.float32)
    cfg["cos"], cfg["sin"], cfg["mask"] = cos, sin, mask

    key = jax.random.PRNGKey(0)
    k_emb, k_par = jax.random.split(key)
    embeddings = jax.random.normal(k_emb, (B, S, cfg["hidden"]), dtype=jnp.float32)

    base = init_base_params(k_par, cfg)
    params = pack_kernel_params(base, cfg)

    fwd = jax.jit(lambda e: llama_forward(e, params, cfg))
    out = fwd(embeddings)
    jax.block_until_ready(out)

    assert out.shape == (B, S, cfg["hidden"]), out.shape
    assert jnp.isfinite(out).all()

    ref = llama_reference(embeddings, base, cos, sin, cfg)
    max_err = float(jnp.max(jnp.abs(out - ref)))
    assert jnp.allclose(out, ref, atol=2e-2, rtol=2e-2), f"max abs err {max_err}"

    print("KERNEL_OK")
</pallas_src>

<mosaic_0001>
module attributes {stable_mosaic.version = 11 : i64} {
  func.func @_llama_kernel(%arg0: i32, %arg1: memref<8x64xf32, #tpu.memory_space<vmem>>, %arg2: memref<8x16xf32, #tpu.memory_space<vmem>>, %arg3: memref<8x16xf32, #tpu.memory_space<vmem>>, %arg4: memref<8x8xf32, #tpu.memory_space<vmem>>, %arg5: memref<6x1x64xf32, #tpu.memory_space<vmem>>, %arg6: memref<6x1x64xf32, #tpu.memory_space<vmem>>, %arg7: memref<30x4x64x16xf32, #tpu.memory_space<vmem>>, %arg8: memref<6x4x16x64xf32, #tpu.memory_space<vmem>>, %arg9: memref<6x64x256xf32, #tpu.memory_space<vmem>>, %arg10: memref<6x128x64xf32, #tpu.memory_space<vmem>>, %arg11: memref<1x64xf32, #tpu.memory_space<vmem>>, %arg12: memref<8x64xf32, #tpu.memory_space<vmem>>) attributes {dimension_semantics = [#tpu.dimension_semantics<parallel>], iteration_bounds = array<i64: 2>, scalar_prefetch = 0 : i64, scratch_operands = 0 : i64, tpu.core_type = #tpu.core_type<tc>, window_params = [{transform_indices = @transform_0, window_bounds = array<i64: 8, 64>}, {pipeline_mode = #tpu.pipeline_mode<synchronous>, transform_indices = @transform_1, window_bounds = array<i64: 8, 16>}, {pipeline_mode = #tpu.pipeline_mode<synchronous>, transform_indices = @transform_2, window_bounds = array<i64: 8, 16>}, {pipeline_mode = #tpu.pipeline_mode<synchronous>, transform_indices = @transform_3, window_bounds = array<i64: 8, 8>}, {pipeline_mode = #tpu.pipeline_mode<synchronous>, transform_indices = @transform_4, window_bounds = array<i64: 6, 1, 64>}, {pipeline_mode = #tpu.pipeline_mode<synchronous>, transform_indices = @transform_5, window_bounds = array<i64: 6, 1, 64>}, {pipeline_mode = #tpu.pipeline_mode<synchronous>, transform_indices = @transform_6, window_bounds = array<i64: 30, 4, 64, 16>}, {pipeline_mode = #tpu.pipeline_mode<synchronous>, transform_indices = @transform_7, window_bounds = array<i64: 6, 4, 16, 64>}, {pipeline_mode = #tpu.pipeline_mode<synchronous>, transform_indices = @transform_8, window_bounds = array<i64: 6, 64, 256>}, {pipeline_mode = #tpu.pipeline_mode<synchronous>, transform_indices = @transform_9, window_bounds = array<i64: 6, 128, 64>}, {pipeline_mode = #tpu.pipeline_mode<synchronous>, transform_indices = @transform_10, window_bounds = array<i64: 1, 64>}, {transform_indices = @transform_11, window_bounds = array<i64: 8, 64>}]} {
    %c0 = arith.constant 0 : index
    %c0_0 = arith.constant 0 : index
    %0 = vector.load %arg2[%c0, %c0_0] : memref<8x16xf32, #tpu.memory_space<vmem>>, vector<8x16xf32>
    %1 = vector.shape_cast %0 : vector<8x16xf32> to vector<1x8x16xf32>
    %2 = vector.shape_cast %1 : vector<1x8x16xf32> to vector<1x8x16xf32>
    %3 = vector.broadcast %2 : vector<1x8x16xf32> to vector<4x8x16xf32>
    %c0_1 = arith.constant 0 : index
    %c0_2 = arith.constant 0 : index
    %4 = vector.load %arg3[%c0_1, %c0_2] : memref<8x16xf32, #tpu.memory_space<vmem>>, vector<8x16xf32>
    %5 = vector.shape_cast %4 : vector<8x16xf32> to vector<1x8x16xf32>
    %6 = vector.shape_cast %5 : vector<1x8x16xf32> to vector<1x8x16xf32>
    %7 = vector.broadcast %6 : vector<1x8x16xf32> to vector<4x8x16xf32>
    %c0_3 = arith.constant 0 : index
    %c0_4 = arith.constant 0 : index
    %8 = vector.load %arg4[%c0_3, %c0_4] : memref<8x8xf32, #tpu.memory_space<vmem>>, vector<8x8xf32>
    %9 = vector.shape_cast %8 : vector<8x8xf32> to vector<1x8x8xf32>
    %10 = vector.shape_cast %9 : vector<1x8x8xf32> to vector<1x8x8xf32>
    %11 = vector.broadcast %10 : vector<1x8x8xf32> to vector<4x8x8xf32>
    %c0_5 = arith.constant 0 : index
    %c0_6 = arith.constant 0 : index
    %12 = vector.load %arg1[%c0_5, %c0_6] : memref<8x64xf32, #tpu.memory_space<vmem>>, vector<8x64xf32>
    %c0_7 = arith.constant 0 : index
    %c0_8 = arith.constant 0 : index
    %c0_9 = arith.constant 0 : index
    %13 = vector.load %arg5[%c0_7, %c0_8, %c0_9] : memref<6x1x64xf32, #tpu.memory_space<vmem>>, vector<1x1x64xf32>
    %14 = vector.shape_cast %13 : vector<1x1x64xf32> to vector<1x64xf32>
    %15 = arith.mulf %12, %12 : vector<8x64xf32>
    %cst = arith.constant dense<0.000000e+00> : vector<8xf32>
    %16 = vector.multi_reduction <add>, %15, %cst [1] : vector<8x64xf32> to vector<8xf32>
    %17 = vector.shape_cast %16 : vector<8xf32> to vector<8x1xf32>
    %cst_10 = arith.constant 6.400000e+01 : f32
    %18 = vector.broadcast %cst_10 : f32 to vector<8x1xf32>
    %19 = arith.divf %17, %18 : vector<8x1xf32>
    %cst_11 = arith.constant 9.99999997E-7 : f32
    %20 = vector.broadcast %cst_11 : f32 to vector<8x1xf32>
    %21 = arith.addf %19, %20 : vector<8x1xf32>
    %22 = math.rsqrt %21 : vector<8x1xf32>
    %23 = vector.broadcast %22 : vector<8x1xf32> to vector<8x64xf32>
    %24 = arith.mulf %12, %23 : vector<8x64xf32>
    %25 = vector.broadcast %14 : vector<1x64xf32> to vector<8x64xf32>
    %26 = arith.mulf %24, %25 : vector<8x64xf32>
    %27 = vector.shape_cast %26 : vector<8x64xf32> to vector<1x8x64xf32>
    %28 = vector.shape_cast %27 : vector<1x8x64xf32> to vector<1x8x64xf32>
    %29 = vector.broadcast %28 : vector<1x8x64xf32> to vector<4x8x64xf32>
    %c0_12 = arith.constant 0 : index
    %c0_13 = arith.constant 0 : index
    %c0_14 = arith.constant 0 : index
    %c0_15 = arith.constant 0 : index
    %30 = vector.load %arg7[%c0_12, %c0_13, %c0_14, %c0_15] : memref<30x4x64x16xf32, #tpu.memory_space<vmem>>, vector<1x4x64x16xf32>
    %31 = vector.shape_cast %30 : vector<1x4x64x16xf32> to vector<4x64x16xf32>
    %cst_16 = arith.constant dense<0.000000e+00> : vector<4x8x16xf32>
    %32 = tpu.matmul %29, %31, %cst_16 {dimension_numbers = #tpu.dot_dimension_numbers<[2], [1], [1], [2], [0, 0, 0, 1, 1, 2], [0], [0]>} : vector<4x8x64xf32>, vector<4x64x16xf32>, vector<4x8x16xf32> -> vector<4x8x16xf32>
    %33 = arith.mulf %32, %3 : vector<4x8x16xf32>
    %c1 = arith.constant 1 : index
    %c0_17 = arith.constant 0 : index
    %c0_18 = arith.constant 0 : index
    %c0_19 = arith.constant 0 : index
    %34 = vector.load %arg7[%c1, %c0_17, %c0_18, %c0_19] : memref<30x4x64x16xf32, #tpu.memory_space<vmem>>, vector<1x4x64x16xf32>
    %35 = vector.shape_cast %34 : vector<1x4x64x16xf32> to vector<4x64x16xf32>
    %cst_20 = arith.constant dense<0.000000e+00> : vector<4x8x16xf32>
    %36 = tpu.matmul %29, %35, %cst_20 {dimension_numbers = #tpu.dot_dimension_numbers<[2], [1], [1], [2], [0, 0, 0, 1, 1, 2], [0], [0]>} : vector<4x8x64xf32>, vector<4x64x16xf32>, vector<4x8x16xf32> -> vector<4x8x16xf32>
    %37 = arith.mulf %36, %7 : vector<4x8x16xf32>
    %38 = arith.addf %33, %37 : vector<4x8x16xf32>
    %c2 = arith.constant 2 : index
    %c0_21 = arith.constant 0 : index
    %c0_22 = arith.constant 0 : index
    %c0_23 = arith.constant 0 : index
    %39 = vector.load %arg7[%c2, %c0_21, %c0_22, %c0_23] : memref<30x4x64x16xf32, #tpu.memory_space<vmem>>, vector<1x4x64x16xf32>
    %40 = vector.shape_cast %39 : vector<1x4x64x16xf32> to vector<4x64x16xf32>
    %cst_24 = arith.constant dense<0.000000e+00> : vector<4x8x16xf32>
    %41 = tpu.matmul %29, %40, %cst_24 {dimension_numbers = #tpu.dot_dimension_numbers<[2], [1], [1], [2], [0, 0, 0, 1, 1, 2], [0], [0]>} : vector<4x8x64xf32>, vector<4x64x16xf32>, vector<4x8x16xf32> -> vector<4x8x16xf32>
    %42 = arith.mulf %41, %3 : vector<4x8x16xf32>
    %c3 = arith.constant 3 : index
    %c0_25 = arith.constant 0 : index
    %c0_26 = arith.constant 0 : index
    %c0_27 = arith.constant 0 : index
    %43 = vector.load %arg7[%c3, %c0_25, %c0_26, %c0_27] : memref<30x4x64x16xf32, #tpu.memory_space<vmem>>, vector<1x4x64x16xf32>
    %44 = vector.shape_cast %43 : vector<1x4x64x16xf32> to vector<4x64x16xf32>
    %cst_28 = arith.constant dense<0.000000e+00> : vector<4x8x16xf32>
    %45 = tpu.matmul %29, %44, %cst_28 {dimension_numbers = #tpu.dot_dimension_numbers<[2], [1], [1], [2], [0, 0, 0, 1, 1, 2], [0], [0]>} : vector<4x8x64xf32>, vector<4x64x16xf32>, vector<4x8x16xf32> -> vector<4x8x16xf32>
    %46 = arith.mulf %45, %7 : vector<4x8x16xf32>
    %47 = arith.addf %42, %46 : vector<4x8x16xf32>
    %c4 = arith.constant 4 : index
    %c0_29 = arith.constant 0 : index
    %c0_30 = arith.constant 0 : index
    %c0_31 = arith.constant 0 : index
    %48 = vector.load %arg7[%c4, %c0_29, %c0_30, %c0_31] : memref<30x4x64x16xf32, #tpu.memory_space<vmem>>, vector<1x4x64x16xf32>
    %49 = vector.shape_cast %48 : vector<1x4x64x16xf32> to vector<4x64x16xf32>
    %cst_32 = arith.constant dense<0.000000e+00> : vector<4x8x16xf32>
    %50 = tpu.matmul %29, %49, %cst_32 {dimension_numbers = #tpu.dot_dimension_numbers<[2], [1], [1], [2], [0, 0, 0, 1, 1, 2], [0], [0]>} : vector<4x8x64xf32>, vector<4x64x16xf32>, vector<4x8x16xf32> -> vector<4x8x16xf32>
    %cst_33 = arith.constant dense<0.000000e+00> : vector<4x8x8xf32>
    %51 = tpu.matmul %38, %47, %cst_33 {dimension_numbers = #tpu.dot_dimension_numbers<[2], [2], [1], [1], [0, 0, 0, 1, 1, 1], [0], [0]>} : vector<4x8x16xf32>, vector<4x8x16xf32>, vector<4x8x8xf32> -> vector<4x8x8xf32>
    %cst_34 = arith.constant 2.500000e-01 : f32
    %52 = vector.broadcast %cst_34 : f32 to vector<4x8x8xf32>
    %53 = arith.mulf %51, %52 : vector<4x8x8xf32>
    %54 = arith.addf %53, %11 : vector<4x8x8xf32>
    %cst_35 = arith.constant dense<0xFF800000> : vector<4x8xf32>
    %55 = vector.multi_reduction <maximumf>, %54, %cst_35 [2] : vector<4x8x8xf32> to vector<4x8xf32>
    %56 = vector.shape_cast %55 : vector<4x8xf32> to vector<4x8x1xf32>
    %57 = vector.broadcast %56 : vector<4x8x1xf32> to vector<4x8x8xf32>
    %58 = arith.subf %54, %57 : vector<4x8x8xf32>
    %59 = math.exp %58 : vector<4x8x8xf32>
    %cst_36 = arith.constant dense<0.000000e+00> : vector<4x8xf32>
    %60 = vector.multi_reduction <add>, %59, %cst_36 [2] : vector<4x8x8xf32> to vector<4x8xf32>
    %61 = vector.shape_cast %60 : vector<4x8xf32> to vector<4x8x1xf32>
    %62 = vector.broadcast %61 : vector<4x8x1xf32> to vector<4x8x8xf32>
    %63 = arith.divf %59, %62 : vector<4x8x8xf32>
    %cst_37 = arith.constant dense<0.000000e+00> : vector<4x8x16xf32>
    %64 = tpu.matmul %63, %50, %cst_37 {dimension_numbers = #tpu.dot_dimension_numbers<[2], [1], [1], [2], [0, 0, 0, 1, 1, 2], [0], [0]>} : vector<4x8x8xf32>, vector<4x8x16xf32>, vector<4x8x16xf32> -> vector<4x8x16xf32>
    %c0_38 = arith.constant 0 : index
    %c0_39 = arith.constant 0 : index
    %c0_40 = arith.constant 0 : index
    %c0_41 = arith.constant 0 : index
    %65 = vector.load %arg8[%c0_38, %c0_39, %c0_40, %c0_41] : memref<6x4x16x64xf32, #tpu.memory_space<vmem>>, vector<1x4x16x64xf32>
    %66 = vector.shape_cast %65 : vector<1x4x16x64xf32> to vector<4x16x64xf32>
    %cst_42 = arith.constant dense<0.000000e+00> : vector<4x8x64xf32>
    %67 = tpu.matmul %64, %66, %cst_42 {dimension_numbers = #tpu.dot_dimension_numbers<[2], [1], [1], [2], [0, 0, 0, 1, 1, 2], [0], [0]>} : vector<4x8x16xf32>, vector<4x16x64xf32>, vector<4x8x64xf32> -> vector<4x8x64xf32>
    %cst_43 = arith.constant dense<0.000000e+00> : vector<8x64xf32>
    %68 = vector.multi_reduction <add>, %67, %cst_43 [0] : vector<4x8x64xf32> to vector<8x64xf32>
    %69 = arith.addf %12, %68 : vector<8x64xf32>
    %c0_44 = arith.constant 0 : index
    %c0_45 = arith.constant 0 : index
    %c0_46 = arith.constant 0 : index
    %70 = vector.load %arg6[%c0_44, %c0_45, %c0_46] : memref<6x1x64xf32, #tpu.memory_space<vmem>>, vector<1x1x64xf32>
    %71 = vector.shape_cast %70 : vector<1x1x64xf32> to vector<1x64xf32>
    %72 = arith.mulf %69, %69 : vector<8x64xf32>
    %cst_47 = arith.constant dense<0.000000e+00> : vector<8xf32>
    %73 = vector.multi_reduction <add>, %72, %cst_47 [1] : vector<8x64xf32> to vector<8xf32>
    %74 = vector.shape_cast %73 : vector<8xf32> to vector<8x1xf32>
    %cst_48 = arith.constant 6.400000e+01 : f32
    %75 = vector.broadcast %cst_48 : f32 to vector<8x1xf32>
    %76 = arith.divf %74, %75 : vector<8x1xf32>
    %cst_49 = arith.constant 9.99999997E-7 : f32
    %77 = vector.broadcast %cst_49 : f32 to vector<8x1xf32>
    %78 = arith.addf %76, %77 : vector<8x1xf32>
    %79 = math.rsqrt %78 : vector<8x1xf32>
    %80 = vector.broadcast %79 : vector<8x1xf32> to vector<8x64xf32>
    %81 = arith.mulf %69, %80 : vector<8x64xf32>
    %82 = vector.broadcast %71 : vector<1x64xf32> to vector<8x64xf32>
    %83 = arith.mulf %81, %82 : vector<8x64xf32>
    %c0_50 = arith.constant 0 : index
    %c0_51 = arith.constant 0 : index
    %c0_52 = arith.constant 0 : index
    %84 = vector.load %arg9[%c0_50, %c0_51, %c0_52] : memref<6x64x256xf32, #tpu.memory_space<vmem>>, vector<1x64x256xf32>
    %85 = vector.shape_cast %84 : vector<1x64x256xf32> to vector<64x256xf32>
    %cst_53 = arith.constant dense<0.000000e+00> : vector<8x256xf32>
    %86 = tpu.matmul %83, %85, %cst_53 {dimension_numbers = #tpu.dot_dimension_numbers<[1], [0], [0], [1], [0, 0, 1, 1], [], []>} : vector<8x64xf32>, vector<64x256xf32>, vector<8x256xf32> -> vector<8x256xf32>
    %87 = vector.extract_strided_slice %86 {offsets = [0, 0], sizes = [8, 128], strides = [1, 1]} : vector<8x256xf32> to vector<8x128xf32>
    %88 = vector.extract_strided_slice %86 {offsets = [0, 128], sizes = [8, 128], strides = [1, 1]} : vector<8x256xf32> to vector<8x128xf32>
    %cst_54 = arith.constant 0.000000e+00 : f32
    %89 = vector.broadcast %cst_54 : f32 to vector<8x128xf32>
    %90 = arith.subf %89, %87 : vector<8x128xf32>
    %91 = math.exp %90 : vector<8x128xf32>
    %cst_55 = arith.constant 1.000000e+00 : f32
    %92 = vector.broadcast %cst_55 : f32 to vector<8x128xf32>
    %93 = arith.addf %92, %91 : vector<8x128xf32>
    %cst_56 = arith.constant 1.000000e+00 : f32
    %94 = vector.broadcast %cst_56 : f32 to vector<8x128xf32>
    %95 = arith.divf %94, %93 : vector<8x128xf32>
    %96 = arith.mulf %87, %95 : vector<8x128xf32>
    %97 = arith.mulf %96, %88 : vector<8x128xf32>
    %c0_57 = arith.constant 0 : index
    %c0_58 = arith.constant 0 : index
    %c0_59 = arith.constant 0 : index
    %98 = vector.load %arg10[%c0_57, %c0_58, %c0_59] : memref<6x128x64xf32, #tpu.memory_space<vmem>>, vector<1x128x64xf32>
    %99 = vector.shape_cast %98 : vector<1x128x64xf32> to vector<128x64xf32>
    %cst_60 = arith.constant dense<0.000000e+00> : vector<8x64xf32>
    %100 = tpu.matmul %97, %99, %cst_60 {dimension_numbers = #tpu.dot_dimension_numbers<[1], [0], [0], [1], [0, 0, 1, 1], [], []>} : vector<8x128xf32>, vector<128x64xf32>, vector<8x64xf32> -> vector<8x64xf32>
    %101 = arith.addf %69, %100 : vector<8x64xf32>
    %c1_61 = arith.constant 1 : index
    %c0_62 = arith.constant 0 : index
    %c0_63 = arith.constant 0 : index
    %102 = vector.load %arg5[%c1_61, %c0_62, %c0_63] : memref<6x1x64xf32, #tpu.memory_space<vmem>>, vector<1x1x64xf32>
    %103 = vector.shape_cast %102 : vector<1x1x64xf32> to vector<1x64xf32>
    %104 = arith.mulf %101, %101 : vector<8x64xf32>
    %cst_64 = arith.constant dense<0.000000e+00> : vector<8xf32>
    %105 = vector.multi_reduction <add>, %104, %cst_64 [1] : vector<8x64xf32> to vector<8xf32>
    %106 = vector.shape_cast %105 : vector<8xf32> to vector<8x1xf32>
    %cst_65 = arith.constant 6.400000e+01 : f32
    %107 = vector.broadcast %cst_65 : f32 to vector<8x1xf32>
    %108 = arith.divf %106, %107 : vector<8x1xf32>
    %cst_66 = arith.constant 9.99999997E-7 : f32
    %109 = vector.broadcast %cst_66 : f32 to vector<8x1xf32>
    %110 = arith.addf %108, %109 : vector<8x1xf32>
    %111 = math.rsqrt %110 : vector<8x1xf32>
    %112 = vector.broadcast %111 : vector<8x1xf32> to vector<8x64xf32>
    %113 = arith.mulf %101, %112 : vector<8x64xf32>
    %114 = vector.broadcast %103 : vector<1x64xf32> to vector<8x64xf32>
    %115 = arith.mulf %113, %114 : vector<8x64xf32>
    %116 = vector.shape_cast %115 : vector<8x64xf32> to vector<1x8x64xf32>
    %117 = vector.shape_cast %116 : vector<1x8x64xf32> to vector<1x8x64xf32>
    %118 = vector.broadcast %117 : vector<1x8x64xf32> to vector<4x8x64xf32>
    %c5 = arith.constant 5 : index
    %c0_67 = arith.constant 0 : index
    %c0_68 = arith.constant 0 : index
    %c0_69 = arith.constant 0 : index
    %119 = vector.load %arg7[%c5, %c0_67, %c0_68, %c0_69] : memref<30x4x64x16xf32, #tpu.memory_space<vmem>>, vector<1x4x64x16xf32>
    %120 = vector.shape_cast %119 : vector<1x4x64x16xf32> to vector<4x64x16xf32>
    %cst_70 = arith.constant dense<0.000000e+00> : vector<4x8x16xf32>
    %121 = tpu.matmul %118, %120, %cst_70 {dimension_numbers = #tpu.dot_dimension_numbers<[2], [1], [1], [2], [0, 0, 0, 1, 1, 2], [0], [0]>} : vector<4x8x64xf32>, vector<4x64x16xf32>, vector<4x8x16xf32> -> vector<4x8x16xf32>
    %122 = arith.mulf %121, %3 : vector<4x8x16xf32>
    %c6 = arith.constant 6 : index
    %c0_71 = arith.constant 0 : index
    %c0_72 = arith.constant 0 : index
    %c0_73 = arith.constant 0 : index
    %123 = vector.load %arg7[%c6, %c0_71, %c0_72, %c0_73] : memref<30x4x64x16xf32, #tpu.memory_space<vmem>>, vector<1x4x64x16xf32>
    %124 = vector.shape_cast %123 : vector<1x4x64x16xf32> to vector<4x64x16xf32>
    %cst_74 = arith.constant dense<0.000000e+00> : vector<4x8x16xf32>
    %125 = tpu.matmul %118, %124, %cst_74 {dimension_numbers = #tpu.dot_dimension_numbers<[2], [1], [1], [2], [0, 0, 0, 1, 1, 2], [0], [0]>} : vector<4x8x64xf32>, vector<4x64x16xf32>, vector<4x8x16xf32> -> vector<4x8x16xf32>
    %126 = arith.mulf %125, %7 : vector<4x8x16xf32>
    %127 = arith.addf %122, %126 : vector<4x8x16xf32>
    %c7 = arith.constant 7 : index
    %c0_75 = arith.constant 0 : index
    %c0_76 = arith.constant 0 : index
    %c0_77 = arith.constant 0 : index
    %128 = vector.load %arg7[%c7, %c0_75, %c0_76, %c0_77] : memref<30x4x64x16xf32, #tpu.memory_space<vmem>>, vector<1x4x64x16xf32>
    %129 = vector.shape_cast %128 : vector<1x4x64x16xf32> to vector<4x64x16xf32>
    %cst_78 = arith.constant dense<0.000000e+00> : vector<4x8x16xf32>
    %130 = tpu.matmul %118, %129, %cst_78 {dimension_numbers = #tpu.dot_dimension_numbers<[2], [1], [1], [2], [0, 0, 0, 1, 1, 2], [0], [0]>} : vector<4x8x64xf32>, vector<4x64x16xf32>, vector<4x8x16xf32> -> vector<4x8x16xf32>
    %131 = arith.mulf %130, %3 : vector<4x8x16xf32>
    %c8 = arith.constant 8 : index
    %c0_79 = arith.constant 0 : index
    %c0_80 = arith.constant 0 : index
    %c0_81 = arith.constant 0 : index
    %132 = vector.load %arg7[%c8, %c0_79, %c0_80, %c0_81] : memref<30x4x64x16xf32, #tpu.memory_space<vmem>>, vector<1x4x64x16xf32>
    %133 = vector.shape_cast %132 : vector<1x4x64x16xf32> to vector<4x64x16xf32>
    %cst_82 = arith.constant dense<0.000000e+00> : vector<4x8x16xf32>
    %134 = tpu.matmul %118, %133, %cst_82 {dimension_numbers = #tpu.dot_dimension_numbers<[2], [1], [1], [2], [0, 0, 0, 1, 1, 2], [0], [0]>} : vector<4x8x64xf32>, vector<4x64x16xf32>, vector<4x8x16xf32> -> vector<4x8x16xf32>
    %135 = arith.mulf %134, %7 : vector<4x8x16xf32>
    %136 = arith.addf %131, %135 : vector<4x8x16xf32>
    %c9 = arith.constant 9 : index
    %c0_83 = arith.constant 0 : index
    %c0_84 = arith.constant 0 : index
    %c0_85 = arith.constant 0 : index
    %137 = vector.load %arg7[%c9, %c0_83, %c0_84, %c0_85] : memref<30x4x64x16xf32, #tpu.memory_space<vmem>>, vector<1x4x64x16xf32>
    %138 = vector.shape_cast %137 : vector<1x4x64x16xf32> to vector<4x64x16xf32>
    %cst_86 = arith.constant dense<0.000000e+00> : vector<4x8x16xf32>
    %139 = tpu.matmul %118, %138, %cst_86 {dimension_numbers = #tpu.dot_dimension_numbers<[2], [1], [1], [2], [0, 0, 0, 1, 1, 2], [0], [0]>} : vector<4x8x64xf32>, vector<4x64x16xf32>, vector<4x8x16xf32> -> vector<4x8x16xf32>
    %cst_87 = arith.constant dense<0.000000e+00> : vector<4x8x8xf32>
    %140 = tpu.matmul %127, %136, %cst_87 {dimension_numbers = #tpu.dot_dimension_numbers<[2], [2], [1], [1], [0, 0, 0, 1, 1, 1], [0], [0]>} : vector<4x8x16xf32>, vector<4x8x16xf32>, vector<4x8x8xf32> -> vector<4x8x8xf32>
    %cst_88 = arith.constant 2.500000e-01 : f32
    %141 = vector.broadcast %cst_88 : f32 to vector<4x8x8xf32>
    %142 = arith.mulf %140, %141 : vector<4x8x8xf32>
    %143 = arith.addf %142, %11 : vector<4x8x8xf32>
    %cst_89 = arith.constant dense<0xFF800000> : vector<4x8xf32>
    %144 = vector.multi_reduction <maximumf>, %143, %cst_89 [2] : vector<4x8x8xf32> to vector<4x8xf32>
    %145 = vector.shape_cast %144 : vector<4x8xf32> to vector<4x8x1xf32>
    %146 = vector.broadcast %145 : vector<4x8x1xf32> to vector<4x8x8xf32>
    %147 = arith.subf %143, %146 : vector<4x8x8xf32>
    %148 = math.exp %147 : vector<4x8x8xf32>
    %cst_90 = arith.constant dense<0.000000e+00> : vector<4x8xf32>
    %149 = vector.multi_reduction <add>, %148, %cst_90 [2] : vector<4x8x8xf32> to vector<4x8xf32>
    %150 = vector.shape_cast %149 : vector<4x8xf32> to vector<4x8x1xf32>
    %151 = vector.broadcast %150 : vector<4x8x1xf32> to vector<4x8x8xf32>
    %152 = arith.divf %148, %151 : vector<4x8x8xf32>
    %cst_91 = arith.constant dense<0.000000e+00> : vector<4x8x16xf32>
    %153 = tpu.matmul %152, %139, %cst_91 {dimension_numbers = #tpu.dot_dimension_numbers<[2], [1], [1], [2], [0, 0, 0, 1, 1, 2], [0], [0]>} : vector<4x8x8xf32>, vector<4x8x16xf32>, vector<4x8x16xf32> -> vector<4x8x16xf32>
    %c1_92 = arith.constant 1 : index
    %c0_93 = arith.constant 0 : index
    %c0_94 = arith.constant 0 : index
    %c0_95 = arith.constant 0 : index
    %154 = vector.load %arg8[%c1_92, %c0_93, %c0_94, %c0_95] : memref<6x4x16x64xf32, #tpu.memory_space<vmem>>, vector<1x4x16x64xf32>
    %155 = vector.shape_cast %154 : vector<1x4x16x64xf32> to vector<4x16x64xf32>
    %cst_96 = arith.constant dense<0.000000e+00> : vector<4x8x64xf32>
    %156 = tpu.matmul %153, %155, %cst_96 {dimension_numbers = #tpu.dot_dimension_numbers<[2], [1], [1], [2], [0, 0, 0, 1, 1, 2], [0], [0]>} : vector<4x8x16xf32>, vector<4x16x64xf32>, vector<4x8x64xf32> -> vector<4x8x64xf32>
    %cst_97 = arith.constant dense<0.000000e+00> : vector<8x64xf32>
    %157 = vector.multi_reduction <add>, %156, %cst_97 [0] : vector<4x8x64xf32> to vector<8x64xf32>
    %158 = arith.addf %101, %157 : vector<8x64xf32>
    %c1_98 = arith.constant 1 : index
    %c0_99 = arith.constant 0 : index
    %c0_100 = arith.constant 0 : index
    %159 = vector.load %arg6[%c1_98, %c0_99, %c0_100] : memref<6x1x64xf32, #tpu.memory_space<vmem>>, vector<1x1x64xf32>
    %160 = vector.shape_cast %159 : vector<1x1x64xf32> to vector<1x64xf32>
    %161 = arith.mulf %158, %158 : vector<8x64xf32>
    %cst_101 = arith.constant dense<0.000000e+00> : vector<8xf32>
    %162 = vector.multi_reduction <add>, %161, %cst_101 [1] : vector<8x64xf32> to vector<8xf32>
    %163 = vector.shape_cast %162 : vector<8xf32> to vector<8x1xf32>
    %cst_102 = arith.constant 6.400000e+01 : f32
    %164 = vector.broadcast %cst_102 : f32 to vector<8x1xf32>
    %165 = arith.divf %163, %164 : vector<8x1xf32>
    %cst_103 = arith.constant 9.99999997E-7 : f32
    %166 = vector.broadcast %cst_103 : f32 to vector<8x1xf32>
    %167 = arith.addf %165, %166 : vector<8x1xf32>
    %168 = math.rsqrt %167 : vector<8x1xf32>
    %169 = vector.broadcast %168 : vector<8x1xf32> to vector<8x64xf32>
    %170 = arith.mulf %158, %169 : vector<8x64xf32>
    %171 = vector.broadcast %160 : vector<1x64xf32> to vector<8x64xf32>
    %172 = arith.mulf %170, %171 : vector<8x64xf32>
    %c1_104 = arith.constant 1 : index
    %c0_105 = arith.constant 0 : index
    %c0_106 = arith.constant 0 : index
    %173 = vector.load %arg9[%c1_104, %c0_105, %c0_106] : memref<6x64x256xf32, #tpu.memory_space<vmem>>, vector<1x64x256xf32>
    %174 = vector.shape_cast %173 : vector<1x64x256xf32> to vector<64x256xf32>
    %cst_107 = arith.constant dense<0.000000e+00> : vector<8x256xf32>
    %175 = tpu.matmul %172, %174, %cst_107 {dimension_numbers = #tpu.dot_dimension_numbers<[1], [0], [0], [1], [0, 0, 1, 1], [], []>} : vector<8x64xf32>, vector<64x256xf32>, vector<8x256xf32> -> vector<8x256xf32>
    %176 = vector.extract_strided_slice %175 {offsets = [0, 0], sizes = [8, 128], strides = [1, 1]} : vector<8x256xf32> to vector<8x128xf32>
    %177 = vector.extract_strided_slice %175 {offsets = [0, 128], sizes = [8, 128], strides = [1, 1]} : vector<8x256xf32> to vector<8x128xf32>
    %cst_108 = arith.constant 0.000000e+00 : f32
    %178 = vector.broadcast %cst_108 : f32 to vector<8x128xf32>
    %179 = arith.subf %178, %176 : vector<8x128xf32>
    %180 = math.exp %179 : vector<8x128xf32>
    %cst_109 = arith.constant 1.000000e+00 : f32
    %181 = vector.broadcast %cst_109 : f32 to vector<8x128xf32>
    %182 = arith.addf %181, %180 : vector<8x128xf32>
    %cst_110 = arith.constant 1.000000e+00 : f32
    %183 = vector.broadcast %cst_110 : f32 to vector<8x128xf32>
    %184 = arith.divf %183, %182 : vector<8x128xf32>
    %185 = arith.mulf %176, %184 : vector<8x128xf32>
    %186 = arith.mulf %185, %177 : vector<8x128xf32>
    %c1_111 = arith.constant 1 : index
    %c0_112 = arith.constant 0 : index
    %c0_113 = arith.constant 0 : index
    %187 = vector.load %arg10[%c1_111, %c0_112, %c0_113] : memref<6x128x64xf32, #tpu.memory_space<vmem>>, vector<1x128x64xf32>
    %188 = vector.shape_cast %187 : vector<1x128x64xf32> to vector<128x64xf32>
    %cst_114 = arith.constant dense<0.000000e+00> : vector<8x64xf32>
    %189 = tpu.matmul %186, %188, %cst_114 {dimension_numbers = #tpu.dot_dimension_numbers<[1], [0], [0], [1], [0, 0, 1, 1], [], []>} : vector<8x128xf32>, vector<128x64xf32>, vector<8x64xf32> -> vector<8x64xf32>
    %190 = arith.addf %158, %189 : vector<8x64xf32>
    %c2_115 = arith.constant 2 : index
    %c0_116 = arith.constant 0 : index
    %c0_117 = arith.constant 0 : index
    %191 = vector.load %arg5[%c2_115, %c0_116, %c0_117] : memref<6x1x64xf32, #tpu.memory_space<vmem>>, vector<1x1x64xf32>
    %192 = vector.shape_cast %191 : vector<1x1x64xf32> to vector<1x64xf32>
    %193 = arith.mulf %190, %190 : vector<8x64xf32>
    %cst_118 = arith.constant dense<0.000000e+00> : vector<8xf32>
    %194 = vector.multi_reduction <add>, %193, %cst_118 [1] : vector<8x64xf32> to vector<8xf32>
    %195 = vector.shape_cast %194 : vector<8xf32> to vector<8x1xf32>
    %cst_119 = arith.constant 6.400000e+01 : f32
    %196 = vector.broadcast %cst_119 : f32 to vector<8x1xf32>
    %197 = arith.divf %195, %196 : vector<8x1xf32>
    %cst_120 = arith.constant 9.99999997E-7 : f32
    %198 = vector.broadcast %cst_120 : f32 to vector<8x1xf32>
    %199 = arith.addf %197, %198 : vector<8x1xf32>
    %200 = math.rsqrt %199 : vector<8x1xf32>
    %201 = vector.broadcast %200 : vector<8x1xf32> to vector<8x64xf32>
    %202 = arith.mulf %190, %201 : vector<8x64xf32>
    %203 = vector.broadcast %192 : vector<1x64xf32> to vector<8x64xf32>
    %204 = arith.mulf %202, %203 : vector<8x64xf32>
    %205 = vector.shape_cast %204 : vector<8x64xf32> to vector<1x8x64xf32>
    %206 = vector.shape_cast %205 : vector<1x8x64xf32> to vector<1x8x64xf32>
    %207 = vector.broadcast %206 : vector<1x8x64xf32> to vector<4x8x64xf32>
    %c10 = arith.constant 10 : index
    %c0_121 = arith.constant 0 : index
    %c0_122 = arith.constant 0 : index
    %c0_123 = arith.constant 0 : index
    %208 = vector.load %arg7[%c10, %c0_121, %c0_122, %c0_123] : memref<30x4x64x16xf32, #tpu.memory_space<vmem>>, vector<1x4x64x16xf32>
    %209 = vector.shape_cast %208 : vector<1x4x64x16xf32> to vector<4x64x16xf32>
    %cst_124 = arith.constant dense<0.000000e+00> : vector<4x8x16xf32>
    %210 = tpu.matmul %207, %209, %cst_124 {dimension_numbers = #tpu.dot_dimension_numbers<[2], [1], [1], [2], [0, 0, 0, 1, 1, 2], [0], [0]>} : vector<4x8x64xf32>, vector<4x64x16xf32>, vector<4x8x16xf32> -> vector<4x8x16xf32>
    %211 = arith.mulf %210, %3 : vector<4x8x16xf32>
    %c11 = arith.constant 11 : index
    %c0_125 = arith.constant 0 : index
    %c0_126 = arith.constant 0 : index
    %c0_127 = arith.constant 0 : index
    %212 = vector.load %arg7[%c11, %c0_125, %c0_126, %c0_127] : memref<30x4x64x16xf32, #tpu.memory_space<vmem>>, vector<1x4x64x16xf32>
    %213 = vector.shape_cast %212 : vector<1x4x64x16xf32> to vector<4x64x16xf32>
    %cst_128 = arith.constant dense<0.000000e+00> : vector<4x8x16xf32>
    %214 = tpu.matmul %207, %213, %cst_128 {dimension_numbers = #tpu.dot_dimension_numbers<[2], [1], [1], [2], [0, 0, 0, 1, 1, 2], [0], [0]>} : vector<4x8x64xf32>, vector<4x64x16xf32>, vector<4x8x16xf32> -> vector<4x8x16xf32>
    %215 = arith.mulf %214, %7 : vector<4x8x16xf32>
    %216 = arith.addf %211, %215 : vector<4x8x16xf32>
    %c12 = arith.constant 12 : index
    %c0_129 = arith.constant 0 : index
    %c0_130 = arith.constant 0 : index
    %c0_131 = arith.constant 0 : index
    %217 = vector.load %arg7[%c12, %c0_129, %c0_130, %c0_131] : memref<30x4x64x16xf32, #tpu.memory_space<vmem>>, vector<1x4x64x16xf32>
    %218 = vector.shape_cast %217 : vector<1x4x64x16xf32> to vector<4x64x16xf32>
    %cst_132 = arith.constant dense<0.000000e+00> : vector<4x8x16xf32>
    %219 = tpu.matmul %207, %218, %cst_132 {dimension_numbers = #tpu.dot_dimension_numbers<[2], [1], [1], [2], [0, 0, 0, 1, 1, 2], [0], [0]>} : vector<4x8x64xf32>, vector<4x64x16xf32>, vector<4x8x16xf32> -> vector<4x8x16xf32>
    %220 = arith.mulf %219, %3 : vector<4x8x16xf32>
    %c13 = arith.constant 13 : index
    %c0_133 = arith.constant 0 : index
    %c0_134 = arith.constant 0 : index
    %c0_135 = arith.constant 0 : index
    %221 = vector.load %arg7[%c13, %c0_133, %c0_134, %c0_135] : memref<30x4x64x16xf32, #tpu.memory_space<vmem>>, vector<1x4x64x16xf32>
    %222 = vector.shape_cast %221 : vector<1x4x64x16xf32> to vector<4x64x16xf32>
    %cst_136 = arith.constant dense<0.000000e+00> : vector<4x8x16xf32>
    %223 = tpu.matmul %207, %222, %cst_136 {dimension_numbers = #tpu.dot_dimension_numbers<[2], [1], [1], [2], [0, 0, 0, 1, 1, 2], [0], [0]>} : vector<4x8x64xf32>, vector<4x64x16xf32>, vector<4x8x16xf32> -> vector<4x8x16xf32>
    %224 = arith.mulf %223, %7 : vector<4x8x16xf32>
    %225 = arith.addf %220, %224 : vector<4x8x16xf32>
    %c14 = arith.constant 14 : index
    %c0_137 = arith.constant 0 : index
    %c0_138 = arith.constant 0 : index
    %c0_139 = arith.constant 0 : index
    %226 = vector.load %arg7[%c14, %c0_137, %c0_138, %c0_139] : memref<30x4x64x16xf32, #tpu.memory_space<vmem>>, vector<1x4x64x16xf32>
    %227 = vector.shape_cast %226 : vector<1x4x64x16xf32> to vector<4x64x16xf32>
    %cst_140 = arith.constant dense<0.000000e+00> : vector<4x8x16xf32>
    %228 = tpu.matmul %207, %227, %cst_140 {dimension_numbers = #tpu.dot_dimension_numbers<[2], [1], [1], [2], [0, 0, 0, 1, 1, 2], [0], [0]>} : vector<4x8x64xf32>, vector<4x64x16xf32>, vector<4x8x16xf32> -> vector<4x8x16xf32>
    %cst_141 = arith.constant dense<0.000000e+00> : vector<4x8x8xf32>
    %229 = tpu.matmul %216, %225, %cst_141 {dimension_numbers = #tpu.dot_dimension_numbers<[2], [2], [1], [1], [0, 0, 0, 1, 1, 1], [0], [0]>} : vector<4x8x16xf32>, vector<4x8x16xf32>, vector<4x8x8xf32> -> vector<4x8x8xf32>
    %cst_142 = arith.constant 2.500000e-01 : f32
    %230 = vector.broadcast %cst_142 : f32 to vector<4x8x8xf32>
    %231 = arith.mulf %229, %230 : vector<4x8x8xf32>
    %232 = arith.addf %231, %11 : vector<4x8x8xf32>
    %cst_143 = arith.constant dense<0xFF800000> : vector<4x8xf32>
    %233 = vector.multi_reduction <maximumf>, %232, %cst_143 [2] : vector<4x8x8xf32> to vector<4x8xf32>
    %234 = vector.shape_cast %233 : vector<4x8xf32> to vector<4x8x1xf32>
    %235 = vector.broadcast %234 : vector<4x8x1xf32> to vector<4x8x8xf32>
    %236 = arith.subf %232, %235 : vector<4x8x8xf32>
    %237 = math.exp %236 : vector<4x8x8xf32>
    %cst_144 = arith.constant dense<0.000000e+00> : vector<4x8xf32>
    %238 = vector.multi_reduction <add>, %237, %cst_144 [2] : vector<4x8x8xf32> to vector<4x8xf32>
    %239 = vector.shape_cast %238 : vector<4x8xf32> to vector<4x8x1xf32>
    %240 = vector.broadcast %239 : vector<4x8x1xf32> to vector<4x8x8xf32>
    %241 = arith.divf %237, %240 : vector<4x8x8xf32>
    %cst_145 = arith.constant dense<0.000000e+00> : vector<4x8x16xf32>
    %242 = tpu.matmul %241, %228, %cst_145 {dimension_numbers = #tpu.dot_dimension_numbers<[2], [1], [1], [2], [0, 0, 0, 1, 1, 2], [0], [0]>} : vector<4x8x8xf32>, vector<4x8x16xf32>, vector<4x8x16xf32> -> vector<4x8x16xf32>
    %c2_146 = arith.constant 2 : index
    %c0_147 = arith.constant 0 : index
    %c0_148 = arith.constant 0 : index
    %c0_149 = arith.constant 0 : index
    %243 = vector.load %arg8[%c2_146, %c0_147, %c0_148, %c0_149] : memref<6x4x16x64xf32, #tpu.memory_space<vmem>>, vector<1x4x16x64xf32>
    %244 = vector.shape_cast %243 : vector<1x4x16x64xf32> to vector<4x16x64xf32>
    %cst_150 = arith.constant dense<0.000000e+00> : vector<4x8x64xf32>
    %245 = tpu.matmul %242, %244, %cst_150 {dimension_numbers = #tpu.dot_dimension_numbers<[2], [1], [1], [2], [0, 0, 0, 1, 1, 2], [0], [0]>} : vector<4x8x16xf32>, vector<4x16x64xf32>, vector<4x8x64xf32> -> vector<4x8x64xf32>
    %cst_151 = arith.constant dense<0.000000e+00> : vector<8x64xf32>
    %246 = vector.multi_reduction <add>, %245, %cst_151 [0] : vector<4x8x64xf32> to vector<8x64xf32>
    %247 = arith.addf %190, %246 : vector<8x64xf32>
    %c2_152 = arith.constant 2 : index
    %c0_153 = arith.constant 0 : index
    %c0_154 = arith.constant 0 : index
    %248 = vector.load %arg6[%c2_152, %c0_153, %c0_154] : memref<6x1x64xf32, #tpu.memory_space<vmem>>, vector<1x1x64xf32>
    %249 = vector.shape_cast %248 : vector<1x1x64xf32> to vector<1x64xf32>
    %250 = arith.mulf %247, %247 : vector<8x64xf32>
    %cst_155 = arith.constant dense<0.000000e+00> : vector<8xf32>
    %251 = vector.multi_reduction <add>, %250, %cst_155 [1] : vector<8x64xf32> to vector<8xf32>
    %252 = vector.shape_cast %251 : vector<8xf32> to vector<8x1xf32>
    %cst_156 = arith.constant 6.400000e+01 : f32
    %253 = vector.broadcast %cst_156 : f32 to vector<8x1xf32>
    %254 = arith.divf %252, %253 : vector<8x1xf32>
    %cst_157 = arith.constant 9.99999997E-7 : f32
    %255 = vector.broadcast %cst_157 : f32 to vector<8x1xf32>
    %256 = arith.addf %254, %255 : vector<8x1xf32>
    %257 = math.rsqrt %256 : vector<8x1xf32>
    %258 = vector.broadcast %257 : vector<8x1xf32> to vector<8x64xf32>
    %259 = arith.mulf %247, %258 : vector<8x64xf32>
    %260 = vector.broadcast %249 : vector<1x64xf32> to vector<8x64xf32>
    %261 = arith.mulf %259, %260 : vector<8x64xf32>
    %c2_158 = arith.constant 2 : index
    %c0_159 = arith.constant 0 : index
    %c0_160 = arith.constant 0 : index
    %262 = vector.load %arg9[%c2_158, %c0_159, %c0_160] : memref<6x64x256xf32, #tpu.memory_space<vmem>>, vector<1x64x256xf32>
    %263 = vector.shape_cast %262 : vector<1x64x256xf32> to vector<64x256xf32>
    %cst_161 = arith.constant dense<0.000000e+00> : vector<8x256xf32>
    %264 = tpu.matmul %261, %263, %cst_161 {dimension_numbers = #tpu.dot_dimension_numbers<[1], [0], [0], [1], [0, 0, 1, 1], [], []>} : vector<8x64xf32>, vector<64x256xf32>, vector<8x256xf32> -> vector<8x256xf32>
    %265 = vector.extract_strided_slice %264 {offsets = [0, 0], sizes = [8, 128], strides = [1, 1]} : vector<8x256xf32> to vector<8x128xf32>
    %266 = vector.extract_strided_slice %264 {offsets = [0, 128], sizes = [8, 128], strides = [1, 1]} : vector<8x256xf32> to vector<8x128xf32>
    %cst_162 = arith.constant 0.000000e+00 : f32
    %267 = vector.broadcast %cst_162 : f32 to vector<8x128xf32>
    %268 = arith.subf %267, %265 : vector<8x128xf32>
    %269 = math.exp %268 : vector<8x128xf32>
    %cst_163 = arith.constant 1.000000e+00 : f32
    %270 = vector.broadcast %cst_163 : f32 to vector<8x128xf32>
    %271 = arith.addf %270, %269 : vector<8x128xf32>
    %cst_164 = arith.constant 1.000000e+00 : f32
    %272 = vector.broadcast %cst_164 : f32 to vector<8x128xf32>
    %273 = arith.divf %272, %271 : vector<8x128xf32>
    %274 = arith.mulf %265, %273 : vector<8x128xf32>
    %275 = arith.mulf %274, %266 : vector<8x128xf32>
    %c2_165 = arith.constant 2 : index
    %c0_166 = arith.constant 0 : index
    %c0_167 = arith.constant 0 : index
    %276 = vector.load %arg10[%c2_165, %c0_166, %c0_167] : memref<6x128x64xf32, #tpu.memory_space<vmem>>, vector<1x128x64xf32>
    %277 = vector.shape_cast %276 : vector<1x128x64xf32> to vector<128x64xf32>
    %cst_168 = arith.constant dense<0.000000e+00> : vector<8x64xf32>
    %278 = tpu.matmul %275, %277, %cst_168 {dimension_numbers = #tpu.dot_dimension_numbers<[1], [0], [0], [1], [0, 0, 1, 1], [], []>} : vector<8x128xf32>, vector<128x64xf32>, vector<8x64xf32> -> vector<8x64xf32>
    %279 = arith.addf %247, %278 : vector<8x64xf32>
    %c3_169 = arith.constant 3 : index
    %c0_170 = arith.constant 0 : index
    %c0_171 = arith.constant 0 : index
    %280 = vector.load %arg5[%c3_169, %c0_170, %c0_171] : memref<6x1x64xf32, #tpu.memory_space<vmem>>, vector<1x1x64xf32>
    %281 = vector.shape_cast %280 : vector<1x1x64xf32> to vector<1x64xf32>
    %282 = arith.mulf %279, %279 : vector<8x64xf32>
    %cst_172 = arith.constant dense<0.000000e+00> : vector<8xf32>
    %283 = vector.multi_reduction <add>, %282, %cst_172 [1] : vector<8x64xf32> to vector<8xf32>
    %284 = vector.shape_cast %283 : vector<8xf32> to vector<8x1xf32>
    %cst_173 = arith.constant 6.400000e+01 : f32
    %285 = vector.broadcast %cst_173 : f32 to vector<8x1xf32>
    %286 = arith.divf %284, %285 : vector<8x1xf32>
    %cst_174 = arith.constant 9.99999997E-7 : f32
    %287 = vector.broadcast %cst_174 : f32 to vector<8x1xf32>
    %288 = arith.addf %286, %287 : vector<8x1xf32>
    %289 = math.rsqrt %288 : vector<8x1xf32>
    %290 = vector.broadcast %289 : vector<8x1xf32> to vector<8x64xf32>
    %291 = arith.mulf %279, %290 : vector<8x64xf32>
    %292 = vector.broadcast %281 : vector<1x64xf32> to vector<8x64xf32>
    %293 = arith.mulf %291, %292 : vector<8x64xf32>
    %294 = vector.shape_cast %293 : vector<8x64xf32> to vector<1x8x64xf32>
    %295 = vector.shape_cast %294 : vector<1x8x64xf32> to vector<1x8x64xf32>
    %296 = vector.broadcast %295 : vector<1x8x64xf32> to vector<4x8x64xf32>
    %c15 = arith.constant 15 : index
    %c0_175 = arith.constant 0 : index
    %c0_176 = arith.constant 0 : index
    %c0_177 = arith.constant 0 : index
    %297 = vector.load %arg7[%c15, %c0_175, %c0_176, %c0_177] : memref<30x4x64x16xf32, #tpu.memory_space<vmem>>, vector<1x4x64x16xf32>
    %298 = vector.shape_cast %297 : vector<1x4x64x16xf32> to vector<4x64x16xf32>
    %cst_178 = arith.constant dense<0.000000e+00> : vector<4x8x16xf32>
    %299 = tpu.matmul %296, %298, %cst_178 {dimension_numbers = #tpu.dot_dimension_numbers<[2], [1], [1], [2], [0, 0, 0, 1, 1, 2], [0], [0]>} : vector<4x8x64xf32>, vector<4x64x16xf32>, vector<4x8x16xf32> -> vector<4x8x16xf32>
    %300 = arith.mulf %299, %3 : vector<4x8x16xf32>
    %c16 = arith.constant 16 : index
    %c0_179 = arith.constant 0 : index
    %c0_180 = arith.constant 0 : index
    %c0_181 = arith.constant 0 : index
    %301 = vector.load %arg7[%c16, %c0_179, %c0_180, %c0_181] : memref<30x4x64x16xf32, #tpu.memory_space<vmem>>, vector<1x4x64x16xf32>
    %302 = vector.shape_cast %301 : vector<1x4x64x16xf32> to vector<4x64x16xf32>
    %cst_182 = arith.constant dense<0.000000e+00> : vector<4x8x16xf32>
    %303 = tpu.matmul %296, %302, %cst_182 {dimension_numbers = #tpu.dot_dimension_numbers<[2], [1], [1], [2], [0, 0, 0, 1, 1, 2], [0], [0]>} : vector<4x8x64xf32>, vector<4x64x16xf32>, vector<4x8x16xf32> -> vector<4x8x16xf32>
    %304 = arith.mulf %303, %7 : vector<4x8x16xf32>
    %305 = arith.addf %300, %304 : vector<4x8x16xf32>
    %c17 = arith.constant 17 : index
    %c0_183 = arith.constant 0 : index
    %c0_184 = arith.constant 0 : index
    %c0_185 = arith.constant 0 : index
    %306 = vector.load %arg7[%c17, %c0_183, %c0_184, %c0_185] : memref<30x4x64x16xf32, #tpu.memory_space<vmem>>, vector<1x4x64x16xf32>
    %307 = vector.shape_cast %306 : vector<1x4x64x16xf32> to vector<4x64x16xf32>
    %cst_186 = arith.constant dense<0.000000e+00> : vector<4x8x16xf32>
    %308 = tpu.matmul %296, %307, %cst_186 {dimension_numbers = #tpu.dot_dimension_numbers<[2], [1], [1], [2], [0, 0, 0, 1, 1, 2], [0], [0]>} : vector<4x8x64xf32>, vector<4x64x16xf32>, vector<4x8x16xf32> -> vector<4x8x16xf32>
    %309 = arith.mulf %308, %3 : vector<4x8x16xf32>
    %c18 = arith.constant 18 : index
    %c0_187 = arith.constant 0 : index
    %c0_188 = arith.constant 0 : index
    %c0_189 = arith.constant 0 : index
    %310 = vector.load %arg7[%c18, %c0_187, %c0_188, %c0_189] : memref<30x4x64x16xf32, #tpu.memory_space<vmem>>, vector<1x4x64x16xf32>
    %311 = vector.shape_cast %310 : vector<1x4x64x16xf32> to vector<4x64x16xf32>
    %cst_190 = arith.constant dense<0.000000e+00> : vector<4x8x16xf32>
    %312 = tpu.matmul %296, %311, %cst_190 {dimension_numbers = #tpu.dot_dimension_numbers<[2], [1], [1], [2], [0, 0, 0, 1, 1, 2], [0], [0]>} : vector<4x8x64xf32>, vector<4x64x16xf32>, vector<4x8x16xf32> -> vector<4x8x16xf32>
    %313 = arith.mulf %312, %7 : vector<4x8x16xf32>
    %314 = arith.addf %309, %313 : vector<4x8x16xf32>
    %c19 = arith.constant 19 : index
    %c0_191 = arith.constant 0 : index
    %c0_192 = arith.constant 0 : index
    %c0_193 = arith.constant 0 : index
    %315 = vector.load %arg7[%c19, %c0_191, %c0_192, %c0_193] : memref<30x4x64x16xf32, #tpu.memory_space<vmem>>, vector<1x4x64x16xf32>
    %316 = vector.shape_cast %315 : vector<1x4x64x16xf32> to vector<4x64x16xf32>
    %cst_194 = arith.constant dense<0.000000e+00> : vector<4x8x16xf32>
    %317 = tpu.matmul %296, %316, %cst_194 {dimension_numbers = #tpu.dot_dimension_numbers<[2], [1], [1], [2], [0, 0, 0, 1, 1, 2], [0], [0]>} : vector<4x8x64xf32>, vector<4x64x16xf32>, vector<4x8x16xf32> -> vector<4x8x16xf32>
    %cst_195 = arith.constant dense<0.000000e+00> : vector<4x8x8xf32>
    %318 = tpu.matmul %305, %314, %cst_195 {dimension_numbers = #tpu.dot_dimension_numbers<[2], [2], [1], [1], [0, 0, 0, 1, 1, 1], [0], [0]>} : vector<4x8x16xf32>, vector<4x8x16xf32>, vector<4x8x8xf32> -> vector<4x8x8xf32>
    %cst_196 = arith.constant 2.500000e-01 : f32
    %319 = vector.broadcast %cst_196 : f32 to vector<4x8x8xf32>
    %320 = arith.mulf %318, %319 : vector<4x8x8xf32>
    %321 = arith.addf %320, %11 : vector<4x8x8xf32>
    %cst_197 = arith.constant dense<0xFF800000> : vector<4x8xf32>
    %322 = vector.multi_reduction <maximumf>, %321, %cst_197 [2] : vector<4x8x8xf32> to vector<4x8xf32>
    %323 = vector.shape_cast %322 : vector<4x8xf32> to vector<4x8x1xf32>
    %324 = vector.broadcast %323 : vector<4x8x1xf32> to vector<4x8x8xf32>
    %325 = arith.subf %321, %324 : vector<4x8x8xf32>
    %326 = math.exp %325 : vector<4x8x8xf32>
    %cst_198 = arith.constant dense<0.000000e+00> : vector<4x8xf32>
    %327 = vector.multi_reduction <add>, %326, %cst_198 [2] : vector<4x8x8xf32> to vector<4x8xf32>
    %328 = vector.shape_cast %327 : vector<4x8xf32> to vector<4x8x1xf32>
    %329 = vector.broadcast %328 : vector<4x8x1xf32> to vector<4x8x8xf32>
    %330 = arith.divf %326, %329 : vector<4x8x8xf32>
    %cst_199 = arith.constant dense<0.000000e+00> : vector<4x8x16xf32>
    %331 = tpu.matmul %330, %317, %cst_199 {dimension_numbers = #tpu.dot_dimension_numbers<[2], [1], [1], [2], [0, 0, 0, 1, 1, 2], [0], [0]>} : vector<4x8x8xf32>, vector<4x8x16xf32>, vector<4x8x16xf32> -> vector<4x8x16xf32>
    %c3_200 = arith.constant 3 : index
    %c0_201 = arith.constant 0 : index
    %c0_202 = arith.constant 0 : index
    %c0_203 = arith.constant 0 : index
    %332 = vector.load %arg8[%c3_200, %c0_201, %c0_202, %c0_203] : memref<6x4x16x64xf32, #tpu.memory_space<vmem>>, vector<1x4x16x64xf32>
    %333 = vector.shape_cast %332 : vector<1x4x16x64xf32> to vector<4x16x64xf32>
    %cst_204 = arith.constant dense<0.000000e+00> : vector<4x8x64xf32>
    %334 = tpu.matmul %331, %333, %cst_204 {dimension_numbers = #tpu.dot_dimension_numbers<[2], [1], [1], [2], [0, 0, 0, 1, 1, 2], [0], [0]>} : vector<4x8x16xf32>, vector<4x16x64xf32>, vector<4x8x64xf32> -> vector<4x8x64xf32>
    %cst_205 = arith.constant dense<0.000000e+00> : vector<8x64xf32>
    %335 = vector.multi_reduction <add>, %334, %cst_205 [0] : vector<4x8x64xf32> to vector<8x64xf32>
    %336 = arith.addf %279, %335 : vector<8x64xf32>
    %c3_206 = arith.constant 3 : index
    %c0_207 = arith.constant 0 : index
    %c0_208 = arith.constant 0 : index
    %337 = vector.load %arg6[%c3_206, %c0_207, %c0_208] : memref<6x1x64xf32, #tpu.memory_space<vmem>>, vector<1x1x64xf32>
    %338 = vector.shape_cast %337 : vector<1x1x64xf32> to vector<1x64xf32>
    %339 = arith.mulf %336, %336 : vector<8x64xf32>
    %cst_209 = arith.constant dense<0.000000e+00> : vector<8xf32>
    %340 = vector.multi_reduction <add>, %339, %cst_209 [1] : vector<8x64xf32> to vector<8xf32>
    %341 = vector.shape_cast %340 : vector<8xf32> to vector<8x1xf32>
    %cst_210 = arith.constant 6.400000e+01 : f32
    %342 = vector.broadcast %cst_210 : f32 to vector<8x1xf32>
    %343 = arith.divf %341, %342 : vector<8x1xf32>
    %cst_211 = arith.constant 9.99999997E-7 : f32
    %344 = vector.broadcast %cst_211 : f32 to vector<8x1xf32>
    %345 = arith.addf %343, %344 : vector<8x1xf32>
    %346 = math.rsqrt %345 : vector<8x1xf32>
    %347 = vector.broadcast %346 : vector<8x1xf32> to vector<8x64xf32>
    %348 = arith.mulf %336, %347 : vector<8x64xf32>
    %349 = vector.broadcast %338 : vector<1x64xf32> to vector<8x64xf32>
    %350 = arith.mulf %348, %349 : vector<8x64xf32>
    %c3_212 = arith.constant 3 : index
    %c0_213 = arith.constant 0 : index
    %c0_214 = arith.constant 0 : index
    %351 = vector.load %arg9[%c3_212, %c0_213, %c0_214] : memref<6x64x256xf32, #tpu.memory_space<vmem>>, vector<1x64x256xf32>
    %352 = vector.shape_cast %351 : vector<1x64x256xf32> to vector<64x256xf32>
    %cst_215 = arith.constant dense<0.000000e+00> : vector<8x256xf32>
    %353 = tpu.matmul %350, %352, %cst_215 {dimension_numbers = #tpu.dot_dimension_numbers<[1], [0], [0], [1], [0, 0, 1, 1], [], []>} : vector<8x64xf32>, vector<64x256xf32>, vector<8x256xf32> -> vector<8x256xf32>
    %354 = vector.extract_strided_slice %353 {offsets = [0, 0], sizes = [8, 128], strides = [1, 1]} : vector<8x256xf32> to vector<8x128xf32>
    %355 = vector.extract_strided_slice %353 {offsets = [0, 128], sizes = [8, 128], strides = [1, 1]} : vector<8x256xf32> to vector<8x128xf32>
    %cst_216 = arith.constant 0.000000e+00 : f32
    %356 = vector.broadcast %cst_216 : f32 to vector<8x128xf32>
    %357 = arith.subf %356, %354 : vector<8x128xf32>
    %358 = math.exp %357 : vector<8x128xf32>
    %cst_217 = arith.constant 1.000000e+00 : f32
    %359 = vector.broadcast %cst_217 : f32 to vector<8x128xf32>
    %360 = arith.addf %359, %358 : vector<8x128xf32>
    %cst_218 = arith.constant 1.000000e+00 : f32
    %361 = vector.broadcast %cst_218 : f32 to vector<8x128xf32>
    %362 = arith.divf %361, %360 : vector<8x128xf32>
    %363 = arith.mulf %354, %362 : vector<8x128xf32>
    %364 = arith.mulf %363, %355 : vector<8x128xf32>
    %c3_219 = arith.constant 3 : index
    %c0_220 = arith.constant 0 : index
    %c0_221 = arith.constant 0 : index
    %365 = vector.load %arg10[%c3_219, %c0_220, %c0_221] : memref<6x128x64xf32, #tpu.memory_space<vmem>>, vector<1x128x64xf32>
    %366 = vector.shape_cast %365 : vector<1x128x64xf32> to vector<128x64xf32>
    %cst_222 = arith.constant dense<0.000000e+00> : vector<8x64xf32>
    %367 = tpu.matmul %364, %366, %cst_222 {dimension_numbers = #tpu.dot_dimension_numbers<[1], [0], [0], [1], [0, 0, 1, 1], [], []>} : vector<8x128xf32>, vector<128x64xf32>, vector<8x64xf32> -> vector<8x64xf32>
    %368 = arith.addf %336, %367 : vector<8x64xf32>
    %c4_223 = arith.constant 4 : index
    %c0_224 = arith.constant 0 : index
    %c0_225 = arith.constant 0 : index
    %369 = vector.load %arg5[%c4_223, %c0_224, %c0_225] : memref<6x1x64xf32, #tpu.memory_space<vmem>>, vector<1x1x64xf32>
    %370 = vector.shape_cast %369 : vector<1x1x64xf32> to vector<1x64xf32>
    %371 = arith.mulf %368, %368 : vector<8x64xf32>
    %cst_226 = arith.constant dense<0.000000e+00> : vector<8xf32>
    %372 = vector.multi_reduction <add>, %371, %cst_226 [1] : vector<8x64xf32> to vector<8xf32>
    %373 = vector.shape_cast %372 : vector<8xf32> to vector<8x1xf32>
    %cst_227 = arith.constant 6.400000e+01 : f32
    %374 = vector.broadcast %cst_227 : f32 to vector<8x1xf32>
    %375 = arith.divf %373, %374 : vector<8x1xf32>
    %cst_228 = arith.constant 9.99999997E-7 : f32
    %376 = vector.broadcast %cst_228 : f32 to vector<8x1xf32>
    %377 = arith.addf %375, %376 : vector<8x1xf32>
    %378 = math.rsqrt %377 : vector<8x1xf32>
    %379 = vector.broadcast %378 : vector<8x1xf32> to vector<8x64xf32>
    %380 = arith.mulf %368, %379 : vector<8x64xf32>
    %381 = vector.broadcast %370 : vector<1x64xf32> to vector<8x64xf32>
    %382 = arith.mulf %380, %381 : vector<8x64xf32>
    %383 = vector.shape_cast %382 : vector<8x64xf32> to vector<1x8x64xf32>
    %384 = vector.shape_cast %383 : vector<1x8x64xf32> to vector<1x8x64xf32>
    %385 = vector.broadcast %384 : vector<1x8x64xf32> to vector<4x8x64xf32>
    %c20 = arith.constant 20 : index
    %c0_229 = arith.constant 0 : index
    %c0_230 = arith.constant 0 : index
    %c0_231 = arith.constant 0 : index
    %386 = vector.load %arg7[%c20, %c0_229, %c0_230, %c0_231] : memref<30x4x64x16xf32, #tpu.memory_space<vmem>>, vector<1x4x64x16xf32>
    %387 = vector.shape_cast %386 : vector<1x4x64x16xf32> to vector<4x64x16xf32>
    %cst_232 = arith.constant dense<0.000000e+00> : vector<4x8x16xf32>
    %388 = tpu.matmul %385, %387, %cst_232 {dimension_numbers = #tpu.dot_dimension_numbers<[2], [1], [1], [2], [0, 0, 0, 1, 1, 2], [0], [0]>} : vector<4x8x64xf32>, vector<4x64x16xf32>, vector<4x8x16xf32> -> vector<4x8x16xf32>
    %389 = arith.mulf %388, %3 : vector<4x8x16xf32>
    %c21 = arith.constant 21 : index
    %c0_233 = arith.constant 0 : index
    %c0_234 = arith.constant 0 : index
    %c0_235 = arith.constant 0 : index
    %390 = vector.load %arg7[%c21, %c0_233, %c0_234, %c0_235] : memref<30x4x64x16xf32, #tpu.memory_space<vmem>>, vector<1x4x64x16xf32>
    %391 = vector.shape_cast %390 : vector<1x4x64x16xf32> to vector<4x64x16xf32>
    %cst_236 = arith.constant dense<0.000000e+00> : vector<4x8x16xf32>
    %392 = tpu.matmul %385, %391, %cst_236 {dimension_numbers = #tpu.dot_dimension_numbers<[2], [1], [1], [2], [0, 0, 0, 1, 1, 2], [0], [0]>} : vector<4x8x64xf32>, vector<4x64x16xf32>, vector<4x8x16xf32> -> vector<4x8x16xf32>
    %393 = arith.mulf %392, %7 : vector<4x8x16xf32>
    %394 = arith.addf %389, %393 : vector<4x8x16xf32>
    %c22 = arith.constant 22 : index
    %c0_237 = arith.constant 0 : index
    %c0_238 = arith.constant 0 : index
    %c0_239 = arith.constant 0 : index
    %395 = vector.load %arg7[%c22, %c0_237, %c0_238, %c0_239] : memref<30x4x64x16xf32, #tpu.memory_space<vmem>>, vector<1x4x64x16xf32>
    %396 = vector.shape_cast %395 : vector<1x4x64x16xf32> to vector<4x64x16xf32>
    %cst_240 = arith.constant dense<0.000000e+00> : vector<4x8x16xf32>
    %397 = tpu.matmul %385, %396, %cst_240 {dimension_numbers = #tpu.dot_dimension_numbers<[2], [1], [1], [2], [0, 0, 0, 1, 1, 2], [0], [0]>} : vector<4x8x64xf32>, vector<4x64x16xf32>, vector<4x8x16xf32> -> vector<4x8x16xf32>
    %398 = arith.mulf %397, %3 : vector<4x8x16xf32>
    %c23 = arith.constant 23 : index
    %c0_241 = arith.constant 0 : index
    %c0_242 = arith.constant 0 : index
    %c0_243 = arith.constant 0 : index
    %399 = vector.load %arg7[%c23, %c0_241, %c0_242, %c0_243] : memref<30x4x64x16xf32, #tpu.memory_space<vmem>>, vector<1x4x64x16xf32>
    %400 = vector.shape_cast %399 : vector<1x4x64x16xf32> to vector<4x64x16xf32>
    %cst_244 = arith.constant dense<0.000000e+00> : vector<4x8x16xf32>
    %401 = tpu.matmul %385, %400, %cst_244 {dimension_numbers = #tpu.dot_dimension_numbers<[2], [1], [1], [2], [0, 0, 0, 1, 1, 2], [0], [0]>} : vector<4x8x64xf32>, vector<4x64x16xf32>, vector<4x8x16xf32> -> vector<4x8x16xf32>
    %402 = arith.mulf %401, %7 : vector<4x8x16xf32>
    %403 = arith.addf %398, %402 : vector<4x8x16xf32>
    %c24 = arith.constant 24 : index
    %c0_245 = arith.constant 0 : index
    %c0_246 = arith.constant 0 : index
    %c0_247 = arith.constant 0 : index
    %404 = vector.load %arg7[%c24, %c0_245, %c0_246, %c0_247] : memref<30x4x64x16xf32, #tpu.memory_space<vmem>>, vector<1x4x64x16xf32>
    %405 = vector.shape_cast %404 : vector<1x4x64x16xf32> to vector<4x64x16xf32>
    %cst_248 = arith.constant dense<0.000000e+00> : vector<4x8x16xf32>
    %406 = tpu.matmul %385, %405, %cst_248 {dimension_numbers = #tpu.dot_dimension_numbers<[2], [1], [1], [2], [0, 0, 0, 1, 1, 2], [0], [0]>} : vector<4x8x64xf32>, vector<4x64x16xf32>, vector<4x8x16xf32> -> vector<4x8x16xf32>
    %cst_249 = arith.constant dense<0.000000e+00> : vector<4x8x8xf32>
    %407 = tpu.matmul %394, %403, %cst_249 {dimension_numbers = #tpu.dot_dimension_numbers<[2], [2], [1], [1], [0, 0, 0, 1, 1, 1], [0], [0]>} : vector<4x8x16xf32>, vector<4x8x16xf32>, vector<4x8x8xf32> -> vector<4x8x8xf32>
    %cst_250 = arith.constant 2.500000e-01 : f32
    %408 = vector.broadcast %cst_250 : f32 to vector<4x8x8xf32>
    %409 = arith.mulf %407, %408 : vector<4x8x8xf32>
    %410 = arith.addf %409, %11 : vector<4x8x8xf32>
    %cst_251 = arith.constant dense<0xFF800000> : vector<4x8xf32>
    %411 = vector.multi_reduction <maximumf>, %410, %cst_251 [2] : vector<4x8x8xf32> to vector<4x8xf32>
    %412 = vector.shape_cast %411 : vector<4x8xf32> to vector<4x8x1xf32>
    %413 = vector.broadcast %412 : vector<4x8x1xf32> to vector<4x8x8xf32>
    %414 = arith.subf %410, %413 : vector<4x8x8xf32>
    %415 = math.exp %414 : vector<4x8x8xf32>
    %cst_252 = arith.constant dense<0.000000e+00> : vector<4x8xf32>
    %416 = vector.multi_reduction <add>, %415, %cst_252 [2] : vector<4x8x8xf32> to vector<4x8xf32>
    %417 = vector.shape_cast %416 : vector<4x8xf32> to vector<4x8x1xf32>
    %418 = vector.broadcast %417 : vector<4x8x1xf32> to vector<4x8x8xf32>
    %419 = arith.divf %415, %418 : vector<4x8x8xf32>
    %cst_253 = arith.constant dense<0.000000e+00> : vector<4x8x16xf32>
    %420 = tpu.matmul %419, %406, %cst_253 {dimension_numbers = #tpu.dot_dimension_numbers<[2], [1], [1], [2], [0, 0, 0, 1, 1, 2], [0], [0]>} : vector<4x8x8xf32>, vector<4x8x16xf32>, vector<4x8x16xf32> -> vector<4x8x16xf32>
    %c4_254 = arith.constant 4 : index
    %c0_255 = arith.constant 0 : index
    %c0_256 = arith.constant 0 : index
    %c0_257 = arith.constant 0 : index
    %421 = vector.load %arg8[%c4_254, %c0_255, %c0_256, %c0_257] : memref<6x4x16x64xf32, #tpu.memory_space<vmem>>, vector<1x4x16x64xf32>
    %422 = vector.shape_cast %421 : vector<1x4x16x64xf32> to vector<4x16x64xf32>
    %cst_258 = arith.constant dense<0.000000e+00> : vector<4x8x64xf32>
    %423 = tpu.matmul %420, %422, %cst_258 {dimension_numbers = #tpu.dot_dimension_numbers<[2], [1], [1], [2], [0, 0, 0, 1, 1, 2], [0], [0]>} : vector<4x8x16xf32>, vector<4x16x64xf32>, vector<4x8x64xf32> -> vector<4x8x64xf32>
    %cst_259 = arith.constant dense<0.000000e+00> : vector<8x64xf32>
    %424 = vector.multi_reduction <add>, %423, %cst_259 [0] : vector<4x8x64xf32> to vector<8x64xf32>
    %425 = arith.addf %368, %424 : vector<8x64xf32>
    %c4_260 = arith.constant 4 : index
    %c0_261 = arith.constant 0 : index
    %c0_262 = arith.constant 0 : index
    %426 = vector.load %arg6[%c4_260, %c0_261, %c0_262] : memref<6x1x64xf32, #tpu.memory_space<vmem>>, vector<1x1x64xf32>
    %427 = vector.shape_cast %426 : vector<1x1x64xf32> to vector<1x64xf32>
    %428 = arith.mulf %425, %425 : vector<8x64xf32>
    %cst_263 = arith.constant dense<0.000000e+00> : vector<8xf32>
    %429 = vector.multi_reduction <add>, %428, %cst_263 [1] : vector<8x64xf32> to vector<8xf32>
    %430 = vector.shape_cast %429 : vector<8xf32> to vector<8x1xf32>
    %cst_264 = arith.constant 6.400000e+01 : f32
    %431 = vector.broadcast %cst_264 : f32 to vector<8x1xf32>
    %432 = arith.divf %430, %431 : vector<8x1xf32>
    %cst_265 = arith.constant 9.99999997E-7 : f32
    %433 = vector.broadcast %cst_265 : f32 to vector<8x1xf32>
    %434 = arith.addf %432, %433 : vector<8x1xf32>
    %435 = math.rsqrt %434 : vector<8x1xf32>
    %436 = vector.broadcast %435 : vector<8x1xf32> to vector<8x64xf32>
    %437 = arith.mulf %425, %436 : vector<8x64xf32>
    %438 = vector.broadcast %427 : vector<1x64xf32> to vector<8x64xf32>
    %439 = arith.mulf %437, %438 : vector<8x64xf32>
    %c4_266 = arith.constant 4 : index
    %c0_267 = arith.constant 0 : index
    %c0_268 = arith.constant 0 : index
    %440 = vector.load %arg9[%c4_266, %c0_267, %c0_268] : memref<6x64x256xf32, #tpu.memory_space<vmem>>, vector<1x64x256xf32>
    %441 = vector.shape_cast %440 : vector<1x64x256xf32> to vector<64x256xf32>
    %cst_269 = arith.constant dense<0.000000e+00> : vector<8x256xf32>
    %442 = tpu.matmul %439, %441, %cst_269 {dimension_numbers = #tpu.dot_dimension_numbers<[1], [0], [0], [1], [0, 0, 1, 1], [], []>} : vector<8x64xf32>, vector<64x256xf32>, vector<8x256xf32> -> vector<8x256xf32>
    %443 = vector.extract_strided_slice %442 {offsets = [0, 0], sizes = [8, 128], strides = [1, 1]} : vector<8x256xf32> to vector<8x128xf32>
    %444 = vector.extract_strided_slice %442 {offsets = [0, 128], sizes = [8, 128], strides = [1, 1]} : vector<8x256xf32> to vector<8x128xf32>
    %cst_270 = arith.constant 0.000000e+00 : f32
    %445 = vector.broadcast %cst_270 : f32 to vector<8x128xf32>
    %446 = arith.subf %445, %443 : vector<8x128xf32>
    %447 = math.exp %446 : vector<8x128xf32>
    %cst_271 = arith.constant 1.000000e+00 : f32
    %448 = vector.broadcast %cst_271 : f32 to vector<8x128xf32>
    %449 = arith.addf %448, %447 : vector<8x128xf32>
    %cst_272 = arith.constant 1.000000e+00 : f32
    %450 = vector.broadcast %cst_272 : f32 to vector<8x128xf32>
    %451 = arith.divf %450, %449 : vector<8x128xf32>
    %452 = arith.mulf %443, %451 : vector<8x128xf32>
    %453 = arith.mulf %452, %444 : vector<8x128xf32>
    %c4_273 = arith.constant 4 : index
    %c0_274 = arith.constant 0 : index
    %c0_275 = arith.constant 0 : index
    %454 = vector.load %arg10[%c4_273, %c0_274, %c0_275] : memref<6x128x64xf32, #tpu.memory_space<vmem>>, vector<1x128x64xf32>
    %455 = vector.shape_cast %454 : vector<1x128x64xf32> to vector<128x64xf32>
    %cst_276 = arith.constant dense<0.000000e+00> : vector<8x64xf32>
    %456 = tpu.matmul %453, %455, %cst_276 {dimension_numbers = #tpu.dot_dimension_numbers<[1], [0], [0], [1], [0, 0, 1, 1], [], []>} : vector<8x128xf32>, vector<128x64xf32>, vector<8x64xf32> -> vector<8x64xf32>
    %457 = arith.addf %425, %456 : vector<8x64xf32>
    %c5_277 = arith.constant 5 : index
    %c0_278 = arith.constant 0 : index
    %c0_279 = arith.constant 0 : index
    %458 = vector.load %arg5[%c5_277, %c0_278, %c0_279] : memref<6x1x64xf32, #tpu.memory_space<vmem>>, vector<1x1x64xf32>
    %459 = vector.shape_cast %458 : vector<1x1x64xf32> to vector<1x64xf32>
    %460 = arith.mulf %457, %457 : vector<8x64xf32>
    %cst_280 = arith.constant dense<0.000000e+00> : vector<8xf32>
    %461 = vector.multi_reduction <add>, %460, %cst_280 [1] : vector<8x64xf32> to vector<8xf32>
    %462 = vector.shape_cast %461 : vector<8xf32> to vector<8x1xf32>
    %cst_281 = arith.constant 6.400000e+01 : f32
    %463 = vector.broadcast %cst_281 : f32 to vector<8x1xf32>
    %464 = arith.divf %462, %463 : vector<8x1xf32>
    %cst_282 = arith.constant 9.99999997E-7 : f32
    %465 = vector.broadcast %cst_282 : f32 to vector<8x1xf32>
    %466 = arith.addf %464, %465 : vector<8x1xf32>
    %467 = math.rsqrt %466 : vector<8x1xf32>
    %468 = vector.broadcast %467 : vector<8x1xf32> to vector<8x64xf32>
    %469 = arith.mulf %457, %468 : vector<8x64xf32>
    %470 = vector.broadcast %459 : vector<1x64xf32> to vector<8x64xf32>
    %471 = arith.mulf %469, %470 : vector<8x64xf32>
    %472 = vector.shape_cast %471 : vector<8x64xf32> to vector<1x8x64xf32>
    %473 = vector.shape_cast %472 : vector<1x8x64xf32> to vector<1x8x64xf32>
    %474 = vector.broadcast %473 : vector<1x8x64xf32> to vector<4x8x64xf32>
    %c25 = arith.constant 25 : index
    %c0_283 = arith.constant 0 : index
    %c0_284 = arith.constant 0 : index
    %c0_285 = arith.constant 0 : index
    %475 = vector.load %arg7[%c25, %c0_283, %c0_284, %c0_285] : memref<30x4x64x16xf32, #tpu.memory_space<vmem>>, vector<1x4x64x16xf32>
    %476 = vector.shape_cast %475 : vector<1x4x64x16xf32> to vector<4x64x16xf32>
    %cst_286 = arith.constant dense<0.000000e+00> : vector<4x8x16xf32>
    %477 = tpu.matmul %474, %476, %cst_286 {dimension_numbers = #tpu.dot_dimension_numbers<[2], [1], [1], [2], [0, 0, 0, 1, 1, 2], [0], [0]>} : vector<4x8x64xf32>, vector<4x64x16xf32>, vector<4x8x16xf32> -> vector<4x8x16xf32>
    %478 = arith.mulf %477, %3 : vector<4x8x16xf32>
    %c26 = arith.constant 26 : index
    %c0_287 = arith.constant 0 : index
    %c0_288 = arith.constant 0 : index
    %c0_289 = arith.constant 0 : index
    %479 = vector.load %arg7[%c26, %c0_287, %c0_288, %c0_289] : memref<30x4x64x16xf32, #tpu.memory_space<vmem>>, vector<1x4x64x16xf32>
    %480 = vector.shape_cast %479 : vector<1x4x64x16xf32> to vector<4x64x16xf32>
    %cst_290 = arith.constant dense<0.000000e+00> : vector<4x8x16xf32>
    %481 = tpu.matmul %474, %480, %cst_290 {dimension_numbers = #tpu.dot_dimension_numbers<[2], [1], [1], [2], [0, 0, 0, 1, 1, 2], [0], [0]>} : vector<4x8x64xf32>, vector<4x64x16xf32>, vector<4x8x16xf32> -> vector<4x8x16xf32>
    %482 = arith.mulf %481, %7 : vector<4x8x16xf32>
    %483 = arith.addf %478, %482 : vector<4x8x16xf32>
    %c27 = arith.constant 27 : index
    %c0_291 = arith.constant 0 : index
    %c0_292 = arith.constant 0 : index
    %c0_293 = arith.constant 0 : index
    %484 = vector.load %arg7[%c27, %c0_291, %c0_292, %c0_293] : memref<30x4x64x16xf32, #tpu.memory_space<vmem>>, vector<1x4x64x16xf32>
    %485 = vector.shape_cast %484 : vector<1x4x64x16xf32> to vector<4x64x16xf32>
    %cst_294 = arith.constant dense<0.000000e+00> : vector<4x8x16xf32>
    %486 = tpu.matmul %474, %485, %cst_294 {dimension_numbers = #tpu.dot_dimension_numbers<[2], [1], [1], [2], [0, 0, 0, 1, 1, 2], [0], [0]>} : vector<4x8x64xf32>, vector<4x64x16xf32>, vector<4x8x16xf32> -> vector<4x8x16xf32>
    %487 = arith.mulf %486, %3 : vector<4x8x16xf32>
    %c28 = arith.constant 28 : index
    %c0_295 = arith.constant 0 : index
    %c0_296 = arith.constant 0 : index
    %c0_297 = arith.constant 0 : index
    %488 = vector.load %arg7[%c28, %c0_295, %c0_296, %c0_297] : memref<30x4x64x16xf32, #tpu.memory_space<vmem>>, vector<1x4x64x16xf32>
    %489 = vector.shape_cast %488 : vector<1x4x64x16xf32> to vector<4x64x16xf32>
    %cst_298 = arith.constant dense<0.000000e+00> : vector<4x8x16xf32>
    %490 = tpu.matmul %474, %489, %cst_298 {dimension_numbers = #tpu.dot_dimension_numbers<[2], [1], [1], [2], [0, 0, 0, 1, 1, 2], [0], [0]>} : vector<4x8x64xf32>, vector<4x64x16xf32>, vector<4x8x16xf32> -> vector<4x8x16xf32>
    %491 = arith.mulf %490, %7 : vector<4x8x16xf32>
    %492 = arith.addf %487, %491 : vector<4x8x16xf32>
    %c29 = arith.constant 29 : index
    %c0_299 = arith.constant 0 : index
    %c0_300 = arith.constant 0 : index
    %c0_301 = arith.constant 0 : index
    %493 = vector.load %arg7[%c29, %c0_299, %c0_300, %c0_301] : memref<30x4x64x16xf32, #tpu.memory_space<vmem>>, vector<1x4x64x16xf32>
    %494 = vector.shape_cast %493 : vector<1x4x64x16xf32> to vector<4x64x16xf32>
    %cst_302 = arith.constant dense<0.000000e+00> : vector<4x8x16xf32>
    %495 = tpu.matmul %474, %494, %cst_302 {dimension_numbers = #tpu.dot_dimension_numbers<[2], [1], [1], [2], [0, 0, 0, 1, 1, 2], [0], [0]>} : vector<4x8x64xf32>, vector<4x64x16xf32>, vector<4x8x16xf32> -> vector<4x8x16xf32>
    %cst_303 = arith.constant dense<0.000000e+00> : vector<4x8x8xf32>
    %496 = tpu.matmul %483, %492, %cst_303 {dimension_numbers = #tpu.dot_dimension_numbers<[2], [2], [1], [1], [0, 0, 0, 1, 1, 1], [0], [0]>} : vector<4x8x16xf32>, vector<4x8x16xf32>, vector<4x8x8xf32> -> vector<4x8x8xf32>
    %cst_304 = arith.constant 2.500000e-01 : f32
    %497 = vector.broadcast %cst_304 : f32 to vector<4x8x8xf32>
    %498 = arith.mulf %496, %497 : vector<4x8x8xf32>
    %499 = arith.addf %498, %11 : vector<4x8x8xf32>
    %cst_305 = arith.constant dense<0xFF800000> : vector<4x8xf32>
    %500 = vector.multi_reduction <maximumf>, %499, %cst_305 [2] : vector<4x8x8xf32> to vector<4x8xf32>
    %501 = vector.shape_cast %500 : vector<4x8xf32> to vector<4x8x1xf32>
    %502 = vector.broadcast %501 : vector<4x8x1xf32> to vector<4x8x8xf32>
    %503 = arith.subf %499, %502 : vector<4x8x8xf32>
    %504 = math.exp %503 : vector<4x8x8xf32>
    %cst_306 = arith.constant dense<0.000000e+00> : vector<4x8xf32>
    %505 = vector.multi_reduction <add>, %504, %cst_306 [2] : vector<4x8x8xf32> to vector<4x8xf32>
    %506 = vector.shape_cast %505 : vector<4x8xf32> to vector<4x8x1xf32>
    %507 = vector.broadcast %506 : vector<4x8x1xf32> to vector<4x8x8xf32>
    %508 = arith.divf %504, %507 : vector<4x8x8xf32>
    %cst_307 = arith.constant dense<0.000000e+00> : vector<4x8x16xf32>
    %509 = tpu.matmul %508, %495, %cst_307 {dimension_numbers = #tpu.dot_dimension_numbers<[2], [1], [1], [2], [0, 0, 0, 1, 1, 2], [0], [0]>} : vector<4x8x8xf32>, vector<4x8x16xf32>, vector<4x8x16xf32> -> vector<4x8x16xf32>
    %c5_308 = arith.constant 5 : index
    %c0_309 = arith.constant 0 : index
    %c0_310 = arith.constant 0 : index
    %c0_311 = arith.constant 0 : index
    %510 = vector.load %arg8[%c5_308, %c0_309, %c0_310, %c0_311] : memref<6x4x16x64xf32, #tpu.memory_space<vmem>>, vector<1x4x16x64xf32>
    %511 = vector.shape_cast %510 : vector<1x4x16x64xf32> to vector<4x16x64xf32>
    %cst_312 = arith.constant dense<0.000000e+00> : vector<4x8x64xf32>
    %512 = tpu.matmul %509, %511, %cst_312 {dimension_numbers = #tpu.dot_dimension_numbers<[2], [1], [1], [2], [0, 0, 0, 1, 1, 2], [0], [0]>} : vector<4x8x16xf32>, vector<4x16x64xf32>, vector<4x8x64xf32> -> vector<4x8x64xf32>
    %cst_313 = arith.constant dense<0.000000e+00> : vector<8x64xf32>
    %513 = vector.multi_reduction <add>, %512, %cst_313 [0] : vector<4x8x64xf32> to vector<8x64xf32>
    %514 = arith.addf %457, %513 : vector<8x64xf32>
    %c5_314 = arith.constant 5 : index
    %c0_315 = arith.constant 0 : index
    %c0_316 = arith.constant 0 : index
    %515 = vector.load %arg6[%c5_314, %c0_315, %c0_316] : memref<6x1x64xf32, #tpu.memory_space<vmem>>, vector<1x1x64xf32>
    %516 = vector.shape_cast %515 : vector<1x1x64xf32> to vector<1x64xf32>
    %517 = arith.mulf %514, %514 : vector<8x64xf32>
    %cst_317 = arith.constant dense<0.000000e+00> : vector<8xf32>
    %518 = vector.multi_reduction <add>, %517, %cst_317 [1] : vector<8x64xf32> to vector<8xf32>
    %519 = vector.shape_cast %518 : vector<8xf32> to vector<8x1xf32>
    %cst_318 = arith.constant 6.400000e+01 : f32
    %520 = vector.broadcast %cst_318 : f32 to vector<8x1xf32>
    %521 = arith.divf %519, %520 : vector<8x1xf32>
    %cst_319 = arith.constant 9.99999997E-7 : f32
    %522 = vector.broadcast %cst_319 : f32 to vector<8x1xf32>
    %523 = arith.addf %521, %522 : vector<8x1xf32>
    %524 = math.rsqrt %523 : vector<8x1xf32>
    %525 = vector.broadcast %524 : vector<8x1xf32> to vector<8x64xf32>
    %526 = arith.mulf %514, %525 : vector<8x64xf32>
    %527 = vector.broadcast %516 : vector<1x64xf32> to vector<8x64xf32>
    %528 = arith.mulf %526, %527 : vector<8x64xf32>
    %c5_320 = arith.constant 5 : index
    %c0_321 = arith.constant 0 : index
    %c0_322 = arith.constant 0 : index
    %529 = vector.load %arg9[%c5_320, %c0_321, %c0_322] : memref<6x64x256xf32, #tpu.memory_space<vmem>>, vector<1x64x256xf32>
    %530 = vector.shape_cast %529 : vector<1x64x256xf32> to vector<64x256xf32>
    %cst_323 = arith.constant dense<0.000000e+00> : vector<8x256xf32>
    %531 = tpu.matmul %528, %530, %cst_323 {dimension_numbers = #tpu.dot_dimension_numbers<[1], [0], [0], [1], [0, 0, 1, 1], [], []>} : vector<8x64xf32>, vector<64x256xf32>, vector<8x256xf32> -> vector<8x256xf32>
    %532 = vector.extract_strided_slice %531 {offsets = [0, 0], sizes = [8, 128], strides = [1, 1]} : vector<8x256xf32> to vector<8x128xf32>
    %533 = vector.extract_strided_slice %531 {offsets = [0, 128], sizes = [8, 128], strides = [1, 1]} : vector<8x256xf32> to vector<8x128xf32>
    %cst_324 = arith.constant 0.000000e+00 : f32
    %534 = vector.broadcast %cst_324 : f32 to vector<8x128xf32>
    %535 = arith.subf %534, %532 : vector<8x128xf32>
    %536 = math.exp %535 : vector<8x128xf32>
    %cst_325 = arith.constant 1.000000e+00 : f32
    %537 = vector.broadcast %cst_325 : f32 to vector<8x128xf32>
    %538 = arith.addf %537, %536 : vector<8x128xf32>
    %cst_326 = arith.constant 1.000000e+00 : f32
    %539 = vector.broadcast %cst_326 : f32 to vector<8x128xf32>
    %540 = arith.divf %539, %538 : vector<8x128xf32>
    %541 = arith.mulf %532, %540 : vector<8x128xf32>
    %542 = arith.mulf %541, %533 : vector<8x128xf32>
    %c5_327 = arith.constant 5 : index
    %c0_328 = arith.constant 0 : index
    %c0_329 = arith.constant 0 : index
    %543 = vector.load %arg10[%c5_327, %c0_328, %c0_329] : memref<6x128x64xf32, #tpu.memory_space<vmem>>, vector<1x128x64xf32>
    %544 = vector.shape_cast %543 : vector<1x128x64xf32> to vector<128x64xf32>
    %cst_330 = arith.constant dense<0.000000e+00> : vector<8x64xf32>
    %545 = tpu.matmul %542, %544, %cst_330 {dimension_numbers = #tpu.dot_dimension_numbers<[1], [0], [0], [1], [0, 0, 1, 1], [], []>} : vector<8x128xf32>, vector<128x64xf32>, vector<8x64xf32> -> vector<8x64xf32>
    %546 = arith.addf %514, %545 : vector<8x64xf32>
    %c0_331 = arith.constant 0 : index
    %c0_332 = arith.constant 0 : index
    %547 = vector.load %arg11[%c0_331, %c0_332] : memref<1x64xf32, #tpu.memory_space<vmem>>, vector<1x64xf32>
    %548 = arith.mulf %546, %546 : vector<8x64xf32>
    %cst_333 = arith.constant dense<0.000000e+00> : vector<8xf32>
    %549 = vector.multi_reduction <add>, %548, %cst_333 [1] : vector<8x64xf32> to vector<8xf32>
    %550 = vector.shape_cast %549 : vector<8xf32> to vector<8x1xf32>
    %cst_334 = arith.constant 6.400000e+01 : f32
    %551 = vector.broadcast %cst_334 : f32 to vector<8x1xf32>
    %552 = arith.divf %550, %551 : vector<8x1xf32>
    %cst_335 = arith.constant 9.99999997E-7 : f32
    %553 = vector.broadcast %cst_335 : f32 to vector<8x1xf32>
    %554 = arith.addf %552, %553 : vector<8x1xf32>
    %555 = math.rsqrt %554 : vector<8x1xf32>
    %556 = vector.broadcast %555 : vector<8x1xf32> to vector<8x64xf32>
    %557 = arith.mulf %546, %556 : vector<8x64xf32>
    %558 = vector.broadcast %547 : vector<1x64xf32> to vector<8x64xf32>
    %559 = arith.mulf %557, %558 : vector<8x64xf32>
    %c0_336 = arith.constant 0 : index
    %c0_337 = arith.constant 0 : index
    %560 = vector.load %arg12[%c0_336, %c0_337] : memref<8x64xf32, #tpu.memory_space<vmem>>, vector<8x64xf32>
    tpu.vector_store %arg12[%c0_336, %c0_337], %559 {strides = array<i32>} : memref<8x64xf32, #tpu.memory_space<vmem>>, vector<8x64xf32>,
    return
  }
  func.func @transform_0(%arg0: i32) -> (i32, i32) {
    %c0_i32 = arith.constant 0 : i32
    %c0_i32_0 = arith.constant 0 : i32
    return %arg0, %c0_i32 : i32, i32
  }
  func.func @transform_1(%arg0: i32) -> (i32, i32) {
    %c0_i32 = arith.constant 0 : i32
    %c0_i32_0 = arith.constant 0 : i32
    %c0_i32_1 = arith.constant 0 : i32
    return %c0_i32, %c0_i32_0 : i32, i32
  }
  func.func @transform_2(%arg0: i32) -> (i32, i32) {
    %c0_i32 = arith.constant 0 : i32
    %c0_i32_0 = arith.constant 0 : i32
    %c0_i32_1 = arith.constant 0 : i32
    return %c0_i32, %c0_i32_0 : i32, i32
  }
  func.func @transform_3(%arg0: i32) -> (i32, i32) {
    %c0_i32 = arith.constant 0 : i32
    %c0_i32_0 = arith.constant 0 : i32
    %c0_i32_1 = arith.constant 0 : i32
    return %c0_i32, %c0_i32_0 : i32, i32
  }
  func.func @transform_4(%arg0: i32) -> (i32, i32, i32) {
    %c0_i32 = arith.constant 0 : i32
    %c0_i32_0 = arith.constant 0 : i32
    %c0_i32_1 = arith.constant 0 : i32
    %c0_i32_2 = arith.constant 0 : i32
    return %c0_i32, %c0_i32_0, %c0_i32_1 : i32, i32, i32
  }
  func.func @transform_5(%arg0: i32) -> (i32, i32, i32) {
    %c0_i32 = arith.constant 0 : i32
    %c0_i32_0 = arith.constant 0 : i32
    %c0_i32_1 = arith.constant 0 : i32
    %c0_i32_2 = arith.constant 0 : i32
    return %c0_i32, %c0_i32_0, %c0_i32_1 : i32, i32, i32
  }
  func.func @transform_6(%arg0: i32) -> (i32, i32, i32, i32) {
    %c0_i32 = arith.constant 0 : i32
    %c0_i32_0 = arith.constant 0 : i32
    %c0_i32_1 = arith.constant 0 : i32
    %c0_i32_2 = arith.constant 0 : i32
    %c0_i32_3 = arith.constant 0 : i32
    return %c0_i32, %c0_i32_0, %c0_i32_1, %c0_i32_2 : i32, i32, i32, i32
  }
  func.func @transform_7(%arg0: i32) -> (i32, i32, i32, i32) {
    %c0_i32 = arith.constant 0 : i32
    %c0_i32_0 = arith.constant 0 : i32
    %c0_i32_1 = arith.constant 0 : i32
    %c0_i32_2 = arith.constant 0 : i32
    %c0_i32_3 = arith.constant 0 : i32
    return %c0_i32, %c0_i32_0, %c0_i32_1, %c0_i32_2 : i32, i32, i32, i32
  }
  func.func @transform_8(%arg0: i32) -> (i32, i32, i32) {
    %c0_i32 = arith.constant 0 : i32
    %c0_i32_0 = arith.constant 0 : i32
    %c0_i32_1 = arith.constant 0 : i32
    %c0_i32_2 = arith.constant 0 : i32
    return %c0_i32, %c0_i32_0, %c0_i32_1 : i32, i32, i32
  }
  func.func @transform_9(%arg0: i32) -> (i32, i32, i32) {
    %c0_i32 = arith.constant 0 : i32
    %c0_i32_0 = arith.constant 0 : i32
    %c0_i32_1 = arith.constant 0 : i32
    %c0_i32_2 = arith.constant 0 : i32
    return %c0_i32, %c0_i32_0, %c0_i32_1 : i32, i32, i32
  }
  func.func @transform_10(%arg0: i32) -> (i32, i32) {
    %c0_i32 = arith.constant 0 : i32
    %c0_i32_0 = arith.constant 0 : i32
    %c0_i32_1 = arith.constant 0 : i32
    return %c0_i32, %c0_i32_0 : i32, i32
  }
  func.func @transform_11(%arg0: i32) -> (i32, i32) {
    %c0_i32 = arith.constant 0 : i32
    %c0_i32_0 = arith.constant 0 : i32
    return %arg0, %c0_i32 : i32, i32
  }
}

</mosaic_0001>

<bundles_post_ra>
// kernel: _lambda_.1
= control target key start
LH: loop header
LB: loop body
LE: loop exit
PB: predicated region body
PF: predicated region fallthrough
CT: control target
= control target key end

     0   :  { %s25110_s0 = inlined_call_operand.hbm [shape: f32[16,64], index: 0, kind: input, shape index: {}]   ;;  %s25111_s1 = inlined_call_operand.hbm [shape: f32[8,16], index: 1, kind: input, shape index: {}]   ;;  %s25112_s2 = inlined_call_operand.hbm [shape: f32[8,16], index: 2, kind: input, shape index: {}]   ;;  %s25113_s3 = inlined_call_operand.hbm [shape: f32[8,8], index: 3, kind: input, shape index: {}]   ;;  %s25114_s4 = inlined_call_operand.hbm [shape: f32[6,1,64], index: 4, kind: input, shape index: {}]   ;;  %s25115_s5 = inlined_call_operand.hbm [shape: f32[6,1,64], index: 5, kind: input, shape index: {}]   ;;  %s25116_s6 = inlined_call_operand.hbm [shape: f32[30,4,64,16], index: 6, kind: input, shape index: {}]   ;;  %s25117_s7 = inlined_call_operand.hbm [shape: f32[6,4,16,64], index: 7, kind: input, shape index: {}]   ;;  %s25118_s8 = inlined_call_operand.hbm [shape: f32[6,64,256], index: 8, kind: input, shape index: {}]   ;;  %s25119_s9 = inlined_call_operand.hbm [shape: f32[6,128,64], index: 9, kind: input, shape index: {}]   ;;  %s25120_s10 = inlined_call_operand.hbm [shape: f32[1,64], index: 10, kind: input, shape index: {}]   ;;  %s25121_s11 = inlined_call_operand.hbm [shape: f32[16,64], index: 11, kind: output, shape index: {}]  }
   0x1   :  { %25131 = sst [smem:[#allocation28_spill]] %s25111_s1 }
   0x2   :  { %25132 = sst [smem:[#allocation29_spill]] %s25112_s2 }
   0x3   :  { %25133 = sst [smem:[#allocation30_spill]] %s25113_s3 }
   0x4   :  { %25134 = sst [smem:[#allocation31_spill]] %s25114_s4 }
   0x5   :  { %25135 = sst [smem:[#allocation32_spill]] %s25115_s5 }
   0x6   :  { %25136 = sst [smem:[#allocation33_spill]] %s25116_s6 }
   0x7   :  { %16 = vsyncpa [#allocation3], 0 }
   0x8   :  { %18 = vsyncpa [#allocation3 + $0x1], 0 }
   0x9   :  { %19 = vsyncpa [#allocation6], 0 }
   0xa   :  { %20 = vsyncpa [#allocation9], 0 }
   0xb   :  { %21 = vsyncpa [#allocation12], 0 }
   0xc   :  { %22 = vsyncpa [#allocation15], 0 }
   0xd   :  { %23 = vsyncpa [#allocation18], 0 }
   0xe   :  { %24 = vsyncpa [#allocation4], 0 }
   0xf   :  { %26 = vsyncpa [#allocation4 + $0x1], 0  ;;  %s22641_s17 = smov 0   ;;  %s22643_s18 = smov 0  }
  0x10   :  { %s22645_s19 = smov 0   ;;  %s22647_s20 = smov 0  }
  0x11 LB: > { %s22562_s21 = smov [#allocation5]   ;;  %s22662_s23 = sadd.s32 4294967295, %s22560_s20   ;;  %s22560_s20 = sphi %s22647_s20, %s25173_s20   ;;  %s22556_s19 = sphi %s22645_s19, %s25172_s19   ;;  %s22552_s18 = sphi %s22643_s18, %s25171_s18   ;;  %s22548_s17 = sphi %s22641_s17, %s25170_s17  }
  0x12   : > { %s312_s22 = sshll.u32 %s22562_s21, 4  ;;  %p17358_p0 = scmp.ge.s32.totalorder %s22560_s20, 1  ;;  %s313_s22 = int_to_ptr.vmem [resolvable:$true] %s312_s22 }
  0x13   : > { %p25122_p1 = scmp.eq.s32.totalorder %s22662_s23, 0  ;;  %p299_p2 = scmp.lt.s32.totalorder %s22560_s20, 3 }
  0x14   : > { %s22563_s25 = smov [#allocation8]   ;;  %s22564_s28 = smov [#allocation11]  }
  0x15   : > { %p22667_p3 = pnand %p17358_p0, %p299_p2  ;;  %s334_s26 = sshll.u32 %s22563_s25, 4  ;;  %s335_s26 = int_to_ptr.vmem [resolvable:$true] %s334_s26 }
  0x16   : > { %s357_s29 = sshll.u32 %s22564_s28, 4  ;;  %s22199_s12 = scalar_lea.vmem %s313_s22, 128  ;;  %s22680_s29 = int_to_ptr.vmem [resolvable:$true] %s357_s29 }
  0x17   : > { %s25137_s24 = scalar_select %p22667_p3, 1, 0 }
  0x18   : > { %p21916_p5 = pneg %p22667_p3  ;;  %p22200_p8 = scmp.ne.s32.totalorder %s313_s22, %s22199_s12 }
  0x19   : > { %p22207_p11 = scmp.lt.s32.totalorder %s313_s22, %s313_s22  ;;  %p22208_p12 = scmp.lt.s32.totalorder %s22199_s12, %s22199_s12 }
  0x1a   : > { %p22676_p6 = pnand %p21916_p5, %p25122_p1 }
  0x1b   : > { %p22209_p13 = por %p22208_p12, %p22207_p11 }
  0x1c   : > { %p22684_p7 = pneg %p22676_p6 }
  0x1e   : > { %p22202_p9 = pnand %p22200_p8, %p22684_p7 }
  0x20   : > { %p22203_p10 = pneg %p22202_p9 }
  0x22   : > { %p22210_p0 = pnand %p22209_p13, %p22203_p10 }
  0x24   : > { %22213 = shalt.err (!%p22210_p0)
}
  0x25   : > { %s25140_s1 = sld [smem:[#allocation28_spill]]  ;;  %s22225_s15 = scalar_lea.vmem %s335_s26, 128 }
  0x26   : > { %p22226_p2 = scmp.ne.s32.totalorder %s335_s26, %s22225_s15  ;;  %p22233_p1 = scmp.lt.s32.totalorder %s335_s26, %s335_s26 }
  0x27   : > { %p22234_p8 = scmp.lt.s32.totalorder %s22225_s15, %s22225_s15 }
  0x28   : > { %p22228_p5 = pnand %p22226_p2, %p22684_p7 }
  0x29   : > { %p22235_p9 = por %p22234_p8, %p22233_p1 }
  0x2a   : > { %p22229_p4 = pneg %p22228_p5 }
  0x2b   : > { %21919 = dma.hbm_to_vmem [thread:$0]  (!%p22676_p6), %s25140_s1, 128, %s313_s22, [#allocation6]  }
  0x2c   : > { %p22236_p3 = pnand %p22235_p9, %p22229_p4 }
  0x2e   : > { %22239 = shalt.err (!%p22236_p3)
}
  0x2f   : > { %s25141_s3 = sld [smem:[#allocation30_spill]]  ;;  %s22251_s22 = scalar_lea.vmem %s22680_s29, 96 }
  0x30   : > { %p22252_p10 = scmp.ne.s32.totalorder %s22680_s29, %s22251_s22  ;;  %p22259_p13 = scmp.lt.s32.totalorder %s22680_s29, %s22680_s29 }
  0x31   : > { %p22260_p1 = scmp.lt.s32.totalorder %s22251_s22, %s22251_s22 }
  0x32   : > { %p22254_p11 = pnand %p22252_p10, %p22684_p7 }
  0x33   : > { %p22261_p4 = por %p22260_p1, %p22259_p13 }
  0x34   : > { %p22255_p12 = pneg %p22254_p11 }
  0x35   : > { %21925 = dma.hbm_to_vmem [thread:$0]  (!%p22676_p6), %s25141_s3, 128, %s335_s26, [#allocation9]  }
  0x36   : > { %p22262_p3 = pnand %p22261_p4, %p22255_p12 }
  0x38   : > { %22265 = shalt.err (!%p22262_p3)
}
  0x39   : > { %s25124_s25 = smov 16   ;;  %s25126_s28 = smov 1  }
  0x3a   : > { %s25142_s5 = sld [smem:[#allocation32_spill]]  ;;  %s22567_s13 = smov [#allocation14]  }
  0x3b   : > { %s383_s14 = sshll.u32 %s22567_s13, 4  ;;  %s22568_s15 = smov [#allocation17]   ;;  %s384_s14 = int_to_ptr.vmem [resolvable:$true] %s383_s14 }
  0x3c   : > { %s409_s16 = sshll.u32 %s22568_s15, 4  ;;  %s22277_s21 = scalar_lea.vmem %s384_s14, 6144  ;;  %s410_s16 = int_to_ptr.vmem [resolvable:$true] %s409_s16 }
  0x3d   : > { %p22278_p0 = scmp.ne.s32.totalorder %s384_s14, %s22277_s21  ;;  %p22285_p8 = scmp.lt.s32.totalorder %s384_s14, %s384_s14 }
  0x3e   : > { %p22286_p9 = scmp.lt.s32.totalorder %s22277_s21, %s22277_s21 }
  0x3f   : > { %p22280_p2 = pnand %p22278_p0, %p22684_p7 }
  0x40   : > { %21931 = dma.hbm_to_vmem [thread:$0]  (!%p22676_p6), %s25142_s5, 96, %s22680_s29, [#allocation12], %s25124_s25, %s25124_s25, %s25126_s28  }
  0x41   : > { %p22281_p5 = pneg %p22280_p2  ;;  %p22287_p10 = por %p22286_p9, %p22285_p8 }
  0x43   : > { %p22288_p11 = pnand %p22287_p10, %p22281_p5 }
  0x45   : > { %22291 = shalt.err (!%p22288_p11)
}
  0x46   : > { %s25127_s22 = smov 128   ;;  %s25128_s26 = smov 8  }
  0x47   : > { %21937 = dma.hbm_to_vmem [thread:$0]  (!%p22676_p6), %s25117_s7, 6144, %s384_s14, [#allocation15], %s25127_s22, %s25127_s22, %s25128_s26  }
  0x48   : > { %s22303_s13 = scalar_lea.vmem %s410_s16, 12288  ;;  %p22311_p4 = scmp.lt.s32.totalorder %s410_s16, %s410_s16 }
  0x49   : > { %p22304_p12 = scmp.ne.s32.totalorder %s410_s16, %s22303_s13  ;;  %p22312_p3 = scmp.lt.s32.totalorder %s22303_s13, %s22303_s13 }
  0x4b   : > { %p22306_p13 = pnand %p22304_p12, %p22684_p7  ;;  %p22313_p0 = por %p22312_p3, %p22311_p4 }
  0x4d   : > { %p22307_p1 = pneg %p22306_p13 }
  0x4f   : > { %p22314_p2 = pnand %p22313_p0, %p22307_p1 }
  0x51   : > { %22317 = shalt.err (!%p22314_p2)
}
  0x52   : > { %21943 = dma.hbm_to_vmem [thread:$0]  (!%p22676_p6), %s25119_s9, 12288, %s410_s16, [#allocation18], %s25127_s22, %s25127_s22, %s25128_s26  }
  0x53   : > { %s22571_s14 = smov [#allocation7]   ;;  %s22572_s12 = smov [#allocation10]  }
  0x54   : > { %s323_s29 = sshll.u32 %s22571_s14, 4  ;;  %s344_s25 = sshll.u32 %s22572_s12, 4  ;;  %s324_s29 = int_to_ptr.vmem [resolvable:$true] %s323_s29  ;;  %s345_s25 = int_to_ptr.vmem [resolvable:$true] %s344_s25 }
  0x55   : > { %s22329_s28 = scalar_lea.vmem %s324_s29, 128  ;;  %p22337_p10 = scmp.lt.s32.totalorder %s324_s29, %s324_s29 }
  0x56   : > { %p22330_p5 = scmp.ne.s32.totalorder %s324_s29, %s22329_s28  ;;  %p22338_p11 = scmp.lt.s32.totalorder %s22329_s28, %s22329_s28 }
  0x58   : > { %p22332_p8 = pnand %p22330_p5, %p22684_p7  ;;  %p22339_p12 = por %p22338_p11, %p22337_p10 }
  0x5a   : > { %p22333_p9 = pneg %p22332_p8 }
  0x5c   : > { %p22340_p13 = pnand %p22339_p12, %p22333_p9 }
  0x5e   : > { %22343 = shalt.err (!%p22340_p13)
}
  0x5f   : > { %s25143_s2 = sld [smem:[#allocation29_spill]]  ;;  %s22355_s16 = scalar_lea.vmem %s345_s25, 96 }
  0x60   : > { %p22356_p1 = scmp.ne.s32.totalorder %s345_s25, %s22355_s16  ;;  %p22363_p0 = scmp.lt.s32.totalorder %s345_s25, %s345_s25 }
  0x61   : > { %p22364_p2 = scmp.lt.s32.totalorder %s22355_s16, %s22355_s16 }
  0x62   : > { %p22358_p4 = pnand %p22356_p1, %p22684_p7 }
  0x63   : > { %p22365_p5 = por %p22364_p2, %p22363_p0 }
  0x64   : > { %p22359_p3 = pneg %p22358_p4 }
  0x65   : > { %21922 = dma.hbm_to_vmem [thread:$0]  (!%p22676_p6), %s25143_s2, 128, %s324_s29, [#allocation6]  }
  0x66   : > { %p22366_p8 = pnand %p22365_p5, %p22359_p3 }
  0x68   : > { %22369 = shalt.err (!%p22366_p8)
}
  0x69   : > { %s25144_s28 = smov 1   ;;  %s25145_s21 = smov 16  }
  0x6a   : > { %s25146_s4 = sld [smem:[#allocation31_spill]]  ;;  %s22573_s29 = smov [#allocation13]  }
  0x6b   : > { %s370_s13 = sshll.u32 %s22573_s29, 4  ;;  %s22574_s15 = smov [#allocation16]   ;;  %s371_s13 = int_to_ptr.vmem [resolvable:$true] %s370_s13 }
  0x6c   : > { %s396_s22 = sshll.u32 %s22574_s15, 4  ;;  %s22381_s26 = scalar_lea.vmem %s371_s13, 122880  ;;  %s397_s22 = int_to_ptr.vmem [resolvable:$true] %s396_s22 }
  0x6d   : > { %p22382_p9 = scmp.ne.s32.totalorder %s371_s13, %s22381_s26  ;;  %p22389_p12 = scmp.lt.s32.totalorder %s371_s13, %s371_s13 }
  0x6e   : > { %p22390_p13 = scmp.lt.s32.totalorder %s22381_s26, %s22381_s26 }
  0x6f   : > { %p22384_p10 = pnand %p22382_p9, %p22684_p7 }
  0x70   : > { %21928 = dma.hbm_to_vmem [thread:$0]  (!%p22676_p6), %s25146_s4, 96, %s345_s25, [#allocation9], %s25145_s21, %s25145_s21, %s25144_s28  }
  0x71   : > { %p22385_p11 = pneg %p22384_p10  ;;  %p22391_p1 = por %p22390_p13, %p22389_p12 }
  0x73   : > { %p22392_p4 = pnand %p22391_p1, %p22385_p11 }
  0x75   : > { %22395 = shalt.err (!%p22392_p4)
}
  0x76   : > { %s25147_s16 = smov 8   ;;  %s25148_s14 = smov 128  }
  0x77   : > { %s25149_s6 = sld [smem:[#allocation33_spill]]  ;;  %s22407_s12 = scalar_lea.vmem %s397_s22, 12288 }
  0x78   : > { %p22408_p3 = scmp.ne.s32.totalorder %s397_s22, %s22407_s12  ;;  %p22415_p5 = scmp.lt.s32.totalorder %s397_s22, %s397_s22 }
  0x79   : > { %p22416_p8 = scmp.lt.s32.totalorder %s22407_s12, %s22407_s12 }
  0x7a   : > { %p22410_p0 = pnand %p22408_p3, %p22684_p7 }
  0x7b   : > { %p22417_p9 = por %p22416_p8, %p22415_p5 }
  0x7c   : > { %p22411_p2 = pneg %p22410_p0 }
  0x7d   : > { %21934 = dma.hbm_to_vmem [thread:$0]  (!%p22676_p6), %s25149_s6, 122880, %s371_s13, [#allocation12], %s25148_s14, %s25148_s14, %s25147_s16  }
  0x7e   : > { %p22418_p10 = pnand %p22417_p9, %p22411_p2 }
  0x80   : > { %22421 = shalt.err (!%p22418_p10)
}
  0x81   : > { %s22575_s26 = smov 256   ;;  %s22576_s13 = smov [#allocation19]  }
  0x82   : > { %21940 = dma.hbm_to_vmem [thread:$0]  (!%p22676_p6), %s25118_s8, 12288, %s397_s22, [#allocation15], %s22575_s26, %s22575_s26, %s25145_s21  }
  0x83   : > { %s423_s16 = sshll.u32 %s22576_s13, 4  ;;  %s424_s16 = int_to_ptr.vmem [resolvable:$true] %s423_s16 }
  0x84   : > { %s22433_s14 = scalar_lea.vmem %s424_s16, 16  ;;  %s22440_s25 = scalar_lea.vmem %s424_s16, 32 }
  0x85   : > { %p22434_p11 = scmp.ne.s32.totalorder %s424_s16, %s22433_s14  ;;  %p22441_p1 = scmp.lt.s32.totalorder %s424_s16, %s424_s16 }
  0x86   : > { %p22442_p4 = scmp.lt.s32.totalorder %s22440_s25, %s22433_s14 }
  0x87   : > { %p22436_p12 = pnand %p22434_p11, %p22684_p7 }
  0x88   : > { %p22443_p3 = por %p22442_p4, %p22441_p1 }
  0x89   : > { %p22437_p13 = pneg %p22436_p12 }
  0x8b   : > { %p22444_p0 = pnand %p22443_p3, %p22437_p13 }
  0x8d   : > { %22447 = shalt.err (!%p22444_p0)
}
  0x8e   : > { %21946 = dma.hbm_to_vmem [thread:$0]  (!%p22676_p6), %s25120_s10, 16, %s424_s16, [#allocation18]  }
  0x8f   : > { %s17357_s30 = sadd.s32 4294967294, %s22560_s20   ;;  %s22781_s27 = sadd.s32 1, %s22560_s20  }
  0x90   : > { %s39_s22 = sadd.s32 1, %s22556_s19  ;;  %s36_s21 = ssub.s32 %s22560_s20, %s22781_s27 }
  0x91   : > { %p46_p7 = scmp.ne.s32.totalorder %s22556_s19, %s22552_s18  ;;  %p37_p2 = scmp.eq.s32.totalorder %s36_s21, 0 }
  0x92   : > { %p47_p5 = scmp.eq.s32.totalorder %s22560_s20, 0  ;;  %p52_p8 = scmp.ne.s32.totalorder %s22552_s18, %s22548_s17 }
  0x93   : > { %p286_p9 = scmp.eq.s32.totalorder %s22662_s23, 1  ;;  %p25150_p11 = scmp.eq.s32.totalorder %s22662_s23, 0 }
  0x94   : > { %s22793_s26 = scalar_select %p37_p2, %s22556_s19, %s39_s22  }
  0x95   : > { %p48_p10 = por %p47_p5, %p46_p7  ;;  %p22797_p12 = por %p25150_p11, %p52_p8 }
  0x96   : > { %p22801_p6 = por %p286_p9, %p46_p7  ;;  %p292_p13 = scmp.eq.s32.totalorder %s17357_s30, 1 }
  0x97   : > { %s25151_s29 = scalar_select %p22797_p12, 1, 0 }
  0x98   : > { %s25152_s15 = scalar_select %p22801_p6, 1, 0 }
  0x99   : > { %p21965_p1 = scmp.lt.s32.totalorder %s22560_s20, 2  ;;  %s434_s13 = sand.u32 1, %s22556_s19  }
  0x9a   : > { %p22807_p4 = por %p292_p13, %p52_p8  ;;  %s17370_s14 = sshll.u32 %s434_s13, 3 }
  0x9b   : > { %s17371_s25 = sshll.u32 %s22560_s20, 7  ;;  %s438_s21 = scalar_lea.vmem [#allocation2], %s17370_s14 }
  0x9c   : > { %s25153_s16 = scalar_select %p22807_p4, 1, 0 }
  0x9d   : > { %s22815_s22 = scalar_lea.hbm %s25110_s0, %s17371_s25  ;;  %s445_s1 = sshll.u32 %s438_s21, 4  ;;  %s446_s1 = int_to_ptr.vmem [resolvable:$true] %s445_s1 }
  0x9e   : > { %p22817_p3 = pnand %p21965_p1, %p48_p10  ;;  %s435_s2 = scalar_lea.sflag [#allocation3], %s434_s13 }
  0x9f   : > { %s22448_s3 = scalar_lea.hbm %s22815_s22, 128  ;;  %s22453_s12 = scalar_lea.hbm %s25110_s0, 256 }
  0xa0   : > { %p22449_p0 = scmp.ne.s32.totalorder %s22815_s22, %s22448_s3  ;;  %p22450_p7 = pneg %p22817_p3 }
  0xa1   : > { %p22454_p8 = scmp.lt.s32.totalorder %s22815_s22, %s25110_s0  ;;  %p22455_p9 = scmp.lt.s32.totalorder %s22453_s12, %s22448_s3 }
  0xa2   : > { %p22451_p2 = pnand %p22450_p7, %p22449_p0 }
  0xa3   : > { %p22456_p10 = por %p22455_p9, %p22454_p8 }
  0xa4   : > { %p22452_p5 = pneg %p22451_p2 }
  0xa6   : > { %p22457_p11 = pnand %p22456_p10, %p22452_p5 }
  0xa8   : > { %22460 = shalt.err (!%p22457_p11)
}
  0xa9   : > { %s22461_s21 = scalar_lea.vmem %s446_s1, 128  ;;  %s22577_s13 = smov [#allocation2]  }
  0xaa   : > { %p22462_p13 = scmp.ne.s32.totalorder %s446_s1, %s22461_s21  ;;  %s22466_s5 = sshll.u32 %s22577_s13, 4  ;;  %s22467_s5 = int_to_ptr.vmem [resolvable:$false] %s22466_s5 }
  0xab   : > { %s22468_s6 = scalar_lea.vmem %s22467_s5, 256  ;;  %p22469_p0 = scmp.lt.s32.totalorder %s446_s1, %s22467_s5 }
  0xac   : > { %p22464_p1 = pnand %p22462_p13, %p22450_p7  ;;  %p22470_p2 = scmp.lt.s32.totalorder %s22468_s6, %s22461_s21 }
  0xae   : > { %p22465_p4 = pneg %p22464_p1  ;;  %p22471_p6 = por %p22470_p2, %p22469_p0 }
  0xb0   : > { %p22472_p12 = pnand %p22471_p6, %p22465_p4 }
  0xb2   : > { %22475 = shalt.err (!%p22472_p12)
}
  0xb3   : > { %21950 = dma.hbm_to_vmem [thread:$0]  (!%p22817_p3), %s22815_s22, 128, %s446_s1, %s435_s2  }
  0xb4   : > { %p25155_p5 = scmp.ne.s32.totalorder %s25137_s24, 0 }
  0xb5   : > { %s22838_s3 = sand.u32 (!%p25155_p5), 1, %s22552_s18   ;;  %p25156_p12 = scmp.ne.s32.totalorder (!%p25155_p5), %s25151_s29, 0 }
  0xb6   : > { %454 = sbr.rel (%p25155_p5) target bundleno = 12337 (0x3031), region = 64  ;;  %s17373_s4 = sshll.u32 (!%p25155_p5), %s22838_s3, 3 }
  0xb7   : > { %s457_s5 = scalar_lea.sflag (!%p25155_p5), [#allocation3], %s22838_s3  ;;  %s22844_s6 = scalar_lea.vmem (!%p25155_p5), [#allocation2], %s17373_s4 }
  0xbb   : > { %22519 = dma.done.wait (%p25156_p12), %s457_s5, 128  }
  0xbc   : > { %22521 = vsyncadd (%p25156_p12), %s457_s5, 4294967168  ;;  %p25157_p6 = scmp.eq.s32.totalorder %s22662_s23, 0 }
  0xbe   : > { %22523 = dma.done.wait (%p25157_p6), [#allocation6], 256   ;;  %p25158_p4 = pmov %p25157_p6 }
  0xc0   : > { %22525 = vsyncadd (%p25158_p4), [#allocation6], 4294967040  ;;  %p25159_p3 = pmov %p25158_p4 }
  0xc2   : > { %22527 = dma.done.wait (%p25159_p3), [#allocation9], 224   ;;  %p25160_p7 = pmov %p25159_p3 }
  0xc3   : > { %p25161_p8 = pmov %p25159_p3 }
  0xc4   : > { %22529 = vsyncadd (%p25160_p7), [#allocation9], 4294967072 }
  0xc5   : > { %22531 = dma.done.wait (%p25161_p8), [#allocation12], 122976   ;;  %p25162_p9 = pmov %p25159_p3 }
  0xc6   : > { %p25163_p10 = pmov %p25159_p3 }
  0xc7   : > { %22533 = vsyncadd (%p25162_p9), [#allocation12], 4294844320 }
  0xc8   : > { %22535 = dma.done.wait (%p25163_p10), [#allocation15], 18432   ;;  %p25164_p11 = pmov %p25159_p3 }
  0xc9   : > { %p25165_p13 = pmov %p25159_p3 }
  0xca   : > { %22537 = vsyncadd (%p25164_p11), [#allocation15], 4294948864 }
  0xcb   : > { %22539 = dma.done.wait (%p25165_p13), [#allocation18], 12304   ;;  %p25166_p1 = pmov %p25159_p3 }
  0xcc   : > { %v22871_v0 = vld [vmem:[%s22844_s6] sm:$0xff]  ;;  %vm545_vm0 = vcmask 523264   ;;  %v22578_v3 = vmov 0.0   ;;  %v565_v10 = vld [vmem:[#allocation13 + $0x20] sm:$0xff]  ;;  %vm22579_vm1 = vmmov 0   ;;  %vm2152_vm2 = vcmask 130048  }
  0xcd   : > { %22541 = vsyncadd (%p25166_p1), [#allocation18], 4294954992  ;;  %v544_v1 = vmul.f32 %v22871_v0, %v22871_v0  ;;  %18974 = vmatprep.subr.mxu0 %v22578_v3  ;;  %18993 = vmatprep.subr.mxu1 %v22578_v3  ;;  %v568_v4 = vld [vmem:[#allocation13 + $0x38] sm:$0xff]  ;;  %v567_v6 = vld [vmem:[#allocation13 + $0x30] sm:$0xff]  ;;  %vm2465_vm3 = vcmask 64512   ;;  %s17621_s1 = sshll.u32 %s22662_s23, 7 }
  0xce   : > { %v576_v5 = vld [vmem:[#allocation13 + $0x78] sm:$0xff]  ;;  %18975 = vmatpush3.msra.mxu0 %v568_v4  ;;  %v575_v7 = vld [vmem:[#allocation13 + $0x70] sm:$0xff]  ;;  %v566_v8 = vld [vmem:[#allocation13 + $0x28] sm:$0xff]  ;;  %18990 = vmatprep.mubr.msk.f32.mxu0 %vm22579_vm1, %v22578_v3  ;;  %s538_s2 = scalar_lea.vmem [#allocation20], %s17373_s4  ;;  %s17190_s30 = scalar_lea.hbm %s25121_s11, %s17621_s1 }
  0xcf   : > { %v546_v2 = vsel %vm545_vm0, %v544_v1, 0.0  ;;  %18994 = vmatpush3.msra.mxu1 %v576_v5  ;;  %18976 = vmatprep.subr.mxu0 %v22578_v3  ;;  %v574_v9 = vld [vmem:[#allocation13 + $0x68] sm:$0xff]  ;;  %v573_v11 = vld [vmem:[#allocation13 + $0x60] sm:$0xff]  ;;  %v564_v12 = vld [vmem:[#allocation13 + $0x18] sm:$0xff]  ;;  %s17192_s24 = sshll.u32 %s538_s2, 4  ;;  %s17179_s25 = scalar_lea.sflag [#allocation4], %s22838_s3  ;;  %s17193_s24 = int_to_ptr.vmem [resolvable:$true] %s17192_s24 }
  0xd0   : > { %547 = vadd.xlane.f32.xlu0 %v546_v2  ;;  %18995 = vmatprep.subr.mxu1 %v22578_v3  ;;  %v572_v13 = vld [vmem:[#allocation13 + $0x58] sm:$0xff]  ;;  %v563_v14 = vld [vmem:[#allocation13 + $0x10] sm:$0xff]  ;;  %v562_v16 = vld [vmem:[#allocation13 + $0x8] sm:$0xff]  ;;  %s22476_s28 = scalar_lea.vmem %s17193_s24, 128  ;;  %p25167_p2 = scmp.ne.s32.totalorder %s25152_s15, 0 }
  0xd1   : > { %18977 = vmatpush3.msra.mxu0 %v567_v6  ;;  %18996 = vmatpush3.msra.mxu1 %v575_v7  ;;  %v571_v15 = vld [vmem:[#allocation13 + $0x50] sm:$0xff]  ;;  %v570_v17 = vld [vmem:[#allocation13 + $0x48] sm:$0xff]  ;;  %v561_v18 = vld [vmem:[#allocation13] sm:$0xff]  ;;  %p22477_p0 = scmp.ne.s32.totalorder %s17193_s24, %s22476_s28  ;;  %s22580_s12 = smov [#allocation20]  }
  0xd2   : > { %18978 = vmatprep.subr.mxu0 %v22578_v3  ;;  %18997 = vmatprep.subr.mxu1 %v22578_v3  ;;  %v569_v19 = vld [vmem:[#allocation13 + $0x40] sm:$0xff]  ;;  %v17385_v24 = vld [vmem:[#allocation10] ss:$0 sm:$0xff]  ;;  %v584_v27 = vld [vmem:[#allocation13 + $0xb8] sm:$0xff]  ;;  %s22480_s23 = sshll.u32 %s22580_s12, 4  ;;  %s22481_s23 = int_to_ptr.vmem [resolvable:$false] %s22480_s23 }
  0xd3   : > { %18979 = vmatpush3.msra.mxu0 %v566_v8  ;;  %18998 = vmatpush3.msra.mxu1 %v574_v9  ;;  %v592_v28 = vld [vmem:[#allocation13 + $0xf8] sm:$0xff]  ;;  %v583_v29 = vld [vmem:[#allocation13 + $0xb0] sm:$0xff]  ;;  %v582_v31 = vld [vmem:[#allocation13 + $0xa8] sm:$0xff]  ;;  %p22478_p5 = pnand %p22477_p0, %p25167_p2  ;;  %s22482_s14 = scalar_lea.vmem %s22481_s23, 256 }
  0xd4   : > { %18980 = vmatprep.subr.mxu0 %v22578_v3  ;;  %18999 = vmatprep.subr.mxu1 %v22578_v3  ;;  %v591_v30 = vld [vmem:[#allocation13 + $0xf0] sm:$0xff]  ;;  %v590_v32 = vld [vmem:[#allocation13 + $0xe8] sm:$0xff]  ;;  %v581_v33 = vld [vmem:[#allocation13 + $0xa0] sm:$0xff]  ;;  %p22483_p6 = scmp.lt.s32.totalorder %s17193_s24, %s22481_s23  ;;  %p22484_p4 = scmp.lt.s32.totalorder %s22482_s14, %s22476_s28 }
  0xd5   : > { %18981 = vmatpush3.msra.mxu0 %v565_v10  ;;  %19000 = vmatpush3.msra.mxu1 %v573_v11  ;;  %v589_v34 = vld [vmem:[#allocation13 + $0xe0] sm:$0xff]  ;;  %v580_v35 = vld [vmem:[#allocation13 + $0x98] sm:$0xff]  ;;  %v579_v37 = vld [vmem:[#allocation13 + $0x90] sm:$0xff]  ;;  %p22479_p12 = pneg %p22478_p5 }
  0xd6   : > { %18982 = vmatprep.subr.mxu0 %v22578_v3  ;;  %19001 = vmatprep.subr.mxu1 %v22578_v3  ;;  %v588_v36 = vld [vmem:[#allocation13 + $0xd8] sm:$0xff]  ;;  %v587_v38 = vld [vmem:[#allocation13 + $0xd0] sm:$0xff]  ;;  %v578_v39 = vld [vmem:[#allocation13 + $0x88] sm:$0xff]  ;;  %p22485_p3 = por %p22484_p4, %p22483_p6 }
  0xd7   : > { %18983 = vmatpush3.msra.mxu0 %v564_v12  ;;  %19002 = vmatpush3.msra.mxu1 %v572_v13  ;;  %v586_v40 = vld [vmem:[#allocation13 + $0xc8] sm:$0xff]  ;;  %v577_v41 = vld [vmem:[#allocation13 + $0x80] sm:$0xff]  ;;  %v888_v43 = vld [vmem:[#allocation13 + $0x138] sm:$0xff] }
  0xd8   : > { %18984 = vmatprep.subr.mxu0 %v22578_v3  ;;  %19003 = vmatprep.subr.mxu1 %v22578_v3  ;;  %v585_v42 = vld [vmem:[#allocation13 + $0xc0] sm:$0xff]  ;;  %v896_v44 = vld [vmem:[#allocation13 + $0x178] sm:$0xff]  ;;  %v887_v45 = vld [vmem:[#allocation13 + $0x130] sm:$0xff]  ;;  %p22486_p7 = pnand %p22485_p3, %p22479_p12 }
  0xd9   : > { %18985 = vmatpush3.msra.mxu0 %v563_v14  ;;  %19004 = vmatpush3.msra.mxu1 %v571_v15  ;;  %v895_v46 = vld [vmem:[#allocation13 + $0x170] sm:$0xff]  ;;  %v886_v47 = vld [vmem:[#allocation13 + $0x128] sm:$0xff]  ;;  %v885_v49 = vld [vmem:[#allocation13 + $0x120] sm:$0xff] }
  0xda   : > { %18986 = vmatprep.subr.mxu0 %v22578_v3  ;;  %19005 = vmatprep.subr.mxu1 %v22578_v3  ;;  %v894_v48 = vld [vmem:[#allocation13 + $0x168] sm:$0xff]  ;;  %v893_v50 = vld [vmem:[#allocation13 + $0x160] sm:$0xff]  ;;  %v884_v51 = vld [vmem:[#allocation13 + $0x118] sm:$0xff] }
  0xdb   : > { %18987 = vmatpush3.msra.mxu0 %v562_v16  ;;  %19006 = vmatpush3.msra.mxu1 %v570_v17  ;;  %v892_v52 = vld [vmem:[#allocation13 + $0x158] sm:$0xff]  ;;  %v883_v53 = vld [vmem:[#allocation13 + $0x110] sm:$0xff]  ;;  %v882_v55 = vld [vmem:[#allocation13 + $0x108] sm:$0xff] }
  0xdc   : > { %18988 = vmatprep.subr.mxu0 %v22578_v3  ;;  %19007 = vmatprep.subr.mxu1 %v22578_v3  ;;  %v891_v54 = vld [vmem:[#allocation13 + $0x150] sm:$0xff]  ;;  %v890_v56 = vld [vmem:[#allocation13 + $0x148] sm:$0xff]  ;;  %v881_v57 = vld [vmem:[#allocation13 + $0x100] sm:$0xff] }
  0xdd   : > { %18989 = vmatpush3.msra.mxu0 %v561_v18  ;;  %19008 = vmatpush3.msra.mxu1 %v569_v19  ;;  %v889_v58 = vld [vmem:[#allocation13 + $0x140] sm:$0xff]  ;;  %v904_v59 = vld [vmem:[#allocation13 + $0x1b8] sm:$0xff]  ;;  %v903_v61 = vld [vmem:[#allocation13 + $0x1b0] sm:$0xff] }
  0xde   : > { %19009 = vmatprep.mubr.msk.f32.mxu1 %vm22579_vm1, %v22578_v3  ;;  %19012 = vmatprep.subr.mxu0 %v22578_v3  ;;  %v912_v60 = vld [vmem:[#allocation13 + $0x1f8] sm:$0xff]  ;;  %v911_v62 = vld [vmem:[#allocation13 + $0x1f0] sm:$0xff]  ;;  %v902_v63 = vld [vmem:[#allocation13 + $0x1a8] sm:$0xff] }
  0xdf   : > { %19031 = vmatprep.subr.mxu1 %v22578_v3  ;;  %v901_v1 = vld [vmem:[#allocation13 + $0x1a0] sm:$0xff]  ;;  %v900_v4 = vld [vmem:[#allocation13 + $0x198] sm:$0xff]  ;;  %v899_v6 = vld [vmem:[#allocation13 + $0x190] sm:$0xff] }
  0xe0   : > { %v909_v2 = vld [vmem:[#allocation13 + $0x1e0] sm:$0xff]  ;;  %v908_v5 = vld [vmem:[#allocation13 + $0x1d8] sm:$0xff]  ;;  %v907_v7 = vld [vmem:[#allocation13 + $0x1d0] sm:$0xff] }
  0xe1   : > { %v898_v8 = vld [vmem:[#allocation13 + $0x188] sm:$0xff]  ;;  %v897_v10 = vld [vmem:[#allocation13 + $0x180] sm:$0xff]  ;;  %v1209_v12 = vld [vmem:[#allocation13 + $0x238] sm:$0xff] }
  0xe2   : > { %v906_v9 = vld [vmem:[#allocation13 + $0x1c8] sm:$0xff]  ;;  %v905_v11 = vld [vmem:[#allocation13 + $0x1c0] sm:$0xff]  ;;  %v1217_v13 = vld [vmem:[#allocation13 + $0x278] sm:$0xff] }
  0xe3   : > { %v1208_v14 = vld [vmem:[#allocation13 + $0x230] sm:$0xff]  ;;  %v1207_v16 = vld [vmem:[#allocation13 + $0x228] sm:$0xff]  ;;  %v1206_v18 = vld [vmem:[#allocation13 + $0x220] sm:$0xff] }
  0xe4   : > { %v1216_v15 = vld [vmem:[#allocation13 + $0x270] sm:$0xff]  ;;  %v1215_v17 = vld [vmem:[#allocation13 + $0x268] sm:$0xff]  ;;  %v1214_v19 = vld [vmem:[#allocation13 + $0x260] sm:$0xff] }
 0x159   : > { %v548_v20 = vpop.xlane.xlu0 %547 }
 0x15a   : > { %v550_v21 = vmul.f32 0.015625, %v548_v20  ;;  %v1205_v20 = vld [vmem:[#allocation13 + $0x218] sm:$0xff] }
 0x15c   : > { %v551_v22 = vadd.f32 1e-06, %v550_v21  ;;  %v1213_v21 = vld [vmem:[#allocation13 + $0x258] sm:$0xff] }
 0x15e   : > { %22026 = vrsqrt.f32 %v551_v22  ;;  %v1204_v22 = vld [vmem:[#allocation13 + $0x210] sm:$0xff] }
 0x16b   : > { %v22027_v23 = vpop.eup %22026 }
 0x16c   : > { %v553_v25 = vmul.f32 %v22027_v23, %v22871_v0  ;;  %v910_v0 = vld [vmem:[#allocation13 + $0x1e8] sm:$0xff]  ;;  %v1212_v23 = vld [vmem:[#allocation13 + $0x250] sm:$0xff] }
 0x16e   : > { %v22899_v26 = vmul.f32 %v17385_v24, %v553_v25  ;;  %v1203_v24 = vld [vmem:[#allocation13 + $0x208] sm:$0xff] }
 0x16f   : > { %v1211_v25 = vld [vmem:[#allocation13 + $0x248] sm:$0xff] }
 0x170   : > { %18991 = vmatmul.mubr.msk.f32.vlgmr.msra.gmra.mxu0 %vm545_vm0, %v22899_v26  ;;  %19010 = vmatmul.mubr.msk.f32.vlgmr.msra.gmra.mxu1 %vm545_vm0, %v22899_v26 }
 0x171   : > { %19013 = vmatpush3.msra.mxu0 %v584_v27  ;;  %19032 = vmatpush3.msra.mxu1 %v592_v28  ;;  %v1202_v27 = vld [vmem:[#allocation13 + $0x200] sm:$0xff] }
 0x172   : > { %19014 = vmatprep.subr.mxu0 %v22578_v3  ;;  %19033 = vmatprep.subr.mxu1 %v22578_v3  ;;  %v1210_v28 = vld [vmem:[#allocation13 + $0x240] sm:$0xff] }
 0x173   : > { %19015 = vmatpush3.msra.mxu0 %v583_v29  ;;  %19034 = vmatpush3.msra.mxu1 %v591_v30  ;;  %v1225_v29 = vld [vmem:[#allocation13 + $0x2b8] sm:$0xff] }
 0x174   : > { %19016 = vmatprep.subr.mxu0 %v22578_v3  ;;  %19035 = vmatprep.subr.mxu1 %v22578_v3  ;;  %v1233_v30 = vld [vmem:[#allocation13 + $0x2f8] sm:$0xff] }
 0x175   : > { %19017 = vmatpush3.msra.mxu0 %v582_v31  ;;  %19036 = vmatpush3.msra.mxu1 %v590_v32  ;;  %v1224_v31 = vld [vmem:[#allocation13 + $0x2b0] sm:$0xff] }
 0x176   : > { %19018 = vmatprep.subr.mxu0 %v22578_v3  ;;  %19037 = vmatprep.subr.mxu1 %v22578_v3  ;;  %v1232_v32 = vld [vmem:[#allocation13 + $0x2f0] sm:$0xff] }
 0x177   : > { %19019 = vmatpush3.msra.mxu0 %v581_v33  ;;  %19038 = vmatpush3.msra.mxu1 %v589_v34  ;;  %v1223_v33 = vld [vmem:[#allocation13 + $0x2a8] sm:$0xff] }
 0x178   : > { %19020 = vmatprep.subr.mxu0 %v22578_v3  ;;  %19039 = vmatprep.subr.mxu1 %v22578_v3  ;;  %v1231_v34 = vld [vmem:[#allocation13 + $0x2e8] sm:$0xff] }
 0x179   : > { %19021 = vmatpush3.msra.mxu0 %v580_v35  ;;  %19040 = vmatpush3.msra.mxu1 %v588_v36  ;;  %v1222_v35 = vld [vmem:[#allocation13 + $0x2a0] sm:$0xff] }
 0x17a   : > { %19022 = vmatprep.subr.mxu0 %v22578_v3  ;;  %19041 = vmatprep.subr.mxu1 %v22578_v3  ;;  %v1230_v36 = vld [vmem:[#allocation13 + $0x2e0] sm:$0xff] }
 0x17b   : > { %19023 = vmatpush3.msra.mxu0 %v579_v37  ;;  %19042 = vmatpush3.msra.mxu1 %v587_v38  ;;  %v1221_v37 = vld [vmem:[#allocation13 + $0x298] sm:$0xff] }
 0x17c   : > { %19024 = vmatprep.subr.mxu0 %v22578_v3  ;;  %19043 = vmatprep.subr.mxu1 %v22578_v3  ;;  %v1229_v38 = vld [vmem:[#allocation13 + $0x2d8] sm:$0xff] }
 0x17d   : > { %19025 = vmatpush3.msra.mxu0 %v578_v39  ;;  %19044 = vmatpush3.msra.mxu1 %v586_v40  ;;  %v1220_v39 = vld [vmem:[#allocation13 + $0x290] sm:$0xff] }
 0x17e   : > { %19026 = vmatprep.subr.mxu0 %v22578_v3  ;;  %19045 = vmatprep.subr.mxu1 %v22578_v3  ;;  %v1228_v40 = vld [vmem:[#allocation13 + $0x2d0] sm:$0xff] }
 0x17f   : > { %19027 = vmatpush3.msra.mxu0 %v577_v41  ;;  %19028 = vmatprep.mubr.msk.f32.mxu0 %vm22579_vm1, %v22578_v3  ;;  %v1219_v41 = vld [vmem:[#allocation13 + $0x288] sm:$0xff] }
 0x180   : > { %19046 = vmatpush3.msra.mxu1 %v585_v42  ;;  %19047 = vmatprep.mubr.msk.f32.mxu1 %vm22579_vm1, %v22578_v3  ;;  %v1227_v42 = vld [vmem:[#allocation13 + $0x2c8] sm:$0xff] }
 0x181   : > { %19029 = vmatmul.mubr.msk.f32.vlgmr.msra.gmra.mxu0 %vm545_vm0, %v22899_v26  ;;  %19048 = vmatmul.mubr.msk.f32.vlgmr.msra.gmra.mxu1 %vm545_vm0, %v22899_v26 }
 0x182   : > { %19050 = vmatprep.subr.mxu0 %v22578_v3  ;;  %19069 = vmatprep.subr.mxu1 %v22578_v3 }
 0x183   : > { %19051 = vmatpush3.msra.mxu0 %v888_v43  ;;  %19070 = vmatpush3.msra.mxu1 %v896_v44  ;;  %v1218_v43 = vld [vmem:[#allocation13 + $0x280] sm:$0xff] }
 0x184   : > { %19052 = vmatprep.subr.mxu0 %v22578_v3  ;;  %19071 = vmatprep.subr.mxu1 %v22578_v3  ;;  %v1226_v44 = vld [vmem:[#allocation13 + $0x2c0] sm:$0xff] }
 0x185   : > { %19053 = vmatpush3.msra.mxu0 %v887_v45  ;;  %19072 = vmatpush3.msra.mxu1 %v895_v46  ;;  %v1526_v45 = vld [vmem:[#allocation13 + $0x338] sm:$0xff] }
 0x186   : > { %19054 = vmatprep.subr.mxu0 %v22578_v3  ;;  %19073 = vmatprep.subr.mxu1 %v22578_v3  ;;  %v1534_v46 = vld [vmem:[#allocation13 + $0x378] sm:$0xff] }
 0x187   : > { %19055 = vmatpush3.msra.mxu0 %v886_v47  ;;  %19074 = vmatpush3.msra.mxu1 %v894_v48  ;;  %v1525_v47 = vld [vmem:[#allocation13 + $0x330] sm:$0xff] }
 0x188   : > { %19056 = vmatprep.subr.mxu0 %v22578_v3  ;;  %19075 = vmatprep.subr.mxu1 %v22578_v3  ;;  %v1533_v48 = vld [vmem:[#allocation13 + $0x370] sm:$0xff] }
 0x189   : > { %19057 = vmatpush3.msra.mxu0 %v885_v49  ;;  %19076 = vmatpush3.msra.mxu1 %v893_v50  ;;  %v1524_v49 = vld [vmem:[#allocation13 + $0x328] sm:$0xff] }
 0x18a   : > { %19058 = vmatprep.subr.mxu0 %v22578_v3  ;;  %19077 = vmatprep.subr.mxu1 %v22578_v3  ;;  %v1532_v50 = vld [vmem:[#allocation13 + $0x368] sm:$0xff] }
 0x18b   : > { %19059 = vmatpush3.msra.mxu0 %v884_v51  ;;  %19078 = vmatpush3.msra.mxu1 %v892_v52  ;;  %v1523_v51 = vld [vmem:[#allocation13 + $0x320] sm:$0xff] }
 0x18c   : > { %19060 = vmatprep.subr.mxu0 %v22578_v3  ;;  %19079 = vmatprep.subr.mxu1 %v22578_v3  ;;  %v1531_v52 = vld [vmem:[#allocation13 + $0x360] sm:$0xff] }
 0x18d   : > { %19061 = vmatpush3.msra.mxu0 %v883_v53  ;;  %19080 = vmatpush3.msra.mxu1 %v891_v54  ;;  %v1522_v53 = vld [vmem:[#allocation13 + $0x318] sm:$0xff] }
 0x18e   : > { %19062 = vmatprep.subr.mxu0 %v22578_v3  ;;  %19081 = vmatprep.subr.mxu1 %v22578_v3  ;;  %v1530_v54 = vld [vmem:[#allocation13 + $0x358] sm:$0xff] }
 0x18f   : > { %19063 = vmatpush3.msra.mxu0 %v882_v55  ;;  %19082 = vmatpush3.msra.mxu1 %v890_v56  ;;  %v1521_v55 = vld [vmem:[#allocation13 + $0x310] sm:$0xff] }
 0x190   : > { %19064 = vmatprep.subr.mxu0 %v22578_v3  ;;  %19083 = vmatprep.subr.mxu1 %v22578_v3  ;;  %v1529_v56 = vld [vmem:[#allocation13 + $0x350] sm:$0xff] }
 0x191   : > { %19065 = vmatpush3.msra.mxu0 %v881_v57  ;;  %19066 = vmatprep.mubr.msk.f32.mxu0 %vm22579_vm1, %v22578_v3  ;;  %v1520_v57 = vld [vmem:[#allocation13 + $0x308] sm:$0xff] }
 0x192   : > { %19084 = vmatpush3.msra.mxu1 %v889_v58  ;;  %19085 = vmatprep.mubr.msk.f32.mxu1 %vm22579_vm1, %v22578_v3  ;;  %v1528_v58 = vld [vmem:[#allocation13 + $0x348] sm:$0xff] }
 0x193   : > { %19067 = vmatmul.mubr.msk.f32.vlgmr.msra.gmra.mxu0 %vm545_vm0, %v22899_v26  ;;  %19086 = vmatmul.mubr.msk.f32.vlgmr.msra.gmra.mxu1 %vm545_vm0, %v22899_v26 }
 0x194   : > { %19088 = vmatprep.subr.mxu0 %v22578_v3  ;;  %19107 = vmatprep.subr.mxu1 %v22578_v3 }
 0x195   : > { %19089 = vmatpush3.msra.mxu0 %v904_v59  ;;  %19108 = vmatpush3.msra.mxu1 %v912_v60  ;;  %v1519_v59 = vld [vmem:[#allocation13 + $0x300] sm:$0xff] }
 0x196   : > { %19090 = vmatprep.subr.mxu0 %v22578_v3  ;;  %19109 = vmatprep.subr.mxu1 %v22578_v3  ;;  %v1527_v60 = vld [vmem:[#allocation13 + $0x340] sm:$0xff] }
 0x197   : > { %19091 = vmatpush3.msra.mxu0 %v903_v61  ;;  %19110 = vmatpush3.msra.mxu1 %v911_v62  ;;  %v1542_v61 = vld [vmem:[#allocation13 + $0x3b8] sm:$0xff] }
 0x198   : > { %19092 = vmatprep.subr.mxu0 %v22578_v3  ;;  %19111 = vmatprep.subr.mxu1 %v22578_v3  ;;  %v1550_v62 = vld [vmem:[#allocation13 + $0x3f8] sm:$0xff] }
 0x199   : > { %19093 = vmatpush3.msra.mxu0 %v902_v63  ;;  %19112 = vmatpush3.msra.mxu1 %v910_v0  ;;  %v1541_v63 = vld [vmem:[#allocation13 + $0x3b0] sm:$0xff] }
 0x19a   : > { %19094 = vmatprep.subr.mxu0 %v22578_v3  ;;  %19113 = vmatprep.subr.mxu1 %v22578_v3  ;;  %v1549_v0 = vld [vmem:[#allocation13 + $0x3f0] sm:$0xff] }
 0x19b   : > { %19095 = vmatpush3.msra.mxu0 %v901_v1  ;;  %19114 = vmatpush3.msra.mxu1 %v909_v2  ;;  %v1540_v1 = vld [vmem:[#allocation13 + $0x3a8] sm:$0xff] }
 0x19c   : > { %19096 = vmatprep.subr.mxu0 %v22578_v3  ;;  %19115 = vmatprep.subr.mxu1 %v22578_v3  ;;  %v1548_v2 = vld [vmem:[#allocation13 + $0x3e8] sm:$0xff] }
 0x19d   : > { %19097 = vmatpush3.msra.mxu0 %v900_v4  ;;  %19116 = vmatpush3.msra.mxu1 %v908_v5  ;;  %v1539_v4 = vld [vmem:[#allocation13 + $0x3a0] sm:$0xff] }
 0x19e   : > { %19098 = vmatprep.subr.mxu0 %v22578_v3  ;;  %19117 = vmatprep.subr.mxu1 %v22578_v3  ;;  %v1547_v5 = vld [vmem:[#allocation13 + $0x3e0] sm:$0xff] }
 0x19f   : > { %19099 = vmatpush3.msra.mxu0 %v899_v6  ;;  %19118 = vmatpush3.msra.mxu1 %v907_v7  ;;  %v1538_v6 = vld [vmem:[#allocation13 + $0x398] sm:$0xff] }
 0x1a0   : > { %19100 = vmatprep.subr.mxu0 %v22578_v3  ;;  %19119 = vmatprep.subr.mxu1 %v22578_v3  ;;  %v1546_v7 = vld [vmem:[#allocation13 + $0x3d8] sm:$0xff] }
 0x1a1   : > { %19101 = vmatpush3.msra.mxu0 %v898_v8  ;;  %19120 = vmatpush3.msra.mxu1 %v906_v9  ;;  %v1537_v8 = vld [vmem:[#allocation13 + $0x390] sm:$0xff] }
 0x1a2   : > { %19102 = vmatprep.subr.mxu0 %v22578_v3  ;;  %19121 = vmatprep.subr.mxu1 %v22578_v3  ;;  %v1545_v9 = vld [vmem:[#allocation13 + $0x3d0] sm:$0xff] }
 0x1a3   : > { %19103 = vmatpush3.msra.mxu0 %v897_v10  ;;  %19104 = vmatprep.mubr.msk.f32.mxu0 %vm22579_vm1, %v22578_v3  ;;  %v1536_v10 = vld [vmem:[#allocation13 + $0x388] sm:$0xff] }
 0x1a4   : > { %19122 = vmatpush3.msra.mxu1 %v905_v11  ;;  %19123 = vmatprep.mubr.msk.f32.mxu1 %vm22579_vm1, %v22578_v3  ;;  %v1544_v11 = vld [vmem:[#allocation13 + $0x3c8] sm:$0xff] }
 0x1a5   : > { %19105 = vmatmul.mubr.msk.f32.vlgmr.msra.gmra.mxu0 %vm545_vm0, %v22899_v26  ;;  %19124 = vmatmul.mubr.msk.f32.vlgmr.msra.gmra.mxu1 %vm545_vm0, %v22899_v26 }
 0x1a6   : > { %19126 = vmatprep.subr.mxu0 %v22578_v3  ;;  %19145 = vmatprep.subr.mxu1 %v22578_v3 }
 0x1a7   : > { %19127 = vmatpush3.msra.mxu0 %v1209_v12  ;;  %19146 = vmatpush3.msra.mxu1 %v1217_v13  ;;  %v1535_v12 = vld [vmem:[#allocation13 + $0x380] sm:$0xff] }
 0x1a8   : > { %19128 = vmatprep.subr.mxu0 %v22578_v3  ;;  %19147 = vmatprep.subr.mxu1 %v22578_v3  ;;  %v1543_v13 = vld [vmem:[#allocation13 + $0x3c0] sm:$0xff] }
 0x1a9   : > { %19129 = vmatpush3.msra.mxu0 %v1208_v14  ;;  %19148 = vmatpush3.msra.mxu1 %v1216_v15  ;;  %v1847_v14 = vld [vmem:[#allocation13 + $0x438] sm:$0xff] }
 0x1aa   : > { %19130 = vmatprep.subr.mxu0 %v22578_v3  ;;  %19149 = vmatprep.subr.mxu1 %v22578_v3  ;;  %v1855_v15 = vld [vmem:[#allocation13 + $0x478] sm:$0xff] }
 0x1ab   : > { %19131 = vmatpush3.msra.mxu0 %v1207_v16  ;;  %19150 = vmatpush3.msra.mxu1 %v1215_v17  ;;  %v1846_v16 = vld [vmem:[#allocation13 + $0x430] sm:$0xff] }
 0x1ac   : > { %19132 = vmatprep.subr.mxu0 %v22578_v3  ;;  %19151 = vmatprep.subr.mxu1 %v22578_v3  ;;  %v1854_v17 = vld [vmem:[#allocation13 + $0x470] sm:$0xff] }
 0x1ad   : > { %19133 = vmatpush3.msra.mxu0 %v1206_v18  ;;  %19152 = vmatpush3.msra.mxu1 %v1214_v19  ;;  %v1845_v18 = vld [vmem:[#allocation13 + $0x428] sm:$0xff] }
 0x1ae   : > { %19134 = vmatprep.subr.mxu0 %v22578_v3  ;;  %19153 = vmatprep.subr.mxu1 %v22578_v3  ;;  %v1853_v19 = vld [vmem:[#allocation13 + $0x468] sm:$0xff] }
 0x1af   : > { %19135 = vmatpush3.msra.mxu0 %v1205_v20  ;;  %19154 = vmatpush3.msra.mxu1 %v1213_v21  ;;  %v1844_v20 = vld [vmem:[#allocation13 + $0x420] sm:$0xff] }
 0x1b0   : > { %19136 = vmatprep.subr.mxu0 %v22578_v3  ;;  %19155 = vmatprep.subr.mxu1 %v22578_v3  ;;  %v1852_v21 = vld [vmem:[#allocation13 + $0x460] sm:$0xff] }
 0x1b1   : > { %19137 = vmatpush3.msra.mxu0 %v1204_v22  ;;  %19156 = vmatpush3.msra.mxu1 %v1212_v23  ;;  %v1843_v22 = vld [vmem:[#allocation13 + $0x418] sm:$0xff] }
 0x1b2   : > { %19138 = vmatprep.subr.mxu0 %v22578_v3  ;;  %19157 = vmatprep.subr.mxu1 %v22578_v3  ;;  %v1851_v23 = vld [vmem:[#allocation13 + $0x458] sm:$0xff] }
 0x1b3   : > { %19139 = vmatpush3.msra.mxu0 %v1203_v24  ;;  %19158 = vmatpush3.msra.mxu1 %v1211_v25  ;;  %v1842_v24 = vld [vmem:[#allocation13 + $0x410] sm:$0xff] }
 0x1b4   : > { %19140 = vmatprep.subr.mxu0 %v22578_v3  ;;  %19159 = vmatprep.subr.mxu1 %v22578_v3  ;;  %v1850_v25 = vld [vmem:[#allocation13 + $0x450] sm:$0xff] }
 0x1b5   : > { %19141 = vmatpush3.msra.mxu0 %v1202_v27  ;;  %19142 = vmatprep.mubr.msk.f32.mxu0 %vm22579_vm1, %v22578_v3  ;;  %v1841_v27 = vld [vmem:[#allocation13 + $0x408] sm:$0xff] }
 0x1b6   : > { %19160 = vmatpush3.msra.mxu1 %v1210_v28  ;;  %19161 = vmatprep.mubr.msk.f32.mxu1 %vm22579_vm1, %v22578_v3  ;;  %v1849_v28 = vld [vmem:[#allocation13 + $0x448] sm:$0xff] }
 0x1b7   : > { %19143 = vmatmul.mubr.msk.f32.vlgmr.msra.gmra.mxu0 %vm545_vm0, %v22899_v26  ;;  %19162 = vmatmul.mubr.msk.f32.vlgmr.msra.gmra.mxu1 %vm545_vm0, %v22899_v26 }
 0x1b8   : > { %19164 = vmatprep.subr.mxu0 %v22578_v3  ;;  %19183 = vmatprep.subr.mxu1 %v22578_v3 }
 0x1b9   : > { %19165 = vmatpush3.msra.mxu0 %v1225_v29  ;;  %19184 = vmatpush3.msra.mxu1 %v1233_v30  ;;  %v1840_v29 = vld [vmem:[#allocation13 + $0x400] sm:$0xff] }
 0x1ba   : > { %19166 = vmatprep.subr.mxu0 %v22578_v3  ;;  %19185 = vmatprep.subr.mxu1 %v22578_v3  ;;  %v1848_v30 = vld [vmem:[#allocation13 + $0x440] sm:$0xff] }
 0x1bb   : > { %19167 = vmatpush3.msra.mxu0 %v1224_v31  ;;  %19186 = vmatpush3.msra.mxu1 %v1232_v32  ;;  %v1863_v31 = vld [vmem:[#allocation13 + $0x4b8] sm:$0xff] }
 0x1bc   : > { %19168 = vmatprep.subr.mxu0 %v22578_v3  ;;  %19187 = vmatprep.subr.mxu1 %v22578_v3  ;;  %v1871_v32 = vld [vmem:[#allocation13 + $0x4f8] sm:$0xff] }
 0x1bd   : > { %19169 = vmatpush3.msra.mxu0 %v1223_v33  ;;  %19188 = vmatpush3.msra.mxu1 %v1231_v34  ;;  %v1862_v33 = vld [vmem:[#allocation13 + $0x4b0] sm:$0xff] }
 0x1be   : > { %19170 = vmatprep.subr.mxu0 %v22578_v3  ;;  %19189 = vmatprep.subr.mxu1 %v22578_v3  ;;  %v1870_v34 = vld [vmem:[#allocation13 + $0x4f0] sm:$0xff] }
 0x1bf   : > { %19171 = vmatpush3.msra.mxu0 %v1222_v35  ;;  %19190 = vmatpush3.msra.mxu1 %v1230_v36  ;;  %v1861_v35 = vld [vmem:[#allocation13 + $0x4a8] sm:$0xff] }
 0x1c0   : > { %19172 = vmatprep.subr.mxu0 %v22578_v3  ;;  %19191 = vmatprep.subr.mxu1 %v22578_v3  ;;  %v1869_v36 = vld [vmem:[#allocation13 + $0x4e8] sm:$0xff] }
 0x1c1   : > { %19173 = vmatpush3.msra.mxu0 %v1221_v37  ;;  %19192 = vmatpush3.msra.mxu1 %v1229_v38  ;;  %v1860_v37 = vld [vmem:[#allocation13 + $0x4a0] sm:$0xff] }
 0x1c2   : > { %19174 = vmatprep.subr.mxu0 %v22578_v3  ;;  %19193 = vmatprep.subr.mxu1 %v22578_v3  ;;  %v1868_v38 = vld [vmem:[#allocation13 + $0x4e0] sm:$0xff] }
 0x1c3   : > { %19175 = vmatpush3.msra.mxu0 %v1220_v39  ;;  %19194 = vmatpush3.msra.mxu1 %v1228_v40  ;;  %v1859_v39 = vld [vmem:[#allocation13 + $0x498] sm:$0xff] }
 0x1c4   : > { %19176 = vmatprep.subr.mxu0 %v22578_v3  ;;  %19195 = vmatprep.subr.mxu1 %v22578_v3  ;;  %v1867_v40 = vld [vmem:[#allocation13 + $0x4d8] sm:$0xff] }
 0x1c5   : > { %19177 = vmatpush3.msra.mxu0 %v1219_v41  ;;  %19196 = vmatpush3.msra.mxu1 %v1227_v42  ;;  %v1858_v41 = vld [vmem:[#allocation13 + $0x490] sm:$0xff] }
 0x1c6   : > { %19178 = vmatprep.subr.mxu0 %v22578_v3  ;;  %19197 = vmatprep.subr.mxu1 %v22578_v3  ;;  %v1866_v42 = vld [vmem:[#allocation13 + $0x4d0] sm:$0xff] }
 0x1c7   : > { %19179 = vmatpush3.msra.mxu0 %v1218_v43  ;;  %19180 = vmatprep.mubr.msk.f32.mxu0 %vm22579_vm1, %v22578_v3  ;;  %v1857_v43 = vld [vmem:[#allocation13 + $0x488] sm:$0xff] }
 0x1c8   : > { %19198 = vmatpush3.msra.mxu1 %v1226_v44  ;;  %19199 = vmatprep.mubr.msk.f32.mxu1 %vm22579_vm1, %v22578_v3  ;;  %v1865_v44 = vld [vmem:[#allocation13 + $0x4c8] sm:$0xff] }
 0x1c9   : > { %19181 = vmatmul.mubr.msk.f32.vlgmr.msra.gmra.mxu0 %vm545_vm0, %v22899_v26  ;;  %19200 = vmatmul.mubr.msk.f32.vlgmr.msra.gmra.mxu1 %vm545_vm0, %v22899_v26 }
 0x1ca   : > { %19202 = vmatprep.subr.mxu0 %v22578_v3  ;;  %19221 = vmatprep.subr.mxu1 %v22578_v3 }
 0x1cb   : > { %19203 = vmatpush3.msra.mxu0 %v1526_v45  ;;  %19222 = vmatpush3.msra.mxu1 %v1534_v46  ;;  %v1856_v45 = vld [vmem:[#allocation13 + $0x480] sm:$0xff] }
 0x1cc   : > { %19204 = vmatprep.subr.mxu0 %v22578_v3  ;;  %19223 = vmatprep.subr.mxu1 %v22578_v3  ;;  %v1864_v46 = vld [vmem:[#allocation13 + $0x4c0] sm:$0xff] }
 0x1cd   : > { %19205 = vmatpush3.msra.mxu0 %v1525_v47  ;;  %19224 = vmatpush3.msra.mxu1 %v1533_v48 }
 0x1ce   : > { %19206 = vmatprep.subr.mxu0 %v22578_v3  ;;  %19225 = vmatprep.subr.mxu1 %v22578_v3 }
 0x1cf   : > { %19207 = vmatpush3.msra.mxu0 %v1524_v49  ;;  %19226 = vmatpush3.msra.mxu1 %v1532_v50 }
 0x1d0   : > { %19208 = vmatprep.subr.mxu0 %v22578_v3  ;;  %19227 = vmatprep.subr.mxu1 %v22578_v3 }
 0x1d1   : > { %19209 = vmatpush3.msra.mxu0 %v1523_v51  ;;  %19228 = vmatpush3.msra.mxu1 %v1531_v52 }
 0x1d2   : > { %19210 = vmatprep.subr.mxu0 %v22578_v3  ;;  %19229 = vmatprep.subr.mxu1 %v22578_v3 }
 0x1d3   : > { %19211 = vmatpush3.msra.mxu0 %v1522_v53  ;;  %19230 = vmatpush3.msra.mxu1 %v1530_v54 }
 0x1d4   : > { %19212 = vmatprep.subr.mxu0 %v22578_v3  ;;  %19231 = vmatprep.subr.mxu1 %v22578_v3 }
 0x1d5   : > { %19213 = vmatpush3.msra.mxu0 %v1521_v55  ;;  %19232 = vmatpush3.msra.mxu1 %v1529_v56  ;;  %v539_v55 = vld [vmem:[#allocation5] sm:$0xff] }
 0x1d6   : > { %19214 = vmatprep.subr.mxu0 %v22578_v3  ;;  %19233 = vmatprep.subr.mxu1 %v22578_v3 }
 0x1d7   : > { %19215 = vmatpush3.msra.mxu0 %v1520_v57  ;;  %19234 = vmatpush3.msra.mxu1 %v1528_v58 }
 0x1d8   : > { %19216 = vmatprep.subr.mxu0 %v22578_v3  ;;  %19235 = vmatprep.subr.mxu1 %v22578_v3 }
 0x1d9   : > { %19217 = vmatpush3.msra.mxu0 %v1519_v59  ;;  %19218 = vmatprep.mubr.msk.f32.mxu0 %vm22579_vm1, %v22578_v3 }
 0x1da   : > { %19236 = vmatpush3.msra.mxu1 %v1527_v60  ;;  %19237 = vmatprep.mubr.msk.f32.mxu1 %vm22579_vm1, %v22578_v3 }
 0x1db   : > { %19219 = vmatmul.mubr.msk.f32.vlgmr.msra.gmra.mxu0 %vm545_vm0, %v22899_v26  ;;  %19238 = vmatmul.mubr.msk.f32.vlgmr.msra.gmra.mxu1 %vm545_vm0, %v22899_v26 }
 0x1dc   : > { %19240 = vmatprep.subr.mxu0 %v22578_v3  ;;  %19259 = vmatprep.subr.mxu1 %v22578_v3 }
 0x1dd   : > { %19241 = vmatpush3.msra.mxu0 %v1542_v61  ;;  %19260 = vmatpush3.msra.mxu1 %v1550_v62 }
 0x1de   : > { %19242 = vmatprep.subr.mxu0 %v22578_v3  ;;  %19261 = vmatprep.subr.mxu1 %v22578_v3 }
 0x1df   : > { %19243 = vmatpush3.msra.mxu0 %v1541_v63  ;;  %19262 = vmatpush3.msra.mxu1 %v1549_v0 }
 0x1e0   : > { %19244 = vmatprep.subr.mxu0 %v22578_v3  ;;  %19263 = vmatprep.subr.mxu1 %v22578_v3 }
 0x1e1   : > { %19245 = vmatpush3.msra.mxu0 %v1540_v1  ;;  %19264 = vmatpush3.msra.mxu1 %v1548_v2 }
 0x1e2   : > { %19246 = vmatprep.subr.mxu0 %v22578_v3  ;;  %19265 = vmatprep.subr.mxu1 %v22578_v3 }
 0x1e3   : > { %19247 = vmatpush3.msra.mxu0 %v1539_v4  ;;  %19266 = vmatpush3.msra.mxu1 %v1547_v5 }
 0x1e4   : > { %19248 = vmatprep.subr.mxu0 %v22578_v3  ;;  %19267 = vmatprep.subr.mxu1 %v22578_v3 }
 0x1e5   : > { %19249 = vmatpush3.msra.mxu0 %v1538_v6  ;;  %19268 = vmatpush3.msra.mxu1 %v1546_v7 }
 0x1e6   : > { %19250 = vmatprep.subr.mxu0 %v22578_v3  ;;  %19269 = vmatprep.subr.mxu1 %v22578_v3 }
 0x1e7   : > { %19251 = vmatpush3.msra.mxu0 %v1537_v8  ;;  %19270 = vmatpush3.msra.mxu1 %v1545_v9 }
 0x1e8   : > { %19252 = vmatprep.subr.mxu0 %v22578_v3  ;;  %19271 = vmatprep.subr.mxu1 %v22578_v3 }
 0x1e9   : > { %19253 = vmatpush3.msra.mxu0 %v1536_v10  ;;  %19272 = vmatpush3.msra.mxu1 %v1544_v11 }
 0x1ea   : > { %19254 = vmatprep.subr.mxu0 %v22578_v3  ;;  %19273 = vmatprep.subr.mxu1 %v22578_v3 }
 0x1eb   : > { %19255 = vmatpush3.msra.mxu0 %v1535_v12  ;;  %19256 = vmatprep.mubr.msk.f32.mxu0 %vm22579_vm1, %v22578_v3 }
 0x1ec   : > { %19274 = vmatpush3.msra.mxu1 %v1543_v13  ;;  %19275 = vmatprep.mubr.msk.f32.mxu1 %vm22579_vm1, %v22578_v3 }
 0x1ed   : > { %19257 = vmatmul.mubr.msk.f32.vlgmr.msra.gmra.mxu0 %vm545_vm0, %v22899_v26  ;;  %19276 = vmatmul.mubr.msk.f32.vlgmr.msra.gmra.mxu1 %vm545_vm0, %v22899_v26 }
 0x1ee   : > { %19278 = vmatprep.subr.mxu0 %v22578_v3  ;;  %19297 = vmatprep.subr.mxu1 %v22578_v3 }
 0x1ef   : > { %19279 = vmatpush3.msra.mxu0 %v1847_v14  ;;  %19298 = vmatpush3.msra.mxu1 %v1855_v15 }
 0x1f0   : > { %19280 = vmatprep.subr.mxu0 %v22578_v3  ;;  %19299 = vmatprep.subr.mxu1 %v22578_v3 }
 0x1f1   : > { %19281 = vmatpush3.msra.mxu0 %v1846_v16  ;;  %19300 = vmatpush3.msra.mxu1 %v1854_v17 }
 0x1f2   : > { %19282 = vmatprep.subr.mxu0 %v22578_v3  ;;  %19301 = vmatprep.subr.mxu1 %v22578_v3 }
 0x1f3   : > { %19283 = vmatpush3.msra.mxu0 %v1845_v18  ;;  %19302 = vmatpush3.msra.mxu1 %v1853_v19 }
 0x1f4   : > { %19284 = vmatprep.subr.mxu0 %v22578_v3  ;;  %19303 = vmatprep.subr.mxu1 %v22578_v3 }
 0x1f5   : > { %19285 = vmatpush3.msra.mxu0 %v1844_v20  ;;  %19304 = vmatpush3.msra.mxu1 %v1852_v21 }
 0x1f6   : > { %19286 = vmatprep.subr.mxu0 %v22578_v3  ;;  %19305 = vmatprep.subr.mxu1 %v22578_v3 }
 0x1f7   : > { %19287 = vmatpush3.msra.mxu0 %v1843_v22  ;;  %19306 = vmatpush3.msra.mxu1 %v1851_v23 }
 0x1f8   : > { %19288 = vmatprep.subr.mxu0 %v22578_v3  ;;  %19307 = vmatprep.subr.mxu1 %v22578_v3 }
 0x1f9   : > { %19289 = vmatpush3.msra.mxu0 %v1842_v24  ;;  %19308 = vmatpush3.msra.mxu1 %v1850_v25 }
 0x1fa   : > { %19290 = vmatprep.subr.mxu0 %v22578_v3  ;;  %19309 = vmatprep.subr.mxu1 %v22578_v3 }
 0x1fb   : > { %19291 = vmatpush3.msra.mxu0 %v1841_v27  ;;  %19310 = vmatpush3.msra.mxu1 %v1849_v28 }
 0x1fc   : > { %19292 = vmatprep.subr.mxu0 %v22578_v3  ;;  %19311 = vmatprep.subr.mxu1 %v22578_v3 }
 0x1fd   : > { %19293 = vmatpush3.msra.mxu0 %v1840_v29  ;;  %19294 = vmatprep.mubr.msk.f32.mxu0 %vm22579_vm1, %v22578_v3 }
 0x1fe   : > { %19312 = vmatpush3.msra.mxu1 %v1848_v30  ;;  %19313 = vmatprep.mubr.msk.f32.mxu1 %vm22579_vm1, %v22578_v3 }
 0x1ff   : > { %19295 = vmatmul.mubr.msk.f32.vlgmr.msra.gmra.mxu0 %vm545_vm0, %v22899_v26  ;;  %19314 = vmatmul.mubr.msk.f32.vlgmr.msra.gmra.mxu1 %vm545_vm0, %v22899_v26 }
 0x200   : > { %19316 = vmatprep.subr.mxu0 %v22578_v3  ;;  %19335 = vmatprep.subr.mxu1 %v22578_v3 }
 0x201   : > { %19317 = vmatpush3.msra.mxu0 %v1863_v31  ;;  %19336 = vmatpush3.msra.mxu1 %v1871_v32 }
 0x202   : > { %19318 = vmatprep.subr.mxu0 %v22578_v3  ;;  %19337 = vmatprep.subr.mxu1 %v22578_v3 }
 0x203   : > { %19319 = vmatpush3.msra.mxu0 %v1862_v33  ;;  %19338 = vmatpush3.msra.mxu1 %v1870_v34 }
 0x204   : > { %19320 = vmatprep.subr.mxu0 %v22578_v3  ;;  %19339 = vmatprep.subr.mxu1 %v22578_v3 }
 0x205   : > { %19321 = vmatpush3.msra.mxu0 %v1861_v35  ;;  %19340 = vmatpush3.msra.mxu1 %v1869_v36 }
 0x206   : > { %19322 = vmatprep.subr.mxu0 %v22578_v3  ;;  %19341 = vmatprep.subr.mxu1 %v22578_v3 }
 0x207   : > { %19323 = vmatpush3.msra.mxu0 %v1860_v37  ;;  %19342 = vmatpush3.msra.mxu1 %v1868_v38 }
 0x208   : > { %19324 = vmatprep.subr.mxu0 %v22578_v3  ;;  %19343 = vmatprep.subr.mxu1 %v22578_v3 }
 0x209   : > { %19325 = vmatpush3.msra.mxu0 %v1859_v39  ;;  %19344 = vmatpush3.msra.mxu1 %v1867_v40 }
 0x20a   : > { %19326 = vmatprep.subr.mxu0 %v22578_v3  ;;  %19345 = vmatprep.subr.mxu1 %v22578_v3 }
 0x20b   : > { %19327 = vmatpush3.msra.mxu0 %v1858_v41  ;;  %19346 = vmatpush3.msra.mxu1 %v1866_v42 }
 0x20c   : > { %19328 = vmatprep.subr.mxu0 %v22578_v3  ;;  %19347 = vmatprep.subr.mxu1 %v22578_v3 }
 0x20d   : > { %19329 = vmatpush3.msra.mxu0 %v1857_v43  ;;  %19348 = vmatpush3.msra.mxu1 %v1865_v44 }
 0x20e   : > { %19330 = vmatprep.subr.mxu0 %v22578_v3  ;;  %19349 = vmatprep.subr.mxu1 %v22578_v3 }
 0x20f   : > { %19331 = vmatpush3.msra.mxu0 %v1856_v45  ;;  %19332 = vmatprep.mubr.msk.f32.mxu0 %vm22579_vm1, %v22578_v3 }
 0x210   : > { %19350 = vmatpush3.msra.mxu1 %v1864_v46  ;;  %19351 = vmatprep.mubr.msk.f32.mxu1 %vm22579_vm1, %v22578_v3 }
 0x211   : > { %19333 = vmatmul.mubr.msk.f32.vlgmr.msra.gmra.mxu0 %vm545_vm0, %v22899_v26  ;;  %19352 = vmatmul.mubr.msk.f32.vlgmr.msra.gmra.mxu1 %vm545_vm0, %v22899_v26  ;;  %v540_v26 = vld [vmem:[#allocation7] sm:$0xff] }
 0x212   : > { %19354 = vmatprep.subr.mxu0 %v22578_v3  ;;  %19356 = vmatprep.mubr.msk.f32.mxu0 %vm22579_vm1, %v22578_v3 }
 0x213   : > { %19379 = vmatprep.subr.mxu1 %v22578_v3  ;;  %19381 = vmatprep.mubr.msk.f32.mxu1 %vm22579_vm1, %v22578_v3 }
 0x230   : > { %v662_v47 = vpop.f32.mrf.mxu0  ;;  %v732_v48 = vpop.f32.mrf.mxu1 }
 0x231   : > { %v876_v58 = vmul.f32 %v662_v47, %v539_v55  ;;  %v877_v59 = vmul.f32 %v732_v48, %v539_v55 }
 0x232   : > { %v18992_v49 = vpop.f32.mrf.mxu0  ;;  %v19011_v50 = vpop.f32.mrf.mxu1 }
 0x241   : > { %v802_v51 = vpop.f32.mrf.mxu0  ;;  %v872_v52 = vpop.f32.mrf.mxu1 }
 0x242   : > { %v878_v5 = vmul.f32 %v802_v51, %v539_v55  ;;  %v879_v6 = vmul.f32 %v872_v52, %v539_v55  ;;  %v541_v51 = vld [vmem:[#allocation8] sm:$0xff] }
 0x243   : > { %v19030_v53 = vpop.f32.mrf.mxu0  ;;  %v19049_v54 = vpop.f32.mrf.mxu1 }
 0x253   : > { %v979_v56 = vpop.f32.mrf.mxu0  ;;  %v1049_v57 = vpop.f32.mrf.mxu1 }
 0x254   : > { %v1193_v60 = vmul.f32 %v979_v56, %v540_v26  ;;  %v1194_v61 = vmul.f32 %v1049_v57, %v540_v26 }
 0x255   : > { %v19068_v62 = vpop.f32.mrf.mxu0  ;;  %v19087_v63 = vpop.f32.mrf.mxu1 }
 0x256   : > { %v1197_v0 = vadd.f32 %v1193_v60, %v876_v58  ;;  %v1198_v1 = vadd.f32 %v1194_v61, %v877_v59 }
 0x265   : > { %v1119_v2 = vpop.f32.mrf.mxu0  ;;  %v1189_v4 = vpop.f32.mrf.mxu1 }
 0x266   : > { %v1195_v7 = vmul.f32 %v1119_v2, %v540_v26  ;;  %v1196_v8 = vmul.f32 %v1189_v4, %v540_v26 }
 0x267   : > { %v19106_v9 = vpop.f32.mrf.mxu0  ;;  %v19125_v10 = vpop.f32.mrf.mxu1 }
 0x268   : > { %v1199_v11 = vadd.f32 %v1195_v7, %v878_v5  ;;  %v1200_v12 = vadd.f32 %v1196_v8, %v879_v6 }
 0x277   : > { %v1300_v13 = vpop.f32.mrf.mxu0  ;;  %v1370_v14 = vpop.f32.mrf.mxu1 }
 0x278   : > { %v1514_v23 = vmul.f32 %v1300_v13, %v539_v55  ;;  %v1515_v30 = vmul.f32 %v1370_v14, %v539_v55 }
 0x279   : > { %v19144_v15 = vpop.f32.mrf.mxu0  ;;  %v19163_v16 = vpop.f32.mrf.mxu1 }
 0x289   : > { %v1440_v17 = vpop.f32.mrf.mxu0  ;;  %v1510_v18 = vpop.f32.mrf.mxu1 }
 0x28a   : > { %v1516_v34 = vmul.f32 %v1440_v17, %v539_v55  ;;  %v1517_v40 = vmul.f32 %v1510_v18, %v539_v55 }
 0x28b   : > { %v19182_v19 = vpop.f32.mrf.mxu0  ;;  %v19201_v20 = vpop.f32.mrf.mxu1 }
 0x29b   : > { %v1617_v21 = vpop.f32.mrf.mxu0  ;;  %v1687_v22 = vpop.f32.mrf.mxu1 }
 0x29c   : > { %v1831_v24 = vmul.f32 %v1617_v21, %v540_v26  ;;  %v1832_v29 = vmul.f32 %v1687_v22, %v540_v26 }
 0x29d   : > { %v19220_v25 = vpop.f32.mrf.mxu0  ;;  %v19239_v27 = vpop.f32.mrf.mxu1 }
 0x29e   : > { %v1835_v28 = vadd.f32 %v1831_v24, %v1514_v23  ;;  %v1836_v31 = vadd.f32 %v1832_v29, %v1515_v30 }
 0x2a0   : > { %19355 = vmatpush3.xpose.msk.msra.mxu0 %vm2152_vm2, %v1835_v28 }
 0x2a1   : > { %19359 = vmatprep.subr.mxu0 %v22578_v3 }
 0x2a3   : > { %19357 = vmatmul.mubr.msk.f32.vlgmr.msra.gmra.mxu0 %vm2152_vm2, %v1197_v0 }
 0x2a4   : > { %19360 = vmatpush3.xpose.msk.msra.mxu0 %vm2152_vm2, %v1836_v31  ;;  %19361 = vmatprep.mubr.msk.f32.mxu0 %vm22579_vm1, %v22578_v3 }
 0x2a5   : > { %19364 = vmatprep.subr.mxu0 %v22578_v3 }
 0x2a7   : > { %19362 = vmatmul.mubr.msk.f32.vlgmr.msra.gmra.mxu0 %vm2152_vm2, %v1198_v1 }
 0x2a8   : > { %19366 = vmatprep.mubr.msk.f32.mxu0 %vm22579_vm1, %v22578_v3 }
 0x2ad   : > { %v1757_v32 = vpop.f32.mrf.mxu0  ;;  %v1827_v33 = vpop.f32.mrf.mxu1 }
 0x2ae   : > { %v1833_v35 = vmul.f32 %v1757_v32, %v540_v26  ;;  %v1834_v39 = vmul.f32 %v1827_v33, %v540_v26 }
 0x2af   : > { %v19258_v36 = vpop.f32.mrf.mxu0  ;;  %v19277_v37 = vpop.f32.mrf.mxu1 }
 0x2b0   : > { %v1837_v38 = vadd.f32 %v1833_v35, %v1516_v34  ;;  %v1838_v41 = vadd.f32 %v1834_v39, %v1517_v40 }
 0x2b2   : > { %19365 = vmatpush3.xpose.msk.msra.mxu0 %vm2152_vm2, %v1837_v38  ;;  %v2803_v38 = vld [vmem:[#allocation14 + $0x8] sm:$0xff] }
 0x2b3   : > { %19369 = vmatprep.subr.mxu0 %v22578_v3 }
 0x2b5   : > { %19367 = vmatmul.mubr.msk.f32.vlgmr.msra.gmra.mxu0 %vm2152_vm2, %v1199_v11 }
 0x2b6   : > { %19370 = vmatpush3.xpose.msk.msra.mxu0 %vm2152_vm2, %v1838_v41  ;;  %19371 = vmatprep.mubr.msk.f32.mxu0 %vm22579_vm1, %v22578_v3  ;;  %v2802_v41 = vld [vmem:[#allocation14] sm:$0xff] }
 0x2b7   : > { %19374 = vmatprep.subr.mxu0 %v22578_v3 }
 0x2b9   : > { %19372 = vmatmul.mubr.msk.f32.vlgmr.msra.gmra.mxu0 %vm2152_vm2, %v1200_v12 }
 0x2ba   : > { %19376 = vmatprep.mubr.msk.f32.mxu0 %vm22579_vm1, %v22578_v3 }
 0x2bf   : > { %v1938_v42 = vpop.f32.mrf.mxu0  ;;  %v2008_v43 = vpop.f32.mrf.mxu1 }
 0x2c0   : > { %19375 = vmatpush3.msra.mxu0 %v1938_v42  ;;  %19380 = vmatpush3.msra.mxu1 %v2008_v43  ;;  %v2805_v42 = vld [vmem:[#allocation14 + $0x18] sm:$0xff]  ;;  %v2804_v43 = vld [vmem:[#allocation14 + $0x10] sm:$0xff] }
 0x2c1   : > { %v19296_v44 = vpop.f32.mrf.mxu0  ;;  %v19315_v45 = vpop.f32.mrf.mxu1  ;;  %19384 = vmatprep.subr.mxu0 %v22578_v3  ;;  %19389 = vmatprep.subr.mxu1 %v22578_v3 }
 0x2c2   : > { %v2807_v44 = vld [vmem:[#allocation14 + $0x28] sm:$0xff] }
 0x2d1   : > { %v23147_v46 = vpop.f32.mrf.mxu0  ;;  %v23149_v47 = vpop.f32.mrf.mxu1 }
 0x2d3   : > { %v19334_v48 = vpop.f32.mrf.mxu0  ;;  %v19353_v49 = vpop.f32.mrf.mxu1 }
 0x2d4   : > { %v2809_v48 = vld [vmem:[#allocation14 + $0x38] sm:$0xff] }
 0x363   : > { %v2225_v50 = vpop.f32.mrf.mxu0 }
 0x364   : > { %v2457_v52 = vmul.f32 0.25, %v2225_v50  ;;  %v2808_v50 = vld [vmem:[#allocation14 + $0x30] sm:$0xff] }
 0x365   : > { %v19358_v53 = vpop.f32.mrf.mxu0 }
 0x366   : > { %v2461_v54 = vadd.f32 %v2457_v52, %v541_v51 }
 0x367   : > { %v2301_v55 = vpop.f32.mrf.mxu0 }
 0x368   : > { %v2458_v26 = vmul.f32 0.25, %v2301_v55  ;;  %v2466_v56 = vsel %vm2465_vm3, %v2461_v54, -inf }
 0x369   : > { %2467 = vmax.xlane.f32.xlu0 %v2466_v56  ;;  %v19363_v57 = vpop.f32.mrf.mxu0 }
 0x36a   : > { %v2462_v58 = vadd.f32 %v2458_v26, %v541_v51 }
 0x36c   : > { %v2469_v59 = vsel %vm2465_vm3, %v2462_v58, -inf }
 0x36d   : > { %2470 = vmax.xlane.f32.xlu1 %v2469_v59 }
 0x375   : > { %v2377_v60 = vpop.f32.mrf.mxu0 }
 0x376   : > { %v2459_v61 = vmul.f32 0.25, %v2377_v60 }
 0x377   : > { %v19368_v62 = vpop.f32.mrf.mxu0 }
 0x378   : > { %v2463_v63 = vadd.f32 %v2459_v61, %v541_v51 }
 0x379   : > { %v2453_v0 = vpop.f32.mrf.mxu0 }
 0x37a   : > { %v2460_v1 = vmul.f32 0.25, %v2453_v0  ;;  %v2472_v2 = vsel %vm2465_vm3, %v2463_v63, -inf }
 0x37b   : > { %2473 = vmax.xlane.f32.xlu1 %v2472_v2  ;;  %v19373_v4 = vpop.f32.mrf.mxu0 }
 0x37c   : > { %v2464_v5 = vadd.f32 %v2460_v1, %v541_v51 }
 0x37e   : > { %v2475_v6 = vsel %vm2465_vm3, %v2464_v5, -inf }
 0x37f   : > { %2476 = vmax.xlane.f32.xlu0 %v2475_v6 }
 0x3f2   : > { %v2468_v7 = vpop.xlane.xlu0 %2467 }
 0x3f3   : > { %v2478_v8 = vsub.f32 %v2461_v54, %v2468_v7  ;;  %v22172_v7 = vld [vmem:[%s22844_s6] sm:$0xff] }
 0x3f5   : > { %v2482_v9 = vmul.f32 1.442695, %v2478_v8 }
 0x3f6   : > { %v2471_v10 = vpop.xlane.xlu1 %2470 }
 0x3f7   : > { %22028 = vpow2.f32 %v2482_v9  ;;  %v2479_v11 = vsub.f32 %v2462_v58, %v2471_v10 }
 0x3f9   : > { %v2484_v12 = vmul.f32 1.442695, %v2479_v11  ;;  %v3141_v11 = vld [vmem:[#allocation16 + $0x78] sm:$0xff] }
 0x3fb   : > { %22030 = vpow2.f32 %v2484_v12  ;;  %v3140_v12 = vld [vmem:[#allocation16 + $0x70] sm:$0xff] }
 0x404   : > { %v22029_v13 = vpop.eup %22028  ;;  %v2474_v14 = vpop.xlane.xlu1 %2473 }
 0x405   : > { %v2480_v15 = vsub.f32 %v2463_v63, %v2474_v14  ;;  %v2490_v16 = vsel %vm2465_vm3, %v22029_v13, 0.0  ;;  %v3138_v14 = vld [vmem:[#allocation16 + $0x60] sm:$0xff] }
 0x406   : > { %2491 = vadd.xlane.f32.xlu1 %v2490_v16  ;;  %v3136_v16 = vld [vmem:[#allocation16 + $0x50] sm:$0xff] }
 0x407   : > { %v2486_v17 = vmul.f32 1.442695, %v2480_v15  ;;  %v3137_v15 = vld [vmem:[#allocation16 + $0x58] sm:$0xff] }
 0x408   : > { %v22031_v18 = vpop.eup %22030  ;;  %v2477_v19 = vpop.xlane.xlu0 %2476 }
 0x409   : > { %22032 = vpow2.f32 %v2486_v17  ;;  %v2481_v20 = vsub.f32 %v2464_v5, %v2477_v19  ;;  %v2493_v21 = vsel %vm2465_vm3, %v22031_v18, 0.0  ;;  %v3135_v17 = vld [vmem:[#allocation16 + $0x48] sm:$0xff]  ;;  %v3133_v19 = vld [vmem:[#allocation16 + $0x38] sm:$0xff] }
 0x40a   : > { %2494 = vadd.xlane.f32.xlu0 %v2493_v21  ;;  %v3131_v21 = vld [vmem:[#allocation16 + $0x28] sm:$0xff] }
 0x40b   : > { %v2488_v22 = vmul.f32 1.442695, %v2481_v20  ;;  %v3132_v20 = vld [vmem:[#allocation16 + $0x30] sm:$0xff] }
 0x40d   : > { %22034 = vpow2.f32 %v2488_v22  ;;  %v3130_v22 = vld [vmem:[#allocation16 + $0x20] sm:$0xff] }
 0x416   : > { %v22033_v23 = vpop.eup %22032 }
 0x417   : > { %v2496_v24 = vsel %vm2465_vm3, %v22033_v23, 0.0 }
 0x418   : > { %2497 = vadd.xlane.f32.xlu1 %v2496_v24  ;;  %v3128_v24 = vld [vmem:[#allocation16 + $0x10] sm:$0xff] }
 0x41a   : > { %v22035_v25 = vpop.eup %22034 }
 0x41b   : > { %v2499_v27 = vsel %vm2465_vm3, %v22035_v25, 0.0 }
 0x41c   : > { %2500 = vadd.xlane.f32.xlu0 %v2499_v27  ;;  %v3126_v27 = vld [vmem:[#allocation16] sm:$0xff] }
 0x48f   : > { %v2492_v28 = vpop.xlane.xlu1 %2491 }
 0x490   : > { %22036 = vrcp.f32 %v2492_v28 }
 0x493   : > { %v2495_v29 = vpop.xlane.xlu0 %2494 }
 0x494   : > { %22038 = vrcp.f32 %v2495_v29 }
 0x49d   : > { %v22037_v30 = vpop.eup %22036 }
 0x49e   : > { %v2503_v31 = vmul.f32 %v22037_v30, %v22029_v13  ;;  %v3139_v13 = vld [vmem:[#allocation16 + $0x68] sm:$0xff] }
 0x4a0   : > { %19377 = vmatmul.mubr.msk.f32.vlgmr.msra.gmra.mxu0 %vm2465_vm3, %v2503_v31 }
 0x4a1   : > { %v22039_v32 = vpop.eup %22038  ;;  %v2498_v33 = vpop.xlane.xlu1 %2497  ;;  %19385 = vmatpush3.msra.mxu0 %v23147_v46  ;;  %19386 = vmatprep.mubr.msk.f32.mxu0 %vm22579_vm1, %v22578_v3  ;;  %v2806_v46 = vld [vmem:[#allocation14 + $0x20] sm:$0xff] }
 0x4a2   : > { %22040 = vrcp.f32 %v2498_v33  ;;  %v2505_v34 = vmul.f32 %v22039_v32, %v22031_v18  ;;  %19394 = vmatprep.subr.mxu0 %v22578_v3  ;;  %v3134_v18 = vld [vmem:[#allocation16 + $0x40] sm:$0xff]  ;;  %v17422_v32 = vld [vmem:[#allocation11] ss:$0 sm:$0xff] }
 0x4a4   : > { %19382 = vmatmul.mubr.msk.f32.vlgmr.msra.gmra.mxu1 %vm2465_vm3, %v2505_v34 }
 0x4a5   : > { %v2501_v35 = vpop.xlane.xlu0 %2500  ;;  %19390 = vmatpush3.msra.mxu1 %v23149_v47  ;;  %19391 = vmatprep.mubr.msk.f32.mxu1 %vm22579_vm1, %v22578_v3 }
 0x4a6   : > { %22042 = vrcp.f32 %v2501_v35  ;;  %19401 = vmatprep.subr.mxu1 %v22578_v3  ;;  %v3239_v35 = vld [vmem:[#allocation17 + $0x78] sm:$0xff] }
 0x4af   : > { %v22041_v36 = vpop.eup %22040 }
 0x4b0   : > { %v2507_v37 = vmul.f32 %v22041_v36, %v22033_v23  ;;  %v3129_v23 = vld [vmem:[#allocation16 + $0x18] sm:$0xff]  ;;  %v3238_v36 = vld [vmem:[#allocation17 + $0x70] sm:$0xff] }
 0x4b2   : > { %19387 = vmatmul.mubr.msk.f32.vlgmr.msra.gmra.mxu0 %vm2465_vm3, %v2507_v37  ;;  %v3237_v37 = vld [vmem:[#allocation17 + $0x68] sm:$0xff] }
 0x4b3   : > { %v22043_v39 = vpop.eup %22042  ;;  %19395 = vmatpush3.msra.mxu0 %v2803_v38  ;;  %19398 = vmatprep.mubr.msk.f32.mxu0 %vm22579_vm1, %v22578_v3  ;;  %v3236_v38 = vld [vmem:[#allocation17 + $0x60] sm:$0xff] }
 0x4b4   : > { %v2509_v40 = vmul.f32 %v22043_v39, %v22035_v25  ;;  %19396 = vmatprep.subr.mxu0 %v22578_v3  ;;  %v3127_v25 = vld [vmem:[#allocation16 + $0x8] sm:$0xff]  ;;  %v3235_v39 = vld [vmem:[#allocation17 + $0x58] sm:$0xff] }
 0x4b5   : > { %19397 = vmatpush3.msra.mxu0 %v2802_v41  ;;  %v3233_v41 = vld [vmem:[#allocation17 + $0x48] sm:$0xff] }
 0x4b6   : > { %19392 = vmatmul.mubr.msk.f32.vlgmr.msra.gmra.mxu1 %vm2465_vm3, %v2509_v40  ;;  %19408 = vmatprep.subr.mxu0 %v22578_v3  ;;  %v3234_v40 = vld [vmem:[#allocation17 + $0x50] sm:$0xff] }
 0x4b7   : > { %19405 = vmatprep.mubr.msk.f32.mxu1 %vm22579_vm1, %v22578_v3  ;;  %19402 = vmatpush3.msra.mxu1 %v2805_v42  ;;  %v3232_v42 = vld [vmem:[#allocation17 + $0x40] sm:$0xff] }
 0x4b8   : > { %19403 = vmatprep.subr.mxu1 %v22578_v3 }
 0x4b9   : > { %19404 = vmatpush3.msra.mxu1 %v2804_v43  ;;  %v3231_v43 = vld [vmem:[#allocation17 + $0x38] sm:$0xff] }
 0x4ba   : > { %19415 = vmatprep.subr.mxu1 %v22578_v3 }
 0x560   : > { %v2579_v45 = vpop.f32.mrf.mxu0 }
 0x561   : > { %19399 = vmatmul.mubr.msk.f32.vlgmr.msra.gmra.mxu0 %vm2152_vm2, %v2579_v45  ;;  %v3229_v45 = vld [vmem:[#allocation17 + $0x28] sm:$0xff] }
 0x562   : > { %v19378_v47 = vpop.f32.mrf.mxu0  ;;  %19409 = vmatpush3.msra.mxu0 %v2807_v44  ;;  %19412 = vmatprep.mubr.msk.f32.mxu0 %vm22579_vm1, %v22578_v3  ;;  %v3230_v44 = vld [vmem:[#allocation17 + $0x30] sm:$0xff] }
 0x563   : > { %19410 = vmatprep.subr.mxu0 %v22578_v3  ;;  %v3227_v47 = vld [vmem:[#allocation17 + $0x18] sm:$0xff] }
 0x564   : > { %v2652_v49 = vpop.f32.mrf.mxu1  ;;  %19411 = vmatpush3.msra.mxu0 %v2806_v46  ;;  %v3228_v46 = vld [vmem:[#allocation17 + $0x20] sm:$0xff] }
 0x565   : > { %19406 = vmatmul.mubr.msk.f32.vlgmr.msra.gmra.mxu1 %vm2152_vm2, %v2652_v49  ;;  %3161 = vmatprep.subr.mxu0 %v3141_v11  ;;  %v3225_v49 = vld [vmem:[#allocation17 + $0x8] sm:$0xff]  ;;  %v3331_v11 = vld [vmem:[#allocation13 + $0x510] sm:$0xff] }
 0x566   : > { %v19383_v51 = vpop.f32.mrf.mxu1  ;;  %19416 = vmatpush3.msra.mxu1 %v2809_v48  ;;  %19419 = vmatprep.mubr.msk.f32.mxu1 %vm22579_vm1, %v22578_v3  ;;  %v3226_v48 = vld [vmem:[#allocation17 + $0x10] sm:$0xff] }
 0x567   : > { %19417 = vmatprep.subr.mxu1 %v22578_v3 }
 0x568   : > { %19418 = vmatpush3.msra.mxu1 %v2808_v50  ;;  %v3224_v50 = vld [vmem:[#allocation17] sm:$0xff] }
 0x569   : > { %19422 = vmatprep.subr.mxu1 %v22578_v3 }
 0x572   : > { %v2725_v52 = vpop.f32.mrf.mxu0 }
 0x573   : > { %19413 = vmatmul.mubr.msk.f32.vlgmr.msra.gmra.mxu0 %vm2152_vm2, %v2725_v52 }
 0x574   : > { %v19388_v53 = vpop.f32.mrf.mxu0  ;;  %3209 = vmatprep.mubr.f32.mxu0 %v22578_v3  ;;  %3162 = vmatpush1.msra.mxu0 %v3140_v12  ;;  %v3347_v12 = vld [vmem:[#allocation13 + $0x590] sm:$0xff] }
 0x575   : > { %3163 = vmatprep.subr.mxu0 %v3139_v13  ;;  %v3330_v13 = vld [vmem:[#allocation13 + $0x508] sm:$0xff] }
 0x576   : > { %v2798_v54 = vpop.f32.mrf.mxu1  ;;  %3164 = vmatpush1.msra.mxu0 %v3138_v14  ;;  %v3346_v14 = vld [vmem:[#allocation13 + $0x588] sm:$0xff] }
 0x577   : > { %19420 = vmatmul.mubr.msk.f32.vlgmr.msra.gmra.mxu1 %vm2152_vm2, %v2798_v54  ;;  %3165 = vmatprep.subr.mxu0 %v3137_v15  ;;  %v3329_v15 = vld [vmem:[#allocation13 + $0x500] sm:$0xff] }
 0x578   : > { %v19393_v55 = vpop.f32.mrf.mxu1  ;;  %19454 = vmatprep.mubr.msk.f32.mxu1 %vm22579_vm1, %v22578_v3  ;;  %3166 = vmatpush1.msra.mxu0 %v3136_v16  ;;  %v3345_v16 = vld [vmem:[#allocation13 + $0x580] sm:$0xff] }
 0x579   : > { %3167 = vmatprep.subr.mxu0 %v3135_v17  ;;  %19423 = vmatpush3.msra.mxu1 %v3239_v35  ;;  %v3339_v35 = vld [vmem:[#allocation13 + $0x550] sm:$0xff] }
 0x57a   : > { %3168 = vmatpush1.msra.mxu0 %v3134_v18  ;;  %19424 = vmatprep.subr.mxu1 %v22578_v3 }
 0x57b   : > { %3169 = vmatprep.subr.mxu0 %v3133_v19  ;;  %19425 = vmatpush3.msra.mxu1 %v3238_v36  ;;  %v3651_v36 = vld [vmem:[#allocation13 + $0x610] sm:$0xff] }
 0x57c   : > { %3170 = vmatpush1.msra.mxu0 %v3132_v20  ;;  %19426 = vmatprep.subr.mxu1 %v22578_v3 }
 0x57d   : > { %3171 = vmatprep.subr.mxu0 %v3131_v21  ;;  %19427 = vmatpush3.msra.mxu1 %v3237_v37  ;;  %v17424_v21 = vld [vmem:[#allocation10 + $0x1] ss:$0 sm:$0xff]  ;;  %v3338_v37 = vld [vmem:[#allocation13 + $0x548] sm:$0xff] }
 0x57e   : > { %3172 = vmatpush1.msra.mxu0 %v3130_v22  ;;  %19428 = vmatprep.subr.mxu1 %v22578_v3 }
 0x57f   : > { %3173 = vmatprep.subr.mxu0 %v3129_v23  ;;  %19429 = vmatpush3.msra.mxu1 %v3236_v38  ;;  %v3650_v38 = vld [vmem:[#allocation13 + $0x608] sm:$0xff] }
 0x580   : > { %3174 = vmatpush1.msra.mxu0 %v3128_v24  ;;  %19430 = vmatprep.subr.mxu1 %v22578_v3  ;;  %v3344_v24 = vld [vmem:[#allocation13 + $0x578] sm:$0xff] }
 0x581   : > { %3175 = vmatprep.subr.mxu0 %v3127_v25  ;;  %19431 = vmatpush3.msra.mxu1 %v3235_v39  ;;  %v3656_v25 = vld [vmem:[#allocation13 + $0x638] sm:$0xff]  ;;  %v3337_v39 = vld [vmem:[#allocation13 + $0x540] sm:$0xff] }
 0x582   : > { %3176 = vmatpush1.msra.mxu0 %v3126_v27  ;;  %19432 = vmatprep.subr.mxu1 %v22578_v3  ;;  %v3343_v27 = vld [vmem:[#allocation13 + $0x570] sm:$0xff] }
 0x583   : > { %19457 = vmatprep.subr.mxu0 %v22578_v3  ;;  %19433 = vmatpush3.msra.mxu1 %v3234_v40  ;;  %v3649_v40 = vld [vmem:[#allocation13 + $0x600] sm:$0xff] }
 0x584   : > { %19434 = vmatprep.subr.mxu1 %v22578_v3 }
 0x585   : > { %19435 = vmatpush3.msra.mxu1 %v3233_v41  ;;  %v3360_v41 = vld [vmem:[#allocation13 + $0x5f8] sm:$0xff] }
 0x586   : > { %19436 = vmatprep.subr.mxu1 %v22578_v3 }
 0x587   : > { %19437 = vmatpush3.msra.mxu1 %v3232_v42  ;;  %v3672_v42 = vld [vmem:[#allocation13 + $0x6b8] sm:$0xff] }
 0x588   : > { %19438 = vmatprep.subr.mxu1 %v22578_v3 }
 0x589   : > { %19439 = vmatpush3.msra.mxu1 %v3231_v43  ;;  %v3359_v43 = vld [vmem:[#allocation13 + $0x5f0] sm:$0xff] }
 0x58a   : > { %19440 = vmatprep.subr.mxu1 %v22578_v3 }
 0x58b   : > { %19441 = vmatpush3.msra.mxu1 %v3230_v44  ;;  %v3671_v44 = vld [vmem:[#allocation13 + $0x6b0] sm:$0xff] }
 0x58c   : > { %19442 = vmatprep.subr.mxu1 %v22578_v3 }
 0x58d   : > { %19443 = vmatpush3.msra.mxu1 %v3229_v45  ;;  %v3358_v45 = vld [vmem:[#allocation13 + $0x5e8] sm:$0xff] }
 0x58e   : > { %19444 = vmatprep.subr.mxu1 %v22578_v3 }
 0x58f   : > { %19445 = vmatpush3.msra.mxu1 %v3228_v46  ;;  %v3670_v46 = vld [vmem:[#allocation13 + $0x6a8] sm:$0xff] }
 0x590   : > { %19446 = vmatprep.subr.mxu1 %v22578_v3 }
 0x591   : > { %19447 = vmatpush3.msra.mxu1 %v3227_v47  ;;  %v3357_v47 = vld [vmem:[#allocation13 + $0x5e0] sm:$0xff] }
 0x592   : > { %19448 = vmatprep.subr.mxu1 %v22578_v3 }
 0x593   : > { %19449 = vmatpush3.msra.mxu1 %v3226_v48  ;;  %v3669_v48 = vld [vmem:[#allocation13 + $0x6a0] sm:$0xff] }
 0x594   : > { %19450 = vmatprep.subr.mxu1 %v22578_v3 }
 0x595   : > { %19451 = vmatpush3.msra.mxu1 %v3225_v49  ;;  %v3356_v49 = vld [vmem:[#allocation13 + $0x5d8] sm:$0xff] }
 0x596   : > { %19452 = vmatprep.subr.mxu1 %v22578_v3 }
 0x597   : > { %19453 = vmatpush3.msra.mxu1 %v3224_v50  ;;  %v3668_v50 = vld [vmem:[#allocation13 + $0x698] sm:$0xff] }
 0x598   : > { %19495 = vmatprep.subr.mxu1 %v22578_v3 }
 0x621   : > { %v2879_v26 = vpop.f32.mrf.mxu0 }
 0x622   : > { %v3102_v61 = vsel %vm545_vm0, %v2879_v26, 0.0 }
 0x623   : > { %v19400_v56 = vpop.f32.mrf.mxu0 }
 0x625   : > { %v2952_v57 = vpop.f32.mrf.mxu1 }
 0x626   : > { %v3103_v59 = vsel %vm545_vm0, %v2952_v57, 0.0 }
 0x627   : > { %v19407_v58 = vpop.f32.mrf.mxu1  ;;  %v3104_v63 = vadd.f32 %v3103_v59, %v3102_v61 }
 0x633   : > { %v3025_v60 = vpop.f32.mrf.mxu0 }
 0x634   : > { %v3105_v62 = vsel %vm545_vm0, %v3025_v60, 0.0 }
 0x635   : > { %v19414_v0 = vpop.f32.mrf.mxu0  ;;  %v3106_v1 = vadd.f32 %v3105_v62, %v3104_v63 }
 0x636   : > { %v3336_v0 = vld [vmem:[#allocation13 + $0x538] sm:$0xff] }
 0x637   : > { %v3098_v2 = vpop.f32.mrf.mxu1 }
 0x638   : > { %v3107_v4 = vsel %vm545_vm0, %v3098_v2, 0.0  ;;  %v3335_v2 = vld [vmem:[#allocation13 + $0x530] sm:$0xff] }
 0x639   : > { %v3108_v5 = vadd.f32 %v3107_v4, %v3106_v1  ;;  %v19421_v6 = vpop.f32.mrf.mxu1  ;;  %v3352_v1 = vld [vmem:[#allocation13 + $0x5b8] sm:$0xff]  ;;  %v3351_v4 = vld [vmem:[#allocation13 + $0x5b0] sm:$0xff] }
 0x63a   : > { %v3350_v6 = vld [vmem:[#allocation13 + $0x5a8] sm:$0xff] }
 0x63b   : > { %v23198_v8 = vadd.f32 %v22172_v7, %v3108_v5  ;;  %v3334_v5 = vld [vmem:[#allocation13 + $0x528] sm:$0xff]  ;;  %v3333_v7 = vld [vmem:[#allocation13 + $0x520] sm:$0xff] }
 0x63d   : > { %v3111_v9 = vmul.f32 %v23198_v8, %v23198_v8 }
 0x63f   : > { %v3112_v10 = vsel %vm545_vm0, %v3111_v9, 0.0  ;;  %v3332_v9 = vld [vmem:[#allocation13 + $0x518] sm:$0xff] }
 0x640   : > { %3113 = vadd.xlane.f32.xlu1 %v3112_v10  ;;  %v3348_v10 = vld [vmem:[#allocation13 + $0x598] sm:$0xff] }
 0x6c9   : > { %v3114_v28 = vpop.xlane.xlu1 %3113 }
 0x6ca   : > { %v3115_v29 = vmul.f32 0.015625, %v3114_v28  ;;  %v3655_v28 = vld [vmem:[#allocation13 + $0x630] sm:$0xff] }
 0x6cc   : > { %v3116_v30 = vadd.f32 1e-06, %v3115_v29  ;;  %v3342_v29 = vld [vmem:[#allocation13 + $0x568] sm:$0xff] }
 0x6ce   : > { %22044 = vrsqrt.f32 %v3116_v30  ;;  %v3654_v30 = vld [vmem:[#allocation13 + $0x628] sm:$0xff] }
 0x6db   : > { %v22045_v31 = vpop.eup %22044 }
 0x6dc   : > { %v3118_v33 = vmul.f32 %v22045_v31, %v23198_v8  ;;  %v3341_v31 = vld [vmem:[#allocation13 + $0x560] sm:$0xff] }
 0x6de   : > { %v3125_v34 = vmul.f32 %v17422_v32, %v3118_v33  ;;  %v3653_v32 = vld [vmem:[#allocation13 + $0x620] sm:$0xff]  ;;  %v3340_v33 = vld [vmem:[#allocation13 + $0x558] sm:$0xff] }
 0x6e0   : > { %17423 = vmatmul.mubr.msk.f32.vlgmr.msra.gmra.mxu0 %vm545_vm0, %v3125_v34  ;;  %v3652_v34 = vld [vmem:[#allocation13 + $0x618] sm:$0xff] }
 0x6e1   : > { %19473 = vmatprep.mubr.msk.f32.mxu0 %vm22579_vm1, %v22578_v3  ;;  %19458 = vmatpush3.msra.mxu0 %v3336_v0  ;;  %v3974_v0 = vld [vmem:[#allocation13 + $0x720] sm:$0xff] }
 0x6e2   : > { %19459 = vmatprep.subr.mxu0 %v22578_v3 }
 0x6e3   : > { %19460 = vmatpush3.msra.mxu0 %v3335_v2  ;;  %v3973_v2 = vld [vmem:[#allocation13 + $0x718] sm:$0xff] }
 0x6e4   : > { %19461 = vmatprep.subr.mxu0 %v22578_v3 }
 0x6e5   : > { %19462 = vmatpush3.msra.mxu0 %v3334_v5  ;;  %v3972_v5 = vld [vmem:[#allocation13 + $0x710] sm:$0xff] }
 0x6e6   : > { %19463 = vmatprep.subr.mxu0 %v22578_v3 }
 0x6e7   : > { %19464 = vmatpush3.msra.mxu0 %v3333_v7  ;;  %v3971_v7 = vld [vmem:[#allocation13 + $0x708] sm:$0xff] }
 0x6e8   : > { %19465 = vmatprep.subr.mxu0 %v22578_v3 }
 0x6e9   : > { %19466 = vmatpush3.msra.mxu0 %v3332_v9  ;;  %v3970_v9 = vld [vmem:[#allocation13 + $0x700] sm:$0xff] }
 0x6ea   : > { %19467 = vmatprep.subr.mxu0 %v22578_v3 }
 0x6eb   : > { %19468 = vmatpush3.msra.mxu0 %v3331_v11  ;;  %v3993_v11 = vld [vmem:[#allocation13 + $0x7b8] sm:$0xff] }
 0x6ec   : > { %19469 = vmatprep.subr.mxu0 %v22578_v3 }
 0x6ed   : > { %19470 = vmatpush3.msra.mxu0 %v3330_v13  ;;  %v3992_v13 = vld [vmem:[#allocation13 + $0x7b0] sm:$0xff] }
 0x6ee   : > { %19471 = vmatprep.subr.mxu0 %v22578_v3 }
 0x6ef   : > { %19472 = vmatpush3.msra.mxu0 %v3329_v15  ;;  %v3991_v15 = vld [vmem:[#allocation13 + $0x7a8] sm:$0xff] }
 0x6f0   : > { %19476 = vmatprep.subr.mxu0 %v22578_v3 }
 0x7a0   : > { %v3211_v51 = vpop.f32.mrf.mxu0 }
 0x7a1   : > { %v3216_v52 = vsub.f32 0.0, %v3211_v51 }
 0x7a2   : > { %v3213_v57 = vpop.f32.mrf.mxu0 }
 0x7a3   : > { %v3217_v53 = vmul.f32 1.442695, %v3216_v52  ;;  %v3667_v52 = vld [vmem:[#allocation13 + $0x690] sm:$0xff] }
 0x7a5   : > { %22046 = vpow2.f32 %v3217_v53  ;;  %v3354_v53 = vld [vmem:[#allocation13 + $0x5c8] sm:$0xff] }
 0x7b2   : > { %v22047_v54 = vpop.eup %22046 }
 0x7b3   : > { %v3219_v55 = vadd.f32 1.0, %v22047_v54  ;;  %v3666_v54 = vld [vmem:[#allocation13 + $0x688] sm:$0xff] }
 0x7b5   : > { %22048 = vrcp.f32 %v3219_v55  ;;  %v3353_v55 = vld [vmem:[#allocation13 + $0x5c0] sm:$0xff] }
 0x7c2   : > { %v22049_v26 = vpop.eup %22048 }
 0x7c3   : > { %v3222_v56 = vmul.f32 %v22049_v26, %v3211_v51  ;;  %v3355_v51 = vld [vmem:[#allocation13 + $0x5d0] sm:$0xff]  ;;  %v3665_v26 = vld [vmem:[#allocation13 + $0x680] sm:$0xff] }
 0x7c5   : > { %v3223_v58 = vmul.f32 %v3222_v56, %v3213_v57  ;;  %v3664_v56 = vld [vmem:[#allocation13 + $0x678] sm:$0xff] }
 0x7c6   : > { %v3977_v57 = vld [vmem:[#allocation13 + $0x738] sm:$0xff] }
 0x7c7   : > { %19455 = vmatmul.mubr.f32.vlgmr.msra.gmra.mxu1 %v3223_v58  ;;  %v3663_v58 = vld [vmem:[#allocation13 + $0x670] sm:$0xff] }
 0x7c8   : > { %19511 = vmatprep.mubr.msk.f32.mxu1 %vm22579_vm1, %v22578_v3  ;;  %19496 = vmatpush3.msra.mxu1 %v3352_v1  ;;  %v3660_v1 = vld [vmem:[#allocation13 + $0x658] sm:$0xff] }
 0x7c9   : > { %19497 = vmatprep.subr.mxu1 %v22578_v3 }
 0x7ca   : > { %19498 = vmatpush3.msra.mxu1 %v3351_v4  ;;  %v3659_v4 = vld [vmem:[#allocation13 + $0x650] sm:$0xff] }
 0x7cb   : > { %19499 = vmatprep.subr.mxu1 %v22578_v3 }
 0x7cc   : > { %19500 = vmatpush3.msra.mxu1 %v3350_v6  ;;  %v3658_v6 = vld [vmem:[#allocation13 + $0x648] sm:$0xff] }
 0x7cd   : > { %19501 = vmatprep.subr.mxu1 %v22578_v3 }
 0x887   : > { %v3306_v59 = vpop.f32.mrf.mxu1 }
 0x888   : > { %v23227_v60 = vadd.f32 %v3306_v59, %v23198_v8  ;;  %v3349_v8 = vld [vmem:[#allocation13 + $0x5a0] sm:$0xff]  ;;  %v3976_v59 = vld [vmem:[#allocation13 + $0x730] sm:$0xff] }
 0x889   : > { %v19456_v61 = vpop.f32.mrf.mxu1  ;;  %19502 = vmatpush3.msra.mxu1 %v3349_v8  ;;  %v3657_v8 = vld [vmem:[#allocation13 + $0x640] sm:$0xff] }
 0x88a   : > { %v3313_v62 = vmul.f32 %v23227_v60, %v23227_v60  ;;  %19503 = vmatprep.subr.mxu1 %v22578_v3  ;;  %v3662_v61 = vld [vmem:[#allocation13 + $0x668] sm:$0xff] }
 0x88b   : > { %19504 = vmatpush3.msra.mxu1 %v3348_v10  ;;  %v3680_v10 = vld [vmem:[#allocation13 + $0x6f8] sm:$0xff] }
 0x88c   : > { %v3314_v63 = vsel %vm545_vm0, %v3313_v62, 0.0  ;;  %19505 = vmatprep.subr.mxu1 %v22578_v3  ;;  %v3975_v62 = vld [vmem:[#allocation13 + $0x728] sm:$0xff] }
 0x88d   : > { %3315 = vadd.xlane.f32.xlu0 %v3314_v63  ;;  %19506 = vmatpush3.msra.mxu1 %v3347_v12  ;;  %v3661_v63 = vld [vmem:[#allocation13 + $0x660] sm:$0xff]  ;;  %v3679_v12 = vld [vmem:[#allocation13 + $0x6f0] sm:$0xff] }
 0x88e   : > { %19507 = vmatprep.subr.mxu1 %v22578_v3 }
 0x88f   : > { %19508 = vmatpush3.msra.mxu1 %v3346_v14  ;;  %v3678_v14 = vld [vmem:[#allocation13 + $0x6e8] sm:$0xff] }
 0x890   : > { %19509 = vmatprep.subr.mxu1 %v22578_v3 }
 0x891   : > { %19510 = vmatpush3.msra.mxu1 %v3345_v16  ;;  %v3677_v16 = vld [vmem:[#allocation13 + $0x6e0] sm:$0xff] }
 0x892   : > { %19533 = vmatprep.subr.mxu1 %v22578_v3 }
 0x916   : > { %v3316_v17 = vpop.xlane.xlu0 %3315 }
 0x917   : > { %v3317_v18 = vmul.f32 0.015625, %v3316_v17  ;;  %v3990_v17 = vld [vmem:[#allocation13 + $0x7a0] sm:$0xff] }
 0x919   : > { %v3318_v19 = vadd.f32 1e-06, %v3317_v18  ;;  %v3676_v18 = vld [vmem:[#allocation13 + $0x6d8] sm:$0xff] }
 0x91b   : > { %22050 = vrsqrt.f32 %v3318_v19  ;;  %v3989_v19 = vld [vmem:[#allocation13 + $0x798] sm:$0xff] }
 0x928   : > { %v22051_v20 = vpop.eup %22050 }
 0x929   : > { %v3320_v22 = vmul.f32 %v22051_v20, %v23227_v60  ;;  %v3675_v20 = vld [vmem:[#allocation13 + $0x6d0] sm:$0xff] }
 0x92b   : > { %v23249_v23 = vmul.f32 %v17424_v21, %v3320_v22  ;;  %v3988_v21 = vld [vmem:[#allocation13 + $0x790] sm:$0xff]  ;;  %v3674_v22 = vld [vmem:[#allocation13 + $0x6c8] sm:$0xff] }
 0x92d   : > { %19474 = vmatmul.mubr.msk.f32.vlgmr.msra.gmra.mxu0 %vm545_vm0, %v23249_v23  ;;  %19512 = vmatmul.mubr.msk.f32.vlgmr.msra.gmra.mxu1 %vm545_vm0, %v23249_v23 }
 0x92e   : > { %19477 = vmatpush3.msra.mxu0 %v3344_v24  ;;  %19534 = vmatpush3.msra.mxu1 %v3656_v25  ;;  %v3987_v24 = vld [vmem:[#allocation13 + $0x788] sm:$0xff]  ;;  %v3673_v25 = vld [vmem:[#allocation13 + $0x6c0] sm:$0xff] }
 0x92f   : > { %19478 = vmatprep.subr.mxu0 %v22578_v3  ;;  %19535 = vmatprep.subr.mxu1 %v22578_v3 }
 0x930   : > { %19479 = vmatpush3.msra.mxu0 %v3343_v27  ;;  %19536 = vmatpush3.msra.mxu1 %v3655_v28  ;;  %v3986_v27 = vld [vmem:[#allocation13 + $0x780] sm:$0xff]  ;;  %v3985_v28 = vld [vmem:[#allocation13 + $0x778] sm:$0xff] }
 0x931   : > { %19480 = vmatprep.subr.mxu0 %v22578_v3  ;;  %19537 = vmatprep.subr.mxu1 %v22578_v3 }
 0x932   : > { %19481 = vmatpush3.msra.mxu0 %v3342_v29  ;;  %19538 = vmatpush3.msra.mxu1 %v3654_v30  ;;  %v4294_v29 = vld [vmem:[#allocation13 + $0x838] sm:$0xff]  ;;  %v3984_v30 = vld [vmem:[#allocation13 + $0x770] sm:$0xff] }
 0x933   : > { %19482 = vmatprep.subr.mxu0 %v22578_v3  ;;  %19539 = vmatprep.subr.mxu1 %v22578_v3 }
 0x934   : > { %19483 = vmatpush3.msra.mxu0 %v3341_v31  ;;  %19540 = vmatpush3.msra.mxu1 %v3653_v32  ;;  %v4293_v31 = vld [vmem:[#allocation13 + $0x830] sm:$0xff]  ;;  %v3983_v32 = vld [vmem:[#allocation13 + $0x768] sm:$0xff] }
 0x935   : > { %19484 = vmatprep.subr.mxu0 %v22578_v3  ;;  %19541 = vmatprep.subr.mxu1 %v22578_v3 }
 0x936   : > { %19485 = vmatpush3.msra.mxu0 %v3340_v33  ;;  %19542 = vmatpush3.msra.mxu1 %v3652_v34  ;;  %v4292_v33 = vld [vmem:[#allocation13 + $0x828] sm:$0xff]  ;;  %v3982_v34 = vld [vmem:[#allocation13 + $0x760] sm:$0xff] }
 0x937   : > { %19486 = vmatprep.subr.mxu0 %v22578_v3  ;;  %19543 = vmatprep.subr.mxu1 %v22578_v3 }
 0x938   : > { %19487 = vmatpush3.msra.mxu0 %v3339_v35  ;;  %19544 = vmatpush3.msra.mxu1 %v3651_v36  ;;  %v4291_v35 = vld [vmem:[#allocation13 + $0x820] sm:$0xff]  ;;  %v3981_v36 = vld [vmem:[#allocation13 + $0x758] sm:$0xff] }
 0x939   : > { %19488 = vmatprep.subr.mxu0 %v22578_v3  ;;  %19545 = vmatprep.subr.mxu1 %v22578_v3 }
 0x93a   : > { %19489 = vmatpush3.msra.mxu0 %v3338_v37  ;;  %19546 = vmatpush3.msra.mxu1 %v3650_v38  ;;  %v4290_v37 = vld [vmem:[#allocation13 + $0x818] sm:$0xff]  ;;  %v3980_v38 = vld [vmem:[#allocation13 + $0x750] sm:$0xff] }
 0x93b   : > { %19490 = vmatprep.subr.mxu0 %v22578_v3  ;;  %19547 = vmatprep.subr.mxu1 %v22578_v3 }
 0x93c   : > { %19491 = vmatpush3.msra.mxu0 %v3337_v39  ;;  %19492 = vmatprep.mubr.msk.f32.mxu0 %vm22579_vm1, %v22578_v3  ;;  %v4289_v39 = vld [vmem:[#allocation13 + $0x810] sm:$0xff] }
 0x93d   : > { %19548 = vmatpush3.msra.mxu1 %v3649_v40  ;;  %19549 = vmatprep.mubr.msk.f32.mxu1 %vm22579_vm1, %v22578_v3  ;;  %v3979_v40 = vld [vmem:[#allocation13 + $0x748] sm:$0xff] }
 0x93e   : > { %19493 = vmatmul.mubr.msk.f32.vlgmr.msra.gmra.mxu0 %vm545_vm0, %v23249_v23  ;;  %19514 = vmatprep.subr.mxu0 %v22578_v3 }
 0x93f   : > { %19550 = vmatmul.mubr.msk.f32.vlgmr.msra.gmra.mxu1 %vm545_vm0, %v23249_v23  ;;  %19571 = vmatprep.subr.mxu1 %v22578_v3 }
 0x940   : > { %19515 = vmatpush3.msra.mxu0 %v3360_v41  ;;  %19572 = vmatpush3.msra.mxu1 %v3672_v42  ;;  %v4288_v41 = vld [vmem:[#allocation13 + $0x808] sm:$0xff]  ;;  %v3978_v42 = vld [vmem:[#allocation13 + $0x740] sm:$0xff] }
 0x941   : > { %19516 = vmatprep.subr.mxu0 %v22578_v3  ;;  %19573 = vmatprep.subr.mxu1 %v22578_v3 }
 0x942   : > { %19517 = vmatpush3.msra.mxu0 %v3359_v43  ;;  %19574 = vmatpush3.msra.mxu1 %v3671_v44  ;;  %v4287_v43 = vld [vmem:[#allocation13 + $0x800] sm:$0xff]  ;;  %v4001_v44 = vld [vmem:[#allocation13 + $0x7f8] sm:$0xff] }
 0x943   : > { %19518 = vmatprep.subr.mxu0 %v22578_v3  ;;  %19575 = vmatprep.subr.mxu1 %v22578_v3 }
 0x944   : > { %19519 = vmatpush3.msra.mxu0 %v3358_v45  ;;  %19576 = vmatpush3.msra.mxu1 %v3670_v46  ;;  %v4310_v45 = vld [vmem:[#allocation13 + $0x8b8] sm:$0xff]  ;;  %v4000_v46 = vld [vmem:[#allocation13 + $0x7f0] sm:$0xff] }
 0x945   : > { %19520 = vmatprep.subr.mxu0 %v22578_v3  ;;  %19577 = vmatprep.subr.mxu1 %v22578_v3 }
 0x946   : > { %19521 = vmatpush3.msra.mxu0 %v3357_v47  ;;  %19578 = vmatpush3.msra.mxu1 %v3669_v48  ;;  %v4309_v47 = vld [vmem:[#allocation13 + $0x8b0] sm:$0xff]  ;;  %v3999_v48 = vld [vmem:[#allocation13 + $0x7e8] sm:$0xff] }
 0x947   : > { %19522 = vmatprep.subr.mxu0 %v22578_v3  ;;  %19579 = vmatprep.subr.mxu1 %v22578_v3 }
 0x948   : > { %19523 = vmatpush3.msra.mxu0 %v3356_v49  ;;  %19580 = vmatpush3.msra.mxu1 %v3668_v50  ;;  %v4308_v49 = vld [vmem:[#allocation13 + $0x8a8] sm:$0xff]  ;;  %v3998_v50 = vld [vmem:[#allocation13 + $0x7e0] sm:$0xff] }
 0x949   : > { %19524 = vmatprep.subr.mxu0 %v22578_v3  ;;  %19581 = vmatprep.subr.mxu1 %v22578_v3 }
 0x94a   : > { %19525 = vmatpush3.msra.mxu0 %v3355_v51  ;;  %19582 = vmatpush3.msra.mxu1 %v3667_v52  ;;  %v4307_v51 = vld [vmem:[#allocation13 + $0x8a0] sm:$0xff]  ;;  %v3997_v52 = vld [vmem:[#allocation13 + $0x7d8] sm:$0xff] }
 0x94b   : > { %19526 = vmatprep.subr.mxu0 %v22578_v3  ;;  %19583 = vmatprep.subr.mxu1 %v22578_v3 }
 0x94c   : > { %19527 = vmatpush3.msra.mxu0 %v3354_v53  ;;  %19584 = vmatpush3.msra.mxu1 %v3666_v54  ;;  %v4306_v53 = vld [vmem:[#allocation13 + $0x898] sm:$0xff]  ;;  %v3996_v54 = vld [vmem:[#allocation13 + $0x7d0] sm:$0xff] }
 0x94d   : > { %19528 = vmatprep.subr.mxu0 %v22578_v3  ;;  %19585 = vmatprep.subr.mxu1 %v22578_v3 }
 0x94e   : > { %19529 = vmatpush3.msra.mxu0 %v3353_v55  ;;  %19530 = vmatprep.mubr.msk.f32.mxu0 %vm22579_vm1, %v22578_v3  ;;  %v4305_v55 = vld [vmem:[#allocation13 + $0x890] sm:$0xff] }
 0x94f   : > { %19586 = vmatpush3.msra.mxu1 %v3665_v26  ;;  %19587 = vmatprep.mubr.msk.f32.mxu1 %vm22579_vm1, %v22578_v3  ;;  %v3995_v26 = vld [vmem:[#allocation13 + $0x7c8] sm:$0xff] }
 0x950   : > { %19531 = vmatmul.mubr.msk.f32.vlgmr.msra.gmra.mxu0 %vm545_vm0, %v23249_v23  ;;  %19552 = vmatprep.subr.mxu0 %v22578_v3 }
 0x951   : > { %19588 = vmatmul.mubr.msk.f32.vlgmr.msra.gmra.mxu1 %vm545_vm0, %v23249_v23  ;;  %19609 = vmatprep.subr.mxu1 %v22578_v3 }
 0x952   : > { %19553 = vmatpush3.msra.mxu0 %v3664_v56  ;;  %19610 = vmatpush3.msra.mxu1 %v3977_v57  ;;  %v4304_v56 = vld [vmem:[#allocation13 + $0x888] sm:$0xff]  ;;  %v3994_v57 = vld [vmem:[#allocation13 + $0x7c0] sm:$0xff] }
 0x953   : > { %19554 = vmatprep.subr.mxu0 %v22578_v3  ;;  %19611 = vmatprep.subr.mxu1 %v22578_v3 }
 0x954   : > { %19555 = vmatpush3.msra.mxu0 %v3663_v58  ;;  %19612 = vmatpush3.msra.mxu1 %v3976_v59  ;;  %v4303_v58 = vld [vmem:[#allocation13 + $0x880] sm:$0xff]  ;;  %v4302_v59 = vld [vmem:[#allocation13 + $0x878] sm:$0xff] }
 0x955   : > { %19556 = vmatprep.subr.mxu0 %v22578_v3  ;;  %19613 = vmatprep.subr.mxu1 %v22578_v3 }
 0x956   : > { %19557 = vmatpush3.msra.mxu0 %v3662_v61  ;;  %19614 = vmatpush3.msra.mxu1 %v3975_v62  ;;  %v4615_v61 = vld [vmem:[#allocation13 + $0x938] sm:$0xff]  ;;  %v4301_v62 = vld [vmem:[#allocation13 + $0x870] sm:$0xff] }
 0x957   : > { %19558 = vmatprep.subr.mxu0 %v22578_v3  ;;  %19615 = vmatprep.subr.mxu1 %v22578_v3 }
 0x958   : > { %19559 = vmatpush3.msra.mxu0 %v3661_v63  ;;  %19616 = vmatpush3.msra.mxu1 %v3974_v0  ;;  %v4614_v63 = vld [vmem:[#allocation13 + $0x930] sm:$0xff]  ;;  %v4300_v0 = vld [vmem:[#allocation13 + $0x868] sm:$0xff] }
 0x959   : > { %19560 = vmatprep.subr.mxu0 %v22578_v3  ;;  %19617 = vmatprep.subr.mxu1 %v22578_v3 }
 0x95a   : > { %19561 = vmatpush3.msra.mxu0 %v3660_v1  ;;  %19618 = vmatpush3.msra.mxu1 %v3973_v2  ;;  %v4613_v1 = vld [vmem:[#allocation13 + $0x928] sm:$0xff]  ;;  %v4299_v2 = vld [vmem:[#allocation13 + $0x860] sm:$0xff] }
 0x95b   : > { %19562 = vmatprep.subr.mxu0 %v22578_v3  ;;  %19619 = vmatprep.subr.mxu1 %v22578_v3 }
 0x95c   : > { %19563 = vmatpush3.msra.mxu0 %v3659_v4  ;;  %19620 = vmatpush3.msra.mxu1 %v3972_v5  ;;  %v4612_v4 = vld [vmem:[#allocation13 + $0x920] sm:$0xff]  ;;  %v4298_v5 = vld [vmem:[#allocation13 + $0x858] sm:$0xff] }
 0x95d   : > { %19564 = vmatprep.subr.mxu0 %v22578_v3  ;;  %19621 = vmatprep.subr.mxu1 %v22578_v3 }
 0x95e   : > { %19565 = vmatpush3.msra.mxu0 %v3658_v6  ;;  %19622 = vmatpush3.msra.mxu1 %v3971_v7  ;;  %v4611_v6 = vld [vmem:[#allocation13 + $0x918] sm:$0xff]  ;;  %v4297_v7 = vld [vmem:[#allocation13 + $0x850] sm:$0xff] }
 0x95f   : > { %19566 = vmatprep.subr.mxu0 %v22578_v3  ;;  %19623 = vmatprep.subr.mxu1 %v22578_v3 }
 0x960   : > { %19567 = vmatpush3.msra.mxu0 %v3657_v8  ;;  %19568 = vmatprep.mubr.msk.f32.mxu0 %vm22579_vm1, %v22578_v3  ;;  %v4610_v8 = vld [vmem:[#allocation13 + $0x910] sm:$0xff] }
 0x961   : > { %19624 = vmatpush3.msra.mxu1 %v3970_v9  ;;  %19625 = vmatprep.mubr.msk.f32.mxu1 %vm22579_vm1, %v22578_v3  ;;  %v4296_v9 = vld [vmem:[#allocation13 + $0x848] sm:$0xff] }
 0x962   : > { %19569 = vmatmul.mubr.msk.f32.vlgmr.msra.gmra.mxu0 %vm545_vm0, %v23249_v23  ;;  %19590 = vmatprep.subr.mxu0 %v22578_v3 }
 0x963   : > { %19626 = vmatmul.mubr.msk.f32.vlgmr.msra.gmra.mxu1 %vm545_vm0, %v23249_v23  ;;  %19647 = vmatprep.subr.mxu1 %v22578_v3 }
 0x964   : > { %19591 = vmatpush3.msra.mxu0 %v3680_v10  ;;  %19648 = vmatpush3.msra.mxu1 %v3993_v11  ;;  %v4609_v10 = vld [vmem:[#allocation13 + $0x908] sm:$0xff]  ;;  %v4295_v11 = vld [vmem:[#allocation13 + $0x840] sm:$0xff] }
 0x965   : > { %19592 = vmatprep.subr.mxu0 %v22578_v3  ;;  %19649 = vmatprep.subr.mxu1 %v22578_v3 }
 0x966   : > { %19593 = vmatpush3.msra.mxu0 %v3679_v12  ;;  %19650 = vmatpush3.msra.mxu1 %v3992_v13  ;;  %v4608_v12 = vld [vmem:[#allocation13 + $0x900] sm:$0xff]  ;;  %v4318_v13 = vld [vmem:[#allocation13 + $0x8f8] sm:$0xff] }
 0x967   : > { %19594 = vmatprep.subr.mxu0 %v22578_v3  ;;  %19651 = vmatprep.subr.mxu1 %v22578_v3 }
 0x968   : > { %19595 = vmatpush3.msra.mxu0 %v3678_v14  ;;  %19652 = vmatpush3.msra.mxu1 %v3991_v15  ;;  %v4631_v14 = vld [vmem:[#allocation13 + $0x9b8] sm:$0xff]  ;;  %v4317_v15 = vld [vmem:[#allocation13 + $0x8f0] sm:$0xff] }
 0x969   : > { %19596 = vmatprep.subr.mxu0 %v22578_v3  ;;  %19653 = vmatprep.subr.mxu1 %v22578_v3 }
 0x96a   : > { %19597 = vmatpush3.msra.mxu0 %v3677_v16  ;;  %19654 = vmatpush3.msra.mxu1 %v3990_v17  ;;  %v4630_v16 = vld [vmem:[#allocation13 + $0x9b0] sm:$0xff]  ;;  %v4316_v17 = vld [vmem:[#allocation13 + $0x8e8] sm:$0xff] }
 0x96b   : > { %19598 = vmatprep.subr.mxu0 %v22578_v3  ;;  %19655 = vmatprep.subr.mxu1 %v22578_v3 }
 0x96c   : > { %19599 = vmatpush3.msra.mxu0 %v3676_v18  ;;  %19656 = vmatpush3.msra.mxu1 %v3989_v19  ;;  %v4629_v18 = vld [vmem:[#allocation13 + $0x9a8] sm:$0xff]  ;;  %v4315_v19 = vld [vmem:[#allocation13 + $0x8e0] sm:$0xff] }
 0x96d   : > { %19600 = vmatprep.subr.mxu0 %v22578_v3  ;;  %19657 = vmatprep.subr.mxu1 %v22578_v3 }
 0x96e   : > { %19601 = vmatpush3.msra.mxu0 %v3675_v20  ;;  %19658 = vmatpush3.msra.mxu1 %v3988_v21  ;;  %v4628_v20 = vld [vmem:[#allocation13 + $0x9a0] sm:$0xff]  ;;  %v4314_v21 = vld [vmem:[#allocation13 + $0x8d8] sm:$0xff] }
 0x96f   : > { %19602 = vmatprep.subr.mxu0 %v22578_v3  ;;  %19659 = vmatprep.subr.mxu1 %v22578_v3 }
 0x970   : > { %19603 = vmatpush3.msra.mxu0 %v3674_v22  ;;  %19660 = vmatpush3.msra.mxu1 %v3987_v24  ;;  %v4627_v22 = vld [vmem:[#allocation13 + $0x998] sm:$0xff]  ;;  %v4313_v24 = vld [vmem:[#allocation13 + $0x8d0] sm:$0xff] }
 0x971   : > { %19604 = vmatprep.subr.mxu0 %v22578_v3  ;;  %19661 = vmatprep.subr.mxu1 %v22578_v3 }
 0x972   : > { %19605 = vmatpush3.msra.mxu0 %v3673_v25  ;;  %19606 = vmatprep.mubr.msk.f32.mxu0 %vm22579_vm1, %v22578_v3  ;;  %v4626_v25 = vld [vmem:[#allocation13 + $0x990] sm:$0xff] }
 0x973   : > { %19662 = vmatpush3.msra.mxu1 %v3986_v27  ;;  %19663 = vmatprep.mubr.msk.f32.mxu1 %vm22579_vm1, %v22578_v3  ;;  %v4312_v27 = vld [vmem:[#allocation13 + $0x8c8] sm:$0xff] }
 0x974   : > { %19607 = vmatmul.mubr.msk.f32.vlgmr.msra.gmra.mxu0 %vm545_vm0, %v23249_v23  ;;  %19628 = vmatprep.subr.mxu0 %v22578_v3 }
 0x975   : > { %19664 = vmatmul.mubr.msk.f32.vlgmr.msra.gmra.mxu1 %vm545_vm0, %v23249_v23  ;;  %19685 = vmatprep.subr.mxu1 %v22578_v3 }
 0x976   : > { %19629 = vmatpush3.msra.mxu0 %v3985_v28  ;;  %19686 = vmatpush3.msra.mxu1 %v4294_v29  ;;  %v4625_v28 = vld [vmem:[#allocation13 + $0x988] sm:$0xff]  ;;  %v4311_v29 = vld [vmem:[#allocation13 + $0x8c0] sm:$0xff] }
 0x977   : > { %19630 = vmatprep.subr.mxu0 %v22578_v3  ;;  %19687 = vmatprep.subr.mxu1 %v22578_v3 }
 0x978   : > { %19631 = vmatpush3.msra.mxu0 %v3984_v30  ;;  %19688 = vmatpush3.msra.mxu1 %v4293_v31  ;;  %v4624_v30 = vld [vmem:[#allocation13 + $0x980] sm:$0xff]  ;;  %v4623_v31 = vld [vmem:[#allocation13 + $0x978] sm:$0xff] }
 0x979   : > { %19632 = vmatprep.subr.mxu0 %v22578_v3  ;;  %19689 = vmatprep.subr.mxu1 %v22578_v3 }
 0x97a   : > { %19633 = vmatpush3.msra.mxu0 %v3983_v32  ;;  %19690 = vmatpush3.msra.mxu1 %v4292_v33  ;;  %v4622_v32 = vld [vmem:[#allocation13 + $0x970] sm:$0xff]  ;;  %v4621_v33 = vld [vmem:[#allocation13 + $0x968] sm:$0xff] }
 0x97b   : > { %19634 = vmatprep.subr.mxu0 %v22578_v3  ;;  %19691 = vmatprep.subr.mxu1 %v22578_v3 }
 0x97c   : > { %19635 = vmatpush3.msra.mxu0 %v3982_v34  ;;  %19692 = vmatpush3.msra.mxu1 %v4291_v35  ;;  %v4620_v34 = vld [vmem:[#allocation13 + $0x960] sm:$0xff]  ;;  %v4619_v35 = vld [vmem:[#allocation13 + $0x958] sm:$0xff] }
 0x97d   : > { %19636 = vmatprep.subr.mxu0 %v22578_v3  ;;  %19693 = vmatprep.subr.mxu1 %v22578_v3 }
 0x97e   : > { %19637 = vmatpush3.msra.mxu0 %v3981_v36  ;;  %19694 = vmatpush3.msra.mxu1 %v4290_v37  ;;  %v4618_v36 = vld [vmem:[#allocation13 + $0x950] sm:$0xff]  ;;  %v4617_v37 = vld [vmem:[#allocation13 + $0x948] sm:$0xff] }
 0x97f   : > { %19638 = vmatprep.subr.mxu0 %v22578_v3  ;;  %19695 = vmatprep.subr.mxu1 %v22578_v3 }
 0x980   : > { %19639 = vmatpush3.msra.mxu0 %v3980_v38  ;;  %19696 = vmatpush3.msra.mxu1 %v4289_v39  ;;  %v4616_v38 = vld [vmem:[#allocation13 + $0x940] sm:$0xff]  ;;  %v4639_v39 = vld [vmem:[#allocation13 + $0x9f8] sm:$0xff] }
 0x981   : > { %19640 = vmatprep.subr.mxu0 %v22578_v3  ;;  %19697 = vmatprep.subr.mxu1 %v22578_v3 }
 0x982   : > { %19641 = vmatpush3.msra.mxu0 %v3979_v40  ;;  %19698 = vmatpush3.msra.mxu1 %v4288_v41  ;;  %v4638_v40 = vld [vmem:[#allocation13 + $0x9f0] sm:$0xff]  ;;  %v4637_v41 = vld [vmem:[#allocation13 + $0x9e8] sm:$0xff] }
 0x983   : > { %19642 = vmatprep.subr.mxu0 %v22578_v3  ;;  %19699 = vmatprep.subr.mxu1 %v22578_v3 }
 0x984   : > { %19643 = vmatpush3.msra.mxu0 %v3978_v42  ;;  %19644 = vmatprep.mubr.msk.f32.mxu0 %vm22579_vm1, %v22578_v3  ;;  %v4636_v42 = vld [vmem:[#allocation13 + $0x9e0] sm:$0xff] }
 0x985   : > { %19700 = vmatpush3.msra.mxu1 %v4287_v43  ;;  %19701 = vmatprep.mubr.msk.f32.mxu1 %vm22579_vm1, %v22578_v3  ;;  %v4635_v43 = vld [vmem:[#allocation13 + $0x9d8] sm:$0xff] }
 0x986   : > { %19645 = vmatmul.mubr.msk.f32.vlgmr.msra.gmra.mxu0 %vm545_vm0, %v23249_v23  ;;  %19666 = vmatprep.subr.mxu0 %v22578_v3 }
 0x987   : > { %19702 = vmatmul.mubr.msk.f32.vlgmr.msra.gmra.mxu1 %vm545_vm0, %v23249_v23  ;;  %19723 = vmatprep.subr.mxu1 %v22578_v3 }
 0x988   : > { %19667 = vmatpush3.msra.mxu0 %v4001_v44  ;;  %19724 = vmatpush3.msra.mxu1 %v4310_v45  ;;  %v4634_v44 = vld [vmem:[#allocation13 + $0x9d0] sm:$0xff]  ;;  %v4633_v45 = vld [vmem:[#allocation13 + $0x9c8] sm:$0xff] }
 0x989   : > { %19668 = vmatprep.subr.mxu0 %v22578_v3  ;;  %19725 = vmatprep.subr.mxu1 %v22578_v3 }
 0x98a   : > { %19669 = vmatpush3.msra.mxu0 %v4000_v46  ;;  %19726 = vmatpush3.msra.mxu1 %v4309_v47  ;;  %v4632_v46 = vld [vmem:[#allocation13 + $0x9c0] sm:$0xff] }
 0x98b   : > { %19670 = vmatprep.subr.mxu0 %v22578_v3  ;;  %19727 = vmatprep.subr.mxu1 %v22578_v3 }
 0x98c   : > { %19671 = vmatpush3.msra.mxu0 %v3999_v48  ;;  %19728 = vmatpush3.msra.mxu1 %v4308_v49 }
 0x98d   : > { %19672 = vmatprep.subr.mxu0 %v22578_v3  ;;  %19729 = vmatprep.subr.mxu1 %v22578_v3 }
 0x98e   : > { %19673 = vmatpush3.msra.mxu0 %v3998_v50  ;;  %19730 = vmatpush3.msra.mxu1 %v4307_v51 }
 0x98f   : > { %19674 = vmatprep.subr.mxu0 %v22578_v3  ;;  %19731 = vmatprep.subr.mxu1 %v22578_v3 }
 0x990   : > { %19675 = vmatpush3.msra.mxu0 %v3997_v52  ;;  %19732 = vmatpush3.msra.mxu1 %v4306_v53  ;;  %v23475_v53 = vld [vmem:[#allocation5] sm:$0xff] }
 0x991   : > { %19676 = vmatprep.subr.mxu0 %v22578_v3  ;;  %19733 = vmatprep.subr.mxu1 %v22578_v3 }
 0x992   : > { %19677 = vmatpush3.msra.mxu0 %v3996_v54  ;;  %19734 = vmatpush3.msra.mxu1 %v4305_v55  ;;  %v23478_v55 = vld [vmem:[#allocation7] sm:$0xff] }
 0x993   : > { %19678 = vmatprep.subr.mxu0 %v22578_v3  ;;  %19735 = vmatprep.subr.mxu1 %v22578_v3 }
 0x994   : > { %19679 = vmatpush3.msra.mxu0 %v3995_v26  ;;  %19736 = vmatpush3.msra.mxu1 %v4304_v56 }
 0x995   : > { %19680 = vmatprep.subr.mxu0 %v22578_v3  ;;  %19737 = vmatprep.subr.mxu1 %v22578_v3 }
 0x996   : > { %19681 = vmatpush3.msra.mxu0 %v3994_v57  ;;  %19682 = vmatprep.mubr.msk.f32.mxu0 %vm22579_vm1, %v22578_v3 }
 0x997   : > { %19738 = vmatpush3.msra.mxu1 %v4303_v58  ;;  %19739 = vmatprep.mubr.msk.f32.mxu1 %vm22579_vm1, %v22578_v3 }
 0x998   : > { %19683 = vmatmul.mubr.msk.f32.vlgmr.msra.gmra.mxu0 %vm545_vm0, %v23249_v23  ;;  %19704 = vmatprep.subr.mxu0 %v22578_v3 }
 0x999   : > { %19740 = vmatmul.mubr.msk.f32.vlgmr.msra.gmra.mxu1 %vm545_vm0, %v23249_v23  ;;  %19761 = vmatprep.subr.mxu1 %v22578_v3 }
 0x99a   : > { %19705 = vmatpush3.msra.mxu0 %v4302_v59  ;;  %19762 = vmatpush3.msra.mxu1 %v4615_v61 }
 0x99b   : > { %19706 = vmatprep.subr.mxu0 %v22578_v3  ;;  %19763 = vmatprep.subr.mxu1 %v22578_v3 }
 0x99c   : > { %19707 = vmatpush3.msra.mxu0 %v4301_v62  ;;  %19764 = vmatpush3.msra.mxu1 %v4614_v63 }
 0x99d   : > { %19708 = vmatprep.subr.mxu0 %v22578_v3  ;;  %19765 = vmatprep.subr.mxu1 %v22578_v3 }
 0x99e   : > { %19709 = vmatpush3.msra.mxu0 %v4300_v0  ;;  %19766 = vmatpush3.msra.mxu1 %v4613_v1 }
 0x99f   : > { %19710 = vmatprep.subr.mxu0 %v22578_v3  ;;  %19767 = vmatprep.subr.mxu1 %v22578_v3 }
 0x9a0   : > { %19711 = vmatpush3.msra.mxu0 %v4299_v2  ;;  %19768 = vmatpush3.msra.mxu1 %v4612_v4 }
 0x9a1   : > { %19712 = vmatprep.subr.mxu0 %v22578_v3  ;;  %19769 = vmatprep.subr.mxu1 %v22578_v3 }
 0x9a2   : > { %19713 = vmatpush3.msra.mxu0 %v4298_v5  ;;  %19770 = vmatpush3.msra.mxu1 %v4611_v6 }
 0x9a3   : > { %19714 = vmatprep.subr.mxu0 %v22578_v3  ;;  %19771 = vmatprep.subr.mxu1 %v22578_v3 }
 0x9a4   : > { %19715 = vmatpush3.msra.mxu0 %v4297_v7  ;;  %19772 = vmatpush3.msra.mxu1 %v4610_v8 }
 0x9a5   : > { %19716 = vmatprep.subr.mxu0 %v22578_v3  ;;  %19773 = vmatprep.subr.mxu1 %v22578_v3 }
 0x9a6   : > { %19717 = vmatpush3.msra.mxu0 %v4296_v9  ;;  %19774 = vmatpush3.msra.mxu1 %v4609_v10 }
 0x9a7   : > { %19718 = vmatprep.subr.mxu0 %v22578_v3  ;;  %19775 = vmatprep.subr.mxu1 %v22578_v3 }
 0x9a8   : > { %19719 = vmatpush3.msra.mxu0 %v4295_v11  ;;  %19720 = vmatprep.mubr.msk.f32.mxu0 %vm22579_vm1, %v22578_v3 }
 0x9a9   : > { %19776 = vmatpush3.msra.mxu1 %v4608_v12  ;;  %19777 = vmatprep.mubr.msk.f32.mxu1 %vm22579_vm1, %v22578_v3 }
 0x9aa   : > { %19721 = vmatmul.mubr.msk.f32.vlgmr.msra.gmra.mxu0 %vm545_vm0, %v23249_v23  ;;  %19742 = vmatprep.subr.mxu0 %v22578_v3 }
 0x9ab   : > { %19778 = vmatmul.mubr.msk.f32.vlgmr.msra.gmra.mxu1 %vm545_vm0, %v23249_v23  ;;  %19799 = vmatprep.subr.mxu1 %v22578_v3 }
 0x9ac   : > { %19743 = vmatpush3.msra.mxu0 %v4318_v13  ;;  %19800 = vmatpush3.msra.mxu1 %v4631_v14 }
 0x9ad   : > { %19744 = vmatprep.subr.mxu0 %v22578_v3  ;;  %19801 = vmatprep.subr.mxu1 %v22578_v3 }
 0x9ae   : > { %19745 = vmatpush3.msra.mxu0 %v4317_v15  ;;  %19802 = vmatpush3.msra.mxu1 %v4630_v16 }
 0x9af   : > { %19746 = vmatprep.subr.mxu0 %v22578_v3  ;;  %19803 = vmatprep.subr.mxu1 %v22578_v3 }
 0x9b0   : > { %19747 = vmatpush3.msra.mxu0 %v4316_v17  ;;  %19804 = vmatpush3.msra.mxu1 %v4629_v18 }
 0x9b1   : > { %19748 = vmatprep.subr.mxu0 %v22578_v3  ;;  %19805 = vmatprep.subr.mxu1 %v22578_v3 }
 0x9b2   : > { %19749 = vmatpush3.msra.mxu0 %v4315_v19  ;;  %19806 = vmatpush3.msra.mxu1 %v4628_v20 }
 0x9b3   : > { %19750 = vmatprep.subr.mxu0 %v22578_v3  ;;  %19807 = vmatprep.subr.mxu1 %v22578_v3 }
 0x9b4   : > { %19751 = vmatpush3.msra.mxu0 %v4314_v21  ;;  %19808 = vmatpush3.msra.mxu1 %v4627_v22 }
 0x9b5   : > { %19752 = vmatprep.subr.mxu0 %v22578_v3  ;;  %19809 = vmatprep.subr.mxu1 %v22578_v3 }
 0x9b6   : > { %19753 = vmatpush3.msra.mxu0 %v4313_v24  ;;  %19810 = vmatpush3.msra.mxu1 %v4626_v25 }
 0x9b7   : > { %19754 = vmatprep.subr.mxu0 %v22578_v3  ;;  %19811 = vmatprep.subr.mxu1 %v22578_v3 }
 0x9b8   : > { %19755 = vmatpush3.msra.mxu0 %v4312_v27  ;;  %19812 = vmatpush3.msra.mxu1 %v4625_v28 }
 0x9b9   : > { %19756 = vmatprep.subr.mxu0 %v22578_v3  ;;  %19813 = vmatprep.subr.mxu1 %v22578_v3 }
 0x9ba   : > { %19757 = vmatpush3.msra.mxu0 %v4311_v29  ;;  %19758 = vmatprep.mubr.msk.f32.mxu0 %vm22579_vm1, %v22578_v3 }
 0x9bb   : > { %19814 = vmatpush3.msra.mxu1 %v4624_v30  ;;  %19815 = vmatprep.mubr.msk.f32.mxu1 %vm22579_vm1, %v22578_v3 }
 0x9bc   : > { %19759 = vmatmul.mubr.msk.f32.vlgmr.msra.gmra.mxu0 %vm545_vm0, %v23249_v23  ;;  %19780 = vmatprep.subr.mxu0 %v22578_v3 }
 0x9bd   : > { %19816 = vmatmul.mubr.msk.f32.vlgmr.msra.gmra.mxu1 %vm545_vm0, %v23249_v23  ;;  %19781 = vmatpush3.msra.mxu0 %v4623_v31 }
 0x9be   : > { %19782 = vmatprep.subr.mxu0 %v22578_v3  ;;  %19796 = vmatprep.mubr.msk.f32.mxu0 %vm22579_vm1, %v22578_v3 }
 0x9bf   : > { %19783 = vmatpush3.msra.mxu0 %v4622_v32  ;;  %19837 = vmatprep.subr.mxu1 %v22578_v3 }
 0x9c0   : > { %19784 = vmatprep.subr.mxu0 %v22578_v3  ;;  %19839 = vmatprep.mubr.msk.f32.mxu1 %vm22579_vm1, %v22578_v3 }
 0x9c1   : > { %19785 = vmatpush3.msra.mxu0 %v4621_v33 }
 0x9c2   : > { %19786 = vmatprep.subr.mxu0 %v22578_v3 }
 0x9c3   : > { %19787 = vmatpush3.msra.mxu0 %v4620_v34 }
 0x9c4   : > { %19788 = vmatprep.subr.mxu0 %v22578_v3 }
 0x9c5   : > { %19789 = vmatpush3.msra.mxu0 %v4619_v35 }
 0x9c6   : > { %19790 = vmatprep.subr.mxu0 %v22578_v3 }
 0x9c7   : > { %19791 = vmatpush3.msra.mxu0 %v4618_v36 }
 0x9c8   : > { %19792 = vmatprep.subr.mxu0 %v22578_v3 }
 0x9c9   : > { %19793 = vmatpush3.msra.mxu0 %v4617_v37 }
 0x9ca   : > { %19794 = vmatprep.subr.mxu0 %v22578_v3 }
 0x9cb   : > { %19795 = vmatpush3.msra.mxu0 %v4616_v38 }
 0x9cc   : > { %19797 = vmatmul.mubr.msk.f32.vlgmr.msra.gmra.mxu0 %vm545_vm0, %v23249_v23  ;;  %19818 = vmatprep.subr.mxu0 %v22578_v3 }
 0x9cd   : > { %19819 = vmatpush3.msra.mxu0 %v4639_v39  ;;  %19834 = vmatprep.mubr.msk.f32.mxu0 %vm22579_vm1, %v22578_v3 }
 0x9ce   : > { %19820 = vmatprep.subr.mxu0 %v22578_v3 }
 0x9cf   : > { %19821 = vmatpush3.msra.mxu0 %v4638_v40 }
 0x9d0   : > { %19822 = vmatprep.subr.mxu0 %v22578_v3 }
 0x9d1   : > { %19823 = vmatpush3.msra.mxu0 %v4637_v41 }
 0x9d2   : > { %19824 = vmatprep.subr.mxu0 %v22578_v3 }
 0x9d3   : > { %19825 = vmatpush3.msra.mxu0 %v4636_v42 }
 0x9d4   : > { %19826 = vmatprep.subr.mxu0 %v22578_v3 }
 0x9d5   : > { %19827 = vmatpush3.msra.mxu0 %v4635_v43 }
 0x9d6   : > { %19828 = vmatprep.subr.mxu0 %v22578_v3 }
 0x9d7   : > { %19829 = vmatpush3.msra.mxu0 %v4634_v44 }
 0x9d8   : > { %19830 = vmatprep.subr.mxu0 %v22578_v3 }
 0x9d9   : > { %19831 = vmatpush3.msra.mxu0 %v4633_v45 }
 0x9da   : > { %19832 = vmatprep.subr.mxu0 %v22578_v3 }
 0x9db   : > { %19833 = vmatpush3.msra.mxu0 %v4632_v46 }
 0x9dc   : > { %19835 = vmatmul.mubr.msk.f32.vlgmr.msra.gmra.mxu0 %vm545_vm0, %v23249_v23  ;;  %19857 = vmatprep.subr.mxu0 %v22578_v3 }
 0x9dd   : > { %19859 = vmatprep.mubr.msk.f32.mxu0 %vm22579_vm1, %v22578_v3 }
 0x9ed   : > { %v3430_v47 = vpop.f32.mrf.mxu0  ;;  %v3570_v48 = vpop.f32.mrf.mxu1 }
 0x9ee   : > { %v3644_v54 = vmul.f32 %v23475_v53, %v3430_v47  ;;  %v3646_v61 = vmul.f32 %v23475_v53, %v3570_v48 }
 0x9ef   : > { %v19475_v49 = vpop.f32.mrf.mxu0  ;;  %v19513_v50 = vpop.f32.mrf.mxu1 }
 0x9fe   : > { %v3500_v51 = vpop.f32.mrf.mxu0 }
 0x9ff   : > { %v3747_v52 = vpop.f32.mrf.mxu1  ;;  %v3645_v4 = vmul.f32 %v23475_v53, %v3500_v51 }
 0xa00   : > { %v3961_v26 = vmul.f32 %v23478_v55, %v3747_v52  ;;  %v19494_v23 = vpop.f32.mrf.mxu0 }
 0xa01   : > { %v19551_v56 = vpop.f32.mrf.mxu1 }
 0xa02   : > { %v3965_v57 = vadd.f32 %v3961_v26, %v3644_v54  ;;  %v22175_v54 = vld [vmem:[#allocation8] sm:$0xff] }
 0xa10   : > { %v3640_v58 = vpop.f32.mrf.mxu0 }
 0xa11   : > { %v3887_v59 = vpop.f32.mrf.mxu1  ;;  %v3647_v11 = vmul.f32 %v23475_v53, %v3640_v58 }
 0xa12   : > { %v3963_v62 = vmul.f32 %v23478_v55, %v3887_v59  ;;  %v19532_v63 = vpop.f32.mrf.mxu0 }
 0xa13   : > { %v19589_v0 = vpop.f32.mrf.mxu1 }
 0xa14   : > { %v3967_v1 = vadd.f32 %v3963_v62, %v3646_v61 }
 0xa22   : > { %v3817_v2 = vpop.f32.mrf.mxu0 }
 0xa23   : > { %v3962_v5 = vmul.f32 %v23478_v55, %v3817_v2  ;;  %v4068_v6 = vpop.f32.mrf.mxu1 }
 0xa24   : > { %v19570_v7 = vpop.f32.mrf.mxu0  ;;  %v4282_v19 = vmul.f32 %v23475_v53, %v4068_v6 }
 0xa25   : > { %v3966_v8 = vadd.f32 %v3962_v5, %v3645_v4  ;;  %v19627_v9 = vpop.f32.mrf.mxu1 }
 0xa34   : > { %v3957_v10 = vpop.f32.mrf.mxu0 }
 0xa35   : > { %v3964_v12 = vmul.f32 %v23478_v55, %v3957_v10  ;;  %v4208_v13 = vpop.f32.mrf.mxu1 }
 0xa36   : > { %v19608_v14 = vpop.f32.mrf.mxu0  ;;  %v4284_v38 = vmul.f32 %v23475_v53, %v4208_v13 }
 0xa37   : > { %v3968_v15 = vadd.f32 %v3964_v12, %v3647_v11  ;;  %v19665_v16 = vpop.f32.mrf.mxu1 }
 0xa46   : > { %v4138_v17 = vpop.f32.mrf.mxu0 }
 0xa47   : > { %v4385_v18 = vpop.f32.mrf.mxu1  ;;  %v4283_v31 = vmul.f32 %v23475_v53, %v4138_v17 }
 0xa48   : > { %v4599_v20 = vmul.f32 %v23478_v55, %v4385_v18  ;;  %v19646_v21 = vpop.f32.mrf.mxu0 }
 0xa49   : > { %v19703_v22 = vpop.f32.mrf.mxu1 }
 0xa4a   : > { %v4603_v24 = vadd.f32 %v4599_v20, %v4282_v19 }
 0xa4c   : > { %19838 = vmatpush3.xpose.msk.msra.mxu1 %vm2152_vm2, %v4603_v24 }
 0xa4d   : > { %19842 = vmatprep.subr.mxu1 %v22578_v3 }
 0xa4f   : > { %19840 = vmatmul.mubr.msk.f32.vlgmr.msra.gmra.mxu1 %vm2152_vm2, %v3965_v57 }
 0xa50   : > { %19844 = vmatprep.mubr.msk.f32.mxu1 %vm22579_vm1, %v22578_v3 }
 0xa58   : > { %v4278_v25 = vpop.f32.mrf.mxu0 }
 0xa59   : > { %v4525_v27 = vpop.f32.mrf.mxu1  ;;  %v4285_v41 = vmul.f32 %v23475_v53, %v4278_v25 }
 0xa5a   : > { %v19684_v28 = vpop.f32.mrf.mxu0  ;;  %v4601_v35 = vmul.f32 %v23478_v55, %v4525_v27 }
 0xa5b   : > { %v19741_v29 = vpop.f32.mrf.mxu1 }
 0xa5c   : > { %v4605_v39 = vadd.f32 %v4601_v35, %v4284_v38 }
 0xa6a   : > { %v4455_v30 = vpop.f32.mrf.mxu0 }
 0xa6b   : > { %v4600_v32 = vmul.f32 %v23478_v55, %v4455_v30  ;;  %v4706_v33 = vpop.f32.mrf.mxu1 }
 0xa6c   : > { %19858 = vmatpush3.msra.mxu0 %v4706_v33  ;;  %v19722_v34 = vpop.f32.mrf.mxu0 }
 0xa6d   : > { %v4604_v36 = vadd.f32 %v4600_v32, %v4283_v31  ;;  %v19779_v37 = vpop.f32.mrf.mxu1  ;;  %19867 = vmatprep.subr.mxu0 %v22578_v3 }
 0xa6f   : > { %19843 = vmatpush3.xpose.msk.msra.mxu1 %vm2152_vm2, %v4604_v36 }
 0xa70   : > { %19847 = vmatprep.subr.mxu1 %v22578_v3 }
 0xa72   : > { %19845 = vmatmul.mubr.msk.f32.vlgmr.msra.gmra.mxu1 %vm2152_vm2, %v3966_v8 }
 0xa73   : > { %19848 = vmatpush3.xpose.msk.msra.mxu1 %vm2152_vm2, %v4605_v39  ;;  %19849 = vmatprep.mubr.msk.f32.mxu1 %vm22579_vm1, %v22578_v3 }
 0xa74   : > { %19852 = vmatprep.subr.mxu1 %v22578_v3 }
 0xa76   : > { %19850 = vmatmul.mubr.msk.f32.vlgmr.msra.gmra.mxu1 %vm2152_vm2, %v3967_v1 }
 0xa77   : > { %19854 = vmatprep.mubr.msk.f32.mxu1 %vm22579_vm1, %v22578_v3 }
 0xa7c   : > { %v4595_v40 = vpop.f32.mrf.mxu0 }
 0xa7d   : > { %v4602_v42 = vmul.f32 %v23478_v55, %v4595_v40  ;;  %v23511_v43 = vpop.f32.mrf.mxu1  ;;  %v5570_v40 = vld [vmem:[#allocation14 + $0x48] sm:$0xff] }
 0xa7e   : > { %v19760_v44 = vpop.f32.mrf.mxu0 }
 0xa7f   : > { %v4606_v45 = vadd.f32 %v4602_v42, %v4285_v41  ;;  %v19817_v46 = vpop.f32.mrf.mxu1  ;;  %v5572_v44 = vld [vmem:[#allocation14 + $0x58] sm:$0xff] }
 0xa80   : > { %v5574_v46 = vld [vmem:[#allocation14 + $0x68] sm:$0xff] }
 0xa81   : > { %19853 = vmatpush3.xpose.msk.msra.mxu1 %vm2152_vm2, %v4606_v45  ;;  %v5571_v45 = vld [vmem:[#allocation14 + $0x50] sm:$0xff] }
 0xa82   : > { %19862 = vmatprep.subr.mxu1 %v22578_v3 }
 0xa84   : > { %19855 = vmatmul.mubr.msk.f32.vlgmr.msra.gmra.mxu1 %vm2152_vm2, %v3968_v15 }
 0xa85   : > { %19864 = vmatprep.mubr.msk.f32.mxu1 %vm22579_vm1, %v22578_v3 }
 0xa8c   : > { %v4776_v47 = vpop.f32.mrf.mxu0 }
 0xa8d   : > { %19863 = vmatpush3.msra.mxu1 %v4776_v47 }
 0xa8e   : > { %v19798_v48 = vpop.f32.mrf.mxu0  ;;  %19872 = vmatprep.subr.mxu1 %v22578_v3 }
 0xa8f   : > { %v5573_v48 = vld [vmem:[#allocation14 + $0x60] sm:$0xff] }
 0xa9c   : > { %v23519_v49 = vpop.f32.mrf.mxu0 }
 0xa9e   : > { %v19836_v50 = vpop.f32.mrf.mxu0 }
 0xa9f   : > { %v5576_v50 = vld [vmem:[#allocation14 + $0x78] sm:$0xff] }
 0xb0f   : > { %v4992_v51 = vpop.f32.mrf.mxu1 }
 0xb10   : > { %v5224_v52 = vmul.f32 0.25, %v4992_v51 }
 0xb11   : > { %v19841_v53 = vpop.f32.mrf.mxu1 }
 0xb12   : > { %v5228_v55 = vadd.f32 %v22175_v54, %v5224_v52  ;;  %v5575_v52 = vld [vmem:[#allocation14 + $0x70] sm:$0xff] }
 0xb14   : > { %v5232_v26 = vsel %vm2465_vm3, %v5228_v55, -inf }
 0xb15   : > { %5233 = vmax.xlane.f32.xlu1 %v5232_v26 }
 0xb32   : > { %v5068_v23 = vpop.f32.mrf.mxu1 }
 0xb33   : > { %v5225_v56 = vmul.f32 0.25, %v5068_v23 }
 0xb34   : > { %v19846_v57 = vpop.f32.mrf.mxu1 }
 0xb35   : > { %v5229_v58 = vadd.f32 %v22175_v54, %v5225_v56 }
 0xb36   : > { %v5144_v59 = vpop.f32.mrf.mxu1 }
 0xb37   : > { %v5226_v61 = vmul.f32 0.25, %v5144_v59  ;;  %v5235_v62 = vsel %vm2465_vm3, %v5229_v58, -inf }
 0xb38   : > { %5236 = vmax.xlane.f32.xlu0 %v5235_v62  ;;  %v19851_v63 = vpop.f32.mrf.mxu1 }
 0xb39   : > { %v5230_v0 = vadd.f32 %v22175_v54, %v5226_v61 }
 0xb3b   : > { %v5238_v1 = vsel %vm2465_vm3, %v5230_v0, -inf }
 0xb3c   : > { %5239 = vmax.xlane.f32.xlu1 %v5238_v1 }
 0xb44   : > { %v5220_v2 = vpop.f32.mrf.mxu1 }
 0xb45   : > { %v5227_v4 = vmul.f32 0.25, %v5220_v2 }
 0xb46   : > { %v19856_v5 = vpop.f32.mrf.mxu1 }
 0xb47   : > { %v5231_v6 = vadd.f32 %v22175_v54, %v5227_v4 }
 0xb49   : > { %v5241_v7 = vsel %vm2465_vm3, %v5231_v6, -inf }
 0xb4a   : > { %5242 = vmax.xlane.f32.xlu0 %v5241_v7 }
 0xb9e   : > { %v5234_v8 = vpop.xlane.xlu1 %5233 }
 0xb9f   : > { %v5244_v9 = vsub.f32 %v5228_v55, %v5234_v8 }
 0xba1   : > { %v5248_v10 = vmul.f32 1.442695, %v5244_v9 }
 0xba3   : > { %22052 = vpow2.f32 %v5248_v10 }
 0xbb0   : > { %v22053_v11 = vpop.eup %22052 }
 0xbb1   : > { %v5256_v12 = vsel %vm2465_vm3, %v22053_v11, 0.0 }
 0xbb2   : > { %5257 = vadd.xlane.f32.xlu1 %v5256_v12  ;;  %v5910_v12 = vld [vmem:[#allocation16 + $0xf8] sm:$0xff] }
 0xbc1   : > { %v5237_v13 = vpop.xlane.xlu0 %5236 }
 0xbc2   : > { %v5245_v14 = vsub.f32 %v5229_v58, %v5237_v13  ;;  %v5909_v13 = vld [vmem:[#allocation16 + $0xf0] sm:$0xff] }
 0xbc4   : > { %v5250_v15 = vmul.f32 1.442695, %v5245_v14  ;;  %v5908_v14 = vld [vmem:[#allocation16 + $0xe8] sm:$0xff] }
 0xbc5   : > { %v5240_v16 = vpop.xlane.xlu1 %5239 }
 0xbc6   : > { %22054 = vpow2.f32 %v5250_v15  ;;  %v5246_v17 = vsub.f32 %v5230_v0, %v5240_v16  ;;  %v5907_v15 = vld [vmem:[#allocation16 + $0xe0] sm:$0xff]  ;;  %v5906_v16 = vld [vmem:[#allocation16 + $0xd8] sm:$0xff] }
 0xbc8   : > { %v5252_v18 = vmul.f32 1.442695, %v5246_v17  ;;  %v5905_v17 = vld [vmem:[#allocation16 + $0xd0] sm:$0xff] }
 0xbca   : > { %22056 = vpow2.f32 %v5252_v18  ;;  %v5904_v18 = vld [vmem:[#allocation16 + $0xc8] sm:$0xff] }
 0xbd3   : > { %v22055_v19 = vpop.eup %22054  ;;  %v5243_v20 = vpop.xlane.xlu0 %5242 }
 0xbd4   : > { %v5247_v21 = vsub.f32 %v5231_v6, %v5243_v20  ;;  %v5259_v22 = vsel %vm2465_vm3, %v22055_v19, 0.0  ;;  %v5901_v20 = vld [vmem:[#allocation16 + $0xb0] sm:$0xff] }
 0xbd5   : > { %5260 = vadd.xlane.f32.xlu0 %v5259_v22  ;;  %v5899_v22 = vld [vmem:[#allocation16 + $0xa0] sm:$0xff] }
 0xbd6   : > { %v5254_v24 = vmul.f32 1.442695, %v5247_v21  ;;  %v5900_v21 = vld [vmem:[#allocation16 + $0xa8] sm:$0xff] }
 0xbd7   : > { %v22057_v25 = vpop.eup %22056 }
 0xbd8   : > { %22058 = vpow2.f32 %v5254_v24  ;;  %v5262_v27 = vsel %vm2465_vm3, %v22057_v25, 0.0  ;;  %v5898_v24 = vld [vmem:[#allocation16 + $0x98] sm:$0xff] }
 0xbd9   : > { %5263 = vadd.xlane.f32.xlu1 %v5262_v27  ;;  %v5896_v27 = vld [vmem:[#allocation16 + $0x88] sm:$0xff] }
 0xbe5   : > { %v22059_v28 = vpop.eup %22058 }
 0xbe6   : > { %v5265_v29 = vsel %vm2465_vm3, %v22059_v28, 0.0 }
 0xbe7   : > { %5266 = vadd.xlane.f32.xlu0 %v5265_v29 }
 0xc3b   : > { %v5258_v30 = vpop.xlane.xlu1 %5257 }
 0xc3c   : > { %22060 = vrcp.f32 %v5258_v30 }
 0xc49   : > { %v22061_v31 = vpop.eup %22060 }
 0xc4a   : > { %v5269_v32 = vmul.f32 %v22061_v31, %v22053_v11 }
 0xc4c   : > { %19860 = vmatmul.mubr.msk.f32.vlgmr.msra.gmra.mxu0 %vm2465_vm3, %v5269_v32 }
 0xc4d   : > { %19868 = vmatpush3.msra.mxu0 %v23511_v43  ;;  %19869 = vmatprep.mubr.msk.f32.mxu0 %vm22579_vm1, %v22578_v3  ;;  %v5569_v43 = vld [vmem:[#allocation14 + $0x40] sm:$0xff] }
 0xc4e   : > { %19877 = vmatprep.subr.mxu0 %v22578_v3 }
 0xc5e   : > { %v5261_v33 = vpop.xlane.xlu0 %5260 }
 0xc5f   : > { %22062 = vrcp.f32 %v5261_v33  ;;  %v17461_v33 = vld [vmem:[#allocation11 + $0x1] ss:$0 sm:$0xff] }
 0xc62   : > { %v5264_v34 = vpop.xlane.xlu1 %5263 }
 0xc63   : > { %22064 = vrcp.f32 %v5264_v34 }
 0xc6c   : > { %v22063_v35 = vpop.eup %22062 }
 0xc6d   : > { %v5271_v36 = vmul.f32 %v22063_v35, %v22055_v19  ;;  %v5902_v19 = vld [vmem:[#allocation16 + $0xb8] sm:$0xff] }
 0xc6f   : > { %19865 = vmatmul.mubr.msk.f32.vlgmr.msra.gmra.mxu1 %vm2465_vm3, %v5271_v36  ;;  %v6009_v36 = vld [vmem:[#allocation17 + $0xf8] sm:$0xff] }
 0xc70   : > { %v22065_v37 = vpop.eup %22064  ;;  %v5267_v38 = vpop.xlane.xlu0 %5266  ;;  %19873 = vmatpush3.msra.mxu1 %v23519_v49  ;;  %19874 = vmatprep.mubr.msk.f32.mxu1 %vm22579_vm1, %v22578_v3 }
 0xc71   : > { %22066 = vrcp.f32 %v5267_v38  ;;  %v5273_v39 = vmul.f32 %v22065_v37, %v22057_v25  ;;  %19884 = vmatprep.subr.mxu1 %v22578_v3  ;;  %v5897_v25 = vld [vmem:[#allocation16 + $0x90] sm:$0xff]  ;;  %v6007_v38 = vld [vmem:[#allocation17 + $0xe8] sm:$0xff] }
 0xc72   : > { %v6008_v37 = vld [vmem:[#allocation17 + $0xf0] sm:$0xff] }
 0xc73   : > { %19870 = vmatmul.mubr.msk.f32.vlgmr.msra.gmra.mxu0 %vm2465_vm3, %v5273_v39  ;;  %v6006_v39 = vld [vmem:[#allocation17 + $0xe0] sm:$0xff] }
 0xc74   : > { %19878 = vmatpush3.msra.mxu0 %v5570_v40  ;;  %19881 = vmatprep.mubr.msk.f32.mxu0 %vm22579_vm1, %v22578_v3  ;;  %v6005_v40 = vld [vmem:[#allocation17 + $0xd8] sm:$0xff] }
 0xc75   : > { %19879 = vmatprep.subr.mxu0 %v22578_v3 }
 0xc76   : > { %19880 = vmatpush3.msra.mxu0 %v5569_v43  ;;  %v6002_v43 = vld [vmem:[#allocation17 + $0xc0] sm:$0xff] }
 0xc77   : > { %19891 = vmatprep.subr.mxu0 %v22578_v3 }
 0xc7e   : > { %v22067_v41 = vpop.eup %22066 }
 0xc7f   : > { %v5275_v42 = vmul.f32 %v22067_v41, %v22059_v28  ;;  %v5895_v28 = vld [vmem:[#allocation16 + $0x80] sm:$0xff]  ;;  %v6004_v41 = vld [vmem:[#allocation17 + $0xd0] sm:$0xff] }
 0xc81   : > { %19875 = vmatmul.mubr.msk.f32.vlgmr.msra.gmra.mxu1 %vm2465_vm3, %v5275_v42  ;;  %v6003_v42 = vld [vmem:[#allocation17 + $0xc8] sm:$0xff] }
 0xc82   : > { %19888 = vmatprep.mubr.msk.f32.mxu1 %vm22579_vm1, %v22578_v3  ;;  %19885 = vmatpush3.msra.mxu1 %v5572_v44  ;;  %v6001_v44 = vld [vmem:[#allocation17 + $0xb8] sm:$0xff] }
 0xc83   : > { %19886 = vmatprep.subr.mxu1 %v22578_v3 }
 0xc84   : > { %19887 = vmatpush3.msra.mxu1 %v5571_v45  ;;  %v6000_v45 = vld [vmem:[#allocation17 + $0xb0] sm:$0xff] }
 0xc85   : > { %19898 = vmatprep.subr.mxu1 %v22578_v3 }
 0xd0c   : > { %v5345_v47 = vpop.f32.mrf.mxu0 }
 0xd0d   : > { %19882 = vmatmul.mubr.msk.f32.vlgmr.msra.gmra.mxu0 %vm2152_vm2, %v5345_v47  ;;  %v5998_v47 = vld [vmem:[#allocation17 + $0xa0] sm:$0xff] }
 0xd0e   : > { %v19861_v49 = vpop.f32.mrf.mxu0  ;;  %19892 = vmatpush3.msra.mxu0 %v5574_v46  ;;  %19895 = vmatprep.mubr.msk.f32.mxu0 %vm22579_vm1, %v22578_v3  ;;  %v5999_v46 = vld [vmem:[#allocation17 + $0xa8] sm:$0xff] }
 0xd0f   : > { %19893 = vmatprep.subr.mxu0 %v22578_v3  ;;  %v5996_v49 = vld [vmem:[#allocation17 + $0x90] sm:$0xff] }
 0xd10   : > { %19894 = vmatpush3.msra.mxu0 %v5573_v48  ;;  %v5997_v48 = vld [vmem:[#allocation17 + $0x98] sm:$0xff] }
 0xd11   : > { %5930 = vmatprep.subr.mxu0 %v5910_v12  ;;  %v6101_v12 = vld [vmem:[#allocation13 + $0xa10] sm:$0xff] }
 0xd2f   : > { %v5418_v51 = vpop.f32.mrf.mxu1 }
 0xd30   : > { %19889 = vmatmul.mubr.msk.f32.vlgmr.msra.gmra.mxu1 %vm2152_vm2, %v5418_v51  ;;  %v5994_v51 = vld [vmem:[#allocation17 + $0x80] sm:$0xff] }
 0xd31   : > { %v19866_v53 = vpop.f32.mrf.mxu1  ;;  %19899 = vmatpush3.msra.mxu1 %v5576_v50  ;;  %19902 = vmatprep.mubr.msk.f32.mxu1 %vm22579_vm1, %v22578_v3  ;;  %v5995_v50 = vld [vmem:[#allocation17 + $0x88] sm:$0xff] }
 0xd32   : > { %19900 = vmatprep.subr.mxu1 %v22578_v3 }
 0xd33   : > { %v5491_v54 = vpop.f32.mrf.mxu0  ;;  %19901 = vmatpush3.msra.mxu1 %v5575_v52 }
 0xd34   : > { %19896 = vmatmul.mubr.msk.f32.vlgmr.msra.gmra.mxu0 %vm2152_vm2, %v5491_v54  ;;  %19905 = vmatprep.subr.mxu1 %v22578_v3 }
 0xd35   : > { %v19871_v55 = vpop.f32.mrf.mxu0  ;;  %5978 = vmatprep.mubr.f32.mxu0 %v22578_v3  ;;  %5931 = vmatpush1.msra.mxu0 %v5909_v13  ;;  %v6117_v13 = vld [vmem:[#allocation13 + $0xa90] sm:$0xff] }
 0xd36   : > { %5932 = vmatprep.subr.mxu0 %v5908_v14  ;;  %v6100_v14 = vld [vmem:[#allocation13 + $0xa08] sm:$0xff] }
 0xd37   : > { %5933 = vmatpush1.msra.mxu0 %v5907_v15  ;;  %v6116_v15 = vld [vmem:[#allocation13 + $0xa88] sm:$0xff] }
 0xd38   : > { %5934 = vmatprep.subr.mxu0 %v5906_v16  ;;  %v6099_v16 = vld [vmem:[#allocation13 + $0xa00] sm:$0xff] }
 0xd39   : > { %5935 = vmatpush1.msra.mxu0 %v5905_v17  ;;  %v6115_v17 = vld [vmem:[#allocation13 + $0xa80] sm:$0xff] }
 0xd3a   : > { %5936 = vmatprep.subr.mxu0 %v5904_v18 }
 0xd41   : > { %v5564_v26 = vpop.f32.mrf.mxu1 }
 0xd42   : > { %19903 = vmatmul.mubr.msk.f32.vlgmr.msra.gmra.mxu1 %vm2152_vm2, %v5564_v26 }
 0xd43   : > { %v19876_v23 = vpop.f32.mrf.mxu1  ;;  %19937 = vmatprep.mubr.msk.f32.mxu1 %vm22579_vm1, %v22578_v3  ;;  %19906 = vmatpush3.msra.mxu1 %v6009_v36  ;;  %v6109_v36 = vld [vmem:[#allocation13 + $0xa50] sm:$0xff] }
 0xd44   : > { %19907 = vmatprep.subr.mxu1 %v22578_v3 }
 0xd45   : > { %19908 = vmatpush3.msra.mxu1 %v6008_v37  ;;  %v6421_v37 = vld [vmem:[#allocation13 + $0xb10] sm:$0xff] }
 0xd46   : > { %19909 = vmatprep.subr.mxu1 %v22578_v3 }
 0xd47   : > { %19910 = vmatpush3.msra.mxu1 %v6007_v38  ;;  %v6108_v38 = vld [vmem:[#allocation13 + $0xa48] sm:$0xff] }
 0xd48   : > { %19911 = vmatprep.subr.mxu1 %v22578_v3 }
 0xd49   : > { %19912 = vmatpush3.msra.mxu1 %v6006_v39  ;;  %v6420_v39 = vld [vmem:[#allocation13 + $0xb08] sm:$0xff] }
 0xd4a   : > { %19913 = vmatprep.subr.mxu1 %v22578_v3 }
 0xd4b   : > { %19914 = vmatpush3.msra.mxu1 %v6005_v40  ;;  %v6107_v40 = vld [vmem:[#allocation13 + $0xa40] sm:$0xff] }
 0xd4c   : > { %19915 = vmatprep.subr.mxu1 %v22578_v3 }
 0xd4d   : > { %19916 = vmatpush3.msra.mxu1 %v6004_v41  ;;  %v6419_v41 = vld [vmem:[#allocation13 + $0xb00] sm:$0xff] }
 0xd4e   : > { %19917 = vmatprep.subr.mxu1 %v22578_v3 }
 0xd4f   : > { %19918 = vmatpush3.msra.mxu1 %v6003_v42  ;;  %v6130_v42 = vld [vmem:[#allocation13 + $0xaf8] sm:$0xff] }
 0xd50   : > { %19919 = vmatprep.subr.mxu1 %v22578_v3 }
 0xd51   : > { %19920 = vmatpush3.msra.mxu1 %v6002_v43  ;;  %v6442_v43 = vld [vmem:[#allocation13 + $0xbb8] sm:$0xff] }
 0xd52   : > { %19921 = vmatprep.subr.mxu1 %v22578_v3 }
 0xd53   : > { %19922 = vmatpush3.msra.mxu1 %v6001_v44  ;;  %v6129_v44 = vld [vmem:[#allocation13 + $0xaf0] sm:$0xff] }
 0xd54   : > { %19923 = vmatprep.subr.mxu1 %v22578_v3 }
 0xd55   : > { %19924 = vmatpush3.msra.mxu1 %v6000_v45  ;;  %v6441_v45 = vld [vmem:[#allocation13 + $0xbb0] sm:$0xff] }
 0xd56   : > { %19925 = vmatprep.subr.mxu1 %v22578_v3 }
 0xd57   : > { %19926 = vmatpush3.msra.mxu1 %v5999_v46  ;;  %v6128_v46 = vld [vmem:[#allocation13 + $0xae8] sm:$0xff] }
 0xd58   : > { %19927 = vmatprep.subr.mxu1 %v22578_v3 }
 0xd59   : > { %19928 = vmatpush3.msra.mxu1 %v5998_v47  ;;  %v6440_v47 = vld [vmem:[#allocation13 + $0xba8] sm:$0xff] }
 0xd5a   : > { %19929 = vmatprep.subr.mxu1 %v22578_v3 }
 0xd5b   : > { %19930 = vmatpush3.msra.mxu1 %v5997_v48  ;;  %v6127_v48 = vld [vmem:[#allocation13 + $0xae0] sm:$0xff] }
 0xd5c   : > { %19931 = vmatprep.subr.mxu1 %v22578_v3 }
 0xd5d   : > { %19932 = vmatpush3.msra.mxu1 %v5996_v49  ;;  %v6439_v49 = vld [vmem:[#allocation13 + $0xba0] sm:$0xff] }
 0xd5e   : > { %19933 = vmatprep.subr.mxu1 %v22578_v3 }
 0xd5f   : > { %19934 = vmatpush3.msra.mxu1 %v5995_v50  ;;  %v6126_v50 = vld [vmem:[#allocation13 + $0xad8] sm:$0xff] }
 0xd60   : > { %19935 = vmatprep.subr.mxu1 %v22578_v3 }
 0xd61   : > { %19936 = vmatpush3.msra.mxu1 %v5994_v51  ;;  %v6438_v51 = vld [vmem:[#allocation13 + $0xb98] sm:$0xff] }
 0xd62   : > { %19978 = vmatprep.subr.mxu1 %v22578_v3 }
 0xdcd   : > { %v5646_v56 = vpop.f32.mrf.mxu0 }
 0xdce   : > { %v5869_v0 = vsel %vm545_vm0, %v5646_v56, 0.0 }
 0xdcf   : > { %v19883_v57 = vpop.f32.mrf.mxu0 }
 0xdf0   : > { %v5719_v58 = vpop.f32.mrf.mxu1 }
 0xdf1   : > { %v5870_v63 = vsel %vm545_vm0, %v5719_v58, 0.0 }
 0xdf2   : > { %v19890_v59 = vpop.f32.mrf.mxu1  ;;  %v5871_v2 = vadd.f32 %v5870_v63, %v5869_v0 }
 0xdf4   : > { %v5792_v61 = vpop.f32.mrf.mxu0 }
 0xdf5   : > { %v5872_v1 = vsel %vm545_vm0, %v5792_v61, 0.0 }
 0xdf6   : > { %v19897_v62 = vpop.f32.mrf.mxu0  ;;  %v5873_v4 = vadd.f32 %v5872_v1, %v5871_v2  ;;  %v6106_v1 = vld [vmem:[#allocation13 + $0xa38] sm:$0xff] }
 0xdf7   : > { %v6122_v2 = vld [vmem:[#allocation13 + $0xab8] sm:$0xff] }
 0xe02   : > { %v5865_v5 = vpop.f32.mrf.mxu1 }
 0xe03   : > { %v5874_v6 = vsel %vm545_vm0, %v5865_v5, 0.0  ;;  %v6121_v5 = vld [vmem:[#allocation13 + $0xab0] sm:$0xff] }
 0xe04   : > { %v5875_v7 = vadd.f32 %v5874_v6, %v5873_v4  ;;  %v19904_v8 = vpop.f32.mrf.mxu1  ;;  %v6105_v4 = vld [vmem:[#allocation13 + $0xa30] sm:$0xff]  ;;  %v6104_v6 = vld [vmem:[#allocation13 + $0xa28] sm:$0xff] }
 0xe05   : > { %v6103_v8 = vld [vmem:[#allocation13 + $0xa20] sm:$0xff] }
 0xe06   : > { %v23568_v9 = vadd.f32 %v5875_v7, %v23227_v60  ;;  %v5903_v60 = vld [vmem:[#allocation16 + $0xc0] sm:$0xff]  ;;  %v6120_v7 = vld [vmem:[#allocation13 + $0xaa8] sm:$0xff] }
 0xe07   : > { %5937 = vmatpush1.msra.mxu0 %v5903_v60 }
 0xe08   : > { %v5879_v10 = vmul.f32 %v23568_v9, %v23568_v9  ;;  %5938 = vmatprep.subr.mxu0 %v5902_v19 }
 0xe09   : > { %5939 = vmatpush1.msra.mxu0 %v5901_v20 }
 0xe0a   : > { %v5880_v11 = vsel %vm545_vm0, %v5879_v10, 0.0  ;;  %5940 = vmatprep.subr.mxu0 %v5900_v21  ;;  %v6102_v10 = vld [vmem:[#allocation13 + $0xa18] sm:$0xff]  ;;  %v17463_v21 = vld [vmem:[#allocation10 + $0x2] ss:$0 sm:$0xff] }
 0xe0b   : > { %5881 = vadd.xlane.f32.xlu1 %v5880_v11  ;;  %5941 = vmatpush1.msra.mxu0 %v5899_v22  ;;  %v6118_v11 = vld [vmem:[#allocation13 + $0xa98] sm:$0xff] }
 0xe0c   : > { %5942 = vmatprep.subr.mxu0 %v5898_v24 }
 0xe0d   : > { %5943 = vmatpush1.msra.mxu0 %v5897_v25  ;;  %v6114_v25 = vld [vmem:[#allocation13 + $0xa78] sm:$0xff] }
 0xe0e   : > { %5944 = vmatprep.subr.mxu0 %v5896_v27  ;;  %v6426_v27 = vld [vmem:[#allocation13 + $0xb38] sm:$0xff] }
 0xe0f   : > { %5945 = vmatpush1.msra.mxu0 %v5895_v28  ;;  %v6113_v28 = vld [vmem:[#allocation13 + $0xa70] sm:$0xff] }
 0xe10   : > { %19940 = vmatprep.subr.mxu0 %v22578_v3 }
 0xe94   : > { %v5882_v29 = vpop.xlane.xlu1 %5881 }
 0xe95   : > { %v5883_v30 = vmul.f32 0.015625, %v5882_v29  ;;  %v6425_v29 = vld [vmem:[#allocation13 + $0xb30] sm:$0xff] }
 0xe97   : > { %v5884_v31 = vadd.f32 1e-06, %v5883_v30  ;;  %v6112_v30 = vld [vmem:[#allocation13 + $0xa68] sm:$0xff] }
 0xe99   : > { %22068 = vrsqrt.f32 %v5884_v31  ;;  %v6424_v31 = vld [vmem:[#allocation13 + $0xb28] sm:$0xff] }
 0xea6   : > { %v22069_v32 = vpop.eup %22068 }
 0xea7   : > { %v5886_v34 = vmul.f32 %v22069_v32, %v23568_v9  ;;  %v6111_v32 = vld [vmem:[#allocation13 + $0xa60] sm:$0xff] }
 0xea9   : > { %v5893_v35 = vmul.f32 %v17461_v33, %v5886_v34  ;;  %v6423_v33 = vld [vmem:[#allocation13 + $0xb20] sm:$0xff]  ;;  %v6110_v34 = vld [vmem:[#allocation13 + $0xa58] sm:$0xff] }
 0xeab   : > { %17462 = vmatmul.mubr.msk.f32.vlgmr.msra.gmra.mxu0 %vm545_vm0, %v5893_v35  ;;  %v6422_v35 = vld [vmem:[#allocation13 + $0xb18] sm:$0xff] }
 0xeac   : > { %19956 = vmatprep.mubr.msk.f32.mxu0 %vm22579_vm1, %v22578_v3  ;;  %19941 = vmatpush3.msra.mxu0 %v6106_v1  ;;  %v6744_v1 = vld [vmem:[#allocation13 + $0xc20] sm:$0xff] }
 0xead   : > { %19942 = vmatprep.subr.mxu0 %v22578_v3 }
 0xeae   : > { %19943 = vmatpush3.msra.mxu0 %v6105_v4  ;;  %v6743_v4 = vld [vmem:[#allocation13 + $0xc18] sm:$0xff] }
 0xeaf   : > { %19944 = vmatprep.subr.mxu0 %v22578_v3 }
 0xeb0   : > { %19945 = vmatpush3.msra.mxu0 %v6104_v6  ;;  %v6742_v6 = vld [vmem:[#allocation13 + $0xc10] sm:$0xff] }
 0xeb1   : > { %19946 = vmatprep.subr.mxu0 %v22578_v3 }
 0xeb2   : > { %19947 = vmatpush3.msra.mxu0 %v6103_v8  ;;  %v6741_v8 = vld [vmem:[#allocation13 + $0xc08] sm:$0xff] }
 0xeb3   : > { %19948 = vmatprep.subr.mxu0 %v22578_v3 }
 0xeb4   : > { %19949 = vmatpush3.msra.mxu0 %v6102_v10  ;;  %v6740_v10 = vld [vmem:[#allocation13 + $0xc00] sm:$0xff] }
 0xeb5   : > { %19950 = vmatprep.subr.mxu0 %v22578_v3 }
 0xeb6   : > { %19951 = vmatpush3.msra.mxu0 %v6101_v12  ;;  %v6763_v12 = vld [vmem:[#allocation13 + $0xcb8] sm:$0xff] }
 0xeb7   : > { %19952 = vmatprep.subr.mxu0 %v22578_v3 }
 0xeb8   : > { %19953 = vmatpush3.msra.mxu0 %v6100_v14  ;;  %v6762_v14 = vld [vmem:[#allocation13 + $0xcb0] sm:$0xff] }
 0xeb9   : > { %19954 = vmatprep.subr.mxu0 %v22578_v3 }
 0xeba   : > { %19955 = vmatpush3.msra.mxu0 %v6099_v16  ;;  %v6761_v16 = vld [vmem:[#allocation13 + $0xca8] sm:$0xff] }
 0xebb   : > { %19959 = vmatprep.subr.mxu0 %v22578_v3 }
 0xf6b   : > { %v5980_v52 = vpop.f32.mrf.mxu0 }
 0xf6c   : > { %v5985_v53 = vsub.f32 0.0, %v5980_v52 }
 0xf6d   : > { %v5982_v57 = vpop.f32.mrf.mxu0 }
 0xf6e   : > { %v5986_v54 = vmul.f32 1.442695, %v5985_v53  ;;  %v6437_v53 = vld [vmem:[#allocation13 + $0xb90] sm:$0xff] }
 0xf70   : > { %22070 = vpow2.f32 %v5986_v54  ;;  %v6124_v54 = vld [vmem:[#allocation13 + $0xac8] sm:$0xff] }
 0xf7d   : > { %v22071_v55 = vpop.eup %22070 }
 0xf7e   : > { %v5988_v26 = vadd.f32 1.0, %v22071_v55  ;;  %v6436_v55 = vld [vmem:[#allocation13 + $0xb88] sm:$0xff] }
 0xf80   : > { %22072 = vrcp.f32 %v5988_v26  ;;  %v6123_v26 = vld [vmem:[#allocation13 + $0xac0] sm:$0xff] }
 0xf8d   : > { %v22073_v23 = vpop.eup %22072 }
 0xf8e   : > { %v5991_v56 = vmul.f32 %v22073_v23, %v5980_v52  ;;  %v6125_v52 = vld [vmem:[#allocation13 + $0xad0] sm:$0xff]  ;;  %v6435_v23 = vld [vmem:[#allocation13 + $0xb80] sm:$0xff] }
 0xf90   : > { %v5992_v58 = vmul.f32 %v5991_v56, %v5982_v57  ;;  %v6434_v56 = vld [vmem:[#allocation13 + $0xb78] sm:$0xff] }
 0xf91   : > { %v6747_v57 = vld [vmem:[#allocation13 + $0xc38] sm:$0xff] }
 0xf92   : > { %19938 = vmatmul.mubr.f32.vlgmr.msra.gmra.mxu1 %v5992_v58  ;;  %v6433_v58 = vld [vmem:[#allocation13 + $0xb70] sm:$0xff] }
 0xf93   : > { %19994 = vmatprep.mubr.msk.f32.mxu1 %vm22579_vm1, %v22578_v3  ;;  %19979 = vmatpush3.msra.mxu1 %v6122_v2  ;;  %v6430_v2 = vld [vmem:[#allocation13 + $0xb58] sm:$0xff] }
 0xf94   : > { %19980 = vmatprep.subr.mxu1 %v22578_v3 }
 0xf95   : > { %19981 = vmatpush3.msra.mxu1 %v6121_v5  ;;  %v6429_v5 = vld [vmem:[#allocation13 + $0xb50] sm:$0xff] }
 0xf96   : > { %19982 = vmatprep.subr.mxu1 %v22578_v3 }
 0xf97   : > { %19983 = vmatpush3.msra.mxu1 %v6120_v7  ;;  %v6428_v7 = vld [vmem:[#allocation13 + $0xb48] sm:$0xff] }
 0xf98   : > { %19984 = vmatprep.subr.mxu1 %v22578_v3 }
0x1052   : > { %v6076_v59 = vpop.f32.mrf.mxu1 }
0x1053   : > { %v23597_v61 = vadd.f32 %v6076_v59, %v23568_v9  ;;  %v6119_v9 = vld [vmem:[#allocation13 + $0xaa0] sm:$0xff]  ;;  %v6746_v59 = vld [vmem:[#allocation13 + $0xc30] sm:$0xff] }
0x1054   : > { %v19939_v62 = vpop.f32.mrf.mxu1  ;;  %19985 = vmatpush3.msra.mxu1 %v6119_v9  ;;  %v6427_v9 = vld [vmem:[#allocation13 + $0xb40] sm:$0xff] }
0x1055   : > { %v6083_v63 = vmul.f32 %v23597_v61, %v23597_v61  ;;  %19986 = vmatprep.subr.mxu1 %v22578_v3  ;;  %v6432_v62 = vld [vmem:[#allocation13 + $0xb68] sm:$0xff] }
0x1056   : > { %19987 = vmatpush3.msra.mxu1 %v6118_v11  ;;  %v6450_v11 = vld [vmem:[#allocation13 + $0xbf8] sm:$0xff] }
0x1057   : > { %v6084_v0 = vsel %vm545_vm0, %v6083_v63, 0.0  ;;  %19988 = vmatprep.subr.mxu1 %v22578_v3  ;;  %v6745_v63 = vld [vmem:[#allocation13 + $0xc28] sm:$0xff] }
0x1058   : > { %6085 = vadd.xlane.f32.xlu0 %v6084_v0  ;;  %19989 = vmatpush3.msra.mxu1 %v6117_v13  ;;  %v6431_v0 = vld [vmem:[#allocation13 + $0xb60] sm:$0xff]  ;;  %v6449_v13 = vld [vmem:[#allocation13 + $0xbf0] sm:$0xff] }
0x1059   : > { %19990 = vmatprep.subr.mxu1 %v22578_v3 }
0x105a   : > { %19991 = vmatpush3.msra.mxu1 %v6116_v15  ;;  %v6448_v15 = vld [vmem:[#allocation13 + $0xbe8] sm:$0xff] }
0x105b   : > { %19992 = vmatprep.subr.mxu1 %v22578_v3 }
0x105c   : > { %19993 = vmatpush3.msra.mxu1 %v6115_v17  ;;  %v6447_v17 = vld [vmem:[#allocation13 + $0xbe0] sm:$0xff] }
0x105d   : > { %20016 = vmatprep.subr.mxu1 %v22578_v3 }
0x10e1   : > { %v6086_v18 = vpop.xlane.xlu0 %6085 }
0x10e2   : > { %v6087_v60 = vmul.f32 0.015625, %v6086_v18  ;;  %v6760_v18 = vld [vmem:[#allocation13 + $0xca0] sm:$0xff] }
0x10e4   : > { %v6088_v19 = vadd.f32 1e-06, %v6087_v60  ;;  %v6446_v60 = vld [vmem:[#allocation13 + $0xbd8] sm:$0xff] }
0x10e6   : > { %22074 = vrsqrt.f32 %v6088_v19  ;;  %v6759_v19 = vld [vmem:[#allocation13 + $0xc98] sm:$0xff] }
0x10f3   : > { %v22075_v20 = vpop.eup %22074 }
0x10f4   : > { %v6090_v22 = vmul.f32 %v22075_v20, %v23597_v61  ;;  %v6445_v20 = vld [vmem:[#allocation13 + $0xbd0] sm:$0xff] }
0x10f6   : > { %v23619_v24 = vmul.f32 %v17463_v21, %v6090_v22  ;;  %v6758_v21 = vld [vmem:[#allocation13 + $0xc90] sm:$0xff]  ;;  %v6444_v22 = vld [vmem:[#allocation13 + $0xbc8] sm:$0xff] }
0x10f8   : > { %19957 = vmatmul.mubr.msk.f32.vlgmr.msra.gmra.mxu0 %vm545_vm0, %v23619_v24  ;;  %19995 = vmatmul.mubr.msk.f32.vlgmr.msra.gmra.mxu1 %vm545_vm0, %v23619_v24 }
0x10f9   : > { %19960 = vmatpush3.msra.mxu0 %v6114_v25  ;;  %20017 = vmatpush3.msra.mxu1 %v6426_v27  ;;  %v6757_v25 = vld [vmem:[#allocation13 + $0xc88] sm:$0xff]  ;;  %v6443_v27 = vld [vmem:[#allocation13 + $0xbc0] sm:$0xff] }
0x10fa   : > { %19961 = vmatprep.subr.mxu0 %v22578_v3  ;;  %20018 = vmatprep.subr.mxu1 %v22578_v3 }
0x10fb   : > { %19962 = vmatpush3.msra.mxu0 %v6113_v28  ;;  %20019 = vmatpush3.msra.mxu1 %v6425_v29  ;;  %v6756_v28 = vld [vmem:[#allocation13 + $0xc80] sm:$0xff]  ;;  %v6755_v29 = vld [vmem:[#allocation13 + $0xc78] sm:$0xff] }
0x10fc   : > { %19963 = vmatprep.subr.mxu0 %v22578_v3  ;;  %20020 = vmatprep.subr.mxu1 %v22578_v3 }
0x10fd   : > { %19964 = vmatpush3.msra.mxu0 %v6112_v30  ;;  %20021 = vmatpush3.msra.mxu1 %v6424_v31  ;;  %v7064_v30 = vld [vmem:[#allocation13 + $0xd38] sm:$0xff]  ;;  %v6754_v31 = vld [vmem:[#allocation13 + $0xc70] sm:$0xff] }
0x10fe   : > { %19965 = vmatprep.subr.mxu0 %v22578_v3  ;;  %20022 = vmatprep.subr.mxu1 %v22578_v3 }
0x10ff   : > { %19966 = vmatpush3.msra.mxu0 %v6111_v32  ;;  %20023 = vmatpush3.msra.mxu1 %v6423_v33  ;;  %v7063_v32 = vld [vmem:[#allocation13 + $0xd30] sm:$0xff]  ;;  %v6753_v33 = vld [vmem:[#allocation13 + $0xc68] sm:$0xff] }
0x1100   : > { %19967 = vmatprep.subr.mxu0 %v22578_v3  ;;  %20024 = vmatprep.subr.mxu1 %v22578_v3 }
0x1101   : > { %19968 = vmatpush3.msra.mxu0 %v6110_v34  ;;  %20025 = vmatpush3.msra.mxu1 %v6422_v35  ;;  %v7062_v34 = vld [vmem:[#allocation13 + $0xd28] sm:$0xff]  ;;  %v6752_v35 = vld [vmem:[#allocation13 + $0xc60] sm:$0xff] }
0x1102   : > { %19969 = vmatprep.subr.mxu0 %v22578_v3  ;;  %20026 = vmatprep.subr.mxu1 %v22578_v3 }
0x1103   : > { %19970 = vmatpush3.msra.mxu0 %v6109_v36  ;;  %20027 = vmatpush3.msra.mxu1 %v6421_v37  ;;  %v7061_v36 = vld [vmem:[#allocation13 + $0xd20] sm:$0xff]  ;;  %v6751_v37 = vld [vmem:[#allocation13 + $0xc58] sm:$0xff] }
0x1104   : > { %19971 = vmatprep.subr.mxu0 %v22578_v3  ;;  %20028 = vmatprep.subr.mxu1 %v22578_v3 }
0x1105   : > { %19972 = vmatpush3.msra.mxu0 %v6108_v38  ;;  %20029 = vmatpush3.msra.mxu1 %v6420_v39  ;;  %v7060_v38 = vld [vmem:[#allocation13 + $0xd18] sm:$0xff]  ;;  %v6750_v39 = vld [vmem:[#allocation13 + $0xc50] sm:$0xff] }
0x1106   : > { %19973 = vmatprep.subr.mxu0 %v22578_v3  ;;  %20030 = vmatprep.subr.mxu1 %v22578_v3 }
0x1107   : > { %19974 = vmatpush3.msra.mxu0 %v6107_v40  ;;  %19975 = vmatprep.mubr.msk.f32.mxu0 %vm22579_vm1, %v22578_v3  ;;  %v7059_v40 = vld [vmem:[#allocation13 + $0xd10] sm:$0xff] }
0x1108   : > { %20031 = vmatpush3.msra.mxu1 %v6419_v41  ;;  %20032 = vmatprep.mubr.msk.f32.mxu1 %vm22579_vm1, %v22578_v3  ;;  %v6749_v41 = vld [vmem:[#allocation13 + $0xc48] sm:$0xff] }
0x1109   : > { %19976 = vmatmul.mubr.msk.f32.vlgmr.msra.gmra.mxu0 %vm545_vm0, %v23619_v24  ;;  %19997 = vmatprep.subr.mxu0 %v22578_v3 }
0x110a   : > { %20033 = vmatmul.mubr.msk.f32.vlgmr.msra.gmra.mxu1 %vm545_vm0, %v23619_v24  ;;  %20054 = vmatprep.subr.mxu1 %v22578_v3 }
0x110b   : > { %19998 = vmatpush3.msra.mxu0 %v6130_v42  ;;  %20055 = vmatpush3.msra.mxu1 %v6442_v43  ;;  %v7058_v42 = vld [vmem:[#allocation13 + $0xd08] sm:$0xff]  ;;  %v6748_v43 = vld [vmem:[#allocation13 + $0xc40] sm:$0xff] }
0x110c   : > { %19999 = vmatprep.subr.mxu0 %v22578_v3  ;;  %20056 = vmatprep.subr.mxu1 %v22578_v3 }
0x110d   : > { %20000 = vmatpush3.msra.mxu0 %v6129_v44  ;;  %20057 = vmatpush3.msra.mxu1 %v6441_v45  ;;  %v7057_v44 = vld [vmem:[#allocation13 + $0xd00] sm:$0xff]  ;;  %v6771_v45 = vld [vmem:[#allocation13 + $0xcf8] sm:$0xff] }
0x110e   : > { %20001 = vmatprep.subr.mxu0 %v22578_v3  ;;  %20058 = vmatprep.subr.mxu1 %v22578_v3 }
0x110f   : > { %20002 = vmatpush3.msra.mxu0 %v6128_v46  ;;  %20059 = vmatpush3.msra.mxu1 %v6440_v47  ;;  %v7080_v46 = vld [vmem:[#allocation13 + $0xdb8] sm:$0xff]  ;;  %v6770_v47 = vld [vmem:[#allocation13 + $0xcf0] sm:$0xff] }
0x1110   : > { %20003 = vmatprep.subr.mxu0 %v22578_v3  ;;  %20060 = vmatprep.subr.mxu1 %v22578_v3 }
0x1111   : > { %20004 = vmatpush3.msra.mxu0 %v6127_v48  ;;  %20061 = vmatpush3.msra.mxu1 %v6439_v49  ;;  %v7079_v48 = vld [vmem:[#allocation13 + $0xdb0] sm:$0xff]  ;;  %v6769_v49 = vld [vmem:[#allocation13 + $0xce8] sm:$0xff] }
0x1112   : > { %20005 = vmatprep.subr.mxu0 %v22578_v3  ;;  %20062 = vmatprep.subr.mxu1 %v22578_v3 }
0x1113   : > { %20006 = vmatpush3.msra.mxu0 %v6126_v50  ;;  %20063 = vmatpush3.msra.mxu1 %v6438_v51  ;;  %v7078_v50 = vld [vmem:[#allocation13 + $0xda8] sm:$0xff]  ;;  %v6768_v51 = vld [vmem:[#allocation13 + $0xce0] sm:$0xff] }
0x1114   : > { %20007 = vmatprep.subr.mxu0 %v22578_v3  ;;  %20064 = vmatprep.subr.mxu1 %v22578_v3 }
0x1115   : > { %20008 = vmatpush3.msra.mxu0 %v6125_v52  ;;  %20065 = vmatpush3.msra.mxu1 %v6437_v53  ;;  %v7077_v52 = vld [vmem:[#allocation13 + $0xda0] sm:$0xff]  ;;  %v6767_v53 = vld [vmem:[#allocation13 + $0xcd8] sm:$0xff] }
0x1116   : > { %20009 = vmatprep.subr.mxu0 %v22578_v3  ;;  %20066 = vmatprep.subr.mxu1 %v22578_v3 }
0x1117   : > { %20010 = vmatpush3.msra.mxu0 %v6124_v54  ;;  %20067 = vmatpush3.msra.mxu1 %v6436_v55  ;;  %v7076_v54 = vld [vmem:[#allocation13 + $0xd98] sm:$0xff]  ;;  %v6766_v55 = vld [vmem:[#allocation13 + $0xcd0] sm:$0xff] }
0x1118   : > { %20011 = vmatprep.subr.mxu0 %v22578_v3  ;;  %20068 = vmatprep.subr.mxu1 %v22578_v3 }
0x1119   : > { %20012 = vmatpush3.msra.mxu0 %v6123_v26  ;;  %20013 = vmatprep.mubr.msk.f32.mxu0 %vm22579_vm1, %v22578_v3  ;;  %v7075_v26 = vld [vmem:[#allocation13 + $0xd90] sm:$0xff] }
0x111a   : > { %20069 = vmatpush3.msra.mxu1 %v6435_v23  ;;  %20070 = vmatprep.mubr.msk.f32.mxu1 %vm22579_vm1, %v22578_v3  ;;  %v6765_v23 = vld [vmem:[#allocation13 + $0xcc8] sm:$0xff] }
0x111b   : > { %20014 = vmatmul.mubr.msk.f32.vlgmr.msra.gmra.mxu0 %vm545_vm0, %v23619_v24  ;;  %20035 = vmatprep.subr.mxu0 %v22578_v3 }
0x111c   : > { %20071 = vmatmul.mubr.msk.f32.vlgmr.msra.gmra.mxu1 %vm545_vm0, %v23619_v24  ;;  %20092 = vmatprep.subr.mxu1 %v22578_v3 }
0x111d   : > { %20036 = vmatpush3.msra.mxu0 %v6434_v56  ;;  %20093 = vmatpush3.msra.mxu1 %v6747_v57  ;;  %v7074_v56 = vld [vmem:[#allocation13 + $0xd88] sm:$0xff]  ;;  %v6764_v57 = vld [vmem:[#allocation13 + $0xcc0] sm:$0xff] }
0x111e   : > { %20037 = vmatprep.subr.mxu0 %v22578_v3  ;;  %20094 = vmatprep.subr.mxu1 %v22578_v3 }
0x111f   : > { %20038 = vmatpush3.msra.mxu0 %v6433_v58  ;;  %20095 = vmatpush3.msra.mxu1 %v6746_v59  ;;  %v7073_v58 = vld [vmem:[#allocation13 + $0xd80] sm:$0xff]  ;;  %v7072_v59 = vld [vmem:[#allocation13 + $0xd78] sm:$0xff] }
0x1120   : > { %20039 = vmatprep.subr.mxu0 %v22578_v3  ;;  %20096 = vmatprep.subr.mxu1 %v22578_v3 }
0x1121   : > { %20040 = vmatpush3.msra.mxu0 %v6432_v62  ;;  %20097 = vmatpush3.msra.mxu1 %v6745_v63  ;;  %v7385_v62 = vld [vmem:[#allocation13 + $0xe38] sm:$0xff]  ;;  %v7071_v63 = vld [vmem:[#allocation13 + $0xd70] sm:$0xff] }
0x1122   : > { %20041 = vmatprep.subr.mxu0 %v22578_v3  ;;  %20098 = vmatprep.subr.mxu1 %v22578_v3 }
0x1123   : > { %20042 = vmatpush3.msra.mxu0 %v6431_v0  ;;  %20099 = vmatpush3.msra.mxu1 %v6744_v1  ;;  %v7384_v0 = vld [vmem:[#allocation13 + $0xe30] sm:$0xff]  ;;  %v7070_v1 = vld [vmem:[#allocation13 + $0xd68] sm:$0xff] }
0x1124   : > { %20043 = vmatprep.subr.mxu0 %v22578_v3  ;;  %20100 = vmatprep.subr.mxu1 %v22578_v3 }
0x1125   : > { %20044 = vmatpush3.msra.mxu0 %v6430_v2  ;;  %20101 = vmatpush3.msra.mxu1 %v6743_v4  ;;  %v7383_v2 = vld [vmem:[#allocation13 + $0xe28] sm:$0xff]  ;;  %v7069_v4 = vld [vmem:[#allocation13 + $0xd60] sm:$0xff] }
0x1126   : > { %20045 = vmatprep.subr.mxu0 %v22578_v3  ;;  %20102 = vmatprep.subr.mxu1 %v22578_v3 }
0x1127   : > { %20046 = vmatpush3.msra.mxu0 %v6429_v5  ;;  %20103 = vmatpush3.msra.mxu1 %v6742_v6  ;;  %v7382_v5 = vld [vmem:[#allocation13 + $0xe20] sm:$0xff]  ;;  %v7068_v6 = vld [vmem:[#allocation13 + $0xd58] sm:$0xff] }
0x1128   : > { %20047 = vmatprep.subr.mxu0 %v22578_v3  ;;  %20104 = vmatprep.subr.mxu1 %v22578_v3 }
0x1129   : > { %20048 = vmatpush3.msra.mxu0 %v6428_v7  ;;  %20105 = vmatpush3.msra.mxu1 %v6741_v8  ;;  %v7381_v7 = vld [vmem:[#allocation13 + $0xe18] sm:$0xff]  ;;  %v7067_v8 = vld [vmem:[#allocation13 + $0xd50] sm:$0xff] }
0x112a   : > { %20049 = vmatprep.subr.mxu0 %v22578_v3  ;;  %20106 = vmatprep.subr.mxu1 %v22578_v3 }
0x112b   : > { %20050 = vmatpush3.msra.mxu0 %v6427_v9  ;;  %20051 = vmatprep.mubr.msk.f32.mxu0 %vm22579_vm1, %v22578_v3  ;;  %v7380_v9 = vld [vmem:[#allocation13 + $0xe10] sm:$0xff] }
0x112c   : > { %20107 = vmatpush3.msra.mxu1 %v6740_v10  ;;  %20108 = vmatprep.mubr.msk.f32.mxu1 %vm22579_vm1, %v22578_v3  ;;  %v7066_v10 = vld [vmem:[#allocation13 + $0xd48] sm:$0xff] }
0x112d   : > { %20052 = vmatmul.mubr.msk.f32.vlgmr.msra.gmra.mxu0 %vm545_vm0, %v23619_v24  ;;  %20073 = vmatprep.subr.mxu0 %v22578_v3 }
0x112e   : > { %20109 = vmatmul.mubr.msk.f32.vlgmr.msra.gmra.mxu1 %vm545_vm0, %v23619_v24  ;;  %20130 = vmatprep.subr.mxu1 %v22578_v3 }
0x112f   : > { %20074 = vmatpush3.msra.mxu0 %v6450_v11  ;;  %20131 = vmatpush3.msra.mxu1 %v6763_v12  ;;  %v7379_v11 = vld [vmem:[#allocation13 + $0xe08] sm:$0xff]  ;;  %v7065_v12 = vld [vmem:[#allocation13 + $0xd40] sm:$0xff] }
0x1130   : > { %20075 = vmatprep.subr.mxu0 %v22578_v3  ;;  %20132 = vmatprep.subr.mxu1 %v22578_v3 }
0x1131   : > { %20076 = vmatpush3.msra.mxu0 %v6449_v13  ;;  %20133 = vmatpush3.msra.mxu1 %v6762_v14  ;;  %v7378_v13 = vld [vmem:[#allocation13 + $0xe00] sm:$0xff]  ;;  %v7088_v14 = vld [vmem:[#allocation13 + $0xdf8] sm:$0xff] }
0x1132   : > { %20077 = vmatprep.subr.mxu0 %v22578_v3  ;;  %20134 = vmatprep.subr.mxu1 %v22578_v3 }
0x1133   : > { %20078 = vmatpush3.msra.mxu0 %v6448_v15  ;;  %20135 = vmatpush3.msra.mxu1 %v6761_v16  ;;  %v7401_v15 = vld [vmem:[#allocation13 + $0xeb8] sm:$0xff]  ;;  %v7087_v16 = vld [vmem:[#allocation13 + $0xdf0] sm:$0xff] }
0x1134   : > { %20079 = vmatprep.subr.mxu0 %v22578_v3  ;;  %20136 = vmatprep.subr.mxu1 %v22578_v3 }
0x1135   : > { %20080 = vmatpush3.msra.mxu0 %v6447_v17  ;;  %20137 = vmatpush3.msra.mxu1 %v6760_v18  ;;  %v7400_v17 = vld [vmem:[#allocation13 + $0xeb0] sm:$0xff]  ;;  %v7086_v18 = vld [vmem:[#allocation13 + $0xde8] sm:$0xff] }
0x1136   : > { %20081 = vmatprep.subr.mxu0 %v22578_v3  ;;  %20138 = vmatprep.subr.mxu1 %v22578_v3 }
0x1137   : > { %20082 = vmatpush3.msra.mxu0 %v6446_v60  ;;  %20139 = vmatpush3.msra.mxu1 %v6759_v19  ;;  %v7399_v60 = vld [vmem:[#allocation13 + $0xea8] sm:$0xff]  ;;  %v7085_v19 = vld [vmem:[#allocation13 + $0xde0] sm:$0xff] }
0x1138   : > { %20083 = vmatprep.subr.mxu0 %v22578_v3  ;;  %20140 = vmatprep.subr.mxu1 %v22578_v3 }
0x1139   : > { %20084 = vmatpush3.msra.mxu0 %v6445_v20  ;;  %20141 = vmatpush3.msra.mxu1 %v6758_v21  ;;  %v7398_v20 = vld [vmem:[#allocation13 + $0xea0] sm:$0xff]  ;;  %v7084_v21 = vld [vmem:[#allocation13 + $0xdd8] sm:$0xff] }
0x113a   : > { %20085 = vmatprep.subr.mxu0 %v22578_v3  ;;  %20142 = vmatprep.subr.mxu1 %v22578_v3 }
0x113b   : > { %20086 = vmatpush3.msra.mxu0 %v6444_v22  ;;  %20143 = vmatpush3.msra.mxu1 %v6757_v25  ;;  %v7397_v22 = vld [vmem:[#allocation13 + $0xe98] sm:$0xff]  ;;  %v7083_v25 = vld [vmem:[#allocation13 + $0xdd0] sm:$0xff] }
0x113c   : > { %20087 = vmatprep.subr.mxu0 %v22578_v3  ;;  %20144 = vmatprep.subr.mxu1 %v22578_v3 }
0x113d   : > { %20088 = vmatpush3.msra.mxu0 %v6443_v27  ;;  %20089 = vmatprep.mubr.msk.f32.mxu0 %vm22579_vm1, %v22578_v3  ;;  %v7396_v27 = vld [vmem:[#allocation13 + $0xe90] sm:$0xff] }
0x113e   : > { %20145 = vmatpush3.msra.mxu1 %v6756_v28  ;;  %20146 = vmatprep.mubr.msk.f32.mxu1 %vm22579_vm1, %v22578_v3  ;;  %v7082_v28 = vld [vmem:[#allocation13 + $0xdc8] sm:$0xff] }
0x113f   : > { %20090 = vmatmul.mubr.msk.f32.vlgmr.msra.gmra.mxu0 %vm545_vm0, %v23619_v24  ;;  %20111 = vmatprep.subr.mxu0 %v22578_v3 }
0x1140   : > { %20147 = vmatmul.mubr.msk.f32.vlgmr.msra.gmra.mxu1 %vm545_vm0, %v23619_v24  ;;  %20168 = vmatprep.subr.mxu1 %v22578_v3 }
0x1141   : > { %20112 = vmatpush3.msra.mxu0 %v6755_v29  ;;  %20169 = vmatpush3.msra.mxu1 %v7064_v30  ;;  %v7395_v29 = vld [vmem:[#allocation13 + $0xe88] sm:$0xff]  ;;  %v7081_v30 = vld [vmem:[#allocation13 + $0xdc0] sm:$0xff] }
0x1142   : > { %20113 = vmatprep.subr.mxu0 %v22578_v3  ;;  %20170 = vmatprep.subr.mxu1 %v22578_v3 }
0x1143   : > { %20114 = vmatpush3.msra.mxu0 %v6754_v31  ;;  %20171 = vmatpush3.msra.mxu1 %v7063_v32  ;;  %v7394_v31 = vld [vmem:[#allocation13 + $0xe80] sm:$0xff]  ;;  %v7393_v32 = vld [vmem:[#allocation13 + $0xe78] sm:$0xff] }
0x1144   : > { %20115 = vmatprep.subr.mxu0 %v22578_v3  ;;  %20172 = vmatprep.subr.mxu1 %v22578_v3 }
0x1145   : > { %20116 = vmatpush3.msra.mxu0 %v6753_v33  ;;  %20173 = vmatpush3.msra.mxu1 %v7062_v34  ;;  %v7392_v33 = vld [vmem:[#allocation13 + $0xe70] sm:$0xff]  ;;  %v7391_v34 = vld [vmem:[#allocation13 + $0xe68] sm:$0xff] }
0x1146   : > { %20117 = vmatprep.subr.mxu0 %v22578_v3  ;;  %20174 = vmatprep.subr.mxu1 %v22578_v3 }
0x1147   : > { %20118 = vmatpush3.msra.mxu0 %v6752_v35  ;;  %20175 = vmatpush3.msra.mxu1 %v7061_v36  ;;  %v7390_v35 = vld [vmem:[#allocation13 + $0xe60] sm:$0xff]  ;;  %v7389_v36 = vld [vmem:[#allocation13 + $0xe58] sm:$0xff] }
0x1148   : > { %20119 = vmatprep.subr.mxu0 %v22578_v3  ;;  %20176 = vmatprep.subr.mxu1 %v22578_v3 }
0x1149   : > { %20120 = vmatpush3.msra.mxu0 %v6751_v37  ;;  %20177 = vmatpush3.msra.mxu1 %v7060_v38  ;;  %v7388_v37 = vld [vmem:[#allocation13 + $0xe50] sm:$0xff]  ;;  %v7387_v38 = vld [vmem:[#allocation13 + $0xe48] sm:$0xff] }
0x114a   : > { %20121 = vmatprep.subr.mxu0 %v22578_v3  ;;  %20178 = vmatprep.subr.mxu1 %v22578_v3 }
0x114b   : > { %20122 = vmatpush3.msra.mxu0 %v6750_v39  ;;  %20179 = vmatpush3.msra.mxu1 %v7059_v40  ;;  %v7386_v39 = vld [vmem:[#allocation13 + $0xe40] sm:$0xff]  ;;  %v7409_v40 = vld [vmem:[#allocation13 + $0xef8] sm:$0xff] }
0x114c   : > { %20123 = vmatprep.subr.mxu0 %v22578_v3  ;;  %20180 = vmatprep.subr.mxu1 %v22578_v3 }
0x114d   : > { %20124 = vmatpush3.msra.mxu0 %v6749_v41  ;;  %20181 = vmatpush3.msra.mxu1 %v7058_v42  ;;  %v7408_v41 = vld [vmem:[#allocation13 + $0xef0] sm:$0xff]  ;;  %v7407_v42 = vld [vmem:[#allocation13 + $0xee8] sm:$0xff] }
0x114e   : > { %20125 = vmatprep.subr.mxu0 %v22578_v3  ;;  %20182 = vmatprep.subr.mxu1 %v22578_v3 }
0x114f   : > { %20126 = vmatpush3.msra.mxu0 %v6748_v43  ;;  %20127 = vmatprep.mubr.msk.f32.mxu0 %vm22579_vm1, %v22578_v3  ;;  %v7406_v43 = vld [vmem:[#allocation13 + $0xee0] sm:$0xff] }
0x1150   : > { %20183 = vmatpush3.msra.mxu1 %v7057_v44  ;;  %20184 = vmatprep.mubr.msk.f32.mxu1 %vm22579_vm1, %v22578_v3  ;;  %v7405_v44 = vld [vmem:[#allocation13 + $0xed8] sm:$0xff] }
0x1151   : > { %20128 = vmatmul.mubr.msk.f32.vlgmr.msra.gmra.mxu0 %vm545_vm0, %v23619_v24  ;;  %20149 = vmatprep.subr.mxu0 %v22578_v3 }
0x1152   : > { %20185 = vmatmul.mubr.msk.f32.vlgmr.msra.gmra.mxu1 %vm545_vm0, %v23619_v24  ;;  %20206 = vmatprep.subr.mxu1 %v22578_v3 }
0x1153   : > { %20150 = vmatpush3.msra.mxu0 %v6771_v45  ;;  %20207 = vmatpush3.msra.mxu1 %v7080_v46  ;;  %v7404_v45 = vld [vmem:[#allocation13 + $0xed0] sm:$0xff]  ;;  %v7403_v46 = vld [vmem:[#allocation13 + $0xec8] sm:$0xff] }
0x1154   : > { %20151 = vmatprep.subr.mxu0 %v22578_v3  ;;  %20208 = vmatprep.subr.mxu1 %v22578_v3 }
0x1155   : > { %20152 = vmatpush3.msra.mxu0 %v6770_v47  ;;  %20209 = vmatpush3.msra.mxu1 %v7079_v48  ;;  %v7402_v47 = vld [vmem:[#allocation13 + $0xec0] sm:$0xff] }
0x1156   : > { %20153 = vmatprep.subr.mxu0 %v22578_v3  ;;  %20210 = vmatprep.subr.mxu1 %v22578_v3 }
0x1157   : > { %20154 = vmatpush3.msra.mxu0 %v6769_v49  ;;  %20211 = vmatpush3.msra.mxu1 %v7078_v50 }
0x1158   : > { %20155 = vmatprep.subr.mxu0 %v22578_v3  ;;  %20212 = vmatprep.subr.mxu1 %v22578_v3 }
0x1159   : > { %20156 = vmatpush3.msra.mxu0 %v6768_v51  ;;  %20213 = vmatpush3.msra.mxu1 %v7077_v52 }
0x115a   : > { %20157 = vmatprep.subr.mxu0 %v22578_v3  ;;  %20214 = vmatprep.subr.mxu1 %v22578_v3 }
0x115b   : > { %20158 = vmatpush3.msra.mxu0 %v6767_v53  ;;  %20215 = vmatpush3.msra.mxu1 %v7076_v54  ;;  %v23845_v54 = vld [vmem:[#allocation5] sm:$0xff] }
0x115c   : > { %20159 = vmatprep.subr.mxu0 %v22578_v3  ;;  %20216 = vmatprep.subr.mxu1 %v22578_v3 }
0x115d   : > { %20160 = vmatpush3.msra.mxu0 %v6766_v55  ;;  %20217 = vmatpush3.msra.mxu1 %v7075_v26  ;;  %v23848_v26 = vld [vmem:[#allocation7] sm:$0xff] }
0x115e   : > { %20161 = vmatprep.subr.mxu0 %v22578_v3  ;;  %20218 = vmatprep.subr.mxu1 %v22578_v3 }
0x115f   : > { %20162 = vmatpush3.msra.mxu0 %v6765_v23  ;;  %20219 = vmatpush3.msra.mxu1 %v7074_v56 }
0x1160   : > { %20163 = vmatprep.subr.mxu0 %v22578_v3  ;;  %20220 = vmatprep.subr.mxu1 %v22578_v3 }
0x1161   : > { %20164 = vmatpush3.msra.mxu0 %v6764_v57  ;;  %20165 = vmatprep.mubr.msk.f32.mxu0 %vm22579_vm1, %v22578_v3 }
0x1162   : > { %20221 = vmatpush3.msra.mxu1 %v7073_v58  ;;  %20222 = vmatprep.mubr.msk.f32.mxu1 %vm22579_vm1, %v22578_v3 }
0x1163   : > { %20166 = vmatmul.mubr.msk.f32.vlgmr.msra.gmra.mxu0 %vm545_vm0, %v23619_v24  ;;  %20187 = vmatprep.subr.mxu0 %v22578_v3 }
0x1164   : > { %20223 = vmatmul.mubr.msk.f32.vlgmr.msra.gmra.mxu1 %vm545_vm0, %v23619_v24  ;;  %20244 = vmatprep.subr.mxu1 %v22578_v3 }
0x1165   : > { %20188 = vmatpush3.msra.mxu0 %v7072_v59  ;;  %20245 = vmatpush3.msra.mxu1 %v7385_v62 }
0x1166   : > { %20189 = vmatprep.subr.mxu0 %v22578_v3  ;;  %20246 = vmatprep.subr.mxu1 %v22578_v3 }
0x1167   : > { %20190 = vmatpush3.msra.mxu0 %v7071_v63  ;;  %20247 = vmatpush3.msra.mxu1 %v7384_v0 }
0x1168   : > { %20191 = vmatprep.subr.mxu0 %v22578_v3  ;;  %20248 = vmatprep.subr.mxu1 %v22578_v3 }
0x1169   : > { %20192 = vmatpush3.msra.mxu0 %v7070_v1  ;;  %20249 = vmatpush3.msra.mxu1 %v7383_v2 }
0x116a   : > { %20193 = vmatprep.subr.mxu0 %v22578_v3  ;;  %20250 = vmatprep.subr.mxu1 %v22578_v3 }
0x116b   : > { %20194 = vmatpush3.msra.mxu0 %v7069_v4  ;;  %20251 = vmatpush3.msra.mxu1 %v7382_v5 }
0x116c   : > { %20195 = vmatprep.subr.mxu0 %v22578_v3  ;;  %20252 = vmatprep.subr.mxu1 %v22578_v3 }
0x116d   : > { %20196 = vmatpush3.msra.mxu0 %v7068_v6  ;;  %20253 = vmatpush3.msra.mxu1 %v7381_v7 }
0x116e   : > { %20197 = vmatprep.subr.mxu0 %v22578_v3  ;;  %20254 = vmatprep.subr.mxu1 %v22578_v3 }
0x116f   : > { %20198 = vmatpush3.msra.mxu0 %v7067_v8  ;;  %20255 = vmatpush3.msra.mxu1 %v7380_v9 }
0x1170   : > { %20199 = vmatprep.subr.mxu0 %v22578_v3  ;;  %20256 = vmatprep.subr.mxu1 %v22578_v3 }
0x1171   : > { %20200 = vmatpush3.msra.mxu0 %v7066_v10  ;;  %20257 = vmatpush3.msra.mxu1 %v7379_v11 }
0x1172   : > { %20201 = vmatprep.subr.mxu0 %v22578_v3  ;;  %20258 = vmatprep.subr.mxu1 %v22578_v3 }
0x1173   : > { %20202 = vmatpush3.msra.mxu0 %v7065_v12  ;;  %20203 = vmatprep.mubr.msk.f32.mxu0 %vm22579_vm1, %v22578_v3 }
0x1174   : > { %20259 = vmatpush3.msra.mxu1 %v7378_v13  ;;  %20260 = vmatprep.mubr.msk.f32.mxu1 %vm22579_vm1, %v22578_v3 }
0x1175   : > { %20204 = vmatmul.mubr.msk.f32.vlgmr.msra.gmra.mxu0 %vm545_vm0, %v23619_v24  ;;  %20225 = vmatprep.subr.mxu0 %v22578_v3 }
0x1176   : > { %20261 = vmatmul.mubr.msk.f32.vlgmr.msra.gmra.mxu1 %vm545_vm0, %v23619_v24  ;;  %20282 = vmatprep.subr.mxu1 %v22578_v3 }
0x1177   : > { %20226 = vmatpush3.msra.mxu0 %v7088_v14  ;;  %20283 = vmatpush3.msra.mxu1 %v7401_v15 }
0x1178   : > { %20227 = vmatprep.subr.mxu0 %v22578_v3  ;;  %20284 = vmatprep.subr.mxu1 %v22578_v3 }
0x1179   : > { %20228 = vmatpush3.msra.mxu0 %v7087_v16  ;;  %20285 = vmatpush3.msra.mxu1 %v7400_v17 }
0x117a   : > { %20229 = vmatprep.subr.mxu0 %v22578_v3  ;;  %20286 = vmatprep.subr.mxu1 %v22578_v3 }
0x117b   : > { %20230 = vmatpush3.msra.mxu0 %v7086_v18  ;;  %20287 = vmatpush3.msra.mxu1 %v7399_v60 }
0x117c   : > { %20231 = vmatprep.subr.mxu0 %v22578_v3  ;;  %20288 = vmatprep.subr.mxu1 %v22578_v3 }
0x117d   : > { %20232 = vmatpush3.msra.mxu0 %v7085_v19  ;;  %20289 = vmatpush3.msra.mxu1 %v7398_v20 }
0x117e   : > { %20233 = vmatprep.subr.mxu0 %v22578_v3  ;;  %20290 = vmatprep.subr.mxu1 %v22578_v3 }
0x117f   : > { %20234 = vmatpush3.msra.mxu0 %v7084_v21  ;;  %20291 = vmatpush3.msra.mxu1 %v7397_v22 }
0x1180   : > { %20235 = vmatprep.subr.mxu0 %v22578_v3  ;;  %20292 = vmatprep.subr.mxu1 %v22578_v3 }
0x1181   : > { %20236 = vmatpush3.msra.mxu0 %v7083_v25  ;;  %20293 = vmatpush3.msra.mxu1 %v7396_v27 }
0x1182   : > { %20237 = vmatprep.subr.mxu0 %v22578_v3  ;;  %20294 = vmatprep.subr.mxu1 %v22578_v3 }
0x1183   : > { %20238 = vmatpush3.msra.mxu0 %v7082_v28  ;;  %20295 = vmatpush3.msra.mxu1 %v7395_v29 }
0x1184   : > { %20239 = vmatprep.subr.mxu0 %v22578_v3  ;;  %20296 = vmatprep.subr.mxu1 %v22578_v3 }
0x1185   : > { %20240 = vmatpush3.msra.mxu0 %v7081_v30  ;;  %20241 = vmatprep.mubr.msk.f32.mxu0 %vm22579_vm1, %v22578_v3 }
0x1186   : > { %20297 = vmatpush3.msra.mxu1 %v7394_v31  ;;  %20298 = vmatprep.mubr.msk.f32.mxu1 %vm22579_vm1, %v22578_v3 }
0x1187   : > { %20242 = vmatmul.mubr.msk.f32.vlgmr.msra.gmra.mxu0 %vm545_vm0, %v23619_v24  ;;  %20263 = vmatprep.subr.mxu0 %v22578_v3 }
0x1188   : > { %20299 = vmatmul.mubr.msk.f32.vlgmr.msra.gmra.mxu1 %vm545_vm0, %v23619_v24  ;;  %20264 = vmatpush3.msra.mxu0 %v7393_v32 }
0x1189   : > { %20265 = vmatprep.subr.mxu0 %v22578_v3  ;;  %20279 = vmatprep.mubr.msk.f32.mxu0 %vm22579_vm1, %v22578_v3 }
0x118a   : > { %20266 = vmatpush3.msra.mxu0 %v7392_v33  ;;  %20320 = vmatprep.subr.mxu1 %v22578_v3 }
0x118b   : > { %20267 = vmatprep.subr.mxu0 %v22578_v3  ;;  %20322 = vmatprep.mubr.msk.f32.mxu1 %vm22579_vm1, %v22578_v3 }
0x118c   : > { %20268 = vmatpush3.msra.mxu0 %v7391_v34 }
0x118d   : > { %20269 = vmatprep.subr.mxu0 %v22578_v3 }
0x118e   : > { %20270 = vmatpush3.msra.mxu0 %v7390_v35 }
0x118f   : > { %20271 = vmatprep.subr.mxu0 %v22578_v3 }
0x1190   : > { %20272 = vmatpush3.msra.mxu0 %v7389_v36 }
0x1191   : > { %20273 = vmatprep.subr.mxu0 %v22578_v3 }
0x1192   : > { %20274 = vmatpush3.msra.mxu0 %v7388_v37 }
0x1193   : > { %20275 = vmatprep.subr.mxu0 %v22578_v3 }
0x1194   : > { %20276 = vmatpush3.msra.mxu0 %v7387_v38 }
0x1195   : > { %20277 = vmatprep.subr.mxu0 %v22578_v3 }
0x1196   : > { %20278 = vmatpush3.msra.mxu0 %v7386_v39 }
0x1197   : > { %20280 = vmatmul.mubr.msk.f32.vlgmr.msra.gmra.mxu0 %vm545_vm0, %v23619_v24  ;;  %20301 = vmatprep.subr.mxu0 %v22578_v3 }
0x1198   : > { %20302 = vmatpush3.msra.mxu0 %v7409_v40  ;;  %20317 = vmatprep.mubr.msk.f32.mxu0 %vm22579_vm1, %v22578_v3 }
0x1199   : > { %20303 = vmatprep.subr.mxu0 %v22578_v3 }
0x119a   : > { %20304 = vmatpush3.msra.mxu0 %v7408_v41 }
0x119b   : > { %20305 = vmatprep.subr.mxu0 %v22578_v3 }
0x119c   : > { %20306 = vmatpush3.msra.mxu0 %v7407_v42 }
0x119d   : > { %20307 = vmatprep.subr.mxu0 %v22578_v3 }
0x119e   : > { %20308 = vmatpush3.msra.mxu0 %v7406_v43 }
0x119f   : > { %20309 = vmatprep.subr.mxu0 %v22578_v3 }
0x11a0   : > { %20310 = vmatpush3.msra.mxu0 %v7405_v44 }
0x11a1   : > { %20311 = vmatprep.subr.mxu0 %v22578_v3 }
0x11a2   : > { %20312 = vmatpush3.msra.mxu0 %v7404_v45 }
0x11a3   : > { %20313 = vmatprep.subr.mxu0 %v22578_v3 }
0x11a4   : > { %20314 = vmatpush3.msra.mxu0 %v7403_v46 }
0x11a5   : > { %20315 = vmatprep.subr.mxu0 %v22578_v3 }
0x11a6   : > { %20316 = vmatpush3.msra.mxu0 %v7402_v47 }
0x11a7   : > { %20318 = vmatmul.mubr.msk.f32.vlgmr.msra.gmra.mxu0 %vm545_vm0, %v23619_v24  ;;  %20340 = vmatprep.subr.mxu0 %v22578_v3 }
0x11a8   : > { %20342 = vmatprep.mubr.msk.f32.mxu0 %vm22579_vm1, %v22578_v3 }
0x11b8   : > { %v6200_v48 = vpop.f32.mrf.mxu0  ;;  %v6340_v49 = vpop.f32.mrf.mxu1 }
0x11b9   : > { %v6414_v55 = vmul.f32 %v23845_v54, %v6200_v48  ;;  %v6416_v62 = vmul.f32 %v23845_v54, %v6340_v49 }
0x11ba   : > { %v19958_v50 = vpop.f32.mrf.mxu0  ;;  %v19996_v51 = vpop.f32.mrf.mxu1 }
0x11c9   : > { %v6270_v52 = vpop.f32.mrf.mxu0 }
0x11ca   : > { %v6517_v53 = vpop.f32.mrf.mxu1  ;;  %v6415_v5 = vmul.f32 %v23845_v54, %v6270_v52 }
0x11cb   : > { %v6731_v23 = vmul.f32 %v23848_v26, %v6517_v53  ;;  %v19977_v24 = vpop.f32.mrf.mxu0 }
0x11cc   : > { %v20034_v56 = vpop.f32.mrf.mxu1 }
0x11cd   : > { %v6735_v57 = vadd.f32 %v6731_v23, %v6414_v55  ;;  %v22178_v55 = vld [vmem:[#allocation8] sm:$0xff] }
0x11db   : > { %v6410_v58 = vpop.f32.mrf.mxu0 }
0x11dc   : > { %v6657_v59 = vpop.f32.mrf.mxu1  ;;  %v6417_v12 = vmul.f32 %v23845_v54, %v6410_v58 }
0x11dd   : > { %v6733_v63 = vmul.f32 %v23848_v26, %v6657_v59  ;;  %v20015_v0 = vpop.f32.mrf.mxu0 }
0x11de   : > { %v20072_v1 = vpop.f32.mrf.mxu1 }
0x11df   : > { %v6737_v2 = vadd.f32 %v6733_v63, %v6416_v62 }
0x11ed   : > { %v6587_v4 = vpop.f32.mrf.mxu0 }
0x11ee   : > { %v6732_v6 = vmul.f32 %v23848_v26, %v6587_v4  ;;  %v6838_v7 = vpop.f32.mrf.mxu1 }
0x11ef   : > { %v20053_v8 = vpop.f32.mrf.mxu0  ;;  %v7052_v19 = vmul.f32 %v23845_v54, %v6838_v7 }
0x11f0   : > { %v6736_v9 = vadd.f32 %v6732_v6, %v6415_v5  ;;  %v20110_v10 = vpop.f32.mrf.mxu1 }
0x11ff   : > { %v6727_v11 = vpop.f32.mrf.mxu0 }
0x1200   : > { %v6734_v13 = vmul.f32 %v23848_v26, %v6727_v11  ;;  %v6978_v14 = vpop.f32.mrf.mxu1 }
0x1201   : > { %v20091_v15 = vpop.f32.mrf.mxu0  ;;  %v7054_v39 = vmul.f32 %v23845_v54, %v6978_v14 }
0x1202   : > { %v6738_v16 = vadd.f32 %v6734_v13, %v6417_v12  ;;  %v20148_v17 = vpop.f32.mrf.mxu1 }
0x1211   : > { %v6908_v18 = vpop.f32.mrf.mxu0 }
0x1212   : > { %v7155_v60 = vpop.f32.mrf.mxu1  ;;  %v7053_v32 = vmul.f32 %v23845_v54, %v6908_v18 }
0x1213   : > { %v7369_v20 = vmul.f32 %v23848_v26, %v7155_v60  ;;  %v20129_v21 = vpop.f32.mrf.mxu0 }
0x1214   : > { %v20186_v22 = vpop.f32.mrf.mxu1 }
0x1215   : > { %v7373_v25 = vadd.f32 %v7369_v20, %v7052_v19 }
0x1217   : > { %20321 = vmatpush3.xpose.msk.msra.mxu1 %vm2152_vm2, %v7373_v25 }
0x1218   : > { %20325 = vmatprep.subr.mxu1 %v22578_v3 }
0x121a   : > { %20323 = vmatmul.mubr.msk.f32.vlgmr.msra.gmra.mxu1 %vm2152_vm2, %v6735_v57 }
0x121b   : > { %20327 = vmatprep.mubr.msk.f32.mxu1 %vm22579_vm1, %v22578_v3 }
0x1223   : > { %v7048_v27 = vpop.f32.mrf.mxu0 }
0x1224   : > { %v7295_v28 = vpop.f32.mrf.mxu1  ;;  %v7055_v42 = vmul.f32 %v23845_v54, %v7048_v27 }
0x1225   : > { %v20167_v29 = vpop.f32.mrf.mxu0  ;;  %v7371_v36 = vmul.f32 %v23848_v26, %v7295_v28 }
0x1226   : > { %v20224_v30 = vpop.f32.mrf.mxu1 }
0x1227   : > { %v7375_v40 = vadd.f32 %v7371_v36, %v7054_v39 }
0x1235   : > { %v7225_v31 = vpop.f32.mrf.mxu0 }
0x1236   : > { %v7370_v33 = vmul.f32 %v23848_v26, %v7225_v31  ;;  %v7476_v34 = vpop.f32.mrf.mxu1 }
0x1237   : > { %20341 = vmatpush3.msra.mxu0 %v7476_v34  ;;  %v20205_v35 = vpop.f32.mrf.mxu0 }
0x1238   : > { %v7374_v37 = vadd.f32 %v7370_v33, %v7053_v32  ;;  %v20262_v38 = vpop.f32.mrf.mxu1  ;;  %20350 = vmatprep.subr.mxu0 %v22578_v3 }
0x123a   : > { %20326 = vmatpush3.xpose.msk.msra.mxu1 %vm2152_vm2, %v7374_v37 }
0x123b   : > { %20330 = vmatprep.subr.mxu1 %v22578_v3 }
0x123d   : > { %20328 = vmatmul.mubr.msk.f32.vlgmr.msra.gmra.mxu1 %vm2152_vm2, %v6736_v9 }
0x123e   : > { %20331 = vmatpush3.xpose.msk.msra.mxu1 %vm2152_vm2, %v7375_v40  ;;  %20332 = vmatprep.mubr.msk.f32.mxu1 %vm22579_vm1, %v22578_v3 }
0x123f   : > { %20335 = vmatprep.subr.mxu1 %v22578_v3 }
0x1241   : > { %20333 = vmatmul.mubr.msk.f32.vlgmr.msra.gmra.mxu1 %vm2152_vm2, %v6737_v2 }
0x1242   : > { %20337 = vmatprep.mubr.msk.f32.mxu1 %vm22579_vm1, %v22578_v3 }
0x1247   : > { %v7365_v41 = vpop.f32.mrf.mxu0 }
0x1248   : > { %v7372_v43 = vmul.f32 %v23848_v26, %v7365_v41  ;;  %v23881_v44 = vpop.f32.mrf.mxu1  ;;  %v8340_v41 = vld [vmem:[#allocation14 + $0x88] sm:$0xff] }
0x1249   : > { %v20243_v45 = vpop.f32.mrf.mxu0 }
0x124a   : > { %v7376_v46 = vadd.f32 %v7372_v43, %v7055_v42  ;;  %v20300_v47 = vpop.f32.mrf.mxu1  ;;  %v8342_v45 = vld [vmem:[#allocation14 + $0x98] sm:$0xff] }
0x124b   : > { %v8344_v47 = vld [vmem:[#allocation14 + $0xa8] sm:$0xff] }
0x124c   : > { %20336 = vmatpush3.xpose.msk.msra.mxu1 %vm2152_vm2, %v7376_v46  ;;  %v8341_v46 = vld [vmem:[#allocation14 + $0x90] sm:$0xff] }
0x124d   : > { %20345 = vmatprep.subr.mxu1 %v22578_v3 }
0x124f   : > { %20338 = vmatmul.mubr.msk.f32.vlgmr.msra.gmra.mxu1 %vm2152_vm2, %v6738_v16 }
0x1250   : > { %20347 = vmatprep.mubr.msk.f32.mxu1 %vm22579_vm1, %v22578_v3 }
0x1257   : > { %v7546_v48 = vpop.f32.mrf.mxu0 }
0x1258   : > { %20346 = vmatpush3.msra.mxu1 %v7546_v48 }
0x1259   : > { %v20281_v49 = vpop.f32.mrf.mxu0  ;;  %20355 = vmatprep.subr.mxu1 %v22578_v3 }
0x125a   : > { %v8343_v49 = vld [vmem:[#allocation14 + $0xa0] sm:$0xff] }
0x1267   : > { %v23889_v50 = vpop.f32.mrf.mxu0 }
0x1269   : > { %v20319_v51 = vpop.f32.mrf.mxu0 }
0x126a   : > { %v8346_v51 = vld [vmem:[#allocation14 + $0xb8] sm:$0xff] }
0x12da   : > { %v7762_v52 = vpop.f32.mrf.mxu1 }
0x12db   : > { %v7994_v53 = vmul.f32 0.25, %v7762_v52 }
0x12dc   : > { %v20324_v54 = vpop.f32.mrf.mxu1 }
0x12dd   : > { %v7998_v26 = vadd.f32 %v22178_v55, %v7994_v53  ;;  %v8345_v53 = vld [vmem:[#allocation14 + $0xb0] sm:$0xff] }
0x12df   : > { %v8002_v23 = vsel %vm2465_vm3, %v7998_v26, -inf }
0x12e0   : > { %8003 = vmax.xlane.f32.xlu1 %v8002_v23 }
0x12fd   : > { %v7838_v24 = vpop.f32.mrf.mxu1 }
0x12fe   : > { %v7995_v56 = vmul.f32 0.25, %v7838_v24 }
0x12ff   : > { %v20329_v57 = vpop.f32.mrf.mxu1 }
0x1300   : > { %v7999_v58 = vadd.f32 %v22178_v55, %v7995_v56 }
0x1301   : > { %v7914_v59 = vpop.f32.mrf.mxu1 }
0x1302   : > { %v7996_v62 = vmul.f32 0.25, %v7914_v59  ;;  %v8005_v63 = vsel %vm2465_vm3, %v7999_v58, -inf }
0x1303   : > { %8006 = vmax.xlane.f32.xlu0 %v8005_v63  ;;  %v20334_v0 = vpop.f32.mrf.mxu1 }
0x1304   : > { %v8000_v1 = vadd.f32 %v22178_v55, %v7996_v62 }
0x1306   : > { %v8008_v2 = vsel %vm2465_vm3, %v8000_v1, -inf }
0x1307   : > { %8009 = vmax.xlane.f32.xlu1 %v8008_v2 }
0x130f   : > { %v7990_v4 = vpop.f32.mrf.mxu1 }
0x1310   : > { %v7997_v5 = vmul.f32 0.25, %v7990_v4 }
0x1311   : > { %v20339_v6 = vpop.f32.mrf.mxu1 }
0x1312   : > { %v8001_v7 = vadd.f32 %v22178_v55, %v7997_v5 }
0x1314   : > { %v8011_v8 = vsel %vm2465_vm3, %v8001_v7, -inf }
0x1315   : > { %8012 = vmax.xlane.f32.xlu0 %v8011_v8 }
0x1369   : > { %v8004_v9 = vpop.xlane.xlu1 %8003 }
0x136a   : > { %v8014_v10 = vsub.f32 %v7998_v26, %v8004_v9 }
0x136c   : > { %v8018_v11 = vmul.f32 1.442695, %v8014_v10 }
0x136e   : > { %22076 = vpow2.f32 %v8018_v11 }
0x137b   : > { %v22077_v12 = vpop.eup %22076 }
0x137c   : > { %v8026_v13 = vsel %vm2465_vm3, %v22077_v12, 0.0 }
0x137d   : > { %8027 = vadd.xlane.f32.xlu1 %v8026_v13  ;;  %v8680_v13 = vld [vmem:[#allocation16 + $0x178] sm:$0xff] }
0x138c   : > { %v8007_v14 = vpop.xlane.xlu0 %8006 }
0x138d   : > { %v8015_v15 = vsub.f32 %v7999_v58, %v8007_v14  ;;  %v8679_v14 = vld [vmem:[#allocation16 + $0x170] sm:$0xff] }
0x138f   : > { %v8020_v16 = vmul.f32 1.442695, %v8015_v15  ;;  %v8678_v15 = vld [vmem:[#allocation16 + $0x168] sm:$0xff] }
0x1390   : > { %v8010_v17 = vpop.xlane.xlu1 %8009 }
0x1391   : > { %22078 = vpow2.f32 %v8020_v16  ;;  %v8016_v18 = vsub.f32 %v8000_v1, %v8010_v17  ;;  %v8677_v16 = vld [vmem:[#allocation16 + $0x160] sm:$0xff]  ;;  %v8676_v17 = vld [vmem:[#allocation16 + $0x158] sm:$0xff] }
0x1393   : > { %v8022_v60 = vmul.f32 1.442695, %v8016_v18  ;;  %v8675_v18 = vld [vmem:[#allocation16 + $0x150] sm:$0xff] }
0x1395   : > { %22080 = vpow2.f32 %v8022_v60  ;;  %v8674_v60 = vld [vmem:[#allocation16 + $0x148] sm:$0xff] }
0x139e   : > { %v22079_v19 = vpop.eup %22078  ;;  %v8013_v20 = vpop.xlane.xlu0 %8012 }
0x139f   : > { %v8017_v21 = vsub.f32 %v8001_v7, %v8013_v20  ;;  %v8029_v22 = vsel %vm2465_vm3, %v22079_v19, 0.0  ;;  %v8671_v20 = vld [vmem:[#allocation16 + $0x130] sm:$0xff] }
0x13a0   : > { %8030 = vadd.xlane.f32.xlu0 %v8029_v22  ;;  %v8669_v22 = vld [vmem:[#allocation16 + $0x120] sm:$0xff] }
0x13a1   : > { %v8024_v25 = vmul.f32 1.442695, %v8017_v21  ;;  %v8670_v21 = vld [vmem:[#allocation16 + $0x128] sm:$0xff] }
0x13a2   : > { %v22081_v27 = vpop.eup %22080 }
0x13a3   : > { %22082 = vpow2.f32 %v8024_v25  ;;  %v8032_v28 = vsel %vm2465_vm3, %v22081_v27, 0.0  ;;  %v8668_v25 = vld [vmem:[#allocation16 + $0x118] sm:$0xff] }
0x13a4   : > { %8033 = vadd.xlane.f32.xlu1 %v8032_v28  ;;  %v8666_v28 = vld [vmem:[#allocation16 + $0x108] sm:$0xff] }
0x13b0   : > { %v22083_v29 = vpop.eup %22082 }
0x13b1   : > { %v8035_v30 = vsel %vm2465_vm3, %v22083_v29, 0.0 }
0x13b2   : > { %8036 = vadd.xlane.f32.xlu0 %v8035_v30 }
0x1406   : > { %v8028_v31 = vpop.xlane.xlu1 %8027 }
0x1407   : > { %22084 = vrcp.f32 %v8028_v31 }
0x1414   : > { %v22085_v32 = vpop.eup %22084 }
0x1415   : > { %v8039_v33 = vmul.f32 %v22085_v32, %v22077_v12 }
0x1417   : > { %20343 = vmatmul.mubr.msk.f32.vlgmr.msra.gmra.mxu0 %vm2465_vm3, %v8039_v33 }
0x1418   : > { %20351 = vmatpush3.msra.mxu0 %v23881_v44  ;;  %20352 = vmatprep.mubr.msk.f32.mxu0 %vm22579_vm1, %v22578_v3  ;;  %v8339_v44 = vld [vmem:[#allocation14 + $0x80] sm:$0xff] }
0x1419   : > { %20360 = vmatprep.subr.mxu0 %v22578_v3 }
0x1429   : > { %v8031_v34 = vpop.xlane.xlu0 %8030 }
0x142a   : > { %22086 = vrcp.f32 %v8031_v34  ;;  %v17500_v34 = vld [vmem:[#allocation11 + $0x2] ss:$0 sm:$0xff] }
0x142d   : > { %v8034_v35 = vpop.xlane.xlu1 %8033 }
0x142e   : > { %22088 = vrcp.f32 %v8034_v35 }
0x1437   : > { %v22087_v36 = vpop.eup %22086 }
0x1438   : > { %v8041_v37 = vmul.f32 %v22087_v36, %v22079_v19  ;;  %v8672_v19 = vld [vmem:[#allocation16 + $0x138] sm:$0xff] }
0x143a   : > { %20348 = vmatmul.mubr.msk.f32.vlgmr.msra.gmra.mxu1 %vm2465_vm3, %v8041_v37  ;;  %v8779_v37 = vld [vmem:[#allocation17 + $0x178] sm:$0xff] }
0x143b   : > { %v22089_v38 = vpop.eup %22088  ;;  %v8037_v39 = vpop.xlane.xlu0 %8036  ;;  %20356 = vmatpush3.msra.mxu1 %v23889_v50  ;;  %20357 = vmatprep.mubr.msk.f32.mxu1 %vm22579_vm1, %v22578_v3 }
0x143c   : > { %22090 = vrcp.f32 %v8037_v39  ;;  %v8043_v40 = vmul.f32 %v22089_v38, %v22081_v27  ;;  %20367 = vmatprep.subr.mxu1 %v22578_v3  ;;  %v8667_v27 = vld [vmem:[#allocation16 + $0x110] sm:$0xff]  ;;  %v8777_v39 = vld [vmem:[#allocation17 + $0x168] sm:$0xff] }
0x143d   : > { %v8778_v38 = vld [vmem:[#allocation17 + $0x170] sm:$0xff] }
0x143e   : > { %20353 = vmatmul.mubr.msk.f32.vlgmr.msra.gmra.mxu0 %vm2465_vm3, %v8043_v40  ;;  %v8776_v40 = vld [vmem:[#allocation17 + $0x160] sm:$0xff] }
0x143f   : > { %20361 = vmatpush3.msra.mxu0 %v8340_v41  ;;  %20364 = vmatprep.mubr.msk.f32.mxu0 %vm22579_vm1, %v22578_v3  ;;  %v8775_v41 = vld [vmem:[#allocation17 + $0x158] sm:$0xff] }
0x1440   : > { %20362 = vmatprep.subr.mxu0 %v22578_v3 }
0x1441   : > { %20363 = vmatpush3.msra.mxu0 %v8339_v44  ;;  %v8772_v44 = vld [vmem:[#allocation17 + $0x140] sm:$0xff] }
0x1442   : > { %20374 = vmatprep.subr.mxu0 %v22578_v3 }
0x1449   : > { %v22091_v42 = vpop.eup %22090 }
0x144a   : > { %v8045_v43 = vmul.f32 %v22091_v42, %v22083_v29  ;;  %v8665_v29 = vld [vmem:[#allocation16 + $0x100] sm:$0xff]  ;;  %v8774_v42 = vld [vmem:[#allocation17 + $0x150] sm:$0xff] }
0x144c   : > { %20358 = vmatmul.mubr.msk.f32.vlgmr.msra.gmra.mxu1 %vm2465_vm3, %v8045_v43  ;;  %v8773_v43 = vld [vmem:[#allocation17 + $0x148] sm:$0xff] }
0x144d   : > { %20371 = vmatprep.mubr.msk.f32.mxu1 %vm22579_vm1, %v22578_v3  ;;  %20368 = vmatpush3.msra.mxu1 %v8342_v45  ;;  %v8771_v45 = vld [vmem:[#allocation17 + $0x138] sm:$0xff] }
0x144e   : > { %20369 = vmatprep.subr.mxu1 %v22578_v3 }
0x144f   : > { %20370 = vmatpush3.msra.mxu1 %v8341_v46  ;;  %v8770_v46 = vld [vmem:[#allocation17 + $0x130] sm:$0xff] }
0x1450   : > { %20381 = vmatprep.subr.mxu1 %v22578_v3 }
0x14d7   : > { %v8115_v48 = vpop.f32.mrf.mxu0 }
0x14d8   : > { %20365 = vmatmul.mubr.msk.f32.vlgmr.msra.gmra.mxu0 %vm2152_vm2, %v8115_v48  ;;  %v8768_v48 = vld [vmem:[#allocation17 + $0x120] sm:$0xff] }
0x14d9   : > { %v20344_v50 = vpop.f32.mrf.mxu0  ;;  %20375 = vmatpush3.msra.mxu0 %v8344_v47  ;;  %20378 = vmatprep.mubr.msk.f32.mxu0 %vm22579_vm1, %v22578_v3  ;;  %v8769_v47 = vld [vmem:[#allocation17 + $0x128] sm:$0xff] }
0x14da   : > { %20376 = vmatprep.subr.mxu0 %v22578_v3  ;;  %v8766_v50 = vld [vmem:[#allocation17 + $0x110] sm:$0xff] }
0x14db   : > { %20377 = vmatpush3.msra.mxu0 %v8343_v49  ;;  %v8767_v49 = vld [vmem:[#allocation17 + $0x118] sm:$0xff] }
0x14dc   : > { %8700 = vmatprep.subr.mxu0 %v8680_v13  ;;  %v8871_v13 = vld [vmem:[#allocation13 + $0xf10] sm:$0xff] }
0x14fa   : > { %v8188_v52 = vpop.f32.mrf.mxu1 }
0x14fb   : > { %20372 = vmatmul.mubr.msk.f32.vlgmr.msra.gmra.mxu1 %vm2152_vm2, %v8188_v52  ;;  %v8764_v52 = vld [vmem:[#allocation17 + $0x100] sm:$0xff] }
0x14fc   : > { %v20349_v54 = vpop.f32.mrf.mxu1  ;;  %20382 = vmatpush3.msra.mxu1 %v8346_v51  ;;  %20385 = vmatprep.mubr.msk.f32.mxu1 %vm22579_vm1, %v22578_v3  ;;  %v8765_v51 = vld [vmem:[#allocation17 + $0x108] sm:$0xff] }
0x14fd   : > { %20383 = vmatprep.subr.mxu1 %v22578_v3 }
0x14fe   : > { %v8261_v55 = vpop.f32.mrf.mxu0  ;;  %20384 = vmatpush3.msra.mxu1 %v8345_v53 }
0x14ff   : > { %20379 = vmatmul.mubr.msk.f32.vlgmr.msra.gmra.mxu0 %vm2152_vm2, %v8261_v55  ;;  %20388 = vmatprep.subr.mxu1 %v22578_v3 }
0x1500   : > { %v20354_v26 = vpop.f32.mrf.mxu0  ;;  %8748 = vmatprep.mubr.f32.mxu0 %v22578_v3  ;;  %8701 = vmatpush1.msra.mxu0 %v8679_v14  ;;  %v8887_v14 = vld [vmem:[#allocation13 + $0xf90] sm:$0xff] }
0x1501   : > { %8702 = vmatprep.subr.mxu0 %v8678_v15  ;;  %v8870_v15 = vld [vmem:[#allocation13 + $0xf08] sm:$0xff] }
0x1502   : > { %8703 = vmatpush1.msra.mxu0 %v8677_v16  ;;  %v8886_v16 = vld [vmem:[#allocation13 + $0xf88] sm:$0xff] }
0x1503   : > { %8704 = vmatprep.subr.mxu0 %v8676_v17  ;;  %v8869_v17 = vld [vmem:[#allocation13 + $0xf00] sm:$0xff] }
0x1504   : > { %8705 = vmatpush1.msra.mxu0 %v8675_v18  ;;  %v8885_v18 = vld [vmem:[#allocation13 + $0xf80] sm:$0xff] }
0x1505   : > { %8706 = vmatprep.subr.mxu0 %v8674_v60 }
0x150c   : > { %v8334_v23 = vpop.f32.mrf.mxu1 }
0x150d   : > { %20386 = vmatmul.mubr.msk.f32.vlgmr.msra.gmra.mxu1 %vm2152_vm2, %v8334_v23 }
0x150e   : > { %v20359_v24 = vpop.f32.mrf.mxu1  ;;  %20420 = vmatprep.mubr.msk.f32.mxu1 %vm22579_vm1, %v22578_v3  ;;  %20389 = vmatpush3.msra.mxu1 %v8779_v37  ;;  %v8879_v37 = vld [vmem:[#allocation13 + $0xf50] sm:$0xff] }
0x150f   : > { %20390 = vmatprep.subr.mxu1 %v22578_v3 }
0x1510   : > { %20391 = vmatpush3.msra.mxu1 %v8778_v38  ;;  %v9191_v38 = vld [vmem:[#allocation13 + $0x1010] sm:$0xff] }
0x1511   : > { %20392 = vmatprep.subr.mxu1 %v22578_v3 }
0x1512   : > { %20393 = vmatpush3.msra.mxu1 %v8777_v39  ;;  %v8878_v39 = vld [vmem:[#allocation13 + $0xf48] sm:$0xff] }
0x1513   : > { %20394 = vmatprep.subr.mxu1 %v22578_v3 }
0x1514   : > { %20395 = vmatpush3.msra.mxu1 %v8776_v40  ;;  %v9190_v40 = vld [vmem:[#allocation13 + $0x1008] sm:$0xff] }
0x1515   : > { %20396 = vmatprep.subr.mxu1 %v22578_v3 }
0x1516   : > { %20397 = vmatpush3.msra.mxu1 %v8775_v41  ;;  %v8877_v41 = vld [vmem:[#allocation13 + $0xf40] sm:$0xff] }
0x1517   : > { %20398 = vmatprep.subr.mxu1 %v22578_v3 }
0x1518   : > { %20399 = vmatpush3.msra.mxu1 %v8774_v42  ;;  %v9189_v42 = vld [vmem:[#allocation13 + $0x1000] sm:$0xff] }
0x1519   : > { %20400 = vmatprep.subr.mxu1 %v22578_v3 }
0x151a   : > { %20401 = vmatpush3.msra.mxu1 %v8773_v43  ;;  %v8900_v43 = vld [vmem:[#allocation13 + $0xff8] sm:$0xff] }
0x151b   : > { %20402 = vmatprep.subr.mxu1 %v22578_v3 }
0x151c   : > { %20403 = vmatpush3.msra.mxu1 %v8772_v44  ;;  %v9212_v44 = vld [vmem:[#allocation13 + $0x10b8] sm:$0xff] }
0x151d   : > { %20404 = vmatprep.subr.mxu1 %v22578_v3 }
0x151e   : > { %20405 = vmatpush3.msra.mxu1 %v8771_v45  ;;  %v8899_v45 = vld [vmem:[#allocation13 + $0xff0] sm:$0xff] }
0x151f   : > { %20406 = vmatprep.subr.mxu1 %v22578_v3 }
0x1520   : > { %20407 = vmatpush3.msra.mxu1 %v8770_v46  ;;  %v9211_v46 = vld [vmem:[#allocation13 + $0x10b0] sm:$0xff] }
0x1521   : > { %20408 = vmatprep.subr.mxu1 %v22578_v3 }
0x1522   : > { %20409 = vmatpush3.msra.mxu1 %v8769_v47  ;;  %v8898_v47 = vld [vmem:[#allocation13 + $0xfe8] sm:$0xff] }
0x1523   : > { %20410 = vmatprep.subr.mxu1 %v22578_v3 }
0x1524   : > { %20411 = vmatpush3.msra.mxu1 %v8768_v48  ;;  %v9210_v48 = vld [vmem:[#allocation13 + $0x10a8] sm:$0xff] }
0x1525   : > { %20412 = vmatprep.subr.mxu1 %v22578_v3 }
0x1526   : > { %20413 = vmatpush3.msra.mxu1 %v8767_v49  ;;  %v8897_v49 = vld [vmem:[#allocation13 + $0xfe0] sm:$0xff] }
0x1527   : > { %20414 = vmatprep.subr.mxu1 %v22578_v3 }
0x1528   : > { %20415 = vmatpush3.msra.mxu1 %v8766_v50  ;;  %v9209_v50 = vld [vmem:[#allocation13 + $0x10a0] sm:$0xff] }
0x1529   : > { %20416 = vmatprep.subr.mxu1 %v22578_v3 }
0x152a   : > { %20417 = vmatpush3.msra.mxu1 %v8765_v51  ;;  %v8896_v51 = vld [vmem:[#allocation13 + $0xfd8] sm:$0xff] }
0x152b   : > { %20418 = vmatprep.subr.mxu1 %v22578_v3 }
0x152c   : > { %20419 = vmatpush3.msra.mxu1 %v8764_v52  ;;  %v9208_v52 = vld [vmem:[#allocation13 + $0x1098] sm:$0xff] }
0x152d   : > { %20461 = vmatprep.subr.mxu1 %v22578_v3 }
0x1598   : > { %v8416_v56 = vpop.f32.mrf.mxu0 }
0x1599   : > { %v8639_v1 = vsel %vm545_vm0, %v8416_v56, 0.0 }
0x159a   : > { %v20366_v57 = vpop.f32.mrf.mxu0 }
0x15bb   : > { %v8489_v58 = vpop.f32.mrf.mxu1 }
0x15bc   : > { %v8640_v0 = vsel %vm545_vm0, %v8489_v58, 0.0 }
0x15bd   : > { %v20373_v59 = vpop.f32.mrf.mxu1  ;;  %v8641_v4 = vadd.f32 %v8640_v0, %v8639_v1 }
0x15bf   : > { %v8562_v62 = vpop.f32.mrf.mxu0 }
0x15c0   : > { %v8642_v2 = vsel %vm545_vm0, %v8562_v62, 0.0 }
0x15c1   : > { %v20380_v63 = vpop.f32.mrf.mxu0  ;;  %v8643_v5 = vadd.f32 %v8642_v2, %v8641_v4  ;;  %v8876_v2 = vld [vmem:[#allocation13 + $0xf38] sm:$0xff] }
0x15c2   : > { %v8892_v4 = vld [vmem:[#allocation13 + $0xfb8] sm:$0xff] }
0x15cd   : > { %v8635_v6 = vpop.f32.mrf.mxu1 }
0x15ce   : > { %v8644_v7 = vsel %vm545_vm0, %v8635_v6, 0.0  ;;  %v8891_v6 = vld [vmem:[#allocation13 + $0xfb0] sm:$0xff] }
0x15cf   : > { %v8645_v8 = vadd.f32 %v8644_v7, %v8643_v5  ;;  %v20387_v9 = vpop.f32.mrf.mxu1  ;;  %v8875_v5 = vld [vmem:[#allocation13 + $0xf30] sm:$0xff]  ;;  %v8874_v7 = vld [vmem:[#allocation13 + $0xf28] sm:$0xff] }
0x15d0   : > { %v8873_v9 = vld [vmem:[#allocation13 + $0xf20] sm:$0xff] }
0x15d1   : > { %v23938_v10 = vadd.f32 %v8645_v8, %v23597_v61  ;;  %v8673_v61 = vld [vmem:[#allocation16 + $0x140] sm:$0xff]  ;;  %v8890_v8 = vld [vmem:[#allocation13 + $0xfa8] sm:$0xff] }
0x15d2   : > { %8707 = vmatpush1.msra.mxu0 %v8673_v61 }
0x15d3   : > { %v8649_v11 = vmul.f32 %v23938_v10, %v23938_v10  ;;  %8708 = vmatprep.subr.mxu0 %v8672_v19 }
0x15d4   : > { %8709 = vmatpush1.msra.mxu0 %v8671_v20 }
0x15d5   : > { %v8650_v12 = vsel %vm545_vm0, %v8649_v11, 0.0  ;;  %8710 = vmatprep.subr.mxu0 %v8670_v21  ;;  %v8872_v11 = vld [vmem:[#allocation13 + $0xf18] sm:$0xff]  ;;  %v17502_v21 = vld [vmem:[#allocation10 + $0x3] ss:$0 sm:$0xff] }
0x15d6   : > { %8651 = vadd.xlane.f32.xlu1 %v8650_v12  ;;  %8711 = vmatpush1.msra.mxu0 %v8669_v22  ;;  %v8888_v12 = vld [vmem:[#allocation13 + $0xf98] sm:$0xff] }
0x15d7   : > { %8712 = vmatprep.subr.mxu0 %v8668_v25 }
0x15d8   : > { %8713 = vmatpush1.msra.mxu0 %v8667_v27  ;;  %v8884_v27 = vld [vmem:[#allocation13 + $0xf78] sm:$0xff] }
0x15d9   : > { %8714 = vmatprep.subr.mxu0 %v8666_v28  ;;  %v9196_v28 = vld [vmem:[#allocation13 + $0x1038] sm:$0xff] }
0x15da   : > { %8715 = vmatpush1.msra.mxu0 %v8665_v29  ;;  %v8883_v29 = vld [vmem:[#allocation13 + $0xf70] sm:$0xff] }
0x15db   : > { %20423 = vmatprep.subr.mxu0 %v22578_v3 }
0x165f   : > { %v8652_v30 = vpop.xlane.xlu1 %8651 }
0x1660   : > { %v8653_v31 = vmul.f32 0.015625, %v8652_v30  ;;  %v9195_v30 = vld [vmem:[#allocation13 + $0x1030] sm:$0xff] }
0x1662   : > { %v8654_v32 = vadd.f32 1e-06, %v8653_v31  ;;  %v8882_v31 = vld [vmem:[#allocation13 + $0xf68] sm:$0xff] }
0x1664   : > { %22092 = vrsqrt.f32 %v8654_v32  ;;  %v9194_v32 = vld [vmem:[#allocation13 + $0x1028] sm:$0xff] }
0x1671   : > { %v22093_v33 = vpop.eup %22092 }
0x1672   : > { %v8656_v35 = vmul.f32 %v22093_v33, %v23938_v10  ;;  %v8881_v33 = vld [vmem:[#allocation13 + $0xf60] sm:$0xff] }
0x1674   : > { %v8663_v36 = vmul.f32 %v17500_v34, %v8656_v35  ;;  %v9193_v34 = vld [vmem:[#allocation13 + $0x1020] sm:$0xff]  ;;  %v8880_v35 = vld [vmem:[#allocation13 + $0xf58] sm:$0xff] }
0x1676   : > { %17501 = vmatmul.mubr.msk.f32.vlgmr.msra.gmra.mxu0 %vm545_vm0, %v8663_v36  ;;  %v9192_v36 = vld [vmem:[#allocation13 + $0x1018] sm:$0xff] }
0x1677   : > { %20439 = vmatprep.mubr.msk.f32.mxu0 %vm22579_vm1, %v22578_v3  ;;  %20424 = vmatpush3.msra.mxu0 %v8876_v2  ;;  %v9514_v2 = vld [vmem:[#allocation13 + $0x1120] sm:$0xff] }
0x1678   : > { %20425 = vmatprep.subr.mxu0 %v22578_v3 }
0x1679   : > { %20426 = vmatpush3.msra.mxu0 %v8875_v5  ;;  %v9513_v5 = vld [vmem:[#allocation13 + $0x1118] sm:$0xff] }
0x167a   : > { %20427 = vmatprep.subr.mxu0 %v22578_v3 }
0x167b   : > { %20428 = vmatpush3.msra.mxu0 %v8874_v7  ;;  %v9512_v7 = vld [vmem:[#allocation13 + $0x1110] sm:$0xff] }
0x167c   : > { %20429 = vmatprep.subr.mxu0 %v22578_v3 }
0x167d   : > { %20430 = vmatpush3.msra.mxu0 %v8873_v9  ;;  %v9511_v9 = vld [vmem:[#allocation13 + $0x1108] sm:$0xff] }
0x167e   : > { %20431 = vmatprep.subr.mxu0 %v22578_v3 }
0x167f   : > { %20432 = vmatpush3.msra.mxu0 %v8872_v11  ;;  %v9510_v11 = vld [vmem:[#allocation13 + $0x1100] sm:$0xff] }
0x1680   : > { %20433 = vmatprep.subr.mxu0 %v22578_v3 }
0x1681   : > { %20434 = vmatpush3.msra.mxu0 %v8871_v13  ;;  %v9533_v13 = vld [vmem:[#allocation13 + $0x11b8] sm:$0xff] }
0x1682   : > { %20435 = vmatprep.subr.mxu0 %v22578_v3 }
0x1683   : > { %20436 = vmatpush3.msra.mxu0 %v8870_v15  ;;  %v9532_v15 = vld [vmem:[#allocation13 + $0x11b0] sm:$0xff] }
0x1684   : > { %20437 = vmatprep.subr.mxu0 %v22578_v3 }
0x1685   : > { %20438 = vmatpush3.msra.mxu0 %v8869_v17  ;;  %v9531_v17 = vld [vmem:[#allocation13 + $0x11a8] sm:$0xff] }
0x1686   : > { %20442 = vmatprep.subr.mxu0 %v22578_v3 }
0x1736   : > { %v8750_v53 = vpop.f32.mrf.mxu0 }
0x1737   : > { %v8755_v54 = vsub.f32 0.0, %v8750_v53 }
0x1738   : > { %v8752_v57 = vpop.f32.mrf.mxu0 }
0x1739   : > { %v8756_v55 = vmul.f32 1.442695, %v8755_v54  ;;  %v9207_v54 = vld [vmem:[#allocation13 + $0x1090] sm:$0xff] }
0x173b   : > { %22094 = vpow2.f32 %v8756_v55  ;;  %v8894_v55 = vld [vmem:[#allocation13 + $0xfc8] sm:$0xff] }
0x1748   : > { %v22095_v26 = vpop.eup %22094 }
0x1749   : > { %v8758_v23 = vadd.f32 1.0, %v22095_v26  ;;  %v9206_v26 = vld [vmem:[#allocation13 + $0x1088] sm:$0xff] }
0x174b   : > { %22096 = vrcp.f32 %v8758_v23  ;;  %v8893_v23 = vld [vmem:[#allocation13 + $0xfc0] sm:$0xff] }
0x1758   : > { %v22097_v24 = vpop.eup %22096 }
0x1759   : > { %v8761_v56 = vmul.f32 %v22097_v24, %v8750_v53  ;;  %v8895_v53 = vld [vmem:[#allocation13 + $0xfd0] sm:$0xff]  ;;  %v9205_v24 = vld [vmem:[#allocation13 + $0x1080] sm:$0xff] }
0x175b   : > { %v8762_v58 = vmul.f32 %v8761_v56, %v8752_v57  ;;  %v9204_v56 = vld [vmem:[#allocation13 + $0x1078] sm:$0xff] }
0x175c   : > { %v9517_v57 = vld [vmem:[#allocation13 + $0x1138] sm:$0xff] }
0x175d   : > { %20421 = vmatmul.mubr.f32.vlgmr.msra.gmra.mxu1 %v8762_v58  ;;  %v9203_v58 = vld [vmem:[#allocation13 + $0x1070] sm:$0xff] }
0x175e   : > { %20477 = vmatprep.mubr.msk.f32.mxu1 %vm22579_vm1, %v22578_v3  ;;  %20462 = vmatpush3.msra.mxu1 %v8892_v4  ;;  %v9200_v4 = vld [vmem:[#allocation13 + $0x1058] sm:$0xff] }
0x175f   : > { %20463 = vmatprep.subr.mxu1 %v22578_v3 }
0x1760   : > { %20464 = vmatpush3.msra.mxu1 %v8891_v6  ;;  %v9199_v6 = vld [vmem:[#allocation13 + $0x1050] sm:$0xff] }
0x1761   : > { %20465 = vmatprep.subr.mxu1 %v22578_v3 }
0x1762   : > { %20466 = vmatpush3.msra.mxu1 %v8890_v8  ;;  %v9198_v8 = vld [vmem:[#allocation13 + $0x1048] sm:$0xff] }
0x1763   : > { %20467 = vmatprep.subr.mxu1 %v22578_v3 }
0x181d   : > { %v8846_v59 = vpop.f32.mrf.mxu1 }
0x181e   : > { %v23967_v62 = vadd.f32 %v8846_v59, %v23938_v10  ;;  %v8889_v10 = vld [vmem:[#allocation13 + $0xfa0] sm:$0xff]  ;;  %v9516_v59 = vld [vmem:[#allocation13 + $0x1130] sm:$0xff] }
0x181f   : > { %v20422_v63 = vpop.f32.mrf.mxu1  ;;  %20468 = vmatpush3.msra.mxu1 %v8889_v10  ;;  %v9197_v10 = vld [vmem:[#allocation13 + $0x1040] sm:$0xff] }
0x1820   : > { %v8853_v0 = vmul.f32 %v23967_v62, %v23967_v62  ;;  %20469 = vmatprep.subr.mxu1 %v22578_v3  ;;  %v9202_v63 = vld [vmem:[#allocation13 + $0x1068] sm:$0xff] }
0x1821   : > { %20470 = vmatpush3.msra.mxu1 %v8888_v12  ;;  %v9220_v12 = vld [vmem:[#allocation13 + $0x10f8] sm:$0xff] }
0x1822   : > { %v8854_v1 = vsel %vm545_vm0, %v8853_v0, 0.0  ;;  %20471 = vmatprep.subr.mxu1 %v22578_v3  ;;  %v9515_v0 = vld [vmem:[#allocation13 + $0x1128] sm:$0xff] }
0x1823   : > { %8855 = vadd.xlane.f32.xlu0 %v8854_v1  ;;  %20472 = vmatpush3.msra.mxu1 %v8887_v14  ;;  %v9201_v1 = vld [vmem:[#allocation13 + $0x1060] sm:$0xff]  ;;  %v9219_v14 = vld [vmem:[#allocation13 + $0x10f0] sm:$0xff] }
0x1824   : > { %20473 = vmatprep.subr.mxu1 %v22578_v3 }
0x1825   : > { %20474 = vmatpush3.msra.mxu1 %v8886_v16  ;;  %v9218_v16 = vld [vmem:[#allocation13 + $0x10e8] sm:$0xff] }
0x1826   : > { %20475 = vmatprep.subr.mxu1 %v22578_v3 }
0x1827   : > { %20476 = vmatpush3.msra.mxu1 %v8885_v18  ;;  %v9217_v18 = vld [vmem:[#allocation13 + $0x10e0] sm:$0xff] }
0x1828   : > { %20499 = vmatprep.subr.mxu1 %v22578_v3 }
0x18ac   : > { %v8856_v60 = vpop.xlane.xlu0 %8855 }
0x18ad   : > { %v8857_v61 = vmul.f32 0.015625, %v8856_v60  ;;  %v9530_v60 = vld [vmem:[#allocation13 + $0x11a0] sm:$0xff] }
0x18af   : > { %v8858_v19 = vadd.f32 1e-06, %v8857_v61  ;;  %v9216_v61 = vld [vmem:[#allocation13 + $0x10d8] sm:$0xff] }
0x18b1   : > { %22098 = vrsqrt.f32 %v8858_v19  ;;  %v9529_v19 = vld [vmem:[#allocation13 + $0x1198] sm:$0xff] }
0x18be   : > { %v22099_v20 = vpop.eup %22098 }
0x18bf   : > { %v8860_v22 = vmul.f32 %v22099_v20, %v23967_v62  ;;  %v9215_v20 = vld [vmem:[#allocation13 + $0x10d0] sm:$0xff] }
0x18c1   : > { %v23989_v25 = vmul.f32 %v17502_v21, %v8860_v22  ;;  %v9528_v21 = vld [vmem:[#allocation13 + $0x1190] sm:$0xff]  ;;  %v9214_v22 = vld [vmem:[#allocation13 + $0x10c8] sm:$0xff] }
0x18c3   : > { %20440 = vmatmul.mubr.msk.f32.vlgmr.msra.gmra.mxu0 %vm545_vm0, %v23989_v25  ;;  %20478 = vmatmul.mubr.msk.f32.vlgmr.msra.gmra.mxu1 %vm545_vm0, %v23989_v25 }
0x18c4   : > { %20443 = vmatpush3.msra.mxu0 %v8884_v27  ;;  %20500 = vmatpush3.msra.mxu1 %v9196_v28  ;;  %v9527_v27 = vld [vmem:[#allocation13 + $0x1188] sm:$0xff]  ;;  %v9213_v28 = vld [vmem:[#allocation13 + $0x10c0] sm:$0xff] }
0x18c5   : > { %20444 = vmatprep.subr.mxu0 %v22578_v3  ;;  %20501 = vmatprep.subr.mxu1 %v22578_v3 }
0x18c6   : > { %20445 = vmatpush3.msra.mxu0 %v8883_v29  ;;  %20502 = vmatpush3.msra.mxu1 %v9195_v30  ;;  %v9526_v29 = vld [vmem:[#allocation13 + $0x1180] sm:$0xff]  ;;  %v9525_v30 = vld [vmem:[#allocation13 + $0x1178] sm:$0xff] }
0x18c7   : > { %20446 = vmatprep.subr.mxu0 %v22578_v3  ;;  %20503 = vmatprep.subr.mxu1 %v22578_v3 }
0x18c8   : > { %20447 = vmatpush3.msra.mxu0 %v8882_v31  ;;  %20504 = vmatpush3.msra.mxu1 %v9194_v32  ;;  %v9834_v31 = vld [vmem:[#allocation13 + $0x1238] sm:$0xff]  ;;  %v9524_v32 = vld [vmem:[#allocation13 + $0x1170] sm:$0xff] }
0x18c9   : > { %20448 = vmatprep.subr.mxu0 %v22578_v3  ;;  %20505 = vmatprep.subr.mxu1 %v22578_v3 }
0x18ca   : > { %20449 = vmatpush3.msra.mxu0 %v8881_v33  ;;  %20506 = vmatpush3.msra.mxu1 %v9193_v34  ;;  %v9833_v33 = vld [vmem:[#allocation13 + $0x1230] sm:$0xff]  ;;  %v9523_v34 = vld [vmem:[#allocation13 + $0x1168] sm:$0xff] }
0x18cb   : > { %20450 = vmatprep.subr.mxu0 %v22578_v3  ;;  %20507 = vmatprep.subr.mxu1 %v22578_v3 }
0x18cc   : > { %20451 = vmatpush3.msra.mxu0 %v8880_v35  ;;  %20508 = vmatpush3.msra.mxu1 %v9192_v36  ;;  %v9832_v35 = vld [vmem:[#allocation13 + $0x1228] sm:$0xff]  ;;  %v9522_v36 = vld [vmem:[#allocation13 + $0x1160] sm:$0xff] }
0x18cd   : > { %20452 = vmatprep.subr.mxu0 %v22578_v3  ;;  %20509 = vmatprep.subr.mxu1 %v22578_v3 }
0x18ce   : > { %20453 = vmatpush3.msra.mxu0 %v8879_v37  ;;  %20510 = vmatpush3.msra.mxu1 %v9191_v38  ;;  %v9831_v37 = vld [vmem:[#allocation13 + $0x1220] sm:$0xff]  ;;  %v9521_v38 = vld [vmem:[#allocation13 + $0x1158] sm:$0xff] }
0x18cf   : > { %20454 = vmatprep.subr.mxu0 %v22578_v3  ;;  %20511 = vmatprep.subr.mxu1 %v22578_v3 }
0x18d0   : > { %20455 = vmatpush3.msra.mxu0 %v8878_v39  ;;  %20512 = vmatpush3.msra.mxu1 %v9190_v40  ;;  %v9830_v39 = vld [vmem:[#allocation13 + $0x1218] sm:$0xff]  ;;  %v9520_v40 = vld [vmem:[#allocation13 + $0x1150] sm:$0xff] }
0x18d1   : > { %20456 = vmatprep.subr.mxu0 %v22578_v3  ;;  %20513 = vmatprep.subr.mxu1 %v22578_v3 }
0x18d2   : > { %20457 = vmatpush3.msra.mxu0 %v8877_v41  ;;  %20458 = vmatprep.mubr.msk.f32.mxu0 %vm22579_vm1, %v22578_v3  ;;  %v9829_v41 = vld [vmem:[#allocation13 + $0x1210] sm:$0xff] }
0x18d3   : > { %20514 = vmatpush3.msra.mxu1 %v9189_v42  ;;  %20515 = vmatprep.mubr.msk.f32.mxu1 %vm22579_vm1, %v22578_v3  ;;  %v9519_v42 = vld [vmem:[#allocation13 + $0x1148] sm:$0xff] }
0x18d4   : > { %20459 = vmatmul.mubr.msk.f32.vlgmr.msra.gmra.mxu0 %vm545_vm0, %v23989_v25  ;;  %20480 = vmatprep.subr.mxu0 %v22578_v3 }
0x18d5   : > { %20516 = vmatmul.mubr.msk.f32.vlgmr.msra.gmra.mxu1 %vm545_vm0, %v23989_v25  ;;  %20537 = vmatprep.subr.mxu1 %v22578_v3 }
0x18d6   : > { %20481 = vmatpush3.msra.mxu0 %v8900_v43  ;;  %20538 = vmatpush3.msra.mxu1 %v9212_v44  ;;  %v9828_v43 = vld [vmem:[#allocation13 + $0x1208] sm:$0xff]  ;;  %v9518_v44 = vld [vmem:[#allocation13 + $0x1140] sm:$0xff] }
0x18d7   : > { %20482 = vmatprep.subr.mxu0 %v22578_v3  ;;  %20539 = vmatprep.subr.mxu1 %v22578_v3 }
0x18d8   : > { %20483 = vmatpush3.msra.mxu0 %v8899_v45  ;;  %20540 = vmatpush3.msra.mxu1 %v9211_v46  ;;  %v9827_v45 = vld [vmem:[#allocation13 + $0x1200] sm:$0xff]  ;;  %v9541_v46 = vld [vmem:[#allocation13 + $0x11f8] sm:$0xff] }
0x18d9   : > { %20484 = vmatprep.subr.mxu0 %v22578_v3  ;;  %20541 = vmatprep.subr.mxu1 %v22578_v3 }
0x18da   : > { %20485 = vmatpush3.msra.mxu0 %v8898_v47  ;;  %20542 = vmatpush3.msra.mxu1 %v9210_v48  ;;  %v9850_v47 = vld [vmem:[#allocation13 + $0x12b8] sm:$0xff]  ;;  %v9540_v48 = vld [vmem:[#allocation13 + $0x11f0] sm:$0xff] }
0x18db   : > { %20486 = vmatprep.subr.mxu0 %v22578_v3  ;;  %20543 = vmatprep.subr.mxu1 %v22578_v3 }
0x18dc   : > { %20487 = vmatpush3.msra.mxu0 %v8897_v49  ;;  %20544 = vmatpush3.msra.mxu1 %v9209_v50  ;;  %v9849_v49 = vld [vmem:[#allocation13 + $0x12b0] sm:$0xff]  ;;  %v9539_v50 = vld [vmem:[#allocation13 + $0x11e8] sm:$0xff] }
0x18dd   : > { %20488 = vmatprep.subr.mxu0 %v22578_v3  ;;  %20545 = vmatprep.subr.mxu1 %v22578_v3 }
0x18de   : > { %20489 = vmatpush3.msra.mxu0 %v8896_v51  ;;  %20546 = vmatpush3.msra.mxu1 %v9208_v52  ;;  %v9848_v51 = vld [vmem:[#allocation13 + $0x12a8] sm:$0xff]  ;;  %v9538_v52 = vld [vmem:[#allocation13 + $0x11e0] sm:$0xff] }
0x18df   : > { %20490 = vmatprep.subr.mxu0 %v22578_v3  ;;  %20547 = vmatprep.subr.mxu1 %v22578_v3 }
0x18e0   : > { %20491 = vmatpush3.msra.mxu0 %v8895_v53  ;;  %20548 = vmatpush3.msra.mxu1 %v9207_v54  ;;  %v9847_v53 = vld [vmem:[#allocation13 + $0x12a0] sm:$0xff]  ;;  %v9537_v54 = vld [vmem:[#allocation13 + $0x11d8] sm:$0xff] }
0x18e1   : > { %20492 = vmatprep.subr.mxu0 %v22578_v3  ;;  %20549 = vmatprep.subr.mxu1 %v22578_v3 }
0x18e2   : > { %20493 = vmatpush3.msra.mxu0 %v8894_v55  ;;  %20550 = vmatpush3.msra.mxu1 %v9206_v26  ;;  %v9846_v55 = vld [vmem:[#allocation13 + $0x1298] sm:$0xff]  ;;  %v9536_v26 = vld [vmem:[#allocation13 + $0x11d0] sm:$0xff] }
0x18e3   : > { %20494 = vmatprep.subr.mxu0 %v22578_v3  ;;  %20551 = vmatprep.subr.mxu1 %v22578_v3 }
0x18e4   : > { %20495 = vmatpush3.msra.mxu0 %v8893_v23  ;;  %20496 = vmatprep.mubr.msk.f32.mxu0 %vm22579_vm1, %v22578_v3  ;;  %v9845_v23 = vld [vmem:[#allocation13 + $0x1290] sm:$0xff] }
0x18e5   : > { %20552 = vmatpush3.msra.mxu1 %v9205_v24  ;;  %20553 = vmatprep.mubr.msk.f32.mxu1 %vm22579_vm1, %v22578_v3  ;;  %v9535_v24 = vld [vmem:[#allocation13 + $0x11c8] sm:$0xff] }
0x18e6   : > { %20497 = vmatmul.mubr.msk.f32.vlgmr.msra.gmra.mxu0 %vm545_vm0, %v23989_v25  ;;  %20518 = vmatprep.subr.mxu0 %v22578_v3 }
0x18e7   : > { %20554 = vmatmul.mubr.msk.f32.vlgmr.msra.gmra.mxu1 %vm545_vm0, %v23989_v25  ;;  %20575 = vmatprep.subr.mxu1 %v22578_v3 }
0x18e8   : > { %20519 = vmatpush3.msra.mxu0 %v9204_v56  ;;  %20576 = vmatpush3.msra.mxu1 %v9517_v57  ;;  %v9844_v56 = vld [vmem:[#allocation13 + $0x1288] sm:$0xff]  ;;  %v9534_v57 = vld [vmem:[#allocation13 + $0x11c0] sm:$0xff] }
0x18e9   : > { %20520 = vmatprep.subr.mxu0 %v22578_v3  ;;  %20577 = vmatprep.subr.mxu1 %v22578_v3 }
0x18ea   : > { %20521 = vmatpush3.msra.mxu0 %v9203_v58  ;;  %20578 = vmatpush3.msra.mxu1 %v9516_v59  ;;  %v9843_v58 = vld [vmem:[#allocation13 + $0x1280] sm:$0xff]  ;;  %v9842_v59 = vld [vmem:[#allocation13 + $0x1278] sm:$0xff] }
0x18eb   : > { %20522 = vmatprep.subr.mxu0 %v22578_v3  ;;  %20579 = vmatprep.subr.mxu1 %v22578_v3 }
0x18ec   : > { %20523 = vmatpush3.msra.mxu0 %v9202_v63  ;;  %20580 = vmatpush3.msra.mxu1 %v9515_v0  ;;  %v10155_v63 = vld [vmem:[#allocation13 + $0x1338] sm:$0xff]  ;;  %v9841_v0 = vld [vmem:[#allocation13 + $0x1270] sm:$0xff] }
0x18ed   : > { %20524 = vmatprep.subr.mxu0 %v22578_v3  ;;  %20581 = vmatprep.subr.mxu1 %v22578_v3 }
0x18ee   : > { %20525 = vmatpush3.msra.mxu0 %v9201_v1  ;;  %20582 = vmatpush3.msra.mxu1 %v9514_v2  ;;  %v10154_v1 = vld [vmem:[#allocation13 + $0x1330] sm:$0xff]  ;;  %v9840_v2 = vld [vmem:[#allocation13 + $0x1268] sm:$0xff] }
0x18ef   : > { %20526 = vmatprep.subr.mxu0 %v22578_v3  ;;  %20583 = vmatprep.subr.mxu1 %v22578_v3 }
0x18f0   : > { %20527 = vmatpush3.msra.mxu0 %v9200_v4  ;;  %20584 = vmatpush3.msra.mxu1 %v9513_v5  ;;  %v10153_v4 = vld [vmem:[#allocation13 + $0x1328] sm:$0xff]  ;;  %v9839_v5 = vld [vmem:[#allocation13 + $0x1260] sm:$0xff] }
0x18f1   : > { %20528 = vmatprep.subr.mxu0 %v22578_v3  ;;  %20585 = vmatprep.subr.mxu1 %v22578_v3 }
0x18f2   : > { %20529 = vmatpush3.msra.mxu0 %v9199_v6  ;;  %20586 = vmatpush3.msra.mxu1 %v9512_v7  ;;  %v10152_v6 = vld [vmem:[#allocation13 + $0x1320] sm:$0xff]  ;;  %v9838_v7 = vld [vmem:[#allocation13 + $0x1258] sm:$0xff] }
0x18f3   : > { %20530 = vmatprep.subr.mxu0 %v22578_v3  ;;  %20587 = vmatprep.subr.mxu1 %v22578_v3 }
0x18f4   : > { %20531 = vmatpush3.msra.mxu0 %v9198_v8  ;;  %20588 = vmatpush3.msra.mxu1 %v9511_v9  ;;  %v10151_v8 = vld [vmem:[#allocation13 + $0x1318] sm:$0xff]  ;;  %v9837_v9 = vld [vmem:[#allocation13 + $0x1250] sm:$0xff] }
0x18f5   : > { %20532 = vmatprep.subr.mxu0 %v22578_v3  ;;  %20589 = vmatprep.subr.mxu1 %v22578_v3 }
0x18f6   : > { %20533 = vmatpush3.msra.mxu0 %v9197_v10  ;;  %20534 = vmatprep.mubr.msk.f32.mxu0 %vm22579_vm1, %v22578_v3  ;;  %v10150_v10 = vld [vmem:[#allocation13 + $0x1310] sm:$0xff] }
0x18f7   : > { %20590 = vmatpush3.msra.mxu1 %v9510_v11  ;;  %20591 = vmatprep.mubr.msk.f32.mxu1 %vm22579_vm1, %v22578_v3  ;;  %v9836_v11 = vld [vmem:[#allocation13 + $0x1248] sm:$0xff] }
0x18f8   : > { %20535 = vmatmul.mubr.msk.f32.vlgmr.msra.gmra.mxu0 %vm545_vm0, %v23989_v25  ;;  %20556 = vmatprep.subr.mxu0 %v22578_v3 }
0x18f9   : > { %20592 = vmatmul.mubr.msk.f32.vlgmr.msra.gmra.mxu1 %vm545_vm0, %v23989_v25  ;;  %20613 = vmatprep.subr.mxu1 %v22578_v3 }
0x18fa   : > { %20557 = vmatpush3.msra.mxu0 %v9220_v12  ;;  %20614 = vmatpush3.msra.mxu1 %v9533_v13  ;;  %v10149_v12 = vld [vmem:[#allocation13 + $0x1308] sm:$0xff]  ;;  %v9835_v13 = vld [vmem:[#allocation13 + $0x1240] sm:$0xff] }
0x18fb   : > { %20558 = vmatprep.subr.mxu0 %v22578_v3  ;;  %20615 = vmatprep.subr.mxu1 %v22578_v3 }
0x18fc   : > { %20559 = vmatpush3.msra.mxu0 %v9219_v14  ;;  %20616 = vmatpush3.msra.mxu1 %v9532_v15  ;;  %v10148_v14 = vld [vmem:[#allocation13 + $0x1300] sm:$0xff]  ;;  %v9858_v15 = vld [vmem:[#allocation13 + $0x12f8] sm:$0xff] }
0x18fd   : > { %20560 = vmatprep.subr.mxu0 %v22578_v3  ;;  %20617 = vmatprep.subr.mxu1 %v22578_v3 }
0x18fe   : > { %20561 = vmatpush3.msra.mxu0 %v9218_v16  ;;  %20618 = vmatpush3.msra.mxu1 %v9531_v17  ;;  %v10171_v16 = vld [vmem:[#allocation13 + $0x13b8] sm:$0xff]  ;;  %v9857_v17 = vld [vmem:[#allocation13 + $0x12f0] sm:$0xff] }
0x18ff   : > { %20562 = vmatprep.subr.mxu0 %v22578_v3  ;;  %20619 = vmatprep.subr.mxu1 %v22578_v3 }
0x1900   : > { %20563 = vmatpush3.msra.mxu0 %v9217_v18  ;;  %20620 = vmatpush3.msra.mxu1 %v9530_v60  ;;  %v10170_v18 = vld [vmem:[#allocation13 + $0x13b0] sm:$0xff]  ;;  %v9856_v60 = vld [vmem:[#allocation13 + $0x12e8] sm:$0xff] }
0x1901   : > { %20564 = vmatprep.subr.mxu0 %v22578_v3  ;;  %20621 = vmatprep.subr.mxu1 %v22578_v3 }
0x1902   : > { %20565 = vmatpush3.msra.mxu0 %v9216_v61  ;;  %20622 = vmatpush3.msra.mxu1 %v9529_v19  ;;  %v10169_v61 = vld [vmem:[#allocation13 + $0x13a8] sm:$0xff]  ;;  %v9855_v19 = vld [vmem:[#allocation13 + $0x12e0] sm:$0xff] }
0x1903   : > { %20566 = vmatprep.subr.mxu0 %v22578_v3  ;;  %20623 = vmatprep.subr.mxu1 %v22578_v3 }
0x1904   : > { %20567 = vmatpush3.msra.mxu0 %v9215_v20  ;;  %20624 = vmatpush3.msra.mxu1 %v9528_v21  ;;  %v10168_v20 = vld [vmem:[#allocation13 + $0x13a0] sm:$0xff]  ;;  %v9854_v21 = vld [vmem:[#allocation13 + $0x12d8] sm:$0xff] }
0x1905   : > { %20568 = vmatprep.subr.mxu0 %v22578_v3  ;;  %20625 = vmatprep.subr.mxu1 %v22578_v3 }
0x1906   : > { %20569 = vmatpush3.msra.mxu0 %v9214_v22  ;;  %20626 = vmatpush3.msra.mxu1 %v9527_v27  ;;  %v10167_v22 = vld [vmem:[#allocation13 + $0x1398] sm:$0xff]  ;;  %v9853_v27 = vld [vmem:[#allocation13 + $0x12d0] sm:$0xff] }
0x1907   : > { %20570 = vmatprep.subr.mxu0 %v22578_v3  ;;  %20627 = vmatprep.subr.mxu1 %v22578_v3 }
0x1908   : > { %20571 = vmatpush3.msra.mxu0 %v9213_v28  ;;  %20572 = vmatprep.mubr.msk.f32.mxu0 %vm22579_vm1, %v22578_v3  ;;  %v10166_v28 = vld [vmem:[#allocation13 + $0x1390] sm:$0xff] }
0x1909   : > { %20628 = vmatpush3.msra.mxu1 %v9526_v29  ;;  %20629 = vmatprep.mubr.msk.f32.mxu1 %vm22579_vm1, %v22578_v3  ;;  %v9852_v29 = vld [vmem:[#allocation13 + $0x12c8] sm:$0xff] }
0x190a   : > { %20573 = vmatmul.mubr.msk.f32.vlgmr.msra.gmra.mxu0 %vm545_vm0, %v23989_v25  ;;  %20594 = vmatprep.subr.mxu0 %v22578_v3 }
0x190b   : > { %20630 = vmatmul.mubr.msk.f32.vlgmr.msra.gmra.mxu1 %vm545_vm0, %v23989_v25  ;;  %20651 = vmatprep.subr.mxu1 %v22578_v3 }
0x190c   : > { %20595 = vmatpush3.msra.mxu0 %v9525_v30  ;;  %20652 = vmatpush3.msra.mxu1 %v9834_v31  ;;  %v10165_v30 = vld [vmem:[#allocation13 + $0x1388] sm:$0xff]  ;;  %v9851_v31 = vld [vmem:[#allocation13 + $0x12c0] sm:$0xff] }
0x190d   : > { %20596 = vmatprep.subr.mxu0 %v22578_v3  ;;  %20653 = vmatprep.subr.mxu1 %v22578_v3 }
0x190e   : > { %20597 = vmatpush3.msra.mxu0 %v9524_v32  ;;  %20654 = vmatpush3.msra.mxu1 %v9833_v33  ;;  %v10164_v32 = vld [vmem:[#allocation13 + $0x1380] sm:$0xff]  ;;  %v10163_v33 = vld [vmem:[#allocation13 + $0x1378] sm:$0xff] }
0x190f   : > { %20598 = vmatprep.subr.mxu0 %v22578_v3  ;;  %20655 = vmatprep.subr.mxu1 %v22578_v3 }
0x1910   : > { %20599 = vmatpush3.msra.mxu0 %v9523_v34  ;;  %20656 = vmatpush3.msra.mxu1 %v9832_v35  ;;  %v10162_v34 = vld [vmem:[#allocation13 + $0x1370] sm:$0xff]  ;;  %v10161_v35 = vld [vmem:[#allocation13 + $0x1368] sm:$0xff] }
0x1911   : > { %20600 = vmatprep.subr.mxu0 %v22578_v3  ;;  %20657 = vmatprep.subr.mxu1 %v22578_v3 }
0x1912   : > { %20601 = vmatpush3.msra.mxu0 %v9522_v36  ;;  %20658 = vmatpush3.msra.mxu1 %v9831_v37  ;;  %v10160_v36 = vld [vmem:[#allocation13 + $0x1360] sm:$0xff]  ;;  %v10159_v37 = vld [vmem:[#allocation13 + $0x1358] sm:$0xff] }
0x1913   : > { %20602 = vmatprep.subr.mxu0 %v22578_v3  ;;  %20659 = vmatprep.subr.mxu1 %v22578_v3 }
0x1914   : > { %20603 = vmatpush3.msra.mxu0 %v9521_v38  ;;  %20660 = vmatpush3.msra.mxu1 %v9830_v39  ;;  %v10158_v38 = vld [vmem:[#allocation13 + $0x1350] sm:$0xff]  ;;  %v10157_v39 = vld [vmem:[#allocation13 + $0x1348] sm:$0xff] }
0x1915   : > { %20604 = vmatprep.subr.mxu0 %v22578_v3  ;;  %20661 = vmatprep.subr.mxu1 %v22578_v3 }
0x1916   : > { %20605 = vmatpush3.msra.mxu0 %v9520_v40  ;;  %20662 = vmatpush3.msra.mxu1 %v9829_v41  ;;  %v10156_v40 = vld [vmem:[#allocation13 + $0x1340] sm:$0xff]  ;;  %v10179_v41 = vld [vmem:[#allocation13 + $0x13f8] sm:$0xff] }
0x1917   : > { %20606 = vmatprep.subr.mxu0 %v22578_v3  ;;  %20663 = vmatprep.subr.mxu1 %v22578_v3 }
0x1918   : > { %20607 = vmatpush3.msra.mxu0 %v9519_v42  ;;  %20664 = vmatpush3.msra.mxu1 %v9828_v43  ;;  %v10178_v42 = vld [vmem:[#allocation13 + $0x13f0] sm:$0xff]  ;;  %v10177_v43 = vld [vmem:[#allocation13 + $0x13e8] sm:$0xff] }
0x1919   : > { %20608 = vmatprep.subr.mxu0 %v22578_v3  ;;  %20665 = vmatprep.subr.mxu1 %v22578_v3 }
0x191a   : > { %20609 = vmatpush3.msra.mxu0 %v9518_v44  ;;  %20610 = vmatprep.mubr.msk.f32.mxu0 %vm22579_vm1, %v22578_v3  ;;  %v10176_v44 = vld [vmem:[#allocation13 + $0x13e0] sm:$0xff] }
0x191b   : > { %20666 = vmatpush3.msra.mxu1 %v9827_v45  ;;  %20667 = vmatprep.mubr.msk.f32.mxu1 %vm22579_vm1, %v22578_v3  ;;  %v10175_v45 = vld [vmem:[#allocation13 + $0x13d8] sm:$0xff] }
0x191c   : > { %20611 = vmatmul.mubr.msk.f32.vlgmr.msra.gmra.mxu0 %vm545_vm0, %v23989_v25  ;;  %20632 = vmatprep.subr.mxu0 %v22578_v3 }
0x191d   : > { %20668 = vmatmul.mubr.msk.f32.vlgmr.msra.gmra.mxu1 %vm545_vm0, %v23989_v25  ;;  %20689 = vmatprep.subr.mxu1 %v22578_v3 }
0x191e   : > { %20633 = vmatpush3.msra.mxu0 %v9541_v46  ;;  %20690 = vmatpush3.msra.mxu1 %v9850_v47  ;;  %v10174_v46 = vld [vmem:[#allocation13 + $0x13d0] sm:$0xff]  ;;  %v10173_v47 = vld [vmem:[#allocation13 + $0x13c8] sm:$0xff] }
0x191f   : > { %20634 = vmatprep.subr.mxu0 %v22578_v3  ;;  %20691 = vmatprep.subr.mxu1 %v22578_v3 }
0x1920   : > { %20635 = vmatpush3.msra.mxu0 %v9540_v48  ;;  %20692 = vmatpush3.msra.mxu1 %v9849_v49  ;;  %v10172_v48 = vld [vmem:[#allocation13 + $0x13c0] sm:$0xff] }
0x1921   : > { %20636 = vmatprep.subr.mxu0 %v22578_v3  ;;  %20693 = vmatprep.subr.mxu1 %v22578_v3 }
0x1922   : > { %20637 = vmatpush3.msra.mxu0 %v9539_v50  ;;  %20694 = vmatpush3.msra.mxu1 %v9848_v51 }
0x1923   : > { %20638 = vmatprep.subr.mxu0 %v22578_v3  ;;  %20695 = vmatprep.subr.mxu1 %v22578_v3 }
0x1924   : > { %20639 = vmatpush3.msra.mxu0 %v9538_v52  ;;  %20696 = vmatpush3.msra.mxu1 %v9847_v53 }
0x1925   : > { %20640 = vmatprep.subr.mxu0 %v22578_v3  ;;  %20697 = vmatprep.subr.mxu1 %v22578_v3 }
0x1926   : > { %20641 = vmatpush3.msra.mxu0 %v9537_v54  ;;  %20698 = vmatpush3.msra.mxu1 %v9846_v55  ;;  %v24215_v55 = vld [vmem:[#allocation5] sm:$0xff] }
0x1927   : > { %20642 = vmatprep.subr.mxu0 %v22578_v3  ;;  %20699 = vmatprep.subr.mxu1 %v22578_v3 }
0x1928   : > { %20643 = vmatpush3.msra.mxu0 %v9536_v26  ;;  %20700 = vmatpush3.msra.mxu1 %v9845_v23  ;;  %v24218_v23 = vld [vmem:[#allocation7] sm:$0xff] }
0x1929   : > { %20644 = vmatprep.subr.mxu0 %v22578_v3  ;;  %20701 = vmatprep.subr.mxu1 %v22578_v3 }
0x192a   : > { %20645 = vmatpush3.msra.mxu0 %v9535_v24  ;;  %20702 = vmatpush3.msra.mxu1 %v9844_v56 }
0x192b   : > { %20646 = vmatprep.subr.mxu0 %v22578_v3  ;;  %20703 = vmatprep.subr.mxu1 %v22578_v3 }
0x192c   : > { %20647 = vmatpush3.msra.mxu0 %v9534_v57  ;;  %20648 = vmatprep.mubr.msk.f32.mxu0 %vm22579_vm1, %v22578_v3 }
0x192d   : > { %20704 = vmatpush3.msra.mxu1 %v9843_v58  ;;  %20705 = vmatprep.mubr.msk.f32.mxu1 %vm22579_vm1, %v22578_v3 }
0x192e   : > { %20649 = vmatmul.mubr.msk.f32.vlgmr.msra.gmra.mxu0 %vm545_vm0, %v23989_v25  ;;  %20670 = vmatprep.subr.mxu0 %v22578_v3 }
0x192f   : > { %20706 = vmatmul.mubr.msk.f32.vlgmr.msra.gmra.mxu1 %vm545_vm0, %v23989_v25  ;;  %20727 = vmatprep.subr.mxu1 %v22578_v3 }
0x1930   : > { %20671 = vmatpush3.msra.mxu0 %v9842_v59  ;;  %20728 = vmatpush3.msra.mxu1 %v10155_v63 }
0x1931   : > { %20672 = vmatprep.subr.mxu0 %v22578_v3  ;;  %20729 = vmatprep.subr.mxu1 %v22578_v3 }
0x1932   : > { %20673 = vmatpush3.msra.mxu0 %v9841_v0  ;;  %20730 = vmatpush3.msra.mxu1 %v10154_v1 }
0x1933   : > { %20674 = vmatprep.subr.mxu0 %v22578_v3  ;;  %20731 = vmatprep.subr.mxu1 %v22578_v3 }
0x1934   : > { %20675 = vmatpush3.msra.mxu0 %v9840_v2  ;;  %20732 = vmatpush3.msra.mxu1 %v10153_v4 }
0x1935   : > { %20676 = vmatprep.subr.mxu0 %v22578_v3  ;;  %20733 = vmatprep.subr.mxu1 %v22578_v3 }
0x1936   : > { %20677 = vmatpush3.msra.mxu0 %v9839_v5  ;;  %20734 = vmatpush3.msra.mxu1 %v10152_v6 }
0x1937   : > { %20678 = vmatprep.subr.mxu0 %v22578_v3  ;;  %20735 = vmatprep.subr.mxu1 %v22578_v3 }
0x1938   : > { %20679 = vmatpush3.msra.mxu0 %v9838_v7  ;;  %20736 = vmatpush3.msra.mxu1 %v10151_v8 }
0x1939   : > { %20680 = vmatprep.subr.mxu0 %v22578_v3  ;;  %20737 = vmatprep.subr.mxu1 %v22578_v3 }
0x193a   : > { %20681 = vmatpush3.msra.mxu0 %v9837_v9  ;;  %20738 = vmatpush3.msra.mxu1 %v10150_v10 }
0x193b   : > { %20682 = vmatprep.subr.mxu0 %v22578_v3  ;;  %20739 = vmatprep.subr.mxu1 %v22578_v3 }
0x193c   : > { %20683 = vmatpush3.msra.mxu0 %v9836_v11  ;;  %20740 = vmatpush3.msra.mxu1 %v10149_v12 }
0x193d   : > { %20684 = vmatprep.subr.mxu0 %v22578_v3  ;;  %20741 = vmatprep.subr.mxu1 %v22578_v3 }
0x193e   : > { %20685 = vmatpush3.msra.mxu0 %v9835_v13  ;;  %20686 = vmatprep.mubr.msk.f32.mxu0 %vm22579_vm1, %v22578_v3 }
0x193f   : > { %20742 = vmatpush3.msra.mxu1 %v10148_v14  ;;  %20743 = vmatprep.mubr.msk.f32.mxu1 %vm22579_vm1, %v22578_v3 }
0x1940   : > { %20687 = vmatmul.mubr.msk.f32.vlgmr.msra.gmra.mxu0 %vm545_vm0, %v23989_v25  ;;  %20708 = vmatprep.subr.mxu0 %v22578_v3 }
0x1941   : > { %20744 = vmatmul.mubr.msk.f32.vlgmr.msra.gmra.mxu1 %vm545_vm0, %v23989_v25  ;;  %20765 = vmatprep.subr.mxu1 %v22578_v3 }
0x1942   : > { %20709 = vmatpush3.msra.mxu0 %v9858_v15  ;;  %20766 = vmatpush3.msra.mxu1 %v10171_v16 }
0x1943   : > { %20710 = vmatprep.subr.mxu0 %v22578_v3  ;;  %20767 = vmatprep.subr.mxu1 %v22578_v3 }
0x1944   : > { %20711 = vmatpush3.msra.mxu0 %v9857_v17  ;;  %20768 = vmatpush3.msra.mxu1 %v10170_v18 }
0x1945   : > { %20712 = vmatprep.subr.mxu0 %v22578_v3  ;;  %20769 = vmatprep.subr.mxu1 %v22578_v3 }
0x1946   : > { %20713 = vmatpush3.msra.mxu0 %v9856_v60  ;;  %20770 = vmatpush3.msra.mxu1 %v10169_v61 }
0x1947   : > { %20714 = vmatprep.subr.mxu0 %v22578_v3  ;;  %20771 = vmatprep.subr.mxu1 %v22578_v3 }
0x1948   : > { %20715 = vmatpush3.msra.mxu0 %v9855_v19  ;;  %20772 = vmatpush3.msra.mxu1 %v10168_v20 }
0x1949   : > { %20716 = vmatprep.subr.mxu0 %v22578_v3  ;;  %20773 = vmatprep.subr.mxu1 %v22578_v3 }
0x194a   : > { %20717 = vmatpush3.msra.mxu0 %v9854_v21  ;;  %20774 = vmatpush3.msra.mxu1 %v10167_v22 }
0x194b   : > { %20718 = vmatprep.subr.mxu0 %v22578_v3  ;;  %20775 = vmatprep.subr.mxu1 %v22578_v3 }
0x194c   : > { %20719 = vmatpush3.msra.mxu0 %v9853_v27  ;;  %20776 = vmatpush3.msra.mxu1 %v10166_v28 }
0x194d   : > { %20720 = vmatprep.subr.mxu0 %v22578_v3  ;;  %20777 = vmatprep.subr.mxu1 %v22578_v3 }
0x194e   : > { %20721 = vmatpush3.msra.mxu0 %v9852_v29  ;;  %20778 = vmatpush3.msra.mxu1 %v10165_v30 }
0x194f   : > { %20722 = vmatprep.subr.mxu0 %v22578_v3  ;;  %20779 = vmatprep.subr.mxu1 %v22578_v3 }
0x1950   : > { %20723 = vmatpush3.msra.mxu0 %v9851_v31  ;;  %20724 = vmatprep.mubr.msk.f32.mxu0 %vm22579_vm1, %v22578_v3 }
0x1951   : > { %20780 = vmatpush3.msra.mxu1 %v10164_v32  ;;  %20781 = vmatprep.mubr.msk.f32.mxu1 %vm22579_vm1, %v22578_v3 }
0x1952   : > { %20725 = vmatmul.mubr.msk.f32.vlgmr.msra.gmra.mxu0 %vm545_vm0, %v23989_v25  ;;  %20746 = vmatprep.subr.mxu0 %v22578_v3 }
0x1953   : > { %20782 = vmatmul.mubr.msk.f32.vlgmr.msra.gmra.mxu1 %vm545_vm0, %v23989_v25  ;;  %20747 = vmatpush3.msra.mxu0 %v10163_v33 }
0x1954   : > { %20748 = vmatprep.subr.mxu0 %v22578_v3  ;;  %20762 = vmatprep.mubr.msk.f32.mxu0 %vm22579_vm1, %v22578_v3 }
0x1955   : > { %20749 = vmatpush3.msra.mxu0 %v10162_v34  ;;  %20803 = vmatprep.subr.mxu1 %v22578_v3 }
0x1956   : > { %20750 = vmatprep.subr.mxu0 %v22578_v3  ;;  %20805 = vmatprep.mubr.msk.f32.mxu1 %vm22579_vm1, %v22578_v3 }
0x1957   : > { %20751 = vmatpush3.msra.mxu0 %v10161_v35 }
0x1958   : > { %20752 = vmatprep.subr.mxu0 %v22578_v3 }
0x1959   : > { %20753 = vmatpush3.msra.mxu0 %v10160_v36 }
0x195a   : > { %20754 = vmatprep.subr.mxu0 %v22578_v3 }
0x195b   : > { %20755 = vmatpush3.msra.mxu0 %v10159_v37 }
0x195c   : > { %20756 = vmatprep.subr.mxu0 %v22578_v3 }
0x195d   : > { %20757 = vmatpush3.msra.mxu0 %v10158_v38 }
0x195e   : > { %20758 = vmatprep.subr.mxu0 %v22578_v3 }
0x195f   : > { %20759 = vmatpush3.msra.mxu0 %v10157_v39 }
0x1960   : > { %20760 = vmatprep.subr.mxu0 %v22578_v3 }
0x1961   : > { %20761 = vmatpush3.msra.mxu0 %v10156_v40 }
0x1962   : > { %20763 = vmatmul.mubr.msk.f32.vlgmr.msra.gmra.mxu0 %vm545_vm0, %v23989_v25  ;;  %20784 = vmatprep.subr.mxu0 %v22578_v3 }
0x1963   : > { %20785 = vmatpush3.msra.mxu0 %v10179_v41  ;;  %20800 = vmatprep.mubr.msk.f32.mxu0 %vm22579_vm1, %v22578_v3 }
0x1964   : > { %20786 = vmatprep.subr.mxu0 %v22578_v3 }
0x1965   : > { %20787 = vmatpush3.msra.mxu0 %v10178_v42 }
0x1966   : > { %20788 = vmatprep.subr.mxu0 %v22578_v3 }
0x1967   : > { %20789 = vmatpush3.msra.mxu0 %v10177_v43 }
0x1968   : > { %20790 = vmatprep.subr.mxu0 %v22578_v3 }
0x1969   : > { %20791 = vmatpush3.msra.mxu0 %v10176_v44 }
0x196a   : > { %20792 = vmatprep.subr.mxu0 %v22578_v3 }
0x196b   : > { %20793 = vmatpush3.msra.mxu0 %v10175_v45 }
0x196c   : > { %20794 = vmatprep.subr.mxu0 %v22578_v3 }
0x196d   : > { %20795 = vmatpush3.msra.mxu0 %v10174_v46 }
0x196e   : > { %20796 = vmatprep.subr.mxu0 %v22578_v3 }
0x196f   : > { %20797 = vmatpush3.msra.mxu0 %v10173_v47 }
0x1970   : > { %20798 = vmatprep.subr.mxu0 %v22578_v3 }
0x1971   : > { %20799 = vmatpush3.msra.mxu0 %v10172_v48 }
0x1972   : > { %20801 = vmatmul.mubr.msk.f32.vlgmr.msra.gmra.mxu0 %vm545_vm0, %v23989_v25  ;;  %20823 = vmatprep.subr.mxu0 %v22578_v3 }
0x1973   : > { %20825 = vmatprep.mubr.msk.f32.mxu0 %vm22579_vm1, %v22578_v3 }
0x1983   : > { %v8970_v49 = vpop.f32.mrf.mxu0  ;;  %v9110_v50 = vpop.f32.mrf.mxu1 }
0x1984   : > { %v9184_v26 = vmul.f32 %v24215_v55, %v8970_v49  ;;  %v9186_v63 = vmul.f32 %v24215_v55, %v9110_v50 }
0x1985   : > { %v20441_v51 = vpop.f32.mrf.mxu0  ;;  %v20479_v52 = vpop.f32.mrf.mxu1 }
0x1994   : > { %v9040_v53 = vpop.f32.mrf.mxu0 }
0x1995   : > { %v9287_v54 = vpop.f32.mrf.mxu1  ;;  %v9185_v6 = vmul.f32 %v24215_v55, %v9040_v53 }
0x1996   : > { %v9501_v24 = vmul.f32 %v24218_v23, %v9287_v54  ;;  %v20460_v25 = vpop.f32.mrf.mxu0 }
0x1997   : > { %v20517_v56 = vpop.f32.mrf.mxu1 }
0x1998   : > { %v9505_v57 = vadd.f32 %v9501_v24, %v9184_v26  ;;  %v22181_v26 = vld [vmem:[#allocation8] sm:$0xff] }
0x19a6   : > { %v9180_v58 = vpop.f32.mrf.mxu0 }
0x19a7   : > { %v9427_v59 = vpop.f32.mrf.mxu1  ;;  %v9187_v13 = vmul.f32 %v24215_v55, %v9180_v58 }
0x19a8   : > { %v9503_v0 = vmul.f32 %v24218_v23, %v9427_v59  ;;  %v20498_v1 = vpop.f32.mrf.mxu0 }
0x19a9   : > { %v20555_v2 = vpop.f32.mrf.mxu1 }
0x19aa   : > { %v9507_v4 = vadd.f32 %v9503_v0, %v9186_v63 }
0x19b8   : > { %v9357_v5 = vpop.f32.mrf.mxu0 }
0x19b9   : > { %v9502_v7 = vmul.f32 %v24218_v23, %v9357_v5  ;;  %v9608_v8 = vpop.f32.mrf.mxu1 }
0x19ba   : > { %v20536_v9 = vpop.f32.mrf.mxu0  ;;  %v9822_v19 = vmul.f32 %v24215_v55, %v9608_v8 }
0x19bb   : > { %v9506_v10 = vadd.f32 %v9502_v7, %v9185_v6  ;;  %v20593_v11 = vpop.f32.mrf.mxu1 }
0x19ca   : > { %v9497_v12 = vpop.f32.mrf.mxu0 }
0x19cb   : > { %v9504_v14 = vmul.f32 %v24218_v23, %v9497_v12  ;;  %v9748_v15 = vpop.f32.mrf.mxu1 }
0x19cc   : > { %v20574_v16 = vpop.f32.mrf.mxu0  ;;  %v9824_v40 = vmul.f32 %v24215_v55, %v9748_v15 }
0x19cd   : > { %v9508_v17 = vadd.f32 %v9504_v14, %v9187_v13  ;;  %v20631_v18 = vpop.f32.mrf.mxu1 }
0x19dc   : > { %v9678_v60 = vpop.f32.mrf.mxu0 }
0x19dd   : > { %v9925_v61 = vpop.f32.mrf.mxu1  ;;  %v9823_v33 = vmul.f32 %v24215_v55, %v9678_v60 }
0x19de   : > { %v10139_v20 = vmul.f32 %v24218_v23, %v9925_v61  ;;  %v20612_v21 = vpop.f32.mrf.mxu0 }
0x19df   : > { %v20669_v22 = vpop.f32.mrf.mxu1 }
0x19e0   : > { %v10143_v27 = vadd.f32 %v10139_v20, %v9822_v19 }
0x19e2   : > { %20804 = vmatpush3.xpose.msk.msra.mxu1 %vm2152_vm2, %v10143_v27 }
0x19e3   : > { %20808 = vmatprep.subr.mxu1 %v22578_v3 }
0x19e5   : > { %20806 = vmatmul.mubr.msk.f32.vlgmr.msra.gmra.mxu1 %vm2152_vm2, %v9505_v57 }
0x19e6   : > { %20810 = vmatprep.mubr.msk.f32.mxu1 %vm22579_vm1, %v22578_v3 }
0x19ee   : > { %v9818_v28 = vpop.f32.mrf.mxu0 }
0x19ef   : > { %v10065_v29 = vpop.f32.mrf.mxu1  ;;  %v9825_v43 = vmul.f32 %v24215_v55, %v9818_v28 }
0x19f0   : > { %v20650_v30 = vpop.f32.mrf.mxu0  ;;  %v10141_v37 = vmul.f32 %v24218_v23, %v10065_v29 }
0x19f1   : > { %v20707_v31 = vpop.f32.mrf.mxu1 }
0x19f2   : > { %v10145_v41 = vadd.f32 %v10141_v37, %v9824_v40 }
0x1a00   : > { %v9995_v32 = vpop.f32.mrf.mxu0 }
0x1a01   : > { %v10140_v34 = vmul.f32 %v24218_v23, %v9995_v32  ;;  %v10246_v35 = vpop.f32.mrf.mxu1 }
0x1a02   : > { %20824 = vmatpush3.msra.mxu0 %v10246_v35  ;;  %v20688_v36 = vpop.f32.mrf.mxu0 }
0x1a03   : > { %v10144_v38 = vadd.f32 %v10140_v34, %v9823_v33  ;;  %v20745_v39 = vpop.f32.mrf.mxu1  ;;  %20833 = vmatprep.subr.mxu0 %v22578_v3 }
0x1a05   : > { %20809 = vmatpush3.xpose.msk.msra.mxu1 %vm2152_vm2, %v10144_v38 }
0x1a06   : > { %20813 = vmatprep.subr.mxu1 %v22578_v3 }
0x1a08   : > { %20811 = vmatmul.mubr.msk.f32.vlgmr.msra.gmra.mxu1 %vm2152_vm2, %v9506_v10 }
0x1a09   : > { %20814 = vmatpush3.xpose.msk.msra.mxu1 %vm2152_vm2, %v10145_v41  ;;  %20815 = vmatprep.mubr.msk.f32.mxu1 %vm22579_vm1, %v22578_v3 }
0x1a0a   : > { %20818 = vmatprep.subr.mxu1 %v22578_v3 }
0x1a0c   : > { %20816 = vmatmul.mubr.msk.f32.vlgmr.msra.gmra.mxu1 %vm2152_vm2, %v9507_v4 }
0x1a0d   : > { %20820 = vmatprep.mubr.msk.f32.mxu1 %vm22579_vm1, %v22578_v3 }
0x1a12   : > { %v10135_v42 = vpop.f32.mrf.mxu0 }
0x1a13   : > { %v10142_v44 = vmul.f32 %v24218_v23, %v10135_v42  ;;  %v24251_v45 = vpop.f32.mrf.mxu1  ;;  %v11110_v42 = vld [vmem:[#allocation14 + $0xc8] sm:$0xff] }
0x1a14   : > { %v20726_v46 = vpop.f32.mrf.mxu0 }
0x1a15   : > { %v10146_v47 = vadd.f32 %v10142_v44, %v9825_v43  ;;  %v20783_v48 = vpop.f32.mrf.mxu1  ;;  %v11112_v46 = vld [vmem:[#allocation14 + $0xd8] sm:$0xff] }
0x1a16   : > { %v11114_v48 = vld [vmem:[#allocation14 + $0xe8] sm:$0xff] }
0x1a17   : > { %20819 = vmatpush3.xpose.msk.msra.mxu1 %vm2152_vm2, %v10146_v47  ;;  %v11111_v47 = vld [vmem:[#allocation14 + $0xd0] sm:$0xff] }
0x1a18   : > { %20828 = vmatprep.subr.mxu1 %v22578_v3 }
0x1a1a   : > { %20821 = vmatmul.mubr.msk.f32.vlgmr.msra.gmra.mxu1 %vm2152_vm2, %v9508_v17 }
0x1a1b   : > { %20830 = vmatprep.mubr.msk.f32.mxu1 %vm22579_vm1, %v22578_v3 }
0x1a22   : > { %v10316_v49 = vpop.f32.mrf.mxu0 }
0x1a23   : > { %20829 = vmatpush3.msra.mxu1 %v10316_v49 }
0x1a24   : > { %v20764_v50 = vpop.f32.mrf.mxu0  ;;  %20838 = vmatprep.subr.mxu1 %v22578_v3 }
0x1a25   : > { %v11113_v50 = vld [vmem:[#allocation14 + $0xe0] sm:$0xff] }
0x1a32   : > { %v24259_v51 = vpop.f32.mrf.mxu0 }
0x1a34   : > { %v20802_v52 = vpop.f32.mrf.mxu0 }
0x1a35   : > { %v11116_v52 = vld [vmem:[#allocation14 + $0xf8] sm:$0xff] }
0x1aa5   : > { %v10532_v53 = vpop.f32.mrf.mxu1 }
0x1aa6   : > { %v10764_v54 = vmul.f32 0.25, %v10532_v53 }
0x1aa7   : > { %v20807_v55 = vpop.f32.mrf.mxu1 }
0x1aa8   : > { %v10768_v23 = vadd.f32 %v22181_v26, %v10764_v54  ;;  %v11115_v54 = vld [vmem:[#allocation14 + $0xf0] sm:$0xff] }
0x1aaa   : > { %v10772_v24 = vsel %vm2465_vm3, %v10768_v23, -inf }
0x1aab   : > { %10773 = vmax.xlane.f32.xlu1 %v10772_v24 }
0x1ac8   : > { %v10608_v25 = vpop.f32.mrf.mxu1 }
0x1ac9   : > { %v10765_v56 = vmul.f32 0.25, %v10608_v25 }
0x1aca   : > { %v20812_v57 = vpop.f32.mrf.mxu1 }
0x1acb   : > { %v10769_v58 = vadd.f32 %v22181_v26, %v10765_v56 }
0x1acc   : > { %v10684_v59 = vpop.f32.mrf.mxu1 }
0x1acd   : > { %v10766_v63 = vmul.f32 0.25, %v10684_v59  ;;  %v10775_v0 = vsel %vm2465_vm3, %v10769_v58, -inf }
0x1ace   : > { %10776 = vmax.xlane.f32.xlu0 %v10775_v0  ;;  %v20817_v1 = vpop.f32.mrf.mxu1 }
0x1acf   : > { %v10770_v2 = vadd.f32 %v22181_v26, %v10766_v63 }
0x1ad1   : > { %v10778_v4 = vsel %vm2465_vm3, %v10770_v2, -inf }
0x1ad2   : > { %10779 = vmax.xlane.f32.xlu1 %v10778_v4 }
0x1ada   : > { %v10760_v5 = vpop.f32.mrf.mxu1 }
0x1adb   : > { %v10767_v6 = vmul.f32 0.25, %v10760_v5 }
0x1adc   : > { %v20822_v7 = vpop.f32.mrf.mxu1 }
0x1add   : > { %v10771_v8 = vadd.f32 %v22181_v26, %v10767_v6 }
0x1adf   : > { %v10781_v9 = vsel %vm2465_vm3, %v10771_v8, -inf }
0x1ae0   : > { %10782 = vmax.xlane.f32.xlu0 %v10781_v9 }
0x1b34   : > { %v10774_v10 = vpop.xlane.xlu1 %10773 }
0x1b35   : > { %v10784_v11 = vsub.f32 %v10768_v23, %v10774_v10 }
0x1b37   : > { %v10788_v12 = vmul.f32 1.442695, %v10784_v11 }
0x1b39   : > { %22100 = vpow2.f32 %v10788_v12 }
0x1b46   : > { %v22101_v13 = vpop.eup %22100 }
0x1b47   : > { %v10796_v14 = vsel %vm2465_vm3, %v22101_v13, 0.0 }
0x1b48   : > { %10797 = vadd.xlane.f32.xlu1 %v10796_v14  ;;  %v11450_v14 = vld [vmem:[#allocation16 + $0x1f8] sm:$0xff] }
0x1b57   : > { %v10777_v15 = vpop.xlane.xlu0 %10776 }
0x1b58   : > { %v10785_v16 = vsub.f32 %v10769_v58, %v10777_v15  ;;  %v11449_v15 = vld [vmem:[#allocation16 + $0x1f0] sm:$0xff] }
0x1b5a   : > { %v10790_v17 = vmul.f32 1.442695, %v10785_v16  ;;  %v11448_v16 = vld [vmem:[#allocation16 + $0x1e8] sm:$0xff] }
0x1b5b   : > { %v10780_v18 = vpop.xlane.xlu1 %10779 }
0x1b5c   : > { %22102 = vpow2.f32 %v10790_v17  ;;  %v10786_v60 = vsub.f32 %v10770_v2, %v10780_v18  ;;  %v11447_v17 = vld [vmem:[#allocation16 + $0x1e0] sm:$0xff]  ;;  %v11446_v18 = vld [vmem:[#allocation16 + $0x1d8] sm:$0xff] }
0x1b5e   : > { %v10792_v61 = vmul.f32 1.442695, %v10786_v60  ;;  %v11445_v60 = vld [vmem:[#allocation16 + $0x1d0] sm:$0xff] }
0x1b60   : > { %22104 = vpow2.f32 %v10792_v61  ;;  %v11443_v61 = vld [vmem:[#allocation16 + $0x1c0] sm:$0xff] }
0x1b69   : > { %v22103_v19 = vpop.eup %22102  ;;  %v10783_v20 = vpop.xlane.xlu0 %10782 }
0x1b6a   : > { %v10787_v21 = vsub.f32 %v10771_v8, %v10783_v20  ;;  %v10799_v22 = vsel %vm2465_vm3, %v22103_v19, 0.0  ;;  %v11441_v20 = vld [vmem:[#allocation16 + $0x1b0] sm:$0xff] }
0x1b6b   : > { %10800 = vadd.xlane.f32.xlu0 %v10799_v22  ;;  %v11439_v22 = vld [vmem:[#allocation16 + $0x1a0] sm:$0xff] }
0x1b6c   : > { %v10794_v27 = vmul.f32 1.442695, %v10787_v21  ;;  %v11440_v21 = vld [vmem:[#allocation16 + $0x1a8] sm:$0xff] }
0x1b6d   : > { %v22105_v28 = vpop.eup %22104 }
0x1b6e   : > { %22106 = vpow2.f32 %v10794_v27  ;;  %v10802_v29 = vsel %vm2465_vm3, %v22105_v28, 0.0  ;;  %v11438_v27 = vld [vmem:[#allocation16 + $0x198] sm:$0xff] }
0x1b6f   : > { %10803 = vadd.xlane.f32.xlu1 %v10802_v29  ;;  %v11436_v29 = vld [vmem:[#allocation16 + $0x188] sm:$0xff] }
0x1b7b   : > { %v22107_v30 = vpop.eup %22106 }
0x1b7c   : > { %v10805_v31 = vsel %vm2465_vm3, %v22107_v30, 0.0 }
0x1b7d   : > { %10806 = vadd.xlane.f32.xlu0 %v10805_v31 }
0x1bd1   : > { %v10798_v32 = vpop.xlane.xlu1 %10797 }
0x1bd2   : > { %22108 = vrcp.f32 %v10798_v32 }
0x1bdf   : > { %v22109_v33 = vpop.eup %22108 }
0x1be0   : > { %v10809_v34 = vmul.f32 %v22109_v33, %v22101_v13 }
0x1be2   : > { %20826 = vmatmul.mubr.msk.f32.vlgmr.msra.gmra.mxu0 %vm2465_vm3, %v10809_v34 }
0x1be3   : > { %20834 = vmatpush3.msra.mxu0 %v24251_v45  ;;  %20835 = vmatprep.mubr.msk.f32.mxu0 %vm22579_vm1, %v22578_v3  ;;  %v11109_v45 = vld [vmem:[#allocation14 + $0xc0] sm:$0xff] }
0x1be4   : > { %20843 = vmatprep.subr.mxu0 %v22578_v3 }
0x1bf4   : > { %v10801_v35 = vpop.xlane.xlu0 %10800 }
0x1bf5   : > { %22110 = vrcp.f32 %v10801_v35  ;;  %v17539_v35 = vld [vmem:[#allocation11 + $0x3] ss:$0 sm:$0xff] }
0x1bf8   : > { %v10804_v36 = vpop.xlane.xlu1 %10803 }
0x1bf9   : > { %22112 = vrcp.f32 %v10804_v36 }
0x1c02   : > { %v22111_v37 = vpop.eup %22110 }
0x1c03   : > { %v10811_v38 = vmul.f32 %v22111_v37, %v22103_v19  ;;  %v11442_v19 = vld [vmem:[#allocation16 + $0x1b8] sm:$0xff] }
0x1c05   : > { %20831 = vmatmul.mubr.msk.f32.vlgmr.msra.gmra.mxu1 %vm2465_vm3, %v10811_v38  ;;  %v11549_v38 = vld [vmem:[#allocation17 + $0x1f8] sm:$0xff] }
0x1c06   : > { %v22113_v39 = vpop.eup %22112  ;;  %v10807_v40 = vpop.xlane.xlu0 %10806  ;;  %20839 = vmatpush3.msra.mxu1 %v24259_v51  ;;  %20840 = vmatprep.mubr.msk.f32.mxu1 %vm22579_vm1, %v22578_v3 }
0x1c07   : > { %v10813_v41 = vmul.f32 %v22113_v39, %v22105_v28  ;;  %22114 = vrcp.f32 %v10807_v40  ;;  %20850 = vmatprep.subr.mxu1 %v22578_v3  ;;  %v11437_v28 = vld [vmem:[#allocation16 + $0x190] sm:$0xff]  ;;  %v11547_v40 = vld [vmem:[#allocation17 + $0x1e8] sm:$0xff] }
0x1c08   : > { %v11548_v39 = vld [vmem:[#allocation17 + $0x1f0] sm:$0xff] }
0x1c09   : > { %20836 = vmatmul.mubr.msk.f32.vlgmr.msra.gmra.mxu0 %vm2465_vm3, %v10813_v41  ;;  %v11546_v41 = vld [vmem:[#allocation17 + $0x1e0] sm:$0xff] }
0x1c0a   : > { %20844 = vmatpush3.msra.mxu0 %v11110_v42  ;;  %20847 = vmatprep.mubr.msk.f32.mxu0 %vm22579_vm1, %v22578_v3  ;;  %v11545_v42 = vld [vmem:[#allocation17 + $0x1d8] sm:$0xff] }
0x1c0b   : > { %20845 = vmatprep.subr.mxu0 %v22578_v3 }
0x1c0c   : > { %20846 = vmatpush3.msra.mxu0 %v11109_v45  ;;  %v11542_v45 = vld [vmem:[#allocation17 + $0x1c0] sm:$0xff] }
0x1c0d   : > { %20857 = vmatprep.subr.mxu0 %v22578_v3 }
0x1c14   : > { %v22115_v43 = vpop.eup %22114 }
0x1c15   : > { %v10815_v44 = vmul.f32 %v22115_v43, %v22107_v30  ;;  %v11435_v30 = vld [vmem:[#allocation16 + $0x180] sm:$0xff]  ;;  %v11544_v43 = vld [vmem:[#allocation17 + $0x1d0] sm:$0xff] }
0x1c17   : > { %20841 = vmatmul.mubr.msk.f32.vlgmr.msra.gmra.mxu1 %vm2465_vm3, %v10815_v44  ;;  %v11543_v44 = vld [vmem:[#allocation17 + $0x1c8] sm:$0xff] }
0x1c18   : > { %20854 = vmatprep.mubr.msk.f32.mxu1 %vm22579_vm1, %v22578_v3  ;;  %20851 = vmatpush3.msra.mxu1 %v11112_v46  ;;  %v11541_v46 = vld [vmem:[#allocation17 + $0x1b8] sm:$0xff] }
0x1c19   : > { %20852 = vmatprep.subr.mxu1 %v22578_v3 }
0x1c1a   : > { %20853 = vmatpush3.msra.mxu1 %v11111_v47  ;;  %v11540_v47 = vld [vmem:[#allocation17 + $0x1b0] sm:$0xff] }
0x1c1b   : > { %20864 = vmatprep.subr.mxu1 %v22578_v3 }
0x1ca2   : > { %v10885_v49 = vpop.f32.mrf.mxu0 }
0x1ca3   : > { %20848 = vmatmul.mubr.msk.f32.vlgmr.msra.gmra.mxu0 %vm2152_vm2, %v10885_v49  ;;  %v11538_v49 = vld [vmem:[#allocation17 + $0x1a0] sm:$0xff] }
0x1ca4   : > { %v20827_v51 = vpop.f32.mrf.mxu0  ;;  %20858 = vmatpush3.msra.mxu0 %v11114_v48  ;;  %20861 = vmatprep.mubr.msk.f32.mxu0 %vm22579_vm1, %v22578_v3  ;;  %v11539_v48 = vld [vmem:[#allocation17 + $0x1a8] sm:$0xff] }
0x1ca5   : > { %20859 = vmatprep.subr.mxu0 %v22578_v3  ;;  %v11536_v51 = vld [vmem:[#allocation17 + $0x190] sm:$0xff] }
0x1ca6   : > { %20860 = vmatpush3.msra.mxu0 %v11113_v50  ;;  %v11537_v50 = vld [vmem:[#allocation17 + $0x198] sm:$0xff] }
0x1ca7   : > { %11470 = vmatprep.subr.mxu0 %v11450_v14  ;;  %v11641_v14 = vld [vmem:[#allocation13 + $0x1410] sm:$0xff] }
0x1cc5   : > { %v10958_v53 = vpop.f32.mrf.mxu1 }
0x1cc6   : > { %20855 = vmatmul.mubr.msk.f32.vlgmr.msra.gmra.mxu1 %vm2152_vm2, %v10958_v53  ;;  %v11534_v53 = vld [vmem:[#allocation17 + $0x180] sm:$0xff] }
0x1cc7   : > { %v20832_v55 = vpop.f32.mrf.mxu1  ;;  %20865 = vmatpush3.msra.mxu1 %v11116_v52  ;;  %20868 = vmatprep.mubr.msk.f32.mxu1 %vm22579_vm1, %v22578_v3  ;;  %v11535_v52 = vld [vmem:[#allocation17 + $0x188] sm:$0xff] }
0x1cc8   : > { %20866 = vmatprep.subr.mxu1 %v22578_v3 }
0x1cc9   : > { %v11031_v26 = vpop.f32.mrf.mxu0  ;;  %20867 = vmatpush3.msra.mxu1 %v11115_v54 }
0x1cca   : > { %20862 = vmatmul.mubr.msk.f32.vlgmr.msra.gmra.mxu0 %vm2152_vm2, %v11031_v26  ;;  %20871 = vmatprep.subr.mxu1 %v22578_v3 }
0x1ccb   : > { %v20837_v23 = vpop.f32.mrf.mxu0  ;;  %11518 = vmatprep.mubr.f32.mxu0 %v22578_v3  ;;  %11471 = vmatpush1.msra.mxu0 %v11449_v15  ;;  %v11657_v15 = vld [vmem:[#allocation13 + $0x1490] sm:$0xff] }
0x1ccc   : > { %11472 = vmatprep.subr.mxu0 %v11448_v16  ;;  %v11640_v16 = vld [vmem:[#allocation13 + $0x1408] sm:$0xff] }
0x1ccd   : > { %11473 = vmatpush1.msra.mxu0 %v11447_v17  ;;  %v11656_v17 = vld [vmem:[#allocation13 + $0x1488] sm:$0xff] }
0x1cce   : > { %11474 = vmatprep.subr.mxu0 %v11446_v18  ;;  %v11639_v18 = vld [vmem:[#allocation13 + $0x1400] sm:$0xff] }
0x1ccf   : > { %11475 = vmatpush1.msra.mxu0 %v11445_v60  ;;  %v11655_v60 = vld [vmem:[#allocation13 + $0x1480] sm:$0xff] }
0x1cd7   : > { %v11104_v24 = vpop.f32.mrf.mxu1 }
0x1cd8   : > { %20869 = vmatmul.mubr.msk.f32.vlgmr.msra.gmra.mxu1 %vm2152_vm2, %v11104_v24 }
0x1cd9   : > { %v20842_v25 = vpop.f32.mrf.mxu1  ;;  %20903 = vmatprep.mubr.msk.f32.mxu1 %vm22579_vm1, %v22578_v3  ;;  %20872 = vmatpush3.msra.mxu1 %v11549_v38  ;;  %v11649_v38 = vld [vmem:[#allocation13 + $0x1450] sm:$0xff] }
0x1cda   : > { %20873 = vmatprep.subr.mxu1 %v22578_v3 }
0x1cdb   : > { %20874 = vmatpush3.msra.mxu1 %v11548_v39  ;;  %v11961_v39 = vld [vmem:[#allocation13 + $0x1510] sm:$0xff] }
0x1cdc   : > { %20875 = vmatprep.subr.mxu1 %v22578_v3 }
0x1cdd   : > { %20876 = vmatpush3.msra.mxu1 %v11547_v40  ;;  %v11648_v40 = vld [vmem:[#allocation13 + $0x1448] sm:$0xff] }
0x1cde   : > { %20877 = vmatprep.subr.mxu1 %v22578_v3 }
0x1cdf   : > { %20878 = vmatpush3.msra.mxu1 %v11546_v41  ;;  %v11960_v41 = vld [vmem:[#allocation13 + $0x1508] sm:$0xff] }
0x1ce0   : > { %20879 = vmatprep.subr.mxu1 %v22578_v3 }
0x1ce1   : > { %20880 = vmatpush3.msra.mxu1 %v11545_v42  ;;  %v11647_v42 = vld [vmem:[#allocation13 + $0x1440] sm:$0xff] }
0x1ce2   : > { %20881 = vmatprep.subr.mxu1 %v22578_v3 }
0x1ce3   : > { %20882 = vmatpush3.msra.mxu1 %v11544_v43  ;;  %v11959_v43 = vld [vmem:[#allocation13 + $0x1500] sm:$0xff] }
0x1ce4   : > { %20883 = vmatprep.subr.mxu1 %v22578_v3 }
0x1ce5   : > { %20884 = vmatpush3.msra.mxu1 %v11543_v44  ;;  %v11670_v44 = vld [vmem:[#allocation13 + $0x14f8] sm:$0xff] }
0x1ce6   : > { %20885 = vmatprep.subr.mxu1 %v22578_v3 }
0x1ce7   : > { %20886 = vmatpush3.msra.mxu1 %v11542_v45  ;;  %v11982_v45 = vld [vmem:[#allocation13 + $0x15b8] sm:$0xff] }
0x1ce8   : > { %20887 = vmatprep.subr.mxu1 %v22578_v3 }
0x1ce9   : > { %20888 = vmatpush3.msra.mxu1 %v11541_v46  ;;  %v11669_v46 = vld [vmem:[#allocation13 + $0x14f0] sm:$0xff] }
0x1cea   : > { %20889 = vmatprep.subr.mxu1 %v22578_v3 }
0x1ceb   : > { %20890 = vmatpush3.msra.mxu1 %v11540_v47  ;;  %v11981_v47 = vld [vmem:[#allocation13 + $0x15b0] sm:$0xff] }
0x1cec   : > { %20891 = vmatprep.subr.mxu1 %v22578_v3 }
0x1ced   : > { %20892 = vmatpush3.msra.mxu1 %v11539_v48  ;;  %v11668_v48 = vld [vmem:[#allocation13 + $0x14e8] sm:$0xff] }
0x1cee   : > { %20893 = vmatprep.subr.mxu1 %v22578_v3 }
0x1cef   : > { %20894 = vmatpush3.msra.mxu1 %v11538_v49  ;;  %v11980_v49 = vld [vmem:[#allocation13 + $0x15a8] sm:$0xff] }
0x1cf0   : > { %20895 = vmatprep.subr.mxu1 %v22578_v3 }
0x1cf1   : > { %20896 = vmatpush3.msra.mxu1 %v11537_v50  ;;  %v11667_v50 = vld [vmem:[#allocation13 + $0x14e0] sm:$0xff] }
0x1cf2   : > { %20897 = vmatprep.subr.mxu1 %v22578_v3 }
0x1cf3   : > { %20898 = vmatpush3.msra.mxu1 %v11536_v51  ;;  %v11979_v51 = vld [vmem:[#allocation13 + $0x15a0] sm:$0xff] }
0x1cf4   : > { %20899 = vmatprep.subr.mxu1 %v22578_v3 }
0x1cf5   : > { %20900 = vmatpush3.msra.mxu1 %v11535_v52  ;;  %v11666_v52 = vld [vmem:[#allocation13 + $0x14d8] sm:$0xff] }
0x1cf6   : > { %20901 = vmatprep.subr.mxu1 %v22578_v3 }
0x1cf7   : > { %20902 = vmatpush3.msra.mxu1 %v11534_v53  ;;  %v11978_v53 = vld [vmem:[#allocation13 + $0x1598] sm:$0xff] }
0x1cf8   : > { %20944 = vmatprep.subr.mxu1 %v22578_v3 }
0x1d63   : > { %v11186_v56 = vpop.f32.mrf.mxu0 }
0x1d64   : > { %v11409_v2 = vsel %vm545_vm0, %v11186_v56, 0.0 }
0x1d65   : > { %v20849_v57 = vpop.f32.mrf.mxu0 }
0x1d86   : > { %v11259_v58 = vpop.f32.mrf.mxu1 }
0x1d87   : > { %v11410_v1 = vsel %vm545_vm0, %v11259_v58, 0.0 }
0x1d88   : > { %v20856_v59 = vpop.f32.mrf.mxu1  ;;  %v11411_v5 = vadd.f32 %v11410_v1, %v11409_v2 }
0x1d8a   : > { %v11332_v63 = vpop.f32.mrf.mxu0 }
0x1d8b   : > { %v11412_v4 = vsel %vm545_vm0, %v11332_v63, 0.0 }
0x1d8c   : > { %v20863_v0 = vpop.f32.mrf.mxu0  ;;  %v11413_v6 = vadd.f32 %v11412_v4, %v11411_v5  ;;  %v11646_v4 = vld [vmem:[#allocation13 + $0x1438] sm:$0xff] }
0x1d8d   : > { %v11662_v5 = vld [vmem:[#allocation13 + $0x14b8] sm:$0xff] }
0x1d98   : > { %v11405_v7 = vpop.f32.mrf.mxu1 }
0x1d99   : > { %v11414_v8 = vsel %vm545_vm0, %v11405_v7, 0.0  ;;  %v11661_v7 = vld [vmem:[#allocation13 + $0x14b0] sm:$0xff] }
0x1d9a   : > { %v11415_v9 = vadd.f32 %v11414_v8, %v11413_v6  ;;  %v20870_v10 = vpop.f32.mrf.mxu1  ;;  %v11645_v6 = vld [vmem:[#allocation13 + $0x1430] sm:$0xff]  ;;  %v11644_v8 = vld [vmem:[#allocation13 + $0x1428] sm:$0xff] }
0x1d9b   : > { %v11643_v10 = vld [vmem:[#allocation13 + $0x1420] sm:$0xff] }
0x1d9c   : > { %v24308_v11 = vadd.f32 %v11415_v9, %v23967_v62  ;;  %v11444_v62 = vld [vmem:[#allocation16 + $0x1c8] sm:$0xff] }
0x1d9d   : > { %11476 = vmatprep.subr.mxu0 %v11444_v62  ;;  %v11660_v9 = vld [vmem:[#allocation13 + $0x14a8] sm:$0xff] }
0x1d9e   : > { %v11419_v12 = vmul.f32 %v24308_v11, %v24308_v11  ;;  %11477 = vmatpush1.msra.mxu0 %v11443_v61 }
0x1d9f   : > { %11478 = vmatprep.subr.mxu0 %v11442_v19 }
0x1da0   : > { %v11420_v13 = vsel %vm545_vm0, %v11419_v12, 0.0  ;;  %11479 = vmatpush1.msra.mxu0 %v11441_v20  ;;  %v11642_v12 = vld [vmem:[#allocation13 + $0x1418] sm:$0xff] }
0x1da1   : > { %11421 = vadd.xlane.f32.xlu1 %v11420_v13  ;;  %11480 = vmatprep.subr.mxu0 %v11440_v21  ;;  %v11658_v13 = vld [vmem:[#allocation13 + $0x1498] sm:$0xff] }
0x1da2   : > { %11481 = vmatpush1.msra.mxu0 %v11439_v22  ;;  %v17541_v21 = vld [vmem:[#allocation10 + $0x4] ss:$0 sm:$0xff] }
0x1da3   : > { %11482 = vmatprep.subr.mxu0 %v11438_v27 }
0x1da4   : > { %11483 = vmatpush1.msra.mxu0 %v11437_v28  ;;  %v11654_v28 = vld [vmem:[#allocation13 + $0x1478] sm:$0xff] }
0x1da5   : > { %11484 = vmatprep.subr.mxu0 %v11436_v29  ;;  %v11966_v29 = vld [vmem:[#allocation13 + $0x1538] sm:$0xff] }
0x1da6   : > { %11485 = vmatpush1.msra.mxu0 %v11435_v30  ;;  %v11653_v30 = vld [vmem:[#allocation13 + $0x1470] sm:$0xff] }
0x1da7   : > { %20906 = vmatprep.subr.mxu0 %v22578_v3 }
0x1e2a   : > { %v11422_v31 = vpop.xlane.xlu1 %11421 }
0x1e2b   : > { %v11423_v32 = vmul.f32 0.015625, %v11422_v31  ;;  %v11965_v31 = vld [vmem:[#allocation13 + $0x1530] sm:$0xff] }
0x1e2d   : > { %v11424_v33 = vadd.f32 1e-06, %v11423_v32  ;;  %v11652_v32 = vld [vmem:[#allocation13 + $0x1468] sm:$0xff] }
0x1e2f   : > { %22116 = vrsqrt.f32 %v11424_v33  ;;  %v11964_v33 = vld [vmem:[#allocation13 + $0x1528] sm:$0xff] }
0x1e3c   : > { %v22117_v34 = vpop.eup %22116 }
0x1e3d   : > { %v11426_v36 = vmul.f32 %v22117_v34, %v24308_v11  ;;  %v11651_v34 = vld [vmem:[#allocation13 + $0x1460] sm:$0xff] }
0x1e3f   : > { %v11433_v37 = vmul.f32 %v17539_v35, %v11426_v36  ;;  %v11963_v35 = vld [vmem:[#allocation13 + $0x1520] sm:$0xff]  ;;  %v11650_v36 = vld [vmem:[#allocation13 + $0x1458] sm:$0xff] }
0x1e41   : > { %17540 = vmatmul.mubr.msk.f32.vlgmr.msra.gmra.mxu0 %vm545_vm0, %v11433_v37  ;;  %v11962_v37 = vld [vmem:[#allocation13 + $0x1518] sm:$0xff] }
0x1e42   : > { %20922 = vmatprep.mubr.msk.f32.mxu0 %vm22579_vm1, %v22578_v3  ;;  %20907 = vmatpush3.msra.mxu0 %v11646_v4  ;;  %v12284_v4 = vld [vmem:[#allocation13 + $0x1620] sm:$0xff] }
0x1e43   : > { %20908 = vmatprep.subr.mxu0 %v22578_v3 }
0x1e44   : > { %20909 = vmatpush3.msra.mxu0 %v11645_v6  ;;  %v12283_v6 = vld [vmem:[#allocation13 + $0x1618] sm:$0xff] }
0x1e45   : > { %20910 = vmatprep.subr.mxu0 %v22578_v3 }
0x1e46   : > { %20911 = vmatpush3.msra.mxu0 %v11644_v8  ;;  %v12282_v8 = vld [vmem:[#allocation13 + $0x1610] sm:$0xff] }
0x1e47   : > { %20912 = vmatprep.subr.mxu0 %v22578_v3 }
0x1e48   : > { %20913 = vmatpush3.msra.mxu0 %v11643_v10  ;;  %v12281_v10 = vld [vmem:[#allocation13 + $0x1608] sm:$0xff] }
0x1e49   : > { %20914 = vmatprep.subr.mxu0 %v22578_v3 }
0x1e4a   : > { %20915 = vmatpush3.msra.mxu0 %v11642_v12  ;;  %v12280_v12 = vld [vmem:[#allocation13 + $0x1600] sm:$0xff] }
0x1e4b   : > { %20916 = vmatprep.subr.mxu0 %v22578_v3 }
0x1e4c   : > { %20917 = vmatpush3.msra.mxu0 %v11641_v14  ;;  %v12303_v14 = vld [vmem:[#allocation13 + $0x16b8] sm:$0xff] }
0x1e4d   : > { %20918 = vmatprep.subr.mxu0 %v22578_v3 }
0x1e4e   : > { %20919 = vmatpush3.msra.mxu0 %v11640_v16  ;;  %v12302_v16 = vld [vmem:[#allocation13 + $0x16b0] sm:$0xff] }
0x1e4f   : > { %20920 = vmatprep.subr.mxu0 %v22578_v3 }
0x1e50   : > { %20921 = vmatpush3.msra.mxu0 %v11639_v18  ;;  %v12301_v18 = vld [vmem:[#allocation13 + $0x16a8] sm:$0xff] }
0x1e51   : > { %20925 = vmatprep.subr.mxu0 %v22578_v3 }
0x1f01   : > { %v11520_v54 = vpop.f32.mrf.mxu0 }
0x1f02   : > { %v11525_v55 = vsub.f32 0.0, %v11520_v54 }
0x1f03   : > { %v11522_v57 = vpop.f32.mrf.mxu0 }
0x1f04   : > { %v11526_v26 = vmul.f32 1.442695, %v11525_v55  ;;  %v11977_v55 = vld [vmem:[#allocation13 + $0x1590] sm:$0xff] }
0x1f06   : > { %22118 = vpow2.f32 %v11526_v26  ;;  %v11664_v26 = vld [vmem:[#allocation13 + $0x14c8] sm:$0xff] }
0x1f13   : > { %v22119_v23 = vpop.eup %22118 }
0x1f14   : > { %v11528_v24 = vadd.f32 1.0, %v22119_v23  ;;  %v11976_v23 = vld [vmem:[#allocation13 + $0x1588] sm:$0xff] }
0x1f16   : > { %22120 = vrcp.f32 %v11528_v24  ;;  %v11663_v24 = vld [vmem:[#allocation13 + $0x14c0] sm:$0xff] }
0x1f23   : > { %v22121_v25 = vpop.eup %22120 }
0x1f24   : > { %v11531_v56 = vmul.f32 %v22121_v25, %v11520_v54  ;;  %v11665_v54 = vld [vmem:[#allocation13 + $0x14d0] sm:$0xff]  ;;  %v11975_v25 = vld [vmem:[#allocation13 + $0x1580] sm:$0xff] }
0x1f26   : > { %v11532_v58 = vmul.f32 %v11531_v56, %v11522_v57  ;;  %v11974_v56 = vld [vmem:[#allocation13 + $0x1578] sm:$0xff] }
0x1f27   : > { %v12287_v57 = vld [vmem:[#allocation13 + $0x1638] sm:$0xff] }
0x1f28   : > { %20904 = vmatmul.mubr.f32.vlgmr.msra.gmra.mxu1 %v11532_v58  ;;  %v11973_v58 = vld [vmem:[#allocation13 + $0x1570] sm:$0xff] }
0x1f29   : > { %20960 = vmatprep.mubr.msk.f32.mxu1 %vm22579_vm1, %v22578_v3  ;;  %20945 = vmatpush3.msra.mxu1 %v11662_v5  ;;  %v11970_v5 = vld [vmem:[#allocation13 + $0x1558] sm:$0xff] }
0x1f2a   : > { %20946 = vmatprep.subr.mxu1 %v22578_v3 }
0x1f2b   : > { %20947 = vmatpush3.msra.mxu1 %v11661_v7  ;;  %v11969_v7 = vld [vmem:[#allocation13 + $0x1550] sm:$0xff] }
0x1f2c   : > { %20948 = vmatprep.subr.mxu1 %v22578_v3 }
0x1f2d   : > { %20949 = vmatpush3.msra.mxu1 %v11660_v9  ;;  %v11968_v9 = vld [vmem:[#allocation13 + $0x1548] sm:$0xff] }
0x1f2e   : > { %20950 = vmatprep.subr.mxu1 %v22578_v3 }
0x1fe8   : > { %v11616_v59 = vpop.f32.mrf.mxu1 }
0x1fe9   : > { %v24337_v63 = vadd.f32 %v11616_v59, %v24308_v11  ;;  %v11659_v11 = vld [vmem:[#allocation13 + $0x14a0] sm:$0xff]  ;;  %v12286_v59 = vld [vmem:[#allocation13 + $0x1630] sm:$0xff] }
0x1fea   : > { %v20905_v0 = vpop.f32.mrf.mxu1  ;;  %20951 = vmatpush3.msra.mxu1 %v11659_v11  ;;  %v11967_v11 = vld [vmem:[#allocation13 + $0x1540] sm:$0xff] }
0x1feb   : > { %v11623_v1 = vmul.f32 %v24337_v63, %v24337_v63  ;;  %20952 = vmatprep.subr.mxu1 %v22578_v3  ;;  %v11972_v0 = vld [vmem:[#allocation13 + $0x1568] sm:$0xff] }
0x1fec   : > { %20953 = vmatpush3.msra.mxu1 %v11658_v13  ;;  %v11990_v13 = vld [vmem:[#allocation13 + $0x15f8] sm:$0xff] }
0x1fed   : > { %v11624_v2 = vsel %vm545_vm0, %v11623_v1, 0.0  ;;  %20954 = vmatprep.subr.mxu1 %v22578_v3  ;;  %v12285_v1 = vld [vmem:[#allocation13 + $0x1628] sm:$0xff] }
0x1fee   : > { %11625 = vadd.xlane.f32.xlu0 %v11624_v2  ;;  %20955 = vmatpush3.msra.mxu1 %v11657_v15  ;;  %v11971_v2 = vld [vmem:[#allocation13 + $0x1560] sm:$0xff]  ;;  %v11989_v15 = vld [vmem:[#allocation13 + $0x15f0] sm:$0xff] }
0x1fef   : > { %20956 = vmatprep.subr.mxu1 %v22578_v3 }
0x1ff0   : > { %20957 = vmatpush3.msra.mxu1 %v11656_v17  ;;  %v11988_v17 = vld [vmem:[#allocation13 + $0x15e8] sm:$0xff] }
0x1ff1   : > { %20958 = vmatprep.subr.mxu1 %v22578_v3 }
0x1ff2   : > { %20959 = vmatpush3.msra.mxu1 %v11655_v60  ;;  %v11987_v60 = vld [vmem:[#allocation13 + $0x15e0] sm:$0xff] }
0x1ff3   : > { %20982 = vmatprep.subr.mxu1 %v22578_v3 }
0x2077   : > { %v11626_v62 = vpop.xlane.xlu0 %11625 }
0x2078   : > { %v11627_v61 = vmul.f32 0.015625, %v11626_v62  ;;  %v12300_v62 = vld [vmem:[#allocation13 + $0x16a0] sm:$0xff] }
0x207a   : > { %v11628_v19 = vadd.f32 1e-06, %v11627_v61  ;;  %v11986_v61 = vld [vmem:[#allocation13 + $0x15d8] sm:$0xff] }
0x207c   : > { %22122 = vrsqrt.f32 %v11628_v19  ;;  %v12299_v19 = vld [vmem:[#allocation13 + $0x1698] sm:$0xff] }
0x2089   : > { %v22123_v20 = vpop.eup %22122 }
0x208a   : > { %v11630_v22 = vmul.f32 %v22123_v20, %v24337_v63  ;;  %v11985_v20 = vld [vmem:[#allocation13 + $0x15d0] sm:$0xff] }
0x208c   : > { %v24359_v27 = vmul.f32 %v17541_v21, %v11630_v22  ;;  %v12298_v21 = vld [vmem:[#allocation13 + $0x1690] sm:$0xff]  ;;  %v11984_v22 = vld [vmem:[#allocation13 + $0x15c8] sm:$0xff] }
0x208e   : > { %20923 = vmatmul.mubr.msk.f32.vlgmr.msra.gmra.mxu0 %vm545_vm0, %v24359_v27  ;;  %20961 = vmatmul.mubr.msk.f32.vlgmr.msra.gmra.mxu1 %vm545_vm0, %v24359_v27 }
0x208f   : > { %20926 = vmatpush3.msra.mxu0 %v11654_v28  ;;  %20983 = vmatpush3.msra.mxu1 %v11966_v29  ;;  %v12297_v28 = vld [vmem:[#allocation13 + $0x1688] sm:$0xff]  ;;  %v11983_v29 = vld [vmem:[#allocation13 + $0x15c0] sm:$0xff] }
0x2090   : > { %20927 = vmatprep.subr.mxu0 %v22578_v3  ;;  %20984 = vmatprep.subr.mxu1 %v22578_v3 }
0x2091   : > { %20928 = vmatpush3.msra.mxu0 %v11653_v30  ;;  %20985 = vmatpush3.msra.mxu1 %v11965_v31  ;;  %v12296_v30 = vld [vmem:[#allocation13 + $0x1680] sm:$0xff]  ;;  %v12295_v31 = vld [vmem:[#allocation13 + $0x1678] sm:$0xff] }
0x2092   : > { %20929 = vmatprep.subr.mxu0 %v22578_v3  ;;  %20986 = vmatprep.subr.mxu1 %v22578_v3 }
0x2093   : > { %20930 = vmatpush3.msra.mxu0 %v11652_v32  ;;  %20987 = vmatpush3.msra.mxu1 %v11964_v33  ;;  %v12604_v32 = vld [vmem:[#allocation13 + $0x1738] sm:$0xff]  ;;  %v12294_v33 = vld [vmem:[#allocation13 + $0x1670] sm:$0xff] }
0x2094   : > { %20931 = vmatprep.subr.mxu0 %v22578_v3  ;;  %20988 = vmatprep.subr.mxu1 %v22578_v3 }
0x2095   : > { %20932 = vmatpush3.msra.mxu0 %v11651_v34  ;;  %20989 = vmatpush3.msra.mxu1 %v11963_v35  ;;  %v12603_v34 = vld [vmem:[#allocation13 + $0x1730] sm:$0xff]  ;;  %v12293_v35 = vld [vmem:[#allocation13 + $0x1668] sm:$0xff] }
0x2096   : > { %20933 = vmatprep.subr.mxu0 %v22578_v3  ;;  %20990 = vmatprep.subr.mxu1 %v22578_v3 }
0x2097   : > { %20934 = vmatpush3.msra.mxu0 %v11650_v36  ;;  %20991 = vmatpush3.msra.mxu1 %v11962_v37  ;;  %v12602_v36 = vld [vmem:[#allocation13 + $0x1728] sm:$0xff]  ;;  %v12292_v37 = vld [vmem:[#allocation13 + $0x1660] sm:$0xff] }
0x2098   : > { %20935 = vmatprep.subr.mxu0 %v22578_v3  ;;  %20992 = vmatprep.subr.mxu1 %v22578_v3 }
0x2099   : > { %20936 = vmatpush3.msra.mxu0 %v11649_v38  ;;  %20993 = vmatpush3.msra.mxu1 %v11961_v39  ;;  %v12601_v38 = vld [vmem:[#allocation13 + $0x1720] sm:$0xff]  ;;  %v12291_v39 = vld [vmem:[#allocation13 + $0x1658] sm:$0xff] }
0x209a   : > { %20937 = vmatprep.subr.mxu0 %v22578_v3  ;;  %20994 = vmatprep.subr.mxu1 %v22578_v3 }
0x209b   : > { %20938 = vmatpush3.msra.mxu0 %v11648_v40  ;;  %20995 = vmatpush3.msra.mxu1 %v11960_v41  ;;  %v12600_v40 = vld [vmem:[#allocation13 + $0x1718] sm:$0xff]  ;;  %v12290_v41 = vld [vmem:[#allocation13 + $0x1650] sm:$0xff] }
0x209c   : > { %20939 = vmatprep.subr.mxu0 %v22578_v3  ;;  %20996 = vmatprep.subr.mxu1 %v22578_v3 }
0x209d   : > { %20940 = vmatpush3.msra.mxu0 %v11647_v42  ;;  %20941 = vmatprep.mubr.msk.f32.mxu0 %vm22579_vm1, %v22578_v3  ;;  %v12599_v42 = vld [vmem:[#allocation13 + $0x1710] sm:$0xff] }
0x209e   : > { %20997 = vmatpush3.msra.mxu1 %v11959_v43  ;;  %20998 = vmatprep.mubr.msk.f32.mxu1 %vm22579_vm1, %v22578_v3  ;;  %v12289_v43 = vld [vmem:[#allocation13 + $0x1648] sm:$0xff] }
0x209f   : > { %20942 = vmatmul.mubr.msk.f32.vlgmr.msra.gmra.mxu0 %vm545_vm0, %v24359_v27  ;;  %20963 = vmatprep.subr.mxu0 %v22578_v3 }
0x20a0   : > { %20999 = vmatmul.mubr.msk.f32.vlgmr.msra.gmra.mxu1 %vm545_vm0, %v24359_v27  ;;  %21020 = vmatprep.subr.mxu1 %v22578_v3 }
0x20a1   : > { %20964 = vmatpush3.msra.mxu0 %v11670_v44  ;;  %21021 = vmatpush3.msra.mxu1 %v11982_v45  ;;  %v12598_v44 = vld [vmem:[#allocation13 + $0x1708] sm:$0xff]  ;;  %v12288_v45 = vld [vmem:[#allocation13 + $0x1640] sm:$0xff] }
0x20a2   : > { %20965 = vmatprep.subr.mxu0 %v22578_v3  ;;  %21022 = vmatprep.subr.mxu1 %v22578_v3 }
0x20a3   : > { %20966 = vmatpush3.msra.mxu0 %v11669_v46  ;;  %21023 = vmatpush3.msra.mxu1 %v11981_v47  ;;  %v12597_v46 = vld [vmem:[#allocation13 + $0x1700] sm:$0xff]  ;;  %v12311_v47 = vld [vmem:[#allocation13 + $0x16f8] sm:$0xff] }
0x20a4   : > { %20967 = vmatprep.subr.mxu0 %v22578_v3  ;;  %21024 = vmatprep.subr.mxu1 %v22578_v3 }
0x20a5   : > { %20968 = vmatpush3.msra.mxu0 %v11668_v48  ;;  %21025 = vmatpush3.msra.mxu1 %v11980_v49  ;;  %v12620_v48 = vld [vmem:[#allocation13 + $0x17b8] sm:$0xff]  ;;  %v12310_v49 = vld [vmem:[#allocation13 + $0x16f0] sm:$0xff] }
0x20a6   : > { %20969 = vmatprep.subr.mxu0 %v22578_v3  ;;  %21026 = vmatprep.subr.mxu1 %v22578_v3 }
0x20a7   : > { %20970 = vmatpush3.msra.mxu0 %v11667_v50  ;;  %21027 = vmatpush3.msra.mxu1 %v11979_v51  ;;  %v12619_v50 = vld [vmem:[#allocation13 + $0x17b0] sm:$0xff]  ;;  %v12309_v51 = vld [vmem:[#allocation13 + $0x16e8] sm:$0xff] }
0x20a8   : > { %20971 = vmatprep.subr.mxu0 %v22578_v3  ;;  %21028 = vmatprep.subr.mxu1 %v22578_v3 }
0x20a9   : > { %20972 = vmatpush3.msra.mxu0 %v11666_v52  ;;  %21029 = vmatpush3.msra.mxu1 %v11978_v53  ;;  %v12618_v52 = vld [vmem:[#allocation13 + $0x17a8] sm:$0xff]  ;;  %v12308_v53 = vld [vmem:[#allocation13 + $0x16e0] sm:$0xff] }
0x20aa   : > { %20973 = vmatprep.subr.mxu0 %v22578_v3  ;;  %21030 = vmatprep.subr.mxu1 %v22578_v3 }
0x20ab   : > { %20974 = vmatpush3.msra.mxu0 %v11665_v54  ;;  %21031 = vmatpush3.msra.mxu1 %v11977_v55  ;;  %v12617_v54 = vld [vmem:[#allocation13 + $0x17a0] sm:$0xff]  ;;  %v12307_v55 = vld [vmem:[#allocation13 + $0x16d8] sm:$0xff] }
0x20ac   : > { %20975 = vmatprep.subr.mxu0 %v22578_v3  ;;  %21032 = vmatprep.subr.mxu1 %v22578_v3 }
0x20ad   : > { %20976 = vmatpush3.msra.mxu0 %v11664_v26  ;;  %21033 = vmatpush3.msra.mxu1 %v11976_v23  ;;  %v12616_v26 = vld [vmem:[#allocation13 + $0x1798] sm:$0xff]  ;;  %v12306_v23 = vld [vmem:[#allocation13 + $0x16d0] sm:$0xff] }
0x20ae   : > { %20977 = vmatprep.subr.mxu0 %v22578_v3  ;;  %21034 = vmatprep.subr.mxu1 %v22578_v3 }
0x20af   : > { %20978 = vmatpush3.msra.mxu0 %v11663_v24  ;;  %20979 = vmatprep.mubr.msk.f32.mxu0 %vm22579_vm1, %v22578_v3  ;;  %v12615_v24 = vld [vmem:[#allocation13 + $0x1790] sm:$0xff] }
0x20b0   : > { %21035 = vmatpush3.msra.mxu1 %v11975_v25  ;;  %21036 = vmatprep.mubr.msk.f32.mxu1 %vm22579_vm1, %v22578_v3  ;;  %v12305_v25 = vld [vmem:[#allocation13 + $0x16c8] sm:$0xff] }
0x20b1   : > { %20980 = vmatmul.mubr.msk.f32.vlgmr.msra.gmra.mxu0 %vm545_vm0, %v24359_v27  ;;  %21001 = vmatprep.subr.mxu0 %v22578_v3 }
0x20b2   : > { %21037 = vmatmul.mubr.msk.f32.vlgmr.msra.gmra.mxu1 %vm545_vm0, %v24359_v27  ;;  %21058 = vmatprep.subr.mxu1 %v22578_v3 }
0x20b3   : > { %21002 = vmatpush3.msra.mxu0 %v11974_v56  ;;  %21059 = vmatpush3.msra.mxu1 %v12287_v57  ;;  %v12614_v56 = vld [vmem:[#allocation13 + $0x1788] sm:$0xff]  ;;  %v12304_v57 = vld [vmem:[#allocation13 + $0x16c0] sm:$0xff] }
0x20b4   : > { %21003 = vmatprep.subr.mxu0 %v22578_v3  ;;  %21060 = vmatprep.subr.mxu1 %v22578_v3 }
0x20b5   : > { %21004 = vmatpush3.msra.mxu0 %v11973_v58  ;;  %21061 = vmatpush3.msra.mxu1 %v12286_v59  ;;  %v12613_v58 = vld [vmem:[#allocation13 + $0x1780] sm:$0xff]  ;;  %v12612_v59 = vld [vmem:[#allocation13 + $0x1778] sm:$0xff] }
0x20b6   : > { %21005 = vmatprep.subr.mxu0 %v22578_v3  ;;  %21062 = vmatprep.subr.mxu1 %v22578_v3 }
0x20b7   : > { %21006 = vmatpush3.msra.mxu0 %v11972_v0  ;;  %21063 = vmatpush3.msra.mxu1 %v12285_v1  ;;  %v12925_v0 = vld [vmem:[#allocation13 + $0x1838] sm:$0xff]  ;;  %v12611_v1 = vld [vmem:[#allocation13 + $0x1770] sm:$0xff] }
0x20b8   : > { %21007 = vmatprep.subr.mxu0 %v22578_v3  ;;  %21064 = vmatprep.subr.mxu1 %v22578_v3 }
0x20b9   : > { %21008 = vmatpush3.msra.mxu0 %v11971_v2  ;;  %21065 = vmatpush3.msra.mxu1 %v12284_v4  ;;  %v12924_v2 = vld [vmem:[#allocation13 + $0x1830] sm:$0xff]  ;;  %v12610_v4 = vld [vmem:[#allocation13 + $0x1768] sm:$0xff] }
0x20ba   : > { %21009 = vmatprep.subr.mxu0 %v22578_v3  ;;  %21066 = vmatprep.subr.mxu1 %v22578_v3 }
0x20bb   : > { %21010 = vmatpush3.msra.mxu0 %v11970_v5  ;;  %21067 = vmatpush3.msra.mxu1 %v12283_v6  ;;  %v12923_v5 = vld [vmem:[#allocation13 + $0x1828] sm:$0xff]  ;;  %v12609_v6 = vld [vmem:[#allocation13 + $0x1760] sm:$0xff] }
0x20bc   : > { %21011 = vmatprep.subr.mxu0 %v22578_v3  ;;  %21068 = vmatprep.subr.mxu1 %v22578_v3 }
0x20bd   : > { %21012 = vmatpush3.msra.mxu0 %v11969_v7  ;;  %21069 = vmatpush3.msra.mxu1 %v12282_v8  ;;  %v12922_v7 = vld [vmem:[#allocation13 + $0x1820] sm:$0xff]  ;;  %v12608_v8 = vld [vmem:[#allocation13 + $0x1758] sm:$0xff] }
0x20be   : > { %21013 = vmatprep.subr.mxu0 %v22578_v3  ;;  %21070 = vmatprep.subr.mxu1 %v22578_v3 }
0x20bf   : > { %21014 = vmatpush3.msra.mxu0 %v11968_v9  ;;  %21071 = vmatpush3.msra.mxu1 %v12281_v10  ;;  %v12921_v9 = vld [vmem:[#allocation13 + $0x1818] sm:$0xff]  ;;  %v12607_v10 = vld [vmem:[#allocation13 + $0x1750] sm:$0xff] }
0x20c0   : > { %21015 = vmatprep.subr.mxu0 %v22578_v3  ;;  %21072 = vmatprep.subr.mxu1 %v22578_v3 }
0x20c1   : > { %21016 = vmatpush3.msra.mxu0 %v11967_v11  ;;  %21017 = vmatprep.mubr.msk.f32.mxu0 %vm22579_vm1, %v22578_v3  ;;  %v12920_v11 = vld [vmem:[#allocation13 + $0x1810] sm:$0xff] }
0x20c2   : > { %21073 = vmatpush3.msra.mxu1 %v12280_v12  ;;  %21074 = vmatprep.mubr.msk.f32.mxu1 %vm22579_vm1, %v22578_v3  ;;  %v12606_v12 = vld [vmem:[#allocation13 + $0x1748] sm:$0xff] }
0x20c3   : > { %21018 = vmatmul.mubr.msk.f32.vlgmr.msra.gmra.mxu0 %vm545_vm0, %v24359_v27  ;;  %21039 = vmatprep.subr.mxu0 %v22578_v3 }
0x20c4   : > { %21075 = vmatmul.mubr.msk.f32.vlgmr.msra.gmra.mxu1 %vm545_vm0, %v24359_v27  ;;  %21096 = vmatprep.subr.mxu1 %v22578_v3 }
0x20c5   : > { %21040 = vmatpush3.msra.mxu0 %v11990_v13  ;;  %21097 = vmatpush3.msra.mxu1 %v12303_v14  ;;  %v12919_v13 = vld [vmem:[#allocation13 + $0x1808] sm:$0xff]  ;;  %v12605_v14 = vld [vmem:[#allocation13 + $0x1740] sm:$0xff] }
0x20c6   : > { %21041 = vmatprep.subr.mxu0 %v22578_v3  ;;  %21098 = vmatprep.subr.mxu1 %v22578_v3 }
0x20c7   : > { %21042 = vmatpush3.msra.mxu0 %v11989_v15  ;;  %21099 = vmatpush3.msra.mxu1 %v12302_v16  ;;  %v12918_v15 = vld [vmem:[#allocation13 + $0x1800] sm:$0xff]  ;;  %v12628_v16 = vld [vmem:[#allocation13 + $0x17f8] sm:$0xff] }
0x20c8   : > { %21043 = vmatprep.subr.mxu0 %v22578_v3  ;;  %21100 = vmatprep.subr.mxu1 %v22578_v3 }
0x20c9   : > { %21044 = vmatpush3.msra.mxu0 %v11988_v17  ;;  %21101 = vmatpush3.msra.mxu1 %v12301_v18  ;;  %v12941_v17 = vld [vmem:[#allocation13 + $0x18b8] sm:$0xff]  ;;  %v12627_v18 = vld [vmem:[#allocation13 + $0x17f0] sm:$0xff] }
0x20ca   : > { %21045 = vmatprep.subr.mxu0 %v22578_v3  ;;  %21102 = vmatprep.subr.mxu1 %v22578_v3 }
0x20cb   : > { %21046 = vmatpush3.msra.mxu0 %v11987_v60  ;;  %21103 = vmatpush3.msra.mxu1 %v12300_v62  ;;  %v12940_v60 = vld [vmem:[#allocation13 + $0x18b0] sm:$0xff]  ;;  %v12626_v62 = vld [vmem:[#allocation13 + $0x17e8] sm:$0xff] }
0x20cc   : > { %21047 = vmatprep.subr.mxu0 %v22578_v3  ;;  %21104 = vmatprep.subr.mxu1 %v22578_v3 }
0x20cd   : > { %21048 = vmatpush3.msra.mxu0 %v11986_v61  ;;  %21105 = vmatpush3.msra.mxu1 %v12299_v19  ;;  %v12939_v61 = vld [vmem:[#allocation13 + $0x18a8] sm:$0xff]  ;;  %v12625_v19 = vld [vmem:[#allocation13 + $0x17e0] sm:$0xff] }
0x20ce   : > { %21049 = vmatprep.subr.mxu0 %v22578_v3  ;;  %21106 = vmatprep.subr.mxu1 %v22578_v3 }
0x20cf   : > { %21050 = vmatpush3.msra.mxu0 %v11985_v20  ;;  %21107 = vmatpush3.msra.mxu1 %v12298_v21  ;;  %v12938_v20 = vld [vmem:[#allocation13 + $0x18a0] sm:$0xff]  ;;  %v12624_v21 = vld [vmem:[#allocation13 + $0x17d8] sm:$0xff] }
0x20d0   : > { %21051 = vmatprep.subr.mxu0 %v22578_v3  ;;  %21108 = vmatprep.subr.mxu1 %v22578_v3 }
0x20d1   : > { %21052 = vmatpush3.msra.mxu0 %v11984_v22  ;;  %21109 = vmatpush3.msra.mxu1 %v12297_v28  ;;  %v12937_v22 = vld [vmem:[#allocation13 + $0x1898] sm:$0xff]  ;;  %v12623_v28 = vld [vmem:[#allocation13 + $0x17d0] sm:$0xff] }
0x20d2   : > { %21053 = vmatprep.subr.mxu0 %v22578_v3  ;;  %21110 = vmatprep.subr.mxu1 %v22578_v3 }
0x20d3   : > { %21054 = vmatpush3.msra.mxu0 %v11983_v29  ;;  %21055 = vmatprep.mubr.msk.f32.mxu0 %vm22579_vm1, %v22578_v3  ;;  %v12936_v29 = vld [vmem:[#allocation13 + $0x1890] sm:$0xff] }
0x20d4   : > { %21111 = vmatpush3.msra.mxu1 %v12296_v30  ;;  %21112 = vmatprep.mubr.msk.f32.mxu1 %vm22579_vm1, %v22578_v3  ;;  %v12622_v30 = vld [vmem:[#allocation13 + $0x17c8] sm:$0xff] }
0x20d5   : > { %21056 = vmatmul.mubr.msk.f32.vlgmr.msra.gmra.mxu0 %vm545_vm0, %v24359_v27  ;;  %21077 = vmatprep.subr.mxu0 %v22578_v3 }
0x20d6   : > { %21113 = vmatmul.mubr.msk.f32.vlgmr.msra.gmra.mxu1 %vm545_vm0, %v24359_v27  ;;  %21134 = vmatprep.subr.mxu1 %v22578_v3 }
0x20d7   : > { %21078 = vmatpush3.msra.mxu0 %v12295_v31  ;;  %21135 = vmatpush3.msra.mxu1 %v12604_v32  ;;  %v12935_v31 = vld [vmem:[#allocation13 + $0x1888] sm:$0xff]  ;;  %v12621_v32 = vld [vmem:[#allocation13 + $0x17c0] sm:$0xff] }
0x20d8   : > { %21079 = vmatprep.subr.mxu0 %v22578_v3  ;;  %21136 = vmatprep.subr.mxu1 %v22578_v3 }
0x20d9   : > { %21080 = vmatpush3.msra.mxu0 %v12294_v33  ;;  %21137 = vmatpush3.msra.mxu1 %v12603_v34  ;;  %v12934_v33 = vld [vmem:[#allocation13 + $0x1880] sm:$0xff]  ;;  %v12933_v34 = vld [vmem:[#allocation13 + $0x1878] sm:$0xff] }
0x20da   : > { %21081 = vmatprep.subr.mxu0 %v22578_v3  ;;  %21138 = vmatprep.subr.mxu1 %v22578_v3 }
0x20db   : > { %21082 = vmatpush3.msra.mxu0 %v12293_v35  ;;  %21139 = vmatpush3.msra.mxu1 %v12602_v36  ;;  %v12932_v35 = vld [vmem:[#allocation13 + $0x1870] sm:$0xff]  ;;  %v12931_v36 = vld [vmem:[#allocation13 + $0x1868] sm:$0xff] }
0x20dc   : > { %21083 = vmatprep.subr.mxu0 %v22578_v3  ;;  %21140 = vmatprep.subr.mxu1 %v22578_v3 }
0x20dd   : > { %21084 = vmatpush3.msra.mxu0 %v12292_v37  ;;  %21141 = vmatpush3.msra.mxu1 %v12601_v38  ;;  %v12930_v37 = vld [vmem:[#allocation13 + $0x1860] sm:$0xff]  ;;  %v12929_v38 = vld [vmem:[#allocation13 + $0x1858] sm:$0xff] }
0x20de   : > { %21085 = vmatprep.subr.mxu0 %v22578_v3  ;;  %21142 = vmatprep.subr.mxu1 %v22578_v3 }
0x20df   : > { %21086 = vmatpush3.msra.mxu0 %v12291_v39  ;;  %21143 = vmatpush3.msra.mxu1 %v12600_v40  ;;  %v12928_v39 = vld [vmem:[#allocation13 + $0x1850] sm:$0xff]  ;;  %v12927_v40 = vld [vmem:[#allocation13 + $0x1848] sm:$0xff] }
0x20e0   : > { %21087 = vmatprep.subr.mxu0 %v22578_v3  ;;  %21144 = vmatprep.subr.mxu1 %v22578_v3 }
0x20e1   : > { %21088 = vmatpush3.msra.mxu0 %v12290_v41  ;;  %21145 = vmatpush3.msra.mxu1 %v12599_v42  ;;  %v12926_v41 = vld [vmem:[#allocation13 + $0x1840] sm:$0xff]  ;;  %v12949_v42 = vld [vmem:[#allocation13 + $0x18f8] sm:$0xff] }
0x20e2   : > { %21089 = vmatprep.subr.mxu0 %v22578_v3  ;;  %21146 = vmatprep.subr.mxu1 %v22578_v3 }
0x20e3   : > { %21090 = vmatpush3.msra.mxu0 %v12289_v43  ;;  %21147 = vmatpush3.msra.mxu1 %v12598_v44  ;;  %v12948_v43 = vld [vmem:[#allocation13 + $0x18f0] sm:$0xff]  ;;  %v12947_v44 = vld [vmem:[#allocation13 + $0x18e8] sm:$0xff] }
0x20e4   : > { %21091 = vmatprep.subr.mxu0 %v22578_v3  ;;  %21148 = vmatprep.subr.mxu1 %v22578_v3 }
0x20e5   : > { %21092 = vmatpush3.msra.mxu0 %v12288_v45  ;;  %21093 = vmatprep.mubr.msk.f32.mxu0 %vm22579_vm1, %v22578_v3  ;;  %v12946_v45 = vld [vmem:[#allocation13 + $0x18e0] sm:$0xff] }
0x20e6   : > { %21149 = vmatpush3.msra.mxu1 %v12597_v46  ;;  %21150 = vmatprep.mubr.msk.f32.mxu1 %vm22579_vm1, %v22578_v3  ;;  %v12945_v46 = vld [vmem:[#allocation13 + $0x18d8] sm:$0xff] }
0x20e7   : > { %21094 = vmatmul.mubr.msk.f32.vlgmr.msra.gmra.mxu0 %vm545_vm0, %v24359_v27  ;;  %21115 = vmatprep.subr.mxu0 %v22578_v3 }
0x20e8   : > { %21151 = vmatmul.mubr.msk.f32.vlgmr.msra.gmra.mxu1 %vm545_vm0, %v24359_v27  ;;  %21172 = vmatprep.subr.mxu1 %v22578_v3 }
0x20e9   : > { %21116 = vmatpush3.msra.mxu0 %v12311_v47  ;;  %21173 = vmatpush3.msra.mxu1 %v12620_v48  ;;  %v12944_v47 = vld [vmem:[#allocation13 + $0x18d0] sm:$0xff]  ;;  %v12943_v48 = vld [vmem:[#allocation13 + $0x18c8] sm:$0xff] }
0x20ea   : > { %21117 = vmatprep.subr.mxu0 %v22578_v3  ;;  %21174 = vmatprep.subr.mxu1 %v22578_v3 }
0x20eb   : > { %21118 = vmatpush3.msra.mxu0 %v12310_v49  ;;  %21175 = vmatpush3.msra.mxu1 %v12619_v50  ;;  %v12942_v49 = vld [vmem:[#allocation13 + $0x18c0] sm:$0xff] }
0x20ec   : > { %21119 = vmatprep.subr.mxu0 %v22578_v3  ;;  %21176 = vmatprep.subr.mxu1 %v22578_v3 }
0x20ed   : > { %21120 = vmatpush3.msra.mxu0 %v12309_v51  ;;  %21177 = vmatpush3.msra.mxu1 %v12618_v52 }
0x20ee   : > { %21121 = vmatprep.subr.mxu0 %v22578_v3  ;;  %21178 = vmatprep.subr.mxu1 %v22578_v3 }
0x20ef   : > { %21122 = vmatpush3.msra.mxu0 %v12308_v53  ;;  %21179 = vmatpush3.msra.mxu1 %v12617_v54 }
0x20f0   : > { %21123 = vmatprep.subr.mxu0 %v22578_v3  ;;  %21180 = vmatprep.subr.mxu1 %v22578_v3 }
0x20f1   : > { %21124 = vmatpush3.msra.mxu0 %v12307_v55  ;;  %21181 = vmatpush3.msra.mxu1 %v12616_v26  ;;  %v24585_v26 = vld [vmem:[#allocation5] sm:$0xff] }
0x20f2   : > { %21125 = vmatprep.subr.mxu0 %v22578_v3  ;;  %21182 = vmatprep.subr.mxu1 %v22578_v3 }
0x20f3   : > { %21126 = vmatpush3.msra.mxu0 %v12306_v23  ;;  %21183 = vmatpush3.msra.mxu1 %v12615_v24  ;;  %v24588_v24 = vld [vmem:[#allocation7] sm:$0xff] }
0x20f4   : > { %21127 = vmatprep.subr.mxu0 %v22578_v3  ;;  %21184 = vmatprep.subr.mxu1 %v22578_v3 }
0x20f5   : > { %21128 = vmatpush3.msra.mxu0 %v12305_v25  ;;  %21185 = vmatpush3.msra.mxu1 %v12614_v56 }
0x20f6   : > { %21129 = vmatprep.subr.mxu0 %v22578_v3  ;;  %21186 = vmatprep.subr.mxu1 %v22578_v3 }
0x20f7   : > { %21130 = vmatpush3.msra.mxu0 %v12304_v57  ;;  %21131 = vmatprep.mubr.msk.f32.mxu0 %vm22579_vm1, %v22578_v3 }
0x20f8   : > { %21187 = vmatpush3.msra.mxu1 %v12613_v58  ;;  %21188 = vmatprep.mubr.msk.f32.mxu1 %vm22579_vm1, %v22578_v3 }
0x20f9   : > { %21132 = vmatmul.mubr.msk.f32.vlgmr.msra.gmra.mxu0 %vm545_vm0, %v24359_v27  ;;  %21153 = vmatprep.subr.mxu0 %v22578_v3 }
0x20fa   : > { %21189 = vmatmul.mubr.msk.f32.vlgmr.msra.gmra.mxu1 %vm545_vm0, %v24359_v27  ;;  %21210 = vmatprep.subr.mxu1 %v22578_v3 }
0x20fb   : > { %21154 = vmatpush3.msra.mxu0 %v12612_v59  ;;  %21211 = vmatpush3.msra.mxu1 %v12925_v0 }
0x20fc   : > { %21155 = vmatprep.subr.mxu0 %v22578_v3  ;;  %21212 = vmatprep.subr.mxu1 %v22578_v3 }
0x20fd   : > { %21156 = vmatpush3.msra.mxu0 %v12611_v1  ;;  %21213 = vmatpush3.msra.mxu1 %v12924_v2 }
0x20fe   : > { %21157 = vmatprep.subr.mxu0 %v22578_v3  ;;  %21214 = vmatprep.subr.mxu1 %v22578_v3 }
0x20ff   : > { %21158 = vmatpush3.msra.mxu0 %v12610_v4  ;;  %21215 = vmatpush3.msra.mxu1 %v12923_v5 }
0x2100   : > { %21159 = vmatprep.subr.mxu0 %v22578_v3  ;;  %21216 = vmatprep.subr.mxu1 %v22578_v3 }
0x2101   : > { %21160 = vmatpush3.msra.mxu0 %v12609_v6  ;;  %21217 = vmatpush3.msra.mxu1 %v12922_v7 }
0x2102   : > { %21161 = vmatprep.subr.mxu0 %v22578_v3  ;;  %21218 = vmatprep.subr.mxu1 %v22578_v3 }
0x2103   : > { %21162 = vmatpush3.msra.mxu0 %v12608_v8  ;;  %21219 = vmatpush3.msra.mxu1 %v12921_v9 }
0x2104   : > { %21163 = vmatprep.subr.mxu0 %v22578_v3  ;;  %21220 = vmatprep.subr.mxu1 %v22578_v3 }
0x2105   : > { %21164 = vmatpush3.msra.mxu0 %v12607_v10  ;;  %21221 = vmatpush3.msra.mxu1 %v12920_v11 }
0x2106   : > { %21165 = vmatprep.subr.mxu0 %v22578_v3  ;;  %21222 = vmatprep.subr.mxu1 %v22578_v3 }
0x2107   : > { %21166 = vmatpush3.msra.mxu0 %v12606_v12  ;;  %21223 = vmatpush3.msra.mxu1 %v12919_v13 }
0x2108   : > { %21167 = vmatprep.subr.mxu0 %v22578_v3  ;;  %21224 = vmatprep.subr.mxu1 %v22578_v3 }
0x2109   : > { %21168 = vmatpush3.msra.mxu0 %v12605_v14  ;;  %21169 = vmatprep.mubr.msk.f32.mxu0 %vm22579_vm1, %v22578_v3 }
0x210a   : > { %21225 = vmatpush3.msra.mxu1 %v12918_v15  ;;  %21226 = vmatprep.mubr.msk.f32.mxu1 %vm22579_vm1, %v22578_v3 }
0x210b   : > { %21170 = vmatmul.mubr.msk.f32.vlgmr.msra.gmra.mxu0 %vm545_vm0, %v24359_v27  ;;  %21191 = vmatprep.subr.mxu0 %v22578_v3 }
0x210c   : > { %21227 = vmatmul.mubr.msk.f32.vlgmr.msra.gmra.mxu1 %vm545_vm0, %v24359_v27  ;;  %21248 = vmatprep.subr.mxu1 %v22578_v3 }
0x210d   : > { %21192 = vmatpush3.msra.mxu0 %v12628_v16  ;;  %21249 = vmatpush3.msra.mxu1 %v12941_v17 }
0x210e   : > { %21193 = vmatprep.subr.mxu0 %v22578_v3  ;;  %21250 = vmatprep.subr.mxu1 %v22578_v3 }
0x210f   : > { %21194 = vmatpush3.msra.mxu0 %v12627_v18  ;;  %21251 = vmatpush3.msra.mxu1 %v12940_v60 }
0x2110   : > { %21195 = vmatprep.subr.mxu0 %v22578_v3  ;;  %21252 = vmatprep.subr.mxu1 %v22578_v3 }
0x2111   : > { %21196 = vmatpush3.msra.mxu0 %v12626_v62  ;;  %21253 = vmatpush3.msra.mxu1 %v12939_v61 }
0x2112   : > { %21197 = vmatprep.subr.mxu0 %v22578_v3  ;;  %21254 = vmatprep.subr.mxu1 %v22578_v3 }
0x2113   : > { %21198 = vmatpush3.msra.mxu0 %v12625_v19  ;;  %21255 = vmatpush3.msra.mxu1 %v12938_v20 }
0x2114   : > { %21199 = vmatprep.subr.mxu0 %v22578_v3  ;;  %21256 = vmatprep.subr.mxu1 %v22578_v3 }
0x2115   : > { %21200 = vmatpush3.msra.mxu0 %v12624_v21  ;;  %21257 = vmatpush3.msra.mxu1 %v12937_v22 }
0x2116   : > { %21201 = vmatprep.subr.mxu0 %v22578_v3  ;;  %21258 = vmatprep.subr.mxu1 %v22578_v3 }
0x2117   : > { %21202 = vmatpush3.msra.mxu0 %v12623_v28  ;;  %21259 = vmatpush3.msra.mxu1 %v12936_v29 }
0x2118   : > { %21203 = vmatprep.subr.mxu0 %v22578_v3  ;;  %21260 = vmatprep.subr.mxu1 %v22578_v3 }
0x2119   : > { %21204 = vmatpush3.msra.mxu0 %v12622_v30  ;;  %21261 = vmatpush3.msra.mxu1 %v12935_v31 }
0x211a   : > { %21205 = vmatprep.subr.mxu0 %v22578_v3  ;;  %21262 = vmatprep.subr.mxu1 %v22578_v3 }
0x211b   : > { %21206 = vmatpush3.msra.mxu0 %v12621_v32  ;;  %21207 = vmatprep.mubr.msk.f32.mxu0 %vm22579_vm1, %v22578_v3 }
0x211c   : > { %21263 = vmatpush3.msra.mxu1 %v12934_v33  ;;  %21264 = vmatprep.mubr.msk.f32.mxu1 %vm22579_vm1, %v22578_v3 }
0x211d   : > { %21208 = vmatmul.mubr.msk.f32.vlgmr.msra.gmra.mxu0 %vm545_vm0, %v24359_v27  ;;  %21229 = vmatprep.subr.mxu0 %v22578_v3 }
0x211e   : > { %21265 = vmatmul.mubr.msk.f32.vlgmr.msra.gmra.mxu1 %vm545_vm0, %v24359_v27  ;;  %21230 = vmatpush3.msra.mxu0 %v12933_v34 }
0x211f   : > { %21231 = vmatprep.subr.mxu0 %v22578_v3  ;;  %21245 = vmatprep.mubr.msk.f32.mxu0 %vm22579_vm1, %v22578_v3 }
0x2120   : > { %21232 = vmatpush3.msra.mxu0 %v12932_v35  ;;  %21286 = vmatprep.subr.mxu1 %v22578_v3 }
0x2121   : > { %21233 = vmatprep.subr.mxu0 %v22578_v3  ;;  %21288 = vmatprep.mubr.msk.f32.mxu1 %vm22579_vm1, %v22578_v3 }
0x2122   : > { %21234 = vmatpush3.msra.mxu0 %v12931_v36 }
0x2123   : > { %21235 = vmatprep.subr.mxu0 %v22578_v3 }
0x2124   : > { %21236 = vmatpush3.msra.mxu0 %v12930_v37 }
0x2125   : > { %21237 = vmatprep.subr.mxu0 %v22578_v3 }
0x2126   : > { %21238 = vmatpush3.msra.mxu0 %v12929_v38 }
0x2127   : > { %21239 = vmatprep.subr.mxu0 %v22578_v3 }
0x2128   : > { %21240 = vmatpush3.msra.mxu0 %v12928_v39 }
0x2129   : > { %21241 = vmatprep.subr.mxu0 %v22578_v3 }
0x212a   : > { %21242 = vmatpush3.msra.mxu0 %v12927_v40 }
0x212b   : > { %21243 = vmatprep.subr.mxu0 %v22578_v3 }
0x212c   : > { %21244 = vmatpush3.msra.mxu0 %v12926_v41 }
0x212d   : > { %21246 = vmatmul.mubr.msk.f32.vlgmr.msra.gmra.mxu0 %vm545_vm0, %v24359_v27  ;;  %21267 = vmatprep.subr.mxu0 %v22578_v3 }
0x212e   : > { %21268 = vmatpush3.msra.mxu0 %v12949_v42  ;;  %21283 = vmatprep.mubr.msk.f32.mxu0 %vm22579_vm1, %v22578_v3 }
0x212f   : > { %21269 = vmatprep.subr.mxu0 %v22578_v3 }
0x2130   : > { %21270 = vmatpush3.msra.mxu0 %v12948_v43 }
0x2131   : > { %21271 = vmatprep.subr.mxu0 %v22578_v3 }
0x2132   : > { %21272 = vmatpush3.msra.mxu0 %v12947_v44 }
0x2133   : > { %21273 = vmatprep.subr.mxu0 %v22578_v3 }
0x2134   : > { %21274 = vmatpush3.msra.mxu0 %v12946_v45 }
0x2135   : > { %21275 = vmatprep.subr.mxu0 %v22578_v3 }
0x2136   : > { %21276 = vmatpush3.msra.mxu0 %v12945_v46 }
0x2137   : > { %21277 = vmatprep.subr.mxu0 %v22578_v3 }
0x2138   : > { %21278 = vmatpush3.msra.mxu0 %v12944_v47 }
0x2139   : > { %21279 = vmatprep.subr.mxu0 %v22578_v3 }
0x213a   : > { %21280 = vmatpush3.msra.mxu0 %v12943_v48 }
0x213b   : > { %21281 = vmatprep.subr.mxu0 %v22578_v3 }
0x213c   : > { %21282 = vmatpush3.msra.mxu0 %v12942_v49 }
0x213d   : > { %21284 = vmatmul.mubr.msk.f32.vlgmr.msra.gmra.mxu0 %vm545_vm0, %v24359_v27  ;;  %21306 = vmatprep.subr.mxu0 %v22578_v3 }
0x213e   : > { %21308 = vmatprep.mubr.msk.f32.mxu0 %vm22579_vm1, %v22578_v3 }
0x214e   : > { %v11740_v50 = vpop.f32.mrf.mxu0  ;;  %v11880_v51 = vpop.f32.mrf.mxu1 }
0x214f   : > { %v11954_v23 = vmul.f32 %v24585_v26, %v11740_v50  ;;  %v11956_v0 = vmul.f32 %v24585_v26, %v11880_v51 }
0x2150   : > { %v20924_v52 = vpop.f32.mrf.mxu0  ;;  %v20962_v53 = vpop.f32.mrf.mxu1 }
0x215f   : > { %v11810_v54 = vpop.f32.mrf.mxu0 }
0x2160   : > { %v12057_v55 = vpop.f32.mrf.mxu1  ;;  %v11955_v7 = vmul.f32 %v24585_v26, %v11810_v54 }
0x2161   : > { %v12271_v25 = vmul.f32 %v24588_v24, %v12057_v55  ;;  %v20943_v27 = vpop.f32.mrf.mxu0 }
0x2162   : > { %v21000_v56 = vpop.f32.mrf.mxu1 }
0x2163   : > { %v12275_v57 = vadd.f32 %v12271_v25, %v11954_v23  ;;  %v22184_v23 = vld [vmem:[#allocation8] sm:$0xff] }
0x2171   : > { %v11950_v58 = vpop.f32.mrf.mxu0 }
0x2172   : > { %v12197_v59 = vpop.f32.mrf.mxu1  ;;  %v11957_v14 = vmul.f32 %v24585_v26, %v11950_v58 }
0x2173   : > { %v12273_v1 = vmul.f32 %v24588_v24, %v12197_v59  ;;  %v20981_v2 = vpop.f32.mrf.mxu0 }
0x2174   : > { %v21038_v4 = vpop.f32.mrf.mxu1 }
0x2175   : > { %v12277_v5 = vadd.f32 %v12273_v1, %v11956_v0 }
0x2183   : > { %v12127_v6 = vpop.f32.mrf.mxu0 }
0x2184   : > { %v12272_v8 = vmul.f32 %v24588_v24, %v12127_v6  ;;  %v12378_v9 = vpop.f32.mrf.mxu1 }
0x2185   : > { %v21019_v10 = vpop.f32.mrf.mxu0  ;;  %v12592_v19 = vmul.f32 %v24585_v26, %v12378_v9 }
0x2186   : > { %v12276_v11 = vadd.f32 %v12272_v8, %v11955_v7  ;;  %v21076_v12 = vpop.f32.mrf.mxu1 }
0x2195   : > { %v12267_v13 = vpop.f32.mrf.mxu0 }
0x2196   : > { %v12274_v15 = vmul.f32 %v24588_v24, %v12267_v13  ;;  %v12518_v16 = vpop.f32.mrf.mxu1 }
0x2197   : > { %v21057_v17 = vpop.f32.mrf.mxu0  ;;  %v12594_v41 = vmul.f32 %v24585_v26, %v12518_v16 }
0x2198   : > { %v12278_v18 = vadd.f32 %v12274_v15, %v11957_v14  ;;  %v21114_v60 = vpop.f32.mrf.mxu1 }
0x21a7   : > { %v12448_v62 = vpop.f32.mrf.mxu0 }
0x21a8   : > { %v12695_v61 = vpop.f32.mrf.mxu1  ;;  %v12593_v34 = vmul.f32 %v24585_v26, %v12448_v62 }
0x21a9   : > { %v12909_v20 = vmul.f32 %v24588_v24, %v12695_v61  ;;  %v21095_v21 = vpop.f32.mrf.mxu0 }
0x21aa   : > { %v21152_v22 = vpop.f32.mrf.mxu1 }
0x21ab   : > { %v12913_v28 = vadd.f32 %v12909_v20, %v12592_v19 }
0x21ad   : > { %21287 = vmatpush3.xpose.msk.msra.mxu1 %vm2152_vm2, %v12913_v28 }
0x21ae   : > { %21291 = vmatprep.subr.mxu1 %v22578_v3 }
0x21b0   : > { %21289 = vmatmul.mubr.msk.f32.vlgmr.msra.gmra.mxu1 %vm2152_vm2, %v12275_v57 }
0x21b1   : > { %21293 = vmatprep.mubr.msk.f32.mxu1 %vm22579_vm1, %v22578_v3 }
0x21b9   : > { %v12588_v29 = vpop.f32.mrf.mxu0 }
0x21ba   : > { %v12835_v30 = vpop.f32.mrf.mxu1  ;;  %v12595_v44 = vmul.f32 %v24585_v26, %v12588_v29 }
0x21bb   : > { %v21133_v31 = vpop.f32.mrf.mxu0  ;;  %v12911_v38 = vmul.f32 %v24588_v24, %v12835_v30 }
0x21bc   : > { %v21190_v32 = vpop.f32.mrf.mxu1 }
0x21bd   : > { %v12915_v42 = vadd.f32 %v12911_v38, %v12594_v41 }
0x21cb   : > { %v12765_v33 = vpop.f32.mrf.mxu0 }
0x21cc   : > { %v12910_v35 = vmul.f32 %v24588_v24, %v12765_v33  ;;  %v13016_v36 = vpop.f32.mrf.mxu1 }
0x21cd   : > { %21307 = vmatpush3.msra.mxu0 %v13016_v36  ;;  %v21171_v37 = vpop.f32.mrf.mxu0 }
0x21ce   : > { %v12914_v39 = vadd.f32 %v12910_v35, %v12593_v34  ;;  %v21228_v40 = vpop.f32.mrf.mxu1  ;;  %21316 = vmatprep.subr.mxu0 %v22578_v3 }
0x21d0   : > { %21292 = vmatpush3.xpose.msk.msra.mxu1 %vm2152_vm2, %v12914_v39 }
0x21d1   : > { %21296 = vmatprep.subr.mxu1 %v22578_v3 }
0x21d3   : > { %21294 = vmatmul.mubr.msk.f32.vlgmr.msra.gmra.mxu1 %vm2152_vm2, %v12276_v11 }
0x21d4   : > { %21297 = vmatpush3.xpose.msk.msra.mxu1 %vm2152_vm2, %v12915_v42  ;;  %21298 = vmatprep.mubr.msk.f32.mxu1 %vm22579_vm1, %v22578_v3 }
0x21d5   : > { %21301 = vmatprep.subr.mxu1 %v22578_v3 }
0x21d7   : > { %21299 = vmatmul.mubr.msk.f32.vlgmr.msra.gmra.mxu1 %vm2152_vm2, %v12277_v5 }
0x21d8   : > { %21303 = vmatprep.mubr.msk.f32.mxu1 %vm22579_vm1, %v22578_v3 }
0x21dd   : > { %v12905_v43 = vpop.f32.mrf.mxu0 }
0x21de   : > { %v12912_v45 = vmul.f32 %v24588_v24, %v12905_v43  ;;  %v24621_v46 = vpop.f32.mrf.mxu1  ;;  %v13880_v43 = vld [vmem:[#allocation14 + $0x108] sm:$0xff] }
0x21df   : > { %v21209_v47 = vpop.f32.mrf.mxu0 }
0x21e0   : > { %v12916_v48 = vadd.f32 %v12912_v45, %v12595_v44  ;;  %v21266_v49 = vpop.f32.mrf.mxu1  ;;  %v13882_v47 = vld [vmem:[#allocation14 + $0x118] sm:$0xff] }
0x21e1   : > { %v13884_v49 = vld [vmem:[#allocation14 + $0x128] sm:$0xff] }
0x21e2   : > { %21302 = vmatpush3.xpose.msk.msra.mxu1 %vm2152_vm2, %v12916_v48  ;;  %v13881_v48 = vld [vmem:[#allocation14 + $0x110] sm:$0xff] }
0x21e3   : > { %21311 = vmatprep.subr.mxu1 %v22578_v3 }
0x21e5   : > { %21304 = vmatmul.mubr.msk.f32.vlgmr.msra.gmra.mxu1 %vm2152_vm2, %v12278_v18 }
0x21e6   : > { %21313 = vmatprep.mubr.msk.f32.mxu1 %vm22579_vm1, %v22578_v3 }
0x21ed   : > { %v13086_v50 = vpop.f32.mrf.mxu0 }
0x21ee   : > { %21312 = vmatpush3.msra.mxu1 %v13086_v50 }
0x21ef   : > { %v21247_v51 = vpop.f32.mrf.mxu0  ;;  %21321 = vmatprep.subr.mxu1 %v22578_v3 }
0x21f0   : > { %v13883_v51 = vld [vmem:[#allocation14 + $0x120] sm:$0xff] }
0x21fd   : > { %v24629_v52 = vpop.f32.mrf.mxu0 }
0x21ff   : > { %v21285_v53 = vpop.f32.mrf.mxu0 }
0x2200   : > { %v13886_v53 = vld [vmem:[#allocation14 + $0x138] sm:$0xff] }
0x2270   : > { %v13302_v54 = vpop.f32.mrf.mxu1 }
0x2271   : > { %v13534_v55 = vmul.f32 0.25, %v13302_v54 }
0x2272   : > { %v21290_v26 = vpop.f32.mrf.mxu1 }
0x2273   : > { %v13538_v24 = vadd.f32 %v22184_v23, %v13534_v55  ;;  %v13885_v55 = vld [vmem:[#allocation14 + $0x130] sm:$0xff] }
0x2275   : > { %v13542_v25 = vsel %vm2465_vm3, %v13538_v24, -inf }
0x2276   : > { %13543 = vmax.xlane.f32.xlu1 %v13542_v25 }
0x2293   : > { %v13378_v27 = vpop.f32.mrf.mxu1 }
0x2294   : > { %v13535_v56 = vmul.f32 0.25, %v13378_v27 }
0x2295   : > { %v21295_v57 = vpop.f32.mrf.mxu1 }
0x2296   : > { %v13539_v58 = vadd.f32 %v22184_v23, %v13535_v56 }
0x2297   : > { %v13454_v59 = vpop.f32.mrf.mxu1 }
0x2298   : > { %v13536_v0 = vmul.f32 0.25, %v13454_v59  ;;  %v13545_v1 = vsel %vm2465_vm3, %v13539_v58, -inf }
0x2299   : > { %13546 = vmax.xlane.f32.xlu0 %v13545_v1  ;;  %v21300_v2 = vpop.f32.mrf.mxu1 }
0x229a   : > { %v13540_v4 = vadd.f32 %v22184_v23, %v13536_v0 }
0x229c   : > { %v13548_v5 = vsel %vm2465_vm3, %v13540_v4, -inf }
0x229d   : > { %13549 = vmax.xlane.f32.xlu1 %v13548_v5 }
0x22a5   : > { %v13530_v6 = vpop.f32.mrf.mxu1 }
0x22a6   : > { %v13537_v7 = vmul.f32 0.25, %v13530_v6 }
0x22a7   : > { %v21305_v8 = vpop.f32.mrf.mxu1 }
0x22a8   : > { %v13541_v9 = vadd.f32 %v22184_v23, %v13537_v7 }
0x22aa   : > { %v13551_v10 = vsel %vm2465_vm3, %v13541_v9, -inf }
0x22ab   : > { %13552 = vmax.xlane.f32.xlu0 %v13551_v10 }
0x22ff   : > { %v13544_v11 = vpop.xlane.xlu1 %13543 }
0x2300   : > { %v13554_v12 = vsub.f32 %v13538_v24, %v13544_v11 }
0x2302   : > { %v13558_v13 = vmul.f32 1.442695, %v13554_v12 }
0x2304   : > { %22124 = vpow2.f32 %v13558_v13 }
0x2311   : > { %v22125_v14 = vpop.eup %22124 }
0x2312   : > { %v13566_v15 = vsel %vm2465_vm3, %v22125_v14, 0.0 }
0x2313   : > { %13567 = vadd.xlane.f32.xlu1 %v13566_v15  ;;  %v14220_v15 = vld [vmem:[#allocation16 + $0x278] sm:$0xff] }
0x2322   : > { %v13547_v16 = vpop.xlane.xlu0 %13546 }
0x2323   : > { %v13555_v17 = vsub.f32 %v13539_v58, %v13547_v16  ;;  %v14219_v16 = vld [vmem:[#allocation16 + $0x270] sm:$0xff] }
0x2325   : > { %v13560_v18 = vmul.f32 1.442695, %v13555_v17  ;;  %v14218_v17 = vld [vmem:[#allocation16 + $0x268] sm:$0xff] }
0x2326   : > { %v13550_v60 = vpop.xlane.xlu1 %13549 }
0x2327   : > { %22126 = vpow2.f32 %v13560_v18  ;;  %v13556_v62 = vsub.f32 %v13540_v4, %v13550_v60  ;;  %v14217_v18 = vld [vmem:[#allocation16 + $0x260] sm:$0xff]  ;;  %v14216_v60 = vld [vmem:[#allocation16 + $0x258] sm:$0xff] }
0x2329   : > { %v13562_v61 = vmul.f32 1.442695, %v13556_v62  ;;  %v14215_v62 = vld [vmem:[#allocation16 + $0x250] sm:$0xff] }
0x232b   : > { %22128 = vpow2.f32 %v13562_v61  ;;  %v14213_v61 = vld [vmem:[#allocation16 + $0x240] sm:$0xff] }
0x2334   : > { %v22127_v19 = vpop.eup %22126  ;;  %v13553_v20 = vpop.xlane.xlu0 %13552 }
0x2335   : > { %v13557_v21 = vsub.f32 %v13541_v9, %v13553_v20  ;;  %v13569_v22 = vsel %vm2465_vm3, %v22127_v19, 0.0  ;;  %v14211_v20 = vld [vmem:[#allocation16 + $0x230] sm:$0xff] }
0x2336   : > { %13570 = vadd.xlane.f32.xlu0 %v13569_v22  ;;  %v14209_v22 = vld [vmem:[#allocation16 + $0x220] sm:$0xff] }
0x2337   : > { %v13564_v28 = vmul.f32 1.442695, %v13557_v21  ;;  %v14210_v21 = vld [vmem:[#allocation16 + $0x228] sm:$0xff] }
0x2338   : > { %v22129_v29 = vpop.eup %22128 }
0x2339   : > { %22130 = vpow2.f32 %v13564_v28  ;;  %v13572_v30 = vsel %vm2465_vm3, %v22129_v29, 0.0  ;;  %v14208_v28 = vld [vmem:[#allocation16 + $0x218] sm:$0xff] }
0x233a   : > { %13573 = vadd.xlane.f32.xlu1 %v13572_v30  ;;  %v14206_v30 = vld [vmem:[#allocation16 + $0x208] sm:$0xff] }
0x2346   : > { %v22131_v31 = vpop.eup %22130 }
0x2347   : > { %v13575_v32 = vsel %vm2465_vm3, %v22131_v31, 0.0 }
0x2348   : > { %13576 = vadd.xlane.f32.xlu0 %v13575_v32 }
0x239c   : > { %v13568_v33 = vpop.xlane.xlu1 %13567 }
0x239d   : > { %22132 = vrcp.f32 %v13568_v33 }
0x23aa   : > { %v22133_v34 = vpop.eup %22132 }
0x23ab   : > { %v13579_v35 = vmul.f32 %v22133_v34, %v22125_v14 }
0x23ad   : > { %21309 = vmatmul.mubr.msk.f32.vlgmr.msra.gmra.mxu0 %vm2465_vm3, %v13579_v35 }
0x23ae   : > { %21317 = vmatpush3.msra.mxu0 %v24621_v46  ;;  %21318 = vmatprep.mubr.msk.f32.mxu0 %vm22579_vm1, %v22578_v3  ;;  %v13879_v46 = vld [vmem:[#allocation14 + $0x100] sm:$0xff] }
0x23af   : > { %21326 = vmatprep.subr.mxu0 %v22578_v3 }
0x23bf   : > { %v13571_v36 = vpop.xlane.xlu0 %13570 }
0x23c0   : > { %22134 = vrcp.f32 %v13571_v36  ;;  %v17578_v36 = vld [vmem:[#allocation11 + $0x4] ss:$0 sm:$0xff] }
0x23c3   : > { %v13574_v37 = vpop.xlane.xlu1 %13573 }
0x23c4   : > { %22136 = vrcp.f32 %v13574_v37 }
0x23cd   : > { %v22135_v38 = vpop.eup %22134 }
0x23ce   : > { %v13581_v39 = vmul.f32 %v22135_v38, %v22127_v19  ;;  %v14212_v19 = vld [vmem:[#allocation16 + $0x238] sm:$0xff] }
0x23d0   : > { %21314 = vmatmul.mubr.msk.f32.vlgmr.msra.gmra.mxu1 %vm2465_vm3, %v13581_v39  ;;  %v14319_v39 = vld [vmem:[#allocation17 + $0x278] sm:$0xff] }
0x23d1   : > { %v22137_v40 = vpop.eup %22136  ;;  %v13577_v41 = vpop.xlane.xlu0 %13576  ;;  %21322 = vmatpush3.msra.mxu1 %v24629_v52  ;;  %21323 = vmatprep.mubr.msk.f32.mxu1 %vm22579_vm1, %v22578_v3 }
0x23d2   : > { %v13583_v42 = vmul.f32 %v22137_v40, %v22129_v29  ;;  %22138 = vrcp.f32 %v13577_v41  ;;  %21333 = vmatprep.subr.mxu1 %v22578_v3  ;;  %v14207_v29 = vld [vmem:[#allocation16 + $0x210] sm:$0xff]  ;;  %v14317_v41 = vld [vmem:[#allocation17 + $0x268] sm:$0xff] }
0x23d3   : > { %v14318_v40 = vld [vmem:[#allocation17 + $0x270] sm:$0xff] }
0x23d4   : > { %21319 = vmatmul.mubr.msk.f32.vlgmr.msra.gmra.mxu0 %vm2465_vm3, %v13583_v42  ;;  %v14316_v42 = vld [vmem:[#allocation17 + $0x260] sm:$0xff] }
0x23d5   : > { %21327 = vmatpush3.msra.mxu0 %v13880_v43  ;;  %21330 = vmatprep.mubr.msk.f32.mxu0 %vm22579_vm1, %v22578_v3  ;;  %v14315_v43 = vld [vmem:[#allocation17 + $0x258] sm:$0xff] }
0x23d6   : > { %21328 = vmatprep.subr.mxu0 %v22578_v3 }
0x23d7   : > { %21329 = vmatpush3.msra.mxu0 %v13879_v46  ;;  %v14312_v46 = vld [vmem:[#allocation17 + $0x240] sm:$0xff] }
0x23d8   : > { %21340 = vmatprep.subr.mxu0 %v22578_v3 }
0x23df   : > { %v22139_v44 = vpop.eup %22138 }
0x23e0   : > { %v13585_v45 = vmul.f32 %v22139_v44, %v22131_v31  ;;  %v14205_v31 = vld [vmem:[#allocation16 + $0x200] sm:$0xff]  ;;  %v14314_v44 = vld [vmem:[#allocation17 + $0x250] sm:$0xff] }
0x23e2   : > { %21324 = vmatmul.mubr.msk.f32.vlgmr.msra.gmra.mxu1 %vm2465_vm3, %v13585_v45  ;;  %v14313_v45 = vld [vmem:[#allocation17 + $0x248] sm:$0xff] }
0x23e3   : > { %21337 = vmatprep.mubr.msk.f32.mxu1 %vm22579_vm1, %v22578_v3  ;;  %21334 = vmatpush3.msra.mxu1 %v13882_v47  ;;  %v14311_v47 = vld [vmem:[#allocation17 + $0x238] sm:$0xff] }
0x23e4   : > { %21335 = vmatprep.subr.mxu1 %v22578_v3 }
0x23e5   : > { %21336 = vmatpush3.msra.mxu1 %v13881_v48  ;;  %v14310_v48 = vld [vmem:[#allocation17 + $0x230] sm:$0xff] }
0x23e6   : > { %21347 = vmatprep.subr.mxu1 %v22578_v3 }
0x246d   : > { %v13655_v50 = vpop.f32.mrf.mxu0 }
0x246e   : > { %21331 = vmatmul.mubr.msk.f32.vlgmr.msra.gmra.mxu0 %vm2152_vm2, %v13655_v50  ;;  %v14308_v50 = vld [vmem:[#allocation17 + $0x220] sm:$0xff] }
0x246f   : > { %v21310_v52 = vpop.f32.mrf.mxu0  ;;  %21341 = vmatpush3.msra.mxu0 %v13884_v49  ;;  %21344 = vmatprep.mubr.msk.f32.mxu0 %vm22579_vm1, %v22578_v3  ;;  %v14309_v49 = vld [vmem:[#allocation17 + $0x228] sm:$0xff] }
0x2470   : > { %21342 = vmatprep.subr.mxu0 %v22578_v3  ;;  %v14306_v52 = vld [vmem:[#allocation17 + $0x210] sm:$0xff] }
0x2471   : > { %21343 = vmatpush3.msra.mxu0 %v13883_v51  ;;  %v14307_v51 = vld [vmem:[#allocation17 + $0x218] sm:$0xff] }
0x2472   : > { %14240 = vmatprep.subr.mxu0 %v14220_v15  ;;  %v14411_v15 = vld [vmem:[#allocation13 + $0x1910] sm:$0xff] }
0x2490   : > { %v13728_v54 = vpop.f32.mrf.mxu1 }
0x2491   : > { %21338 = vmatmul.mubr.msk.f32.vlgmr.msra.gmra.mxu1 %vm2152_vm2, %v13728_v54  ;;  %v14304_v54 = vld [vmem:[#allocation17 + $0x200] sm:$0xff] }
0x2492   : > { %v21315_v26 = vpop.f32.mrf.mxu1  ;;  %21348 = vmatpush3.msra.mxu1 %v13886_v53  ;;  %21351 = vmatprep.mubr.msk.f32.mxu1 %vm22579_vm1, %v22578_v3  ;;  %v14305_v53 = vld [vmem:[#allocation17 + $0x208] sm:$0xff] }
0x2493   : > { %21349 = vmatprep.subr.mxu1 %v22578_v3 }
0x2494   : > { %v13801_v23 = vpop.f32.mrf.mxu0  ;;  %21350 = vmatpush3.msra.mxu1 %v13885_v55 }
0x2495   : > { %21345 = vmatmul.mubr.msk.f32.vlgmr.msra.gmra.mxu0 %vm2152_vm2, %v13801_v23  ;;  %21354 = vmatprep.subr.mxu1 %v22578_v3 }
0x2496   : > { %v21320_v24 = vpop.f32.mrf.mxu0  ;;  %14288 = vmatprep.mubr.f32.mxu0 %v22578_v3  ;;  %14241 = vmatpush1.msra.mxu0 %v14219_v16  ;;  %v14427_v16 = vld [vmem:[#allocation13 + $0x1990] sm:$0xff] }
0x2497   : > { %14242 = vmatprep.subr.mxu0 %v14218_v17  ;;  %v14410_v17 = vld [vmem:[#allocation13 + $0x1908] sm:$0xff] }
0x2498   : > { %14243 = vmatpush1.msra.mxu0 %v14217_v18  ;;  %v14426_v18 = vld [vmem:[#allocation13 + $0x1988] sm:$0xff] }
0x2499   : > { %14244 = vmatprep.subr.mxu0 %v14216_v60  ;;  %v14409_v60 = vld [vmem:[#allocation13 + $0x1900] sm:$0xff] }
0x249a   : > { %14245 = vmatpush1.msra.mxu0 %v14215_v62  ;;  %v14425_v62 = vld [vmem:[#allocation13 + $0x1980] sm:$0xff] }
0x24a2   : > { %v13874_v25 = vpop.f32.mrf.mxu1 }
0x24a3   : > { %21352 = vmatmul.mubr.msk.f32.vlgmr.msra.gmra.mxu1 %vm2152_vm2, %v13874_v25 }
0x24a4   : > { %v21325_v27 = vpop.f32.mrf.mxu1  ;;  %21386 = vmatprep.mubr.msk.f32.mxu1 %vm22579_vm1, %v22578_v3  ;;  %21355 = vmatpush3.msra.mxu1 %v14319_v39  ;;  %v14419_v39 = vld [vmem:[#allocation13 + $0x1950] sm:$0xff] }
0x24a5   : > { %21356 = vmatprep.subr.mxu1 %v22578_v3 }
0x24a6   : > { %21357 = vmatpush3.msra.mxu1 %v14318_v40  ;;  %v14731_v40 = vld [vmem:[#allocation13 + $0x1a10] sm:$0xff] }
0x24a7   : > { %21358 = vmatprep.subr.mxu1 %v22578_v3 }
0x24a8   : > { %21359 = vmatpush3.msra.mxu1 %v14317_v41  ;;  %v14418_v41 = vld [vmem:[#allocation13 + $0x1948] sm:$0xff] }
0x24a9   : > { %21360 = vmatprep.subr.mxu1 %v22578_v3 }
0x24aa   : > { %21361 = vmatpush3.msra.mxu1 %v14316_v42  ;;  %v14730_v42 = vld [vmem:[#allocation13 + $0x1a08] sm:$0xff] }
0x24ab   : > { %21362 = vmatprep.subr.mxu1 %v22578_v3 }
0x24ac   : > { %21363 = vmatpush3.msra.mxu1 %v14315_v43  ;;  %v14417_v43 = vld [vmem:[#allocation13 + $0x1940] sm:$0xff] }
0x24ad   : > { %21364 = vmatprep.subr.mxu1 %v22578_v3 }
0x24ae   : > { %21365 = vmatpush3.msra.mxu1 %v14314_v44  ;;  %v14729_v44 = vld [vmem:[#allocation13 + $0x1a00] sm:$0xff] }
0x24af   : > { %21366 = vmatprep.subr.mxu1 %v22578_v3 }
0x24b0   : > { %21367 = vmatpush3.msra.mxu1 %v14313_v45  ;;  %v14440_v45 = vld [vmem:[#allocation13 + $0x19f8] sm:$0xff] }
0x24b1   : > { %21368 = vmatprep.subr.mxu1 %v22578_v3 }
0x24b2   : > { %21369 = vmatpush3.msra.mxu1 %v14312_v46  ;;  %v14752_v46 = vld [vmem:[#allocation13 + $0x1ab8] sm:$0xff] }
0x24b3   : > { %21370 = vmatprep.subr.mxu1 %v22578_v3 }
0x24b4   : > { %21371 = vmatpush3.msra.mxu1 %v14311_v47  ;;  %v14439_v47 = vld [vmem:[#allocation13 + $0x19f0] sm:$0xff] }
0x24b5   : > { %21372 = vmatprep.subr.mxu1 %v22578_v3 }
0x24b6   : > { %21373 = vmatpush3.msra.mxu1 %v14310_v48  ;;  %v14751_v48 = vld [vmem:[#allocation13 + $0x1ab0] sm:$0xff] }
0x24b7   : > { %21374 = vmatprep.subr.mxu1 %v22578_v3 }
0x24b8   : > { %21375 = vmatpush3.msra.mxu1 %v14309_v49  ;;  %v14438_v49 = vld [vmem:[#allocation13 + $0x19e8] sm:$0xff] }
0x24b9   : > { %21376 = vmatprep.subr.mxu1 %v22578_v3 }
0x24ba   : > { %21377 = vmatpush3.msra.mxu1 %v14308_v50  ;;  %v14750_v50 = vld [vmem:[#allocation13 + $0x1aa8] sm:$0xff] }
0x24bb   : > { %21378 = vmatprep.subr.mxu1 %v22578_v3 }
0x24bc   : > { %21379 = vmatpush3.msra.mxu1 %v14307_v51  ;;  %v14437_v51 = vld [vmem:[#allocation13 + $0x19e0] sm:$0xff] }
0x24bd   : > { %21380 = vmatprep.subr.mxu1 %v22578_v3 }
0x24be   : > { %21381 = vmatpush3.msra.mxu1 %v14306_v52  ;;  %v14749_v52 = vld [vmem:[#allocation13 + $0x1aa0] sm:$0xff] }
0x24bf   : > { %21382 = vmatprep.subr.mxu1 %v22578_v3 }
0x24c0   : > { %21383 = vmatpush3.msra.mxu1 %v14305_v53  ;;  %v14436_v53 = vld [vmem:[#allocation13 + $0x19d8] sm:$0xff] }
0x24c1   : > { %21384 = vmatprep.subr.mxu1 %v22578_v3 }
0x24c2   : > { %21385 = vmatpush3.msra.mxu1 %v14304_v54  ;;  %v14748_v54 = vld [vmem:[#allocation13 + $0x1a98] sm:$0xff] }
0x24c3   : > { %21427 = vmatprep.subr.mxu1 %v22578_v3 }
0x252e   : > { %v13956_v56 = vpop.f32.mrf.mxu0 }
0x252f   : > { %v14179_v4 = vsel %vm545_vm0, %v13956_v56, 0.0 }
0x2530   : > { %v21332_v57 = vpop.f32.mrf.mxu0 }
0x2551   : > { %v14029_v58 = vpop.f32.mrf.mxu1 }
0x2552   : > { %v14180_v2 = vsel %vm545_vm0, %v14029_v58, 0.0 }
0x2553   : > { %v21339_v59 = vpop.f32.mrf.mxu1  ;;  %v14181_v6 = vadd.f32 %v14180_v2, %v14179_v4 }
0x2555   : > { %v14102_v0 = vpop.f32.mrf.mxu0 }
0x2556   : > { %v14182_v5 = vsel %vm545_vm0, %v14102_v0, 0.0 }
0x2557   : > { %v21346_v1 = vpop.f32.mrf.mxu0  ;;  %v14183_v7 = vadd.f32 %v14182_v5, %v14181_v6  ;;  %v14416_v5 = vld [vmem:[#allocation13 + $0x1938] sm:$0xff] }
0x2558   : > { %v14432_v6 = vld [vmem:[#allocation13 + $0x19b8] sm:$0xff] }
0x2563   : > { %v14175_v8 = vpop.f32.mrf.mxu1 }
0x2564   : > { %v14184_v9 = vsel %vm545_vm0, %v14175_v8, 0.0  ;;  %v14431_v8 = vld [vmem:[#allocation13 + $0x19b0] sm:$0xff] }
0x2565   : > { %v14185_v10 = vadd.f32 %v14184_v9, %v14183_v7  ;;  %v21353_v11 = vpop.f32.mrf.mxu1  ;;  %v14415_v7 = vld [vmem:[#allocation13 + $0x1930] sm:$0xff]  ;;  %v14414_v9 = vld [vmem:[#allocation13 + $0x1928] sm:$0xff] }
0x2566   : > { %v14413_v11 = vld [vmem:[#allocation13 + $0x1920] sm:$0xff] }
0x2567   : > { %v24678_v12 = vadd.f32 %v14185_v10, %v24337_v63  ;;  %v14214_v63 = vld [vmem:[#allocation16 + $0x248] sm:$0xff] }
0x2568   : > { %14246 = vmatprep.subr.mxu0 %v14214_v63  ;;  %v14430_v10 = vld [vmem:[#allocation13 + $0x19a8] sm:$0xff] }
0x2569   : > { %v14189_v13 = vmul.f32 %v24678_v12, %v24678_v12  ;;  %14247 = vmatpush1.msra.mxu0 %v14213_v61 }
0x256a   : > { %14248 = vmatprep.subr.mxu0 %v14212_v19 }
0x256b   : > { %v14190_v14 = vsel %vm545_vm0, %v14189_v13, 0.0  ;;  %14249 = vmatpush1.msra.mxu0 %v14211_v20  ;;  %v14412_v13 = vld [vmem:[#allocation13 + $0x1918] sm:$0xff] }
0x256c   : > { %14191 = vadd.xlane.f32.xlu1 %v14190_v14  ;;  %14250 = vmatprep.subr.mxu0 %v14210_v21  ;;  %v14428_v14 = vld [vmem:[#allocation13 + $0x1998] sm:$0xff] }
0x256d   : > { %14251 = vmatpush1.msra.mxu0 %v14209_v22  ;;  %v17580_v21 = vld [vmem:[#allocation10 + $0x5] ss:$0 sm:$0xff] }
0x256e   : > { %14252 = vmatprep.subr.mxu0 %v14208_v28 }
0x256f   : > { %14253 = vmatpush1.msra.mxu0 %v14207_v29  ;;  %v14424_v29 = vld [vmem:[#allocation13 + $0x1978] sm:$0xff] }
0x2570   : > { %14254 = vmatprep.subr.mxu0 %v14206_v30  ;;  %v14736_v30 = vld [vmem:[#allocation13 + $0x1a38] sm:$0xff] }
0x2571   : > { %14255 = vmatpush1.msra.mxu0 %v14205_v31  ;;  %v14423_v31 = vld [vmem:[#allocation13 + $0x1970] sm:$0xff] }
0x2572   : > { %21389 = vmatprep.subr.mxu0 %v22578_v3 }
0x25f5   : > { %v14192_v32 = vpop.xlane.xlu1 %14191 }
0x25f6   : > { %v14193_v33 = vmul.f32 0.015625, %v14192_v32  ;;  %v14735_v32 = vld [vmem:[#allocation13 + $0x1a30] sm:$0xff] }
0x25f8   : > { %v14194_v34 = vadd.f32 1e-06, %v14193_v33  ;;  %v14422_v33 = vld [vmem:[#allocation13 + $0x1968] sm:$0xff] }
0x25fa   : > { %22140 = vrsqrt.f32 %v14194_v34  ;;  %v14734_v34 = vld [vmem:[#allocation13 + $0x1a28] sm:$0xff] }
0x2607   : > { %v22141_v35 = vpop.eup %22140 }
0x2608   : > { %v14196_v37 = vmul.f32 %v22141_v35, %v24678_v12  ;;  %v14421_v35 = vld [vmem:[#allocation13 + $0x1960] sm:$0xff] }
0x260a   : > { %v14203_v38 = vmul.f32 %v17578_v36, %v14196_v37  ;;  %v14733_v36 = vld [vmem:[#allocation13 + $0x1a20] sm:$0xff]  ;;  %v14420_v37 = vld [vmem:[#allocation13 + $0x1958] sm:$0xff] }
0x260c   : > { %17579 = vmatmul.mubr.msk.f32.vlgmr.msra.gmra.mxu0 %vm545_vm0, %v14203_v38  ;;  %v14732_v38 = vld [vmem:[#allocation13 + $0x1a18] sm:$0xff] }
0x260d   : > { %21405 = vmatprep.mubr.msk.f32.mxu0 %vm22579_vm1, %v22578_v3  ;;  %21390 = vmatpush3.msra.mxu0 %v14416_v5  ;;  %v15054_v5 = vld [vmem:[#allocation13 + $0x1b20] sm:$0xff] }
0x260e   : > { %21391 = vmatprep.subr.mxu0 %v22578_v3 }
0x260f   : > { %21392 = vmatpush3.msra.mxu0 %v14415_v7  ;;  %v15053_v7 = vld [vmem:[#allocation13 + $0x1b18] sm:$0xff] }
0x2610   : > { %21393 = vmatprep.subr.mxu0 %v22578_v3 }
0x2611   : > { %21394 = vmatpush3.msra.mxu0 %v14414_v9  ;;  %v15052_v9 = vld [vmem:[#allocation13 + $0x1b10] sm:$0xff] }
0x2612   : > { %21395 = vmatprep.subr.mxu0 %v22578_v3 }
0x2613   : > { %21396 = vmatpush3.msra.mxu0 %v14413_v11  ;;  %v15051_v11 = vld [vmem:[#allocation13 + $0x1b08] sm:$0xff] }
0x2614   : > { %21397 = vmatprep.subr.mxu0 %v22578_v3 }
0x2615   : > { %21398 = vmatpush3.msra.mxu0 %v14412_v13  ;;  %v15050_v13 = vld [vmem:[#allocation13 + $0x1b00] sm:$0xff] }
0x2616   : > { %21399 = vmatprep.subr.mxu0 %v22578_v3 }
0x2617   : > { %21400 = vmatpush3.msra.mxu0 %v14411_v15  ;;  %v15073_v15 = vld [vmem:[#allocation13 + $0x1bb8] sm:$0xff] }
0x2618   : > { %21401 = vmatprep.subr.mxu0 %v22578_v3 }
0x2619   : > { %21402 = vmatpush3.msra.mxu0 %v14410_v17  ;;  %v15072_v17 = vld [vmem:[#allocation13 + $0x1bb0] sm:$0xff] }
0x261a   : > { %21403 = vmatprep.subr.mxu0 %v22578_v3 }
0x261b   : > { %21404 = vmatpush3.msra.mxu0 %v14409_v60  ;;  %v15071_v60 = vld [vmem:[#allocation13 + $0x1ba8] sm:$0xff] }
0x261c   : > { %21408 = vmatprep.subr.mxu0 %v22578_v3 }
0x26cc   : > { %v14290_v55 = vpop.f32.mrf.mxu0 }
0x26cd   : > { %v14295_v26 = vsub.f32 0.0, %v14290_v55 }
0x26ce   : > { %v14292_v57 = vpop.f32.mrf.mxu0 }
0x26cf   : > { %v14296_v23 = vmul.f32 1.442695, %v14295_v26  ;;  %v14747_v26 = vld [vmem:[#allocation13 + $0x1a90] sm:$0xff] }
0x26d1   : > { %22142 = vpow2.f32 %v14296_v23  ;;  %v14434_v23 = vld [vmem:[#allocation13 + $0x19c8] sm:$0xff] }
0x26de   : > { %v22143_v24 = vpop.eup %22142 }
0x26df   : > { %v14298_v25 = vadd.f32 1.0, %v22143_v24  ;;  %v14746_v24 = vld [vmem:[#allocation13 + $0x1a88] sm:$0xff] }
0x26e1   : > { %22144 = vrcp.f32 %v14298_v25  ;;  %v14433_v25 = vld [vmem:[#allocation13 + $0x19c0] sm:$0xff] }
0x26ee   : > { %v22145_v27 = vpop.eup %22144 }
0x26ef   : > { %v14301_v56 = vmul.f32 %v22145_v27, %v14290_v55  ;;  %v14435_v55 = vld [vmem:[#allocation13 + $0x19d0] sm:$0xff]  ;;  %v14745_v27 = vld [vmem:[#allocation13 + $0x1a80] sm:$0xff] }
0x26f1   : > { %v14302_v58 = vmul.f32 %v14301_v56, %v14292_v57  ;;  %v14744_v56 = vld [vmem:[#allocation13 + $0x1a78] sm:$0xff] }
0x26f2   : > { %v15057_v57 = vld [vmem:[#allocation13 + $0x1b38] sm:$0xff] }
0x26f3   : > { %21387 = vmatmul.mubr.f32.vlgmr.msra.gmra.mxu1 %v14302_v58  ;;  %v14743_v58 = vld [vmem:[#allocation13 + $0x1a70] sm:$0xff] }
0x26f4   : > { %21443 = vmatprep.mubr.msk.f32.mxu1 %vm22579_vm1, %v22578_v3  ;;  %21428 = vmatpush3.msra.mxu1 %v14432_v6  ;;  %v14740_v6 = vld [vmem:[#allocation13 + $0x1a58] sm:$0xff] }
0x26f5   : > { %21429 = vmatprep.subr.mxu1 %v22578_v3 }
0x26f6   : > { %21430 = vmatpush3.msra.mxu1 %v14431_v8  ;;  %v14739_v8 = vld [vmem:[#allocation13 + $0x1a50] sm:$0xff] }
0x26f7   : > { %21431 = vmatprep.subr.mxu1 %v22578_v3 }
0x26f8   : > { %21432 = vmatpush3.msra.mxu1 %v14430_v10  ;;  %v14738_v10 = vld [vmem:[#allocation13 + $0x1a48] sm:$0xff] }
0x26f9   : > { %21433 = vmatprep.subr.mxu1 %v22578_v3 }
0x27b3   : > { %v14386_v59 = vpop.f32.mrf.mxu1 }
0x27b4   : > { %v24707_v0 = vadd.f32 %v14386_v59, %v24678_v12  ;;  %v14429_v12 = vld [vmem:[#allocation13 + $0x19a0] sm:$0xff]  ;;  %v15056_v59 = vld [vmem:[#allocation13 + $0x1b30] sm:$0xff] }
0x27b5   : > { %v21388_v1 = vpop.f32.mrf.mxu1  ;;  %21434 = vmatpush3.msra.mxu1 %v14429_v12  ;;  %v14737_v12 = vld [vmem:[#allocation13 + $0x1a40] sm:$0xff] }
0x27b6   : > { %v14393_v2 = vmul.f32 %v24707_v0, %v24707_v0  ;;  %21435 = vmatprep.subr.mxu1 %v22578_v3  ;;  %v14742_v1 = vld [vmem:[#allocation13 + $0x1a68] sm:$0xff] }
0x27b7   : > { %21436 = vmatpush3.msra.mxu1 %v14428_v14  ;;  %v14760_v14 = vld [vmem:[#allocation13 + $0x1af8] sm:$0xff] }
0x27b8   : > { %v14394_v4 = vsel %vm545_vm0, %v14393_v2, 0.0  ;;  %21437 = vmatprep.subr.mxu1 %v22578_v3  ;;  %v15055_v2 = vld [vmem:[#allocation13 + $0x1b28] sm:$0xff] }
0x27b9   : > { %14395 = vadd.xlane.f32.xlu0 %v14394_v4  ;;  %21438 = vmatpush3.msra.mxu1 %v14427_v16  ;;  %v14741_v4 = vld [vmem:[#allocation13 + $0x1a60] sm:$0xff]  ;;  %v14759_v16 = vld [vmem:[#allocation13 + $0x1af0] sm:$0xff] }
0x27ba   : > { %21439 = vmatprep.subr.mxu1 %v22578_v3 }
0x27bb   : > { %21440 = vmatpush3.msra.mxu1 %v14426_v18  ;;  %v14758_v18 = vld [vmem:[#allocation13 + $0x1ae8] sm:$0xff] }
0x27bc   : > { %21441 = vmatprep.subr.mxu1 %v22578_v3 }
0x27bd   : > { %21442 = vmatpush3.msra.mxu1 %v14425_v62  ;;  %v14757_v62 = vld [vmem:[#allocation13 + $0x1ae0] sm:$0xff] }
0x27be   : > { %21465 = vmatprep.subr.mxu1 %v22578_v3 }
0x2842   : > { %v14396_v63 = vpop.xlane.xlu0 %14395 }
0x2843   : > { %v14397_v61 = vmul.f32 0.015625, %v14396_v63  ;;  %v15070_v63 = vld [vmem:[#allocation13 + $0x1ba0] sm:$0xff] }
0x2845   : > { %v14398_v19 = vadd.f32 1e-06, %v14397_v61  ;;  %v14756_v61 = vld [vmem:[#allocation13 + $0x1ad8] sm:$0xff] }
0x2847   : > { %22146 = vrsqrt.f32 %v14398_v19  ;;  %v15069_v19 = vld [vmem:[#allocation13 + $0x1b98] sm:$0xff] }
0x2854   : > { %v22147_v20 = vpop.eup %22146 }
0x2855   : > { %v14400_v22 = vmul.f32 %v22147_v20, %v24707_v0  ;;  %v14755_v20 = vld [vmem:[#allocation13 + $0x1ad0] sm:$0xff] }
0x2857   : > { %v24729_v28 = vmul.f32 %v17580_v21, %v14400_v22  ;;  %v15068_v21 = vld [vmem:[#allocation13 + $0x1b90] sm:$0xff]  ;;  %v14754_v22 = vld [vmem:[#allocation13 + $0x1ac8] sm:$0xff] }
0x2859   : > { %21406 = vmatmul.mubr.msk.f32.vlgmr.msra.gmra.mxu0 %vm545_vm0, %v24729_v28  ;;  %21444 = vmatmul.mubr.msk.f32.vlgmr.msra.gmra.mxu1 %vm545_vm0, %v24729_v28 }
0x285a   : > { %21409 = vmatpush3.msra.mxu0 %v14424_v29  ;;  %21466 = vmatpush3.msra.mxu1 %v14736_v30  ;;  %v15067_v29 = vld [vmem:[#allocation13 + $0x1b88] sm:$0xff]  ;;  %v14753_v30 = vld [vmem:[#allocation13 + $0x1ac0] sm:$0xff] }
0x285b   : > { %21410 = vmatprep.subr.mxu0 %v22578_v3  ;;  %21467 = vmatprep.subr.mxu1 %v22578_v3 }
0x285c   : > { %21411 = vmatpush3.msra.mxu0 %v14423_v31  ;;  %21468 = vmatpush3.msra.mxu1 %v14735_v32  ;;  %v15066_v31 = vld [vmem:[#allocation13 + $0x1b80] sm:$0xff]  ;;  %v15065_v32 = vld [vmem:[#allocation13 + $0x1b78] sm:$0xff] }
0x285d   : > { %21412 = vmatprep.subr.mxu0 %v22578_v3  ;;  %21469 = vmatprep.subr.mxu1 %v22578_v3 }
0x285e   : > { %21413 = vmatpush3.msra.mxu0 %v14422_v33  ;;  %21470 = vmatpush3.msra.mxu1 %v14734_v34  ;;  %v15374_v33 = vld [vmem:[#allocation13 + $0x1c38] sm:$0xff]  ;;  %v15064_v34 = vld [vmem:[#allocation13 + $0x1b70] sm:$0xff] }
0x285f   : > { %21414 = vmatprep.subr.mxu0 %v22578_v3  ;;  %21471 = vmatprep.subr.mxu1 %v22578_v3 }
0x2860   : > { %21415 = vmatpush3.msra.mxu0 %v14421_v35  ;;  %21472 = vmatpush3.msra.mxu1 %v14733_v36  ;;  %v15373_v35 = vld [vmem:[#allocation13 + $0x1c30] sm:$0xff]  ;;  %v15063_v36 = vld [vmem:[#allocation13 + $0x1b68] sm:$0xff] }
0x2861   : > { %21416 = vmatprep.subr.mxu0 %v22578_v3  ;;  %21473 = vmatprep.subr.mxu1 %v22578_v3 }
0x2862   : > { %21417 = vmatpush3.msra.mxu0 %v14420_v37  ;;  %21474 = vmatpush3.msra.mxu1 %v14732_v38  ;;  %v15372_v37 = vld [vmem:[#allocation13 + $0x1c28] sm:$0xff]  ;;  %v15062_v38 = vld [vmem:[#allocation13 + $0x1b60] sm:$0xff] }
0x2863   : > { %21418 = vmatprep.subr.mxu0 %v22578_v3  ;;  %21475 = vmatprep.subr.mxu1 %v22578_v3 }
0x2864   : > { %21419 = vmatpush3.msra.mxu0 %v14419_v39  ;;  %21476 = vmatpush3.msra.mxu1 %v14731_v40  ;;  %v15371_v39 = vld [vmem:[#allocation13 + $0x1c20] sm:$0xff]  ;;  %v15061_v40 = vld [vmem:[#allocation13 + $0x1b58] sm:$0xff] }
0x2865   : > { %21420 = vmatprep.subr.mxu0 %v22578_v3  ;;  %21477 = vmatprep.subr.mxu1 %v22578_v3 }
0x2866   : > { %21421 = vmatpush3.msra.mxu0 %v14418_v41  ;;  %21478 = vmatpush3.msra.mxu1 %v14730_v42  ;;  %v15370_v41 = vld [vmem:[#allocation13 + $0x1c18] sm:$0xff]  ;;  %v15060_v42 = vld [vmem:[#allocation13 + $0x1b50] sm:$0xff] }
0x2867   : > { %21422 = vmatprep.subr.mxu0 %v22578_v3  ;;  %21479 = vmatprep.subr.mxu1 %v22578_v3 }
0x2868   : > { %21423 = vmatpush3.msra.mxu0 %v14417_v43  ;;  %21424 = vmatprep.mubr.msk.f32.mxu0 %vm22579_vm1, %v22578_v3  ;;  %v15369_v43 = vld [vmem:[#allocation13 + $0x1c10] sm:$0xff] }
0x2869   : > { %21480 = vmatpush3.msra.mxu1 %v14729_v44  ;;  %21481 = vmatprep.mubr.msk.f32.mxu1 %vm22579_vm1, %v22578_v3  ;;  %v15059_v44 = vld [vmem:[#allocation13 + $0x1b48] sm:$0xff] }
0x286a   : > { %21425 = vmatmul.mubr.msk.f32.vlgmr.msra.gmra.mxu0 %vm545_vm0, %v24729_v28  ;;  %21446 = vmatprep.subr.mxu0 %v22578_v3 }
0x286b   : > { %21482 = vmatmul.mubr.msk.f32.vlgmr.msra.gmra.mxu1 %vm545_vm0, %v24729_v28  ;;  %21503 = vmatprep.subr.mxu1 %v22578_v3 }
0x286c   : > { %21447 = vmatpush3.msra.mxu0 %v14440_v45  ;;  %21504 = vmatpush3.msra.mxu1 %v14752_v46  ;;  %v15368_v45 = vld [vmem:[#allocation13 + $0x1c08] sm:$0xff]  ;;  %v15058_v46 = vld [vmem:[#allocation13 + $0x1b40] sm:$0xff] }
0x286d   : > { %21448 = vmatprep.subr.mxu0 %v22578_v3  ;;  %21505 = vmatprep.subr.mxu1 %v22578_v3 }
0x286e   : > { %21449 = vmatpush3.msra.mxu0 %v14439_v47  ;;  %21506 = vmatpush3.msra.mxu1 %v14751_v48  ;;  %v15367_v47 = vld [vmem:[#allocation13 + $0x1c00] sm:$0xff]  ;;  %v15081_v48 = vld [vmem:[#allocation13 + $0x1bf8] sm:$0xff] }
0x286f   : > { %21450 = vmatprep.subr.mxu0 %v22578_v3  ;;  %21507 = vmatprep.subr.mxu1 %v22578_v3 }
0x2870   : > { %21451 = vmatpush3.msra.mxu0 %v14438_v49  ;;  %21508 = vmatpush3.msra.mxu1 %v14750_v50  ;;  %v15390_v49 = vld [vmem:[#allocation13 + $0x1cb8] sm:$0xff]  ;;  %v15080_v50 = vld [vmem:[#allocation13 + $0x1bf0] sm:$0xff] }
0x2871   : > { %21452 = vmatprep.subr.mxu0 %v22578_v3  ;;  %21509 = vmatprep.subr.mxu1 %v22578_v3 }
0x2872   : > { %21453 = vmatpush3.msra.mxu0 %v14437_v51  ;;  %21510 = vmatpush3.msra.mxu1 %v14749_v52  ;;  %v15389_v51 = vld [vmem:[#allocation13 + $0x1cb0] sm:$0xff]  ;;  %v15079_v52 = vld [vmem:[#allocation13 + $0x1be8] sm:$0xff] }
0x2873   : > { %21454 = vmatprep.subr.mxu0 %v22578_v3  ;;  %21511 = vmatprep.subr.mxu1 %v22578_v3 }
0x2874   : > { %21455 = vmatpush3.msra.mxu0 %v14436_v53  ;;  %21512 = vmatpush3.msra.mxu1 %v14748_v54  ;;  %v15388_v53 = vld [vmem:[#allocation13 + $0x1ca8] sm:$0xff]  ;;  %v15078_v54 = vld [vmem:[#allocation13 + $0x1be0] sm:$0xff] }
0x2875   : > { %21456 = vmatprep.subr.mxu0 %v22578_v3  ;;  %21513 = vmatprep.subr.mxu1 %v22578_v3 }
0x2876   : > { %21457 = vmatpush3.msra.mxu0 %v14435_v55  ;;  %21514 = vmatpush3.msra.mxu1 %v14747_v26  ;;  %v15387_v55 = vld [vmem:[#allocation13 + $0x1ca0] sm:$0xff]  ;;  %v15077_v26 = vld [vmem:[#allocation13 + $0x1bd8] sm:$0xff] }
0x2877   : > { %21458 = vmatprep.subr.mxu0 %v22578_v3  ;;  %21515 = vmatprep.subr.mxu1 %v22578_v3 }
0x2878   : > { %21459 = vmatpush3.msra.mxu0 %v14434_v23  ;;  %21516 = vmatpush3.msra.mxu1 %v14746_v24  ;;  %v15386_v23 = vld [vmem:[#allocation13 + $0x1c98] sm:$0xff]  ;;  %v15076_v24 = vld [vmem:[#allocation13 + $0x1bd0] sm:$0xff] }
0x2879   : > { %21460 = vmatprep.subr.mxu0 %v22578_v3  ;;  %21517 = vmatprep.subr.mxu1 %v22578_v3 }
0x287a   : > { %21461 = vmatpush3.msra.mxu0 %v14433_v25  ;;  %21462 = vmatprep.mubr.msk.f32.mxu0 %vm22579_vm1, %v22578_v3  ;;  %v15385_v25 = vld [vmem:[#allocation13 + $0x1c90] sm:$0xff] }
0x287b   : > { %21518 = vmatpush3.msra.mxu1 %v14745_v27  ;;  %21519 = vmatprep.mubr.msk.f32.mxu1 %vm22579_vm1, %v22578_v3  ;;  %v15075_v27 = vld [vmem:[#allocation13 + $0x1bc8] sm:$0xff] }
0x287c   : > { %21463 = vmatmul.mubr.msk.f32.vlgmr.msra.gmra.mxu0 %vm545_vm0, %v24729_v28  ;;  %21484 = vmatprep.subr.mxu0 %v22578_v3 }
0x287d   : > { %21520 = vmatmul.mubr.msk.f32.vlgmr.msra.gmra.mxu1 %vm545_vm0, %v24729_v28  ;;  %21541 = vmatprep.subr.mxu1 %v22578_v3 }
0x287e   : > { %21485 = vmatpush3.msra.mxu0 %v14744_v56  ;;  %21542 = vmatpush3.msra.mxu1 %v15057_v57  ;;  %v15384_v56 = vld [vmem:[#allocation13 + $0x1c88] sm:$0xff]  ;;  %v15074_v57 = vld [vmem:[#allocation13 + $0x1bc0] sm:$0xff] }
0x287f   : > { %21486 = vmatprep.subr.mxu0 %v22578_v3  ;;  %21543 = vmatprep.subr.mxu1 %v22578_v3 }
0x2880   : > { %21487 = vmatpush3.msra.mxu0 %v14743_v58  ;;  %21544 = vmatpush3.msra.mxu1 %v15056_v59  ;;  %v15383_v58 = vld [vmem:[#allocation13 + $0x1c80] sm:$0xff]  ;;  %v15382_v59 = vld [vmem:[#allocation13 + $0x1c78] sm:$0xff] }
0x2881   : > { %21488 = vmatprep.subr.mxu0 %v22578_v3  ;;  %21545 = vmatprep.subr.mxu1 %v22578_v3 }
0x2882   : > { %21489 = vmatpush3.msra.mxu0 %v14742_v1  ;;  %21546 = vmatpush3.msra.mxu1 %v15055_v2  ;;  %v15695_v1 = vld [vmem:[#allocation13 + $0x1d38] sm:$0xff]  ;;  %v15381_v2 = vld [vmem:[#allocation13 + $0x1c70] sm:$0xff] }
0x2883   : > { %21490 = vmatprep.subr.mxu0 %v22578_v3  ;;  %21547 = vmatprep.subr.mxu1 %v22578_v3 }
0x2884   : > { %21491 = vmatpush3.msra.mxu0 %v14741_v4  ;;  %21548 = vmatpush3.msra.mxu1 %v15054_v5  ;;  %v15694_v4 = vld [vmem:[#allocation13 + $0x1d30] sm:$0xff]  ;;  %v15380_v5 = vld [vmem:[#allocation13 + $0x1c68] sm:$0xff] }
0x2885   : > { %21492 = vmatprep.subr.mxu0 %v22578_v3  ;;  %21549 = vmatprep.subr.mxu1 %v22578_v3 }
0x2886   : > { %21493 = vmatpush3.msra.mxu0 %v14740_v6  ;;  %21550 = vmatpush3.msra.mxu1 %v15053_v7  ;;  %v15693_v6 = vld [vmem:[#allocation13 + $0x1d28] sm:$0xff]  ;;  %v15379_v7 = vld [vmem:[#allocation13 + $0x1c60] sm:$0xff] }
0x2887   : > { %21494 = vmatprep.subr.mxu0 %v22578_v3  ;;  %21551 = vmatprep.subr.mxu1 %v22578_v3 }
0x2888   : > { %21495 = vmatpush3.msra.mxu0 %v14739_v8  ;;  %21552 = vmatpush3.msra.mxu1 %v15052_v9  ;;  %v15692_v8 = vld [vmem:[#allocation13 + $0x1d20] sm:$0xff]  ;;  %v15378_v9 = vld [vmem:[#allocation13 + $0x1c58] sm:$0xff] }
0x2889   : > { %21496 = vmatprep.subr.mxu0 %v22578_v3  ;;  %21553 = vmatprep.subr.mxu1 %v22578_v3 }
0x288a   : > { %21497 = vmatpush3.msra.mxu0 %v14738_v10  ;;  %21554 = vmatpush3.msra.mxu1 %v15051_v11  ;;  %v15691_v10 = vld [vmem:[#allocation13 + $0x1d18] sm:$0xff]  ;;  %v15377_v11 = vld [vmem:[#allocation13 + $0x1c50] sm:$0xff] }
0x288b   : > { %21498 = vmatprep.subr.mxu0 %v22578_v3  ;;  %21555 = vmatprep.subr.mxu1 %v22578_v3 }
0x288c   : > { %21499 = vmatpush3.msra.mxu0 %v14737_v12  ;;  %21500 = vmatprep.mubr.msk.f32.mxu0 %vm22579_vm1, %v22578_v3  ;;  %v15690_v12 = vld [vmem:[#allocation13 + $0x1d10] sm:$0xff] }
0x288d   : > { %21556 = vmatpush3.msra.mxu1 %v15050_v13  ;;  %21557 = vmatprep.mubr.msk.f32.mxu1 %vm22579_vm1, %v22578_v3  ;;  %v15376_v13 = vld [vmem:[#allocation13 + $0x1c48] sm:$0xff] }
0x288e   : > { %21501 = vmatmul.mubr.msk.f32.vlgmr.msra.gmra.mxu0 %vm545_vm0, %v24729_v28  ;;  %21522 = vmatprep.subr.mxu0 %v22578_v3 }
0x288f   : > { %21558 = vmatmul.mubr.msk.f32.vlgmr.msra.gmra.mxu1 %vm545_vm0, %v24729_v28  ;;  %21579 = vmatprep.subr.mxu1 %v22578_v3 }
0x2890   : > { %21523 = vmatpush3.msra.mxu0 %v14760_v14  ;;  %21580 = vmatpush3.msra.mxu1 %v15073_v15  ;;  %v15689_v14 = vld [vmem:[#allocation13 + $0x1d08] sm:$0xff]  ;;  %v15375_v15 = vld [vmem:[#allocation13 + $0x1c40] sm:$0xff] }
0x2891   : > { %21524 = vmatprep.subr.mxu0 %v22578_v3  ;;  %21581 = vmatprep.subr.mxu1 %v22578_v3 }
0x2892   : > { %21525 = vmatpush3.msra.mxu0 %v14759_v16  ;;  %21582 = vmatpush3.msra.mxu1 %v15072_v17  ;;  %v15688_v16 = vld [vmem:[#allocation13 + $0x1d00] sm:$0xff]  ;;  %v15398_v17 = vld [vmem:[#allocation13 + $0x1cf8] sm:$0xff] }
0x2893   : > { %21526 = vmatprep.subr.mxu0 %v22578_v3  ;;  %21583 = vmatprep.subr.mxu1 %v22578_v3 }
0x2894   : > { %21527 = vmatpush3.msra.mxu0 %v14758_v18  ;;  %21584 = vmatpush3.msra.mxu1 %v15071_v60  ;;  %v15711_v18 = vld [vmem:[#allocation13 + $0x1db8] sm:$0xff]  ;;  %v15397_v60 = vld [vmem:[#allocation13 + $0x1cf0] sm:$0xff] }
0x2895   : > { %21528 = vmatprep.subr.mxu0 %v22578_v3  ;;  %21585 = vmatprep.subr.mxu1 %v22578_v3 }
0x2896   : > { %21529 = vmatpush3.msra.mxu0 %v14757_v62  ;;  %21586 = vmatpush3.msra.mxu1 %v15070_v63  ;;  %v15710_v62 = vld [vmem:[#allocation13 + $0x1db0] sm:$0xff]  ;;  %v15396_v63 = vld [vmem:[#allocation13 + $0x1ce8] sm:$0xff] }
0x2897   : > { %21530 = vmatprep.subr.mxu0 %v22578_v3  ;;  %21587 = vmatprep.subr.mxu1 %v22578_v3 }
0x2898   : > { %21531 = vmatpush3.msra.mxu0 %v14756_v61  ;;  %21588 = vmatpush3.msra.mxu1 %v15069_v19  ;;  %v15709_v61 = vld [vmem:[#allocation13 + $0x1da8] sm:$0xff]  ;;  %v15395_v19 = vld [vmem:[#allocation13 + $0x1ce0] sm:$0xff] }
0x2899   : > { %21532 = vmatprep.subr.mxu0 %v22578_v3  ;;  %21589 = vmatprep.subr.mxu1 %v22578_v3 }
0x289a   : > { %21533 = vmatpush3.msra.mxu0 %v14755_v20  ;;  %21590 = vmatpush3.msra.mxu1 %v15068_v21  ;;  %v15708_v20 = vld [vmem:[#allocation13 + $0x1da0] sm:$0xff]  ;;  %v15394_v21 = vld [vmem:[#allocation13 + $0x1cd8] sm:$0xff] }
0x289b   : > { %21534 = vmatprep.subr.mxu0 %v22578_v3  ;;  %21591 = vmatprep.subr.mxu1 %v22578_v3 }
0x289c   : > { %21535 = vmatpush3.msra.mxu0 %v14754_v22  ;;  %21592 = vmatpush3.msra.mxu1 %v15067_v29  ;;  %v15707_v22 = vld [vmem:[#allocation13 + $0x1d98] sm:$0xff]  ;;  %v15393_v29 = vld [vmem:[#allocation13 + $0x1cd0] sm:$0xff] }
0x289d   : > { %21536 = vmatprep.subr.mxu0 %v22578_v3  ;;  %21593 = vmatprep.subr.mxu1 %v22578_v3 }
0x289e   : > { %21537 = vmatpush3.msra.mxu0 %v14753_v30  ;;  %21538 = vmatprep.mubr.msk.f32.mxu0 %vm22579_vm1, %v22578_v3  ;;  %v15706_v30 = vld [vmem:[#allocation13 + $0x1d90] sm:$0xff] }
0x289f   : > { %21594 = vmatpush3.msra.mxu1 %v15066_v31  ;;  %21595 = vmatprep.mubr.msk.f32.mxu1 %vm22579_vm1, %v22578_v3  ;;  %v15392_v31 = vld [vmem:[#allocation13 + $0x1cc8] sm:$0xff] }
0x28a0   : > { %21539 = vmatmul.mubr.msk.f32.vlgmr.msra.gmra.mxu0 %vm545_vm0, %v24729_v28  ;;  %21560 = vmatprep.subr.mxu0 %v22578_v3 }
0x28a1   : > { %21596 = vmatmul.mubr.msk.f32.vlgmr.msra.gmra.mxu1 %vm545_vm0, %v24729_v28  ;;  %21617 = vmatprep.subr.mxu1 %v22578_v3 }
0x28a2   : > { %21561 = vmatpush3.msra.mxu0 %v15065_v32  ;;  %21618 = vmatpush3.msra.mxu1 %v15374_v33  ;;  %v15705_v32 = vld [vmem:[#allocation13 + $0x1d88] sm:$0xff]  ;;  %v15391_v33 = vld [vmem:[#allocation13 + $0x1cc0] sm:$0xff] }
0x28a3   : > { %21562 = vmatprep.subr.mxu0 %v22578_v3  ;;  %21619 = vmatprep.subr.mxu1 %v22578_v3 }
0x28a4   : > { %21563 = vmatpush3.msra.mxu0 %v15064_v34  ;;  %21620 = vmatpush3.msra.mxu1 %v15373_v35  ;;  %v15704_v34 = vld [vmem:[#allocation13 + $0x1d80] sm:$0xff]  ;;  %v15703_v35 = vld [vmem:[#allocation13 + $0x1d78] sm:$0xff] }
0x28a5   : > { %21564 = vmatprep.subr.mxu0 %v22578_v3  ;;  %21621 = vmatprep.subr.mxu1 %v22578_v3 }
0x28a6   : > { %21565 = vmatpush3.msra.mxu0 %v15063_v36  ;;  %21622 = vmatpush3.msra.mxu1 %v15372_v37  ;;  %v15702_v36 = vld [vmem:[#allocation13 + $0x1d70] sm:$0xff]  ;;  %v15701_v37 = vld [vmem:[#allocation13 + $0x1d68] sm:$0xff] }
0x28a7   : > { %21566 = vmatprep.subr.mxu0 %v22578_v3  ;;  %21623 = vmatprep.subr.mxu1 %v22578_v3 }
0x28a8   : > { %21567 = vmatpush3.msra.mxu0 %v15062_v38  ;;  %21624 = vmatpush3.msra.mxu1 %v15371_v39  ;;  %v15700_v38 = vld [vmem:[#allocation13 + $0x1d60] sm:$0xff]  ;;  %v15699_v39 = vld [vmem:[#allocation13 + $0x1d58] sm:$0xff] }
0x28a9   : > { %21568 = vmatprep.subr.mxu0 %v22578_v3  ;;  %21625 = vmatprep.subr.mxu1 %v22578_v3 }
0x28aa   : > { %21569 = vmatpush3.msra.mxu0 %v15061_v40  ;;  %21626 = vmatpush3.msra.mxu1 %v15370_v41  ;;  %v15698_v40 = vld [vmem:[#allocation13 + $0x1d50] sm:$0xff]  ;;  %v15697_v41 = vld [vmem:[#allocation13 + $0x1d48] sm:$0xff] }
0x28ab   : > { %21570 = vmatprep.subr.mxu0 %v22578_v3  ;;  %21627 = vmatprep.subr.mxu1 %v22578_v3 }
0x28ac   : > { %21571 = vmatpush3.msra.mxu0 %v15060_v42  ;;  %21628 = vmatpush3.msra.mxu1 %v15369_v43  ;;  %v15696_v42 = vld [vmem:[#allocation13 + $0x1d40] sm:$0xff]  ;;  %v15719_v43 = vld [vmem:[#allocation13 + $0x1df8] sm:$0xff] }
0x28ad   : > { %21572 = vmatprep.subr.mxu0 %v22578_v3  ;;  %21629 = vmatprep.subr.mxu1 %v22578_v3 }
0x28ae   : > { %21573 = vmatpush3.msra.mxu0 %v15059_v44  ;;  %21630 = vmatpush3.msra.mxu1 %v15368_v45  ;;  %v15718_v44 = vld [vmem:[#allocation13 + $0x1df0] sm:$0xff]  ;;  %v15717_v45 = vld [vmem:[#allocation13 + $0x1de8] sm:$0xff] }
0x28af   : > { %21574 = vmatprep.subr.mxu0 %v22578_v3  ;;  %21631 = vmatprep.subr.mxu1 %v22578_v3 }
0x28b0   : > { %21575 = vmatpush3.msra.mxu0 %v15058_v46  ;;  %21576 = vmatprep.mubr.msk.f32.mxu0 %vm22579_vm1, %v22578_v3  ;;  %v15716_v46 = vld [vmem:[#allocation13 + $0x1de0] sm:$0xff] }
0x28b1   : > { %21632 = vmatpush3.msra.mxu1 %v15367_v47  ;;  %21633 = vmatprep.mubr.msk.f32.mxu1 %vm22579_vm1, %v22578_v3  ;;  %v15715_v47 = vld [vmem:[#allocation13 + $0x1dd8] sm:$0xff] }
0x28b2   : > { %21577 = vmatmul.mubr.msk.f32.vlgmr.msra.gmra.mxu0 %vm545_vm0, %v24729_v28  ;;  %21598 = vmatprep.subr.mxu0 %v22578_v3 }
0x28b3   : > { %21634 = vmatmul.mubr.msk.f32.vlgmr.msra.gmra.mxu1 %vm545_vm0, %v24729_v28  ;;  %21655 = vmatprep.subr.mxu1 %v22578_v3 }
0x28b4   : > { %21599 = vmatpush3.msra.mxu0 %v15081_v48  ;;  %21656 = vmatpush3.msra.mxu1 %v15390_v49  ;;  %v15714_v48 = vld [vmem:[#allocation13 + $0x1dd0] sm:$0xff]  ;;  %v15713_v49 = vld [vmem:[#allocation13 + $0x1dc8] sm:$0xff] }
0x28b5   : > { %21600 = vmatprep.subr.mxu0 %v22578_v3  ;;  %21657 = vmatprep.subr.mxu1 %v22578_v3 }
0x28b6   : > { %21601 = vmatpush3.msra.mxu0 %v15080_v50  ;;  %21658 = vmatpush3.msra.mxu1 %v15389_v51  ;;  %v15712_v50 = vld [vmem:[#allocation13 + $0x1dc0] sm:$0xff] }
0x28b7   : > { %21602 = vmatprep.subr.mxu0 %v22578_v3  ;;  %21659 = vmatprep.subr.mxu1 %v22578_v3 }
0x28b8   : > { %21603 = vmatpush3.msra.mxu0 %v15079_v52  ;;  %21660 = vmatpush3.msra.mxu1 %v15388_v53 }
0x28b9   : > { %21604 = vmatprep.subr.mxu0 %v22578_v3  ;;  %21661 = vmatprep.subr.mxu1 %v22578_v3 }
0x28ba   : > { %21605 = vmatpush3.msra.mxu0 %v15078_v54  ;;  %21662 = vmatpush3.msra.mxu1 %v15387_v55 }
0x28bb   : > { %21606 = vmatprep.subr.mxu0 %v22578_v3  ;;  %21663 = vmatprep.subr.mxu1 %v22578_v3 }
0x28bc   : > { %21607 = vmatpush3.msra.mxu0 %v15077_v26  ;;  %21664 = vmatpush3.msra.mxu1 %v15386_v23  ;;  %v24955_v23 = vld [vmem:[#allocation5] sm:$0xff] }
0x28bd   : > { %21608 = vmatprep.subr.mxu0 %v22578_v3  ;;  %21665 = vmatprep.subr.mxu1 %v22578_v3 }
0x28be   : > { %21609 = vmatpush3.msra.mxu0 %v15076_v24  ;;  %21666 = vmatpush3.msra.mxu1 %v15385_v25  ;;  %v24958_v25 = vld [vmem:[#allocation7] sm:$0xff] }
0x28bf   : > { %21610 = vmatprep.subr.mxu0 %v22578_v3  ;;  %21667 = vmatprep.subr.mxu1 %v22578_v3 }
0x28c0   : > { %21611 = vmatpush3.msra.mxu0 %v15075_v27  ;;  %21668 = vmatpush3.msra.mxu1 %v15384_v56 }
0x28c1   : > { %21612 = vmatprep.subr.mxu0 %v22578_v3  ;;  %21669 = vmatprep.subr.mxu1 %v22578_v3 }
0x28c2   : > { %21613 = vmatpush3.msra.mxu0 %v15074_v57  ;;  %21614 = vmatprep.mubr.msk.f32.mxu0 %vm22579_vm1, %v22578_v3 }
0x28c3   : > { %21670 = vmatpush3.msra.mxu1 %v15383_v58  ;;  %21671 = vmatprep.mubr.msk.f32.mxu1 %vm22579_vm1, %v22578_v3 }
0x28c4   : > { %21615 = vmatmul.mubr.msk.f32.vlgmr.msra.gmra.mxu0 %vm545_vm0, %v24729_v28  ;;  %21636 = vmatprep.subr.mxu0 %v22578_v3 }
0x28c5   : > { %21672 = vmatmul.mubr.msk.f32.vlgmr.msra.gmra.mxu1 %vm545_vm0, %v24729_v28  ;;  %21693 = vmatprep.subr.mxu1 %v22578_v3 }
0x28c6   : > { %21637 = vmatpush3.msra.mxu0 %v15382_v59  ;;  %21694 = vmatpush3.msra.mxu1 %v15695_v1 }
0x28c7   : > { %21638 = vmatprep.subr.mxu0 %v22578_v3  ;;  %21695 = vmatprep.subr.mxu1 %v22578_v3 }
0x28c8   : > { %21639 = vmatpush3.msra.mxu0 %v15381_v2  ;;  %21696 = vmatpush3.msra.mxu1 %v15694_v4 }
0x28c9   : > { %21640 = vmatprep.subr.mxu0 %v22578_v3  ;;  %21697 = vmatprep.subr.mxu1 %v22578_v3 }
0x28ca   : > { %21641 = vmatpush3.msra.mxu0 %v15380_v5  ;;  %21698 = vmatpush3.msra.mxu1 %v15693_v6 }
0x28cb   : > { %21642 = vmatprep.subr.mxu0 %v22578_v3  ;;  %21699 = vmatprep.subr.mxu1 %v22578_v3 }
0x28cc   : > { %21643 = vmatpush3.msra.mxu0 %v15379_v7  ;;  %21700 = vmatpush3.msra.mxu1 %v15692_v8 }
0x28cd   : > { %21644 = vmatprep.subr.mxu0 %v22578_v3  ;;  %21701 = vmatprep.subr.mxu1 %v22578_v3 }
0x28ce   : > { %21645 = vmatpush3.msra.mxu0 %v15378_v9  ;;  %21702 = vmatpush3.msra.mxu1 %v15691_v10 }
0x28cf   : > { %21646 = vmatprep.subr.mxu0 %v22578_v3  ;;  %21703 = vmatprep.subr.mxu1 %v22578_v3 }
0x28d0   : > { %21647 = vmatpush3.msra.mxu0 %v15377_v11  ;;  %21704 = vmatpush3.msra.mxu1 %v15690_v12 }
0x28d1   : > { %21648 = vmatprep.subr.mxu0 %v22578_v3  ;;  %21705 = vmatprep.subr.mxu1 %v22578_v3 }
0x28d2   : > { %21649 = vmatpush3.msra.mxu0 %v15376_v13  ;;  %21706 = vmatpush3.msra.mxu1 %v15689_v14 }
0x28d3   : > { %21650 = vmatprep.subr.mxu0 %v22578_v3  ;;  %21707 = vmatprep.subr.mxu1 %v22578_v3 }
0x28d4   : > { %21651 = vmatpush3.msra.mxu0 %v15375_v15  ;;  %21652 = vmatprep.mubr.msk.f32.mxu0 %vm22579_vm1, %v22578_v3 }
0x28d5   : > { %21708 = vmatpush3.msra.mxu1 %v15688_v16  ;;  %21709 = vmatprep.mubr.msk.f32.mxu1 %vm22579_vm1, %v22578_v3 }
0x28d6   : > { %21653 = vmatmul.mubr.msk.f32.vlgmr.msra.gmra.mxu0 %vm545_vm0, %v24729_v28  ;;  %21674 = vmatprep.subr.mxu0 %v22578_v3 }
0x28d7   : > { %21710 = vmatmul.mubr.msk.f32.vlgmr.msra.gmra.mxu1 %vm545_vm0, %v24729_v28  ;;  %21731 = vmatprep.subr.mxu1 %v22578_v3 }
0x28d8   : > { %21675 = vmatpush3.msra.mxu0 %v15398_v17  ;;  %21732 = vmatpush3.msra.mxu1 %v15711_v18 }
0x28d9   : > { %21676 = vmatprep.subr.mxu0 %v22578_v3  ;;  %21733 = vmatprep.subr.mxu1 %v22578_v3 }
0x28da   : > { %21677 = vmatpush3.msra.mxu0 %v15397_v60  ;;  %21734 = vmatpush3.msra.mxu1 %v15710_v62 }
0x28db   : > { %21678 = vmatprep.subr.mxu0 %v22578_v3  ;;  %21735 = vmatprep.subr.mxu1 %v22578_v3 }
0x28dc   : > { %21679 = vmatpush3.msra.mxu0 %v15396_v63  ;;  %21736 = vmatpush3.msra.mxu1 %v15709_v61 }
0x28dd   : > { %21680 = vmatprep.subr.mxu0 %v22578_v3  ;;  %21737 = vmatprep.subr.mxu1 %v22578_v3 }
0x28de   : > { %21681 = vmatpush3.msra.mxu0 %v15395_v19  ;;  %21738 = vmatpush3.msra.mxu1 %v15708_v20 }
0x28df   : > { %21682 = vmatprep.subr.mxu0 %v22578_v3  ;;  %21739 = vmatprep.subr.mxu1 %v22578_v3 }
0x28e0   : > { %21683 = vmatpush3.msra.mxu0 %v15394_v21  ;;  %21740 = vmatpush3.msra.mxu1 %v15707_v22 }
0x28e1   : > { %21684 = vmatprep.subr.mxu0 %v22578_v3  ;;  %21741 = vmatprep.subr.mxu1 %v22578_v3 }
0x28e2   : > { %21685 = vmatpush3.msra.mxu0 %v15393_v29  ;;  %21742 = vmatpush3.msra.mxu1 %v15706_v30 }
0x28e3   : > { %21686 = vmatprep.subr.mxu0 %v22578_v3  ;;  %21743 = vmatprep.subr.mxu1 %v22578_v3 }
0x28e4   : > { %21687 = vmatpush3.msra.mxu0 %v15392_v31  ;;  %21744 = vmatpush3.msra.mxu1 %v15705_v32 }
0x28e5   : > { %21688 = vmatprep.subr.mxu0 %v22578_v3  ;;  %21745 = vmatprep.subr.mxu1 %v22578_v3 }
0x28e6   : > { %21689 = vmatpush3.msra.mxu0 %v15391_v33  ;;  %21690 = vmatprep.mubr.msk.f32.mxu0 %vm22579_vm1, %v22578_v3 }
0x28e7   : > { %21746 = vmatpush3.msra.mxu1 %v15704_v34  ;;  %21747 = vmatprep.mubr.msk.f32.mxu1 %vm22579_vm1, %v22578_v3 }
0x28e8   : > { %21691 = vmatmul.mubr.msk.f32.vlgmr.msra.gmra.mxu0 %vm545_vm0, %v24729_v28  ;;  %21712 = vmatprep.subr.mxu0 %v22578_v3 }
0x28e9   : > { %21748 = vmatmul.mubr.msk.f32.vlgmr.msra.gmra.mxu1 %vm545_vm0, %v24729_v28  ;;  %21713 = vmatpush3.msra.mxu0 %v15703_v35 }
0x28ea   : > { %21714 = vmatprep.subr.mxu0 %v22578_v3  ;;  %21728 = vmatprep.mubr.msk.f32.mxu0 %vm22579_vm1, %v22578_v3 }
0x28eb   : > { %21715 = vmatpush3.msra.mxu0 %v15702_v36  ;;  %21769 = vmatprep.subr.mxu1 %v22578_v3 }
0x28ec   : > { %21716 = vmatprep.subr.mxu0 %v22578_v3  ;;  %21771 = vmatprep.mubr.msk.f32.mxu1 %vm22579_vm1, %v22578_v3 }
0x28ed   : > { %21717 = vmatpush3.msra.mxu0 %v15701_v37 }
0x28ee   : > { %21718 = vmatprep.subr.mxu0 %v22578_v3 }
0x28ef   : > { %21719 = vmatpush3.msra.mxu0 %v15700_v38 }
0x28f0   : > { %21720 = vmatprep.subr.mxu0 %v22578_v3 }
0x28f1   : > { %21721 = vmatpush3.msra.mxu0 %v15699_v39 }
0x28f2   : > { %21722 = vmatprep.subr.mxu0 %v22578_v3 }
0x28f3   : > { %21723 = vmatpush3.msra.mxu0 %v15698_v40 }
0x28f4   : > { %21724 = vmatprep.subr.mxu0 %v22578_v3 }
0x28f5   : > { %21725 = vmatpush3.msra.mxu0 %v15697_v41 }
0x28f6   : > { %21726 = vmatprep.subr.mxu0 %v22578_v3 }
0x28f7   : > { %21727 = vmatpush3.msra.mxu0 %v15696_v42 }
0x28f8   : > { %21729 = vmatmul.mubr.msk.f32.vlgmr.msra.gmra.mxu0 %vm545_vm0, %v24729_v28  ;;  %21750 = vmatprep.subr.mxu0 %v22578_v3 }
0x28f9   : > { %21751 = vmatpush3.msra.mxu0 %v15719_v43  ;;  %21766 = vmatprep.mubr.msk.f32.mxu0 %vm22579_vm1, %v22578_v3 }
0x28fa   : > { %21752 = vmatprep.subr.mxu0 %v22578_v3 }
0x28fb   : > { %21753 = vmatpush3.msra.mxu0 %v15718_v44 }
0x28fc   : > { %21754 = vmatprep.subr.mxu0 %v22578_v3 }
0x28fd   : > { %21755 = vmatpush3.msra.mxu0 %v15717_v45 }
0x28fe   : > { %21756 = vmatprep.subr.mxu0 %v22578_v3 }
0x28ff   : > { %21757 = vmatpush3.msra.mxu0 %v15716_v46 }
0x2900   : > { %21758 = vmatprep.subr.mxu0 %v22578_v3 }
0x2901   : > { %21759 = vmatpush3.msra.mxu0 %v15715_v47 }
0x2902   : > { %21760 = vmatprep.subr.mxu0 %v22578_v3 }
0x2903   : > { %21761 = vmatpush3.msra.mxu0 %v15714_v48 }
0x2904   : > { %21762 = vmatprep.subr.mxu0 %v22578_v3 }
0x2905   : > { %21763 = vmatpush3.msra.mxu0 %v15713_v49 }
0x2906   : > { %21764 = vmatprep.subr.mxu0 %v22578_v3 }
0x2907   : > { %21765 = vmatpush3.msra.mxu0 %v15712_v50 }
0x2908   : > { %21767 = vmatmul.mubr.msk.f32.vlgmr.msra.gmra.mxu0 %vm545_vm0, %v24729_v28  ;;  %21789 = vmatprep.subr.mxu0 %v22578_v3 }
0x2909   : > { %21791 = vmatprep.mubr.msk.f32.mxu0 %vm22579_vm1, %v22578_v3 }
0x2919   : > { %v14510_v51 = vpop.f32.mrf.mxu0  ;;  %v14650_v52 = vpop.f32.mrf.mxu1 }
0x291a   : > { %v14724_v24 = vmul.f32 %v24955_v23, %v14510_v51  ;;  %v14726_v1 = vmul.f32 %v24955_v23, %v14650_v52 }
0x291b   : > { %v21407_v53 = vpop.f32.mrf.mxu0  ;;  %v21445_v54 = vpop.f32.mrf.mxu1 }
0x292a   : > { %v14580_v55 = vpop.f32.mrf.mxu0 }
0x292b   : > { %v14827_v26 = vpop.f32.mrf.mxu1  ;;  %v14725_v8 = vmul.f32 %v24955_v23, %v14580_v55 }
0x292c   : > { %v15041_v27 = vmul.f32 %v24958_v25, %v14827_v26  ;;  %v21426_v28 = vpop.f32.mrf.mxu0 }
0x292d   : > { %v21483_v56 = vpop.f32.mrf.mxu1 }
0x292e   : > { %v15045_v57 = vadd.f32 %v15041_v27, %v14724_v24  ;;  %v22187_v24 = vld [vmem:[#allocation8] sm:$0xff] }
0x293c   : > { %v14720_v58 = vpop.f32.mrf.mxu0 }
0x293d   : > { %v14967_v59 = vpop.f32.mrf.mxu1  ;;  %v14727_v15 = vmul.f32 %v24955_v23, %v14720_v58 }
0x293e   : > { %v15043_v2 = vmul.f32 %v24958_v25, %v14967_v59  ;;  %v21464_v4 = vpop.f32.mrf.mxu0 }
0x293f   : > { %v21521_v5 = vpop.f32.mrf.mxu1 }
0x2940   : > { %v15047_v6 = vadd.f32 %v15043_v2, %v14726_v1 }
0x294e   : > { %v14897_v7 = vpop.f32.mrf.mxu0 }
0x294f   : > { %v15042_v9 = vmul.f32 %v24958_v25, %v14897_v7  ;;  %v15148_v10 = vpop.f32.mrf.mxu1 }
0x2950   : > { %v21502_v11 = vpop.f32.mrf.mxu0  ;;  %v15362_v19 = vmul.f32 %v24955_v23, %v15148_v10 }
0x2951   : > { %v15046_v12 = vadd.f32 %v15042_v9, %v14725_v8  ;;  %v21559_v13 = vpop.f32.mrf.mxu1 }
0x2960   : > { %v15037_v14 = vpop.f32.mrf.mxu0 }
0x2961   : > { %v15044_v16 = vmul.f32 %v24958_v25, %v15037_v14  ;;  %v15288_v17 = vpop.f32.mrf.mxu1 }
0x2962   : > { %v21540_v18 = vpop.f32.mrf.mxu0  ;;  %v15364_v42 = vmul.f32 %v24955_v23, %v15288_v17 }
0x2963   : > { %v15048_v60 = vadd.f32 %v15044_v16, %v14727_v15  ;;  %v21597_v62 = vpop.f32.mrf.mxu1 }
0x2972   : > { %v15218_v63 = vpop.f32.mrf.mxu0 }
0x2973   : > { %v15465_v61 = vpop.f32.mrf.mxu1  ;;  %v15363_v35 = vmul.f32 %v24955_v23, %v15218_v63 }
0x2974   : > { %v15679_v20 = vmul.f32 %v24958_v25, %v15465_v61  ;;  %v21578_v21 = vpop.f32.mrf.mxu0 }
0x2975   : > { %v21635_v22 = vpop.f32.mrf.mxu1 }
0x2976   : > { %v15683_v29 = vadd.f32 %v15679_v20, %v15362_v19 }
0x2978   : > { %21770 = vmatpush3.xpose.msk.msra.mxu1 %vm2152_vm2, %v15683_v29 }
0x2979   : > { %21774 = vmatprep.subr.mxu1 %v22578_v3 }
0x297b   : > { %21772 = vmatmul.mubr.msk.f32.vlgmr.msra.gmra.mxu1 %vm2152_vm2, %v15045_v57 }
0x297c   : > { %21776 = vmatprep.mubr.msk.f32.mxu1 %vm22579_vm1, %v22578_v3 }
0x2984   : > { %v15358_v30 = vpop.f32.mrf.mxu0 }
0x2985   : > { %v15605_v31 = vpop.f32.mrf.mxu1  ;;  %v15365_v45 = vmul.f32 %v24955_v23, %v15358_v30 }
0x2986   : > { %v21616_v32 = vpop.f32.mrf.mxu0  ;;  %v15681_v39 = vmul.f32 %v24958_v25, %v15605_v31 }
0x2987   : > { %v21673_v33 = vpop.f32.mrf.mxu1 }
0x2988   : > { %v15685_v43 = vadd.f32 %v15681_v39, %v15364_v42 }
0x2996   : > { %v15535_v34 = vpop.f32.mrf.mxu0 }
0x2997   : > { %v15680_v36 = vmul.f32 %v24958_v25, %v15535_v34  ;;  %v15786_v37 = vpop.f32.mrf.mxu1 }
0x2998   : > { %21790 = vmatpush3.msra.mxu0 %v15786_v37  ;;  %v21654_v38 = vpop.f32.mrf.mxu0 }
0x2999   : > { %v15684_v40 = vadd.f32 %v15680_v36, %v15363_v35  ;;  %v21711_v41 = vpop.f32.mrf.mxu1  ;;  %21799 = vmatprep.subr.mxu0 %v22578_v3 }
0x299b   : > { %21775 = vmatpush3.xpose.msk.msra.mxu1 %vm2152_vm2, %v15684_v40 }
0x299c   : > { %21779 = vmatprep.subr.mxu1 %v22578_v3 }
0x299e   : > { %21777 = vmatmul.mubr.msk.f32.vlgmr.msra.gmra.mxu1 %vm2152_vm2, %v15046_v12 }
0x299f   : > { %21780 = vmatpush3.xpose.msk.msra.mxu1 %vm2152_vm2, %v15685_v43  ;;  %21781 = vmatprep.mubr.msk.f32.mxu1 %vm22579_vm1, %v22578_v3 }
0x29a0   : > { %21784 = vmatprep.subr.mxu1 %v22578_v3 }
0x29a2   : > { %21782 = vmatmul.mubr.msk.f32.vlgmr.msra.gmra.mxu1 %vm2152_vm2, %v15047_v6 }
0x29a3   : > { %21786 = vmatprep.mubr.msk.f32.mxu1 %vm22579_vm1, %v22578_v3 }
0x29a8   : > { %v15675_v44 = vpop.f32.mrf.mxu0 }
0x29a9   : > { %v15682_v46 = vmul.f32 %v24958_v25, %v15675_v44  ;;  %v24991_v47 = vpop.f32.mrf.mxu1  ;;  %v16650_v44 = vld [vmem:[#allocation14 + $0x148] sm:$0xff] }
0x29aa   : > { %v21692_v48 = vpop.f32.mrf.mxu0 }
0x29ab   : > { %v15686_v49 = vadd.f32 %v15682_v46, %v15365_v45  ;;  %v21749_v50 = vpop.f32.mrf.mxu1  ;;  %v16652_v48 = vld [vmem:[#allocation14 + $0x158] sm:$0xff] }
0x29ac   : > { %v16654_v50 = vld [vmem:[#allocation14 + $0x168] sm:$0xff] }
0x29ad   : > { %21785 = vmatpush3.xpose.msk.msra.mxu1 %vm2152_vm2, %v15686_v49  ;;  %v16651_v49 = vld [vmem:[#allocation14 + $0x150] sm:$0xff] }
0x29ae   : > { %21794 = vmatprep.subr.mxu1 %v22578_v3 }
0x29b0   : > { %21787 = vmatmul.mubr.msk.f32.vlgmr.msra.gmra.mxu1 %vm2152_vm2, %v15048_v60 }
0x29b1   : > { %21796 = vmatprep.mubr.msk.f32.mxu1 %vm22579_vm1, %v22578_v3 }
0x29b8   : > { %v15856_v51 = vpop.f32.mrf.mxu0 }
0x29b9   : > { %21795 = vmatpush3.msra.mxu1 %v15856_v51 }
0x29ba   : > { %v21730_v52 = vpop.f32.mrf.mxu0  ;;  %21804 = vmatprep.subr.mxu1 %v22578_v3 }
0x29bb   : > { %v16653_v52 = vld [vmem:[#allocation14 + $0x160] sm:$0xff] }
0x29c8   : > { %v24999_v53 = vpop.f32.mrf.mxu0 }
0x29ca   : > { %v21768_v54 = vpop.f32.mrf.mxu0 }
0x29cb   : > { %v16656_v54 = vld [vmem:[#allocation14 + $0x178] sm:$0xff] }
0x2a3b   : > { %v16072_v55 = vpop.f32.mrf.mxu1 }
0x2a3c   : > { %v16304_v26 = vmul.f32 0.25, %v16072_v55 }
0x2a3d   : > { %v21773_v23 = vpop.f32.mrf.mxu1 }
0x2a3e   : > { %v16308_v25 = vadd.f32 %v22187_v24, %v16304_v26  ;;  %v16655_v26 = vld [vmem:[#allocation14 + $0x170] sm:$0xff] }
0x2a40   : > { %v16312_v27 = vsel %vm2465_vm3, %v16308_v25, -inf }
0x2a41   : > { %16313 = vmax.xlane.f32.xlu1 %v16312_v27 }
0x2a5e   : > { %v16148_v28 = vpop.f32.mrf.mxu1 }
0x2a5f   : > { %v16305_v56 = vmul.f32 0.25, %v16148_v28 }
0x2a60   : > { %v21778_v57 = vpop.f32.mrf.mxu1 }
0x2a61   : > { %v16309_v58 = vadd.f32 %v22187_v24, %v16305_v56 }
0x2a62   : > { %v16224_v59 = vpop.f32.mrf.mxu1 }
0x2a63   : > { %v16306_v1 = vmul.f32 0.25, %v16224_v59  ;;  %v16315_v2 = vsel %vm2465_vm3, %v16309_v58, -inf }
0x2a64   : > { %16316 = vmax.xlane.f32.xlu0 %v16315_v2  ;;  %v21783_v4 = vpop.f32.mrf.mxu1 }
0x2a65   : > { %v16310_v5 = vadd.f32 %v22187_v24, %v16306_v1 }
0x2a67   : > { %v16318_v6 = vsel %vm2465_vm3, %v16310_v5, -inf }
0x2a68   : > { %16319 = vmax.xlane.f32.xlu1 %v16318_v6 }
0x2a70   : > { %v16300_v7 = vpop.f32.mrf.mxu1 }
0x2a71   : > { %v16307_v8 = vmul.f32 0.25, %v16300_v7 }
0x2a72   : > { %v21788_v9 = vpop.f32.mrf.mxu1 }
0x2a73   : > { %v16311_v10 = vadd.f32 %v22187_v24, %v16307_v8 }
0x2a75   : > { %v16321_v11 = vsel %vm2465_vm3, %v16311_v10, -inf }
0x2a76   : > { %16322 = vmax.xlane.f32.xlu0 %v16321_v11 }
0x2aca   : > { %v16314_v12 = vpop.xlane.xlu1 %16313 }
0x2acb   : > { %v16324_v13 = vsub.f32 %v16308_v25, %v16314_v12 }
0x2acd   : > { %v16328_v14 = vmul.f32 1.442695, %v16324_v13 }
0x2acf   : > { %22148 = vpow2.f32 %v16328_v14 }
0x2adc   : > { %v22149_v15 = vpop.eup %22148 }
0x2add   : > { %v16336_v16 = vsel %vm2465_vm3, %v22149_v15, 0.0 }
0x2ade   : > { %16337 = vadd.xlane.f32.xlu1 %v16336_v16  ;;  %v16990_v16 = vld [vmem:[#allocation16 + $0x2f8] sm:$0xff] }
0x2aed   : > { %v16317_v17 = vpop.xlane.xlu0 %16316 }
0x2aee   : > { %v16325_v18 = vsub.f32 %v16309_v58, %v16317_v17  ;;  %v16989_v17 = vld [vmem:[#allocation16 + $0x2f0] sm:$0xff] }
0x2af0   : > { %v16330_v60 = vmul.f32 1.442695, %v16325_v18  ;;  %v16988_v18 = vld [vmem:[#allocation16 + $0x2e8] sm:$0xff] }
0x2af1   : > { %v16320_v62 = vpop.xlane.xlu1 %16319 }
0x2af2   : > { %22150 = vpow2.f32 %v16330_v60  ;;  %v16326_v63 = vsub.f32 %v16310_v5, %v16320_v62  ;;  %v16987_v60 = vld [vmem:[#allocation16 + $0x2e0] sm:$0xff]  ;;  %v16986_v62 = vld [vmem:[#allocation16 + $0x2d8] sm:$0xff] }
0x2af4   : > { %v16332_v61 = vmul.f32 1.442695, %v16326_v63  ;;  %v16985_v63 = vld [vmem:[#allocation16 + $0x2d0] sm:$0xff] }
0x2af6   : > { %22152 = vpow2.f32 %v16332_v61  ;;  %v16983_v61 = vld [vmem:[#allocation16 + $0x2c0] sm:$0xff] }
0x2aff   : > { %v22151_v19 = vpop.eup %22150  ;;  %v16323_v20 = vpop.xlane.xlu0 %16322 }
0x2b00   : > { %v16327_v21 = vsub.f32 %v16311_v10, %v16323_v20  ;;  %v16339_v22 = vsel %vm2465_vm3, %v22151_v19, 0.0  ;;  %v16981_v20 = vld [vmem:[#allocation16 + $0x2b0] sm:$0xff] }
0x2b01   : > { %16340 = vadd.xlane.f32.xlu0 %v16339_v22  ;;  %v16979_v22 = vld [vmem:[#allocation16 + $0x2a0] sm:$0xff] }
0x2b02   : > { %v16334_v29 = vmul.f32 1.442695, %v16327_v21  ;;  %v16980_v21 = vld [vmem:[#allocation16 + $0x2a8] sm:$0xff] }
0x2b03   : > { %v22153_v30 = vpop.eup %22152 }
0x2b04   : > { %22154 = vpow2.f32 %v16334_v29  ;;  %v16342_v31 = vsel %vm2465_vm3, %v22153_v30, 0.0  ;;  %v16978_v29 = vld [vmem:[#allocation16 + $0x298] sm:$0xff] }
0x2b05   : > { %16343 = vadd.xlane.f32.xlu1 %v16342_v31  ;;  %v16976_v31 = vld [vmem:[#allocation16 + $0x288] sm:$0xff] }
0x2b11   : > { %v22155_v32 = vpop.eup %22154 }
0x2b12   : > { %v16345_v33 = vsel %vm2465_vm3, %v22155_v32, 0.0 }
0x2b13   : > { %16346 = vadd.xlane.f32.xlu0 %v16345_v33 }
0x2b67   : > { %v16338_v34 = vpop.xlane.xlu1 %16337 }
0x2b68   : > { %22156 = vrcp.f32 %v16338_v34 }
0x2b75   : > { %v22157_v35 = vpop.eup %22156 }
0x2b76   : > { %v16349_v36 = vmul.f32 %v22157_v35, %v22149_v15 }
0x2b78   : > { %21792 = vmatmul.mubr.msk.f32.vlgmr.msra.gmra.mxu0 %vm2465_vm3, %v16349_v36 }
0x2b79   : > { %21800 = vmatpush3.msra.mxu0 %v24991_v47  ;;  %21801 = vmatprep.mubr.msk.f32.mxu0 %vm22579_vm1, %v22578_v3  ;;  %v16649_v47 = vld [vmem:[#allocation14 + $0x140] sm:$0xff] }
0x2b7a   : > { %21809 = vmatprep.subr.mxu0 %v22578_v3 }
0x2b8a   : > { %v16341_v37 = vpop.xlane.xlu0 %16340 }
0x2b8b   : > { %22158 = vrcp.f32 %v16341_v37  ;;  %v17617_v37 = vld [vmem:[#allocation11 + $0x5] ss:$0 sm:$0xff] }
0x2b8e   : > { %v16344_v38 = vpop.xlane.xlu1 %16343 }
0x2b8f   : > { %22160 = vrcp.f32 %v16344_v38 }
0x2b98   : > { %v22159_v39 = vpop.eup %22158 }
0x2b99   : > { %v16351_v40 = vmul.f32 %v22159_v39, %v22151_v19  ;;  %v16982_v19 = vld [vmem:[#allocation16 + $0x2b8] sm:$0xff] }
0x2b9b   : > { %21797 = vmatmul.mubr.msk.f32.vlgmr.msra.gmra.mxu1 %vm2465_vm3, %v16351_v40  ;;  %v17089_v40 = vld [vmem:[#allocation17 + $0x2f8] sm:$0xff] }
0x2b9c   : > { %v22161_v41 = vpop.eup %22160  ;;  %v16347_v42 = vpop.xlane.xlu0 %16346  ;;  %21805 = vmatpush3.msra.mxu1 %v24999_v53  ;;  %21806 = vmatprep.mubr.msk.f32.mxu1 %vm22579_vm1, %v22578_v3 }
0x2b9d   : > { %v16353_v43 = vmul.f32 %v22161_v41, %v22153_v30  ;;  %22162 = vrcp.f32 %v16347_v42  ;;  %21816 = vmatprep.subr.mxu1 %v22578_v3  ;;  %v16977_v30 = vld [vmem:[#allocation16 + $0x290] sm:$0xff]  ;;  %v17087_v42 = vld [vmem:[#allocation17 + $0x2e8] sm:$0xff] }
0x2b9e   : > { %v17088_v41 = vld [vmem:[#allocation17 + $0x2f0] sm:$0xff] }
0x2b9f   : > { %21802 = vmatmul.mubr.msk.f32.vlgmr.msra.gmra.mxu0 %vm2465_vm3, %v16353_v43  ;;  %v17086_v43 = vld [vmem:[#allocation17 + $0x2e0] sm:$0xff] }
0x2ba0   : > { %21810 = vmatpush3.msra.mxu0 %v16650_v44  ;;  %21813 = vmatprep.mubr.msk.f32.mxu0 %vm22579_vm1, %v22578_v3  ;;  %v17085_v44 = vld [vmem:[#allocation17 + $0x2d8] sm:$0xff] }
0x2ba1   : > { %21811 = vmatprep.subr.mxu0 %v22578_v3 }
0x2ba2   : > { %21812 = vmatpush3.msra.mxu0 %v16649_v47  ;;  %v17082_v47 = vld [vmem:[#allocation17 + $0x2c0] sm:$0xff] }
0x2ba3   : > { %21823 = vmatprep.subr.mxu0 %v22578_v3 }
0x2baa   : > { %v22163_v45 = vpop.eup %22162 }
0x2bab   : > { %v16355_v46 = vmul.f32 %v22163_v45, %v22155_v32  ;;  %v16975_v32 = vld [vmem:[#allocation16 + $0x280] sm:$0xff]  ;;  %v17084_v45 = vld [vmem:[#allocation17 + $0x2d0] sm:$0xff] }
0x2bad   : > { %21807 = vmatmul.mubr.msk.f32.vlgmr.msra.gmra.mxu1 %vm2465_vm3, %v16355_v46  ;;  %v17083_v46 = vld [vmem:[#allocation17 + $0x2c8] sm:$0xff] }
0x2bae   : > { %21820 = vmatprep.mubr.msk.f32.mxu1 %vm22579_vm1, %v22578_v3  ;;  %21817 = vmatpush3.msra.mxu1 %v16652_v48  ;;  %v17081_v48 = vld [vmem:[#allocation17 + $0x2b8] sm:$0xff] }
0x2baf   : > { %21818 = vmatprep.subr.mxu1 %v22578_v3 }
0x2bb0   : > { %21819 = vmatpush3.msra.mxu1 %v16651_v49  ;;  %v17080_v49 = vld [vmem:[#allocation17 + $0x2b0] sm:$0xff] }
0x2bb1   : > { %21830 = vmatprep.subr.mxu1 %v22578_v3 }
0x2c38   : > { %v16425_v51 = vpop.f32.mrf.mxu0 }
0x2c39   : > { %21814 = vmatmul.mubr.msk.f32.vlgmr.msra.gmra.mxu0 %vm2152_vm2, %v16425_v51  ;;  %v17078_v51 = vld [vmem:[#allocation17 + $0x2a0] sm:$0xff] }
0x2c3a   : > { %v21793_v53 = vpop.f32.mrf.mxu0  ;;  %21824 = vmatpush3.msra.mxu0 %v16654_v50  ;;  %21827 = vmatprep.mubr.msk.f32.mxu0 %vm22579_vm1, %v22578_v3  ;;  %v17079_v50 = vld [vmem:[#allocation17 + $0x2a8] sm:$0xff] }
0x2c3b   : > { %21825 = vmatprep.subr.mxu0 %v22578_v3  ;;  %v17076_v53 = vld [vmem:[#allocation17 + $0x290] sm:$0xff] }
0x2c3c   : > { %21826 = vmatpush3.msra.mxu0 %v16653_v52  ;;  %v17077_v52 = vld [vmem:[#allocation17 + $0x298] sm:$0xff] }
0x2c3d   : > { %17010 = vmatprep.subr.mxu0 %v16990_v16 }
0x2c5b   : > { %v16498_v55 = vpop.f32.mrf.mxu1 }
0x2c5c   : > { %21821 = vmatmul.mubr.msk.f32.vlgmr.msra.gmra.mxu1 %vm2152_vm2, %v16498_v55  ;;  %v17074_v55 = vld [vmem:[#allocation17 + $0x280] sm:$0xff] }
0x2c5d   : > { %v21798_v23 = vpop.f32.mrf.mxu1  ;;  %21831 = vmatpush3.msra.mxu1 %v16656_v54  ;;  %21834 = vmatprep.mubr.msk.f32.mxu1 %vm22579_vm1, %v22578_v3  ;;  %v17075_v54 = vld [vmem:[#allocation17 + $0x288] sm:$0xff] }
0x2c5e   : > { %21832 = vmatprep.subr.mxu1 %v22578_v3 }
0x2c5f   : > { %v16571_v24 = vpop.f32.mrf.mxu0  ;;  %21833 = vmatpush3.msra.mxu1 %v16655_v26 }
0x2c60   : > { %21828 = vmatmul.mubr.msk.f32.vlgmr.msra.gmra.mxu0 %vm2152_vm2, %v16571_v24  ;;  %21837 = vmatprep.subr.mxu1 %v22578_v3 }
0x2c61   : > { %v21803_v25 = vpop.f32.mrf.mxu0  ;;  %17058 = vmatprep.mubr.f32.mxu0 %v22578_v3  ;;  %17011 = vmatpush1.msra.mxu0 %v16989_v17 }
0x2c62   : > { %17012 = vmatprep.subr.mxu0 %v16988_v18 }
0x2c63   : > { %17013 = vmatpush1.msra.mxu0 %v16987_v60 }
0x2c64   : > { %17014 = vmatprep.subr.mxu0 %v16986_v62 }
0x2c65   : > { %17015 = vmatpush1.msra.mxu0 %v16985_v63 }
0x2c6d   : > { %v16644_v27 = vpop.f32.mrf.mxu1 }
0x2c6e   : > { %21835 = vmatmul.mubr.msk.f32.vlgmr.msra.gmra.mxu1 %vm2152_vm2, %v16644_v27 }
0x2c6f   : > { %v21808_v28 = vpop.f32.mrf.mxu1  ;;  %21869 = vmatprep.mubr.msk.f32.mxu1 %vm22579_vm1, %v22578_v3  ;;  %21838 = vmatpush3.msra.mxu1 %v17089_v40 }
0x2c70   : > { %21839 = vmatprep.subr.mxu1 %v22578_v3 }
0x2c71   : > { %21840 = vmatpush3.msra.mxu1 %v17088_v41 }
0x2c72   : > { %21841 = vmatprep.subr.mxu1 %v22578_v3 }
0x2c73   : > { %21842 = vmatpush3.msra.mxu1 %v17087_v42 }
0x2c74   : > { %21843 = vmatprep.subr.mxu1 %v22578_v3 }
0x2c75   : > { %21844 = vmatpush3.msra.mxu1 %v17086_v43 }
0x2c76   : > { %21845 = vmatprep.subr.mxu1 %v22578_v3 }
0x2c77   : > { %21846 = vmatpush3.msra.mxu1 %v17085_v44 }
0x2c78   : > { %21847 = vmatprep.subr.mxu1 %v22578_v3 }
0x2c79   : > { %21848 = vmatpush3.msra.mxu1 %v17084_v45 }
0x2c7a   : > { %21849 = vmatprep.subr.mxu1 %v22578_v3 }
0x2c7b   : > { %21850 = vmatpush3.msra.mxu1 %v17083_v46 }
0x2c7c   : > { %21851 = vmatprep.subr.mxu1 %v22578_v3 }
0x2c7d   : > { %21852 = vmatpush3.msra.mxu1 %v17082_v47 }
0x2c7e   : > { %21853 = vmatprep.subr.mxu1 %v22578_v3 }
0x2c7f   : > { %21854 = vmatpush3.msra.mxu1 %v17081_v48 }
0x2c80   : > { %21855 = vmatprep.subr.mxu1 %v22578_v3 }
0x2c81   : > { %21856 = vmatpush3.msra.mxu1 %v17080_v49 }
0x2c82   : > { %21857 = vmatprep.subr.mxu1 %v22578_v3 }
0x2c83   : > { %21858 = vmatpush3.msra.mxu1 %v17079_v50 }
0x2c84   : > { %21859 = vmatprep.subr.mxu1 %v22578_v3 }
0x2c85   : > { %21860 = vmatpush3.msra.mxu1 %v17078_v51 }
0x2c86   : > { %21861 = vmatprep.subr.mxu1 %v22578_v3 }
0x2c87   : > { %21862 = vmatpush3.msra.mxu1 %v17077_v52 }
0x2c88   : > { %21863 = vmatprep.subr.mxu1 %v22578_v3 }
0x2c89   : > { %21864 = vmatpush3.msra.mxu1 %v17076_v53 }
0x2c8a   : > { %21865 = vmatprep.subr.mxu1 %v22578_v3 }
0x2c8b   : > { %21866 = vmatpush3.msra.mxu1 %v17075_v54 }
0x2c8c   : > { %21867 = vmatprep.subr.mxu1 %v22578_v3 }
0x2c8d   : > { %21868 = vmatpush3.msra.mxu1 %v17074_v55 }
0x2cf9   : > { %v16726_v56 = vpop.f32.mrf.mxu0 }
0x2cfa   : > { %v16949_v5 = vsel %vm545_vm0, %v16726_v56, 0.0 }
0x2cfb   : > { %v21815_v57 = vpop.f32.mrf.mxu0 }
0x2d1c   : > { %v16799_v58 = vpop.f32.mrf.mxu1 }
0x2d1d   : > { %v16950_v4 = vsel %vm545_vm0, %v16799_v58, 0.0 }
0x2d1e   : > { %v21822_v59 = vpop.f32.mrf.mxu1  ;;  %v16951_v7 = vadd.f32 %v16950_v4, %v16949_v5 }
0x2d20   : > { %v16872_v1 = vpop.f32.mrf.mxu0 }
0x2d21   : > { %v16952_v6 = vsel %vm545_vm0, %v16872_v1, 0.0 }
0x2d22   : > { %v21829_v2 = vpop.f32.mrf.mxu0  ;;  %v16953_v8 = vadd.f32 %v16952_v6, %v16951_v7 }
0x2d2e   : > { %v16945_v9 = vpop.f32.mrf.mxu1 }
0x2d2f   : > { %v16954_v10 = vsel %vm545_vm0, %v16945_v9, 0.0  ;;  %v17619_v9 = vld [vmem:[#allocation19] ss:$0 sm:$0xff] }
0x2d30   : > { %v16955_v11 = vadd.f32 %v16954_v10, %v16953_v8  ;;  %v21836_v12 = vpop.f32.mrf.mxu1 }
0x2d32   : > { %v25048_v13 = vadd.f32 %v16955_v11, %v24707_v0  ;;  %v16984_v0 = vld [vmem:[#allocation16 + $0x2c8] sm:$0xff] }
0x2d33   : > { %17016 = vmatprep.subr.mxu0 %v16984_v0 }
0x2d34   : > { %v16959_v14 = vmul.f32 %v25048_v13, %v25048_v13  ;;  %17017 = vmatpush1.msra.mxu0 %v16983_v61 }
0x2d35   : > { %17018 = vmatprep.subr.mxu0 %v16982_v19 }
0x2d36   : > { %v16960_v15 = vsel %vm545_vm0, %v16959_v14, 0.0  ;;  %17019 = vmatpush1.msra.mxu0 %v16981_v20 }
0x2d37   : > { %16961 = vadd.xlane.f32.xlu1 %v16960_v15  ;;  %17020 = vmatprep.subr.mxu0 %v16980_v21 }
0x2d38   : > { %17021 = vmatpush1.msra.mxu0 %v16979_v22 }
0x2d39   : > { %17022 = vmatprep.subr.mxu0 %v16978_v29 }
0x2d3a   : > { %17023 = vmatpush1.msra.mxu0 %v16977_v30 }
0x2d3b   : > { %17024 = vmatprep.subr.mxu0 %v16976_v31 }
0x2d3c   : > { %17025 = vmatpush1.msra.mxu0 %v16975_v32 }
0x2dc0   : > { %v16962_v33 = vpop.xlane.xlu1 %16961 }
0x2dc1   : > { %v16963_v34 = vmul.f32 0.015625, %v16962_v33 }
0x2dc3   : > { %v16964_v35 = vadd.f32 1e-06, %v16963_v34 }
0x2dc5   : > { %22164 = vrsqrt.f32 %v16964_v35 }
0x2dd2   : > { %v22165_v36 = vpop.eup %22164 }
0x2dd3   : > { %v16966_v38 = vmul.f32 %v22165_v36, %v25048_v13 }
0x2dd5   : > { %v16973_v39 = vmul.f32 %v17617_v37, %v16966_v38 }
0x2dd7   : > { %17618 = vmatmul.mubr.msk.f32.vlgmr.msra.gmra.mxu0 %vm545_vm0, %v16973_v39 }
0x2e97   : > { %v17060_v26 = vpop.f32.mrf.mxu0 }
0x2e98   : > { %v17065_v23 = vsub.f32 0.0, %v17060_v26 }
0x2e99   : > { %v17062_v57 = vpop.f32.mrf.mxu0 }
0x2e9a   : > { %v17066_v24 = vmul.f32 1.442695, %v17065_v23 }
0x2e9c   : > { %22166 = vpow2.f32 %v17066_v24 }
0x2ea9   : > { %v22167_v25 = vpop.eup %22166 }
0x2eaa   : > { %v17068_v27 = vadd.f32 1.0, %v22167_v25 }
0x2eac   : > { %22168 = vrcp.f32 %v17068_v27 }
0x2eb9   : > { %v22169_v28 = vpop.eup %22168 }
0x2eba   : > { %v17071_v56 = vmul.f32 %v22169_v28, %v17060_v26 }
0x2ebc   : > { %v17072_v58 = vmul.f32 %v17071_v56, %v17062_v57 }
0x2ebe   : > { %21870 = vmatmul.mubr.f32.vlgmr.msra.gmra.mxu1 %v17072_v58 }
0x2f7e   : > { %v17156_v59 = vpop.f32.mrf.mxu1 }
0x2f7f   : > { %v17160_v1 = vadd.f32 %v17156_v59, %v25048_v13 }
0x2f80   : > { %v21871_v2 = vpop.f32.mrf.mxu1 }
0x2f81   : > { %v17162_v3 = vmul.f32 %v17160_v1, %v17160_v1 }
0x2f83   : > { %v17163_v4 = vsel %vm545_vm0, %v17162_v3, 0.0 }
0x2f84   : > { %17164 = vadd.xlane.f32.xlu0 %v17163_v4 }
0x300d   : > { %v17165_v5 = vpop.xlane.xlu0 %17164 }
0x300e   : > { %v17166_v6 = vmul.f32 0.015625, %v17165_v5 }
0x3010   : > { %v17167_v7 = vadd.f32 1e-06, %v17166_v6 }
0x3012   : > { %22170 = vrsqrt.f32 %v17167_v7 }
0x301f   : > { %v22171_v8 = vpop.eup %22170 }
0x3020   : > { %v17169_v10 = vmul.f32 %v22171_v8, %v17160_v1 }
0x3022   : > { %v17176_v11 = vmul.f32 %v17619_v9, %v17169_v10 }
0x3024   : > { %17177 = vst.msk [vmem:[%s538_s2] sm:$0xff] %vm545_vm0, %v17176_v11 }
0x3025   : > { %22489 = shalt.err (!%p22486_p7)
}
0x3026   : > { %s22490_s21 = scalar_lea.hbm %s17190_s30, 128  ;;  %s22494_s4 = scalar_lea.hbm %s25121_s11, 256 }
0x3027   : > { %p22491_p8 = scmp.ne.s32.totalorder %s17190_s30, %s22490_s21  ;;  %p22495_p11 = scmp.lt.s32.totalorder %s17190_s30, %s25121_s11 }
0x3028   : > { %p22496_p13 = scmp.lt.s32.totalorder %s22494_s4, %s22490_s21 }
0x3029   : > { %p22492_p9 = pnand %p22491_p8, %p25167_p2 }
0x302a   : > { %p22497_p1 = por %p22496_p13, %p22495_p11 }
0x302b   : > { %p22493_p10 = pneg %p22492_p9 }
0x302d   : > { %p22498_p0 = pnand %p22497_p1, %p22493_p10 }
0x302f   : > { %22501 = shalt.err (!%p22498_p0)
}
0x3030   : > { %21914 = dma.vmem_to_hbm [thread:$0]  (%p25167_p2), %s17193_s24, 128, %s17190_s30, %s17179_s25  }
0x3031 PF: > { %s17204_s1 = sand.u32 1, %s22548_s17   ;;  %p25168_p5 = scmp.ne.s32.totalorder %s25153_s16, 0 }
0x3032   : > { %p25169_p12 = scmp.ge.s32.totalorder %s22560_s20, 2  ;;  %s17205_s2 = scalar_lea.sflag [#allocation4], %s17204_s1 }
0x3034   : > { %p21952_p6 = pnand %p25169_p12, %p25168_p5 }
0x3036   : > { %p21953_p4 = pneg %p21952_p6 }
0x3038   : > { %22543 = dma.done.wait (%p21953_p4), %s17205_s2, 128  }
0x3039   : > { %22545 = vsyncadd (%p21953_p4), %s17205_s2, 4294967168  ;;  %p29_p3 = scmp.ge.s32.totalorder %s22781_s27, 4   ;;  %s25170_s17 = smov %s22552_s18 }
0x303a   : > { %s25171_s18 = smov %s22556_s19  ;;  %s25172_s19 = smov %s22793_s26 }
0x303b   : > { %s25173_s20 = smov %s22781_s27  ;;  %31 = sbr.rel (!%p29_p3) target bundleno = 17 (0x11), region = 203 }
0x3040   :  { %17210 = vsyncpa [#allocation3], 1 }
0x3041   :  { %17212 = vsyncpa [#allocation3 + $0x1], 1 }
0x3042   :  { %17213 = vsyncpa [#allocation6], 1 }
0x3043   :  { %17214 = vsyncpa [#allocation9], 1 }
0x3044   :  { %17215 = vsyncpa [#allocation12], 1 }
0x3045   :  { %17216 = vsyncpa [#allocation15], 1 }
0x3046   :  { %17217 = vsyncpa [#allocation18], 1 }
0x3047   :  { %17218 = vsyncpa [#allocation4], 1 }
0x3048   :  { %17220 = vsyncpa [#allocation4 + $0x1], 1 }

</bundles_post_ra>
